<compile_context>
chip_gen: v5e
topology: v5e:2x2
jax: 0.10.0
libtpu: 0.0.40
codegen_flags: <defaults>
</compile_context>

<pallas_src>
import functools

import jax
import jax.numpy as jnp
import numpy as np
from jax.experimental import pallas as pl
from jax.experimental.pallas import tpu as pltpu


# ----------------------------------------------------------------------------
# Fused Pallas kernel: 3 x bidirectional LSTM layers + MLP head
# ----------------------------------------------------------------------------
def _fused_lstm_mlp_kernel(
    # inputs
    x_ref,                                   # (T*Bp, D0) time-major, padded
    wih0_ref, whhf0_ref, whhb0_ref, b0_ref,  # layer 0
    wih1_ref, whhf1_ref, whhb1_ref, b1_ref,  # layer 1
    wih2_ref, whhf2_ref, whhb2_ref, b2_ref,  # layer 2
    fc1w_ref, fc1b_ref, fc2w_ref, fc2b_ref,  # MLP head
    # output
    out_ref,                                 # (T*Bp, out_dim)
    # scratch
    xproj_scr,                               # (T*Bp, 8H) hoisted input proj
    hf_scr,                                  # (T*Bp, H)  fwd-direction h(t)
    hb_scr,                                  # (T*Bp, H)  bwd-direction h(t)
    *, T, Bp, H,
):
    G = 4 * H  # per-direction gate width; gate order i, f, g, o

    def lstm_cell(gates, c_prev):
        # One EUP pass over the full (Bp, 4H) gate block for each of
        # sigmoid / tanh, then cheap static lane slices.
        sg = jax.nn.sigmoid(gates)
        tg = jnp.tanh(gates)
        i = sg[:, 0 * H:1 * H]
        f = sg[:, 1 * H:2 * H]
        g = tg[:, 2 * H:3 * H]
        o = sg[:, 3 * H:4 * H]
        c = f * c_prev + i * g
        h = o * jnp.tanh(c)
        return h, c

    def run_layer(x_proj, whhf_ref, whhb_ref):
        # x_proj: (T*Bp, 8H) = input projection + bias for both directions.
        xproj_scr[...] = x_proj
        whhf = whhf_ref[...]                 # (H, 4H) resident across loop
        whhb = whhb_ref[...]
        z = jnp.zeros((Bp, H), jnp.float32)
        hf, cf, hb, cb = z, z, z, z
        for s in range(T):                   # fully unrolled; static slices
            rf = s * Bp                      # fwd direction processes time s
            rb = (T - 1 - s) * Bp            # bwd direction processes T-1-s
            gf = xproj_scr[pl.ds(rf, Bp), 0:G] + jnp.dot(
                hf, whhf, preferred_element_type=jnp.float32)
            gb = xproj_scr[pl.ds(rb, Bp), G:2 * G] + jnp.dot(
                hb, whhb, preferred_element_type=jnp.float32)
            hf, cf = lstm_cell(gf, cf)
            hb, cb = lstm_cell(gb, cb)
            hf_scr[pl.ds(rf, Bp), :] = hf
            hb_scr[pl.ds(rb, Bp), :] = hb

    # ---- layer 0: input projection from the raw input ----------------------
    xp = jnp.dot(x_ref[...], wih0_ref[...],
                 preferred_element_type=jnp.float32) + b0_ref[...]
    run_layer(xp, whhf0_ref, whhb0_ref)

    # ---- layers 1, 2: input projection from (fwd | bwd) of previous layer --
    for wih_ref, whhf_ref, whhb_ref, b_ref in (
            (wih1_ref, whhf1_ref, whhb1_ref, b1_ref),
            (wih2_ref, whhf2_ref, whhb2_ref, b2_ref)):
        xp = (jnp.dot(hf_scr[...], wih_ref[0:H, :],
                      preferred_element_type=jnp.float32)
              + jnp.dot(hb_scr[...], wih_ref[H:2 * H, :],
                        preferred_element_type=jnp.float32)
              + b_ref[...])
        run_layer(xp, whhf_ref, whhb_ref)

    # ---- MLP head: fc1 -> relu -> fc2 -> sigmoid (dropout = identity) ------
    h1 = (jnp.dot(hf_scr[...], fc1w_ref[0:H, :],
                  preferred_element_type=jnp.float32)
          + jnp.dot(hb_scr[...], fc1w_ref[H:2 * H, :],
                    preferred_element_type=jnp.float32)
          + fc1b_ref[...])
    h1 = jnp.maximum(h1, 0.0)
    y = jnp.dot(h1, fc2w_ref[...],
                preferred_element_type=jnp.float32) + fc2b_ref[...]
    out_ref[...] = jax.nn.sigmoid(y)


# ----------------------------------------------------------------------------
# Wrapper
# ----------------------------------------------------------------------------
def _pack_layer(layer_p):
    wih = jnp.concatenate([layer_p["w_ih_f"], layer_p["w_ih_b"]], axis=1)
    b = jnp.concatenate([layer_p["b_f"], layer_p["b_b"]]).reshape(1, -1)
    return [wih, layer_p["w_hh_f"], layer_p["w_hh_b"], b]


def lstm_model_forward(x, params):
    """x: (B, T, input_dim) batch_first, like PyTorch."""
    B, T, D = x.shape
    H = params["lstm"][0]["w_hh_f"].shape[0]
    out_dim = params["fc2_b"].shape[-1]
    Bp = max(8, -(-B // 8) * 8)              # pad batch to a sublane multiple

    x_tm = jnp.transpose(x, (1, 0, 2))       # (T, B, D) time-major
    x_tm = jnp.pad(x_tm, ((0, 0), (0, Bp - B), (0, 0)))
    x_flat = x_tm.reshape(T * Bp, D)         # row = t*Bp + b

    flat_w = []
    for layer_p in params["lstm"]:
        flat_w.extend(_pack_layer(layer_p))
    flat_w += [params["fc1_w_t"], params["fc1_b"].reshape(1, -1),
               params["fc2_w_t"], params["fc2_b"].reshape(1, -1)]

    n_in = 1 + len(flat_w)
    y = pl.pallas_call(
        functools.partial(_fused_lstm_mlp_kernel, T=T, Bp=Bp, H=H),
        out_shape=jax.ShapeDtypeStruct((T * Bp, out_dim), jnp.float32),
        in_specs=[pl.BlockSpec(memory_space=pltpu.MemorySpace.VMEM)
                  for _ in range(n_in)],
        out_specs=pl.BlockSpec(memory_space=pltpu.MemorySpace.VMEM),
        scratch_shapes=[
            pltpu.VMEM((T * Bp, 8 * H), jnp.float32),   # x_proj (both dirs)
            pltpu.VMEM((T * Bp, H), jnp.float32),       # fwd h per time step
            pltpu.VMEM((T * Bp, H), jnp.float32),       # bwd h per time step
        ],
    )(x_flat, *flat_w)

    y = y.reshape(T, Bp, out_dim)[:, :B, :]
    return jnp.transpose(y, (1, 0, 2))       # (B, T, out_dim)


# ----------------------------------------------------------------------------
# Pure-JAX reference (for correctness check)
# ----------------------------------------------------------------------------
def _lstm_dir_ref(x_tm, w_ih_t, w_hh_t, b, *, reverse):
    T, B, _ = x_tm.shape
    H = w_hh_t.shape[0]
    xs = x_tm[::-1] if reverse else x_tm

    def step(carry, x_t):
        h, c = carry
        gates = x_t @ w_ih_t + h @ w_hh_t + b
        i = jax.nn.sigmoid(gates[:, :H])
        f = jax.nn.sigmoid(gates[:, H:2 * H])
        g = jnp.tanh(gates[:, 2 * H:3 * H])
        o = jax.nn.sigmoid(gates[:, 3 * H:])
        c = f * c + i * g
        h = o * jnp.tanh(c)
        return (h, c), h

    init = (jnp.zeros((B, H), jnp.float32), jnp.zeros((B, H), jnp.float32))
    _, ys = jax.lax.scan(step, init, xs)
    return ys[::-1] if reverse else ys


def lstm_model_ref(x, params):
    B, T, _ = x.shape
    inp = jnp.transpose(x, (1, 0, 2))
    for layer in params["lstm"]:
        fwd = _lstm_dir_ref(inp, layer["w_ih_f"], layer["w_hh_f"],
                            layer["b_f"], reverse=False)
        bwd = _lstm_dir_ref(inp, layer["w_ih_b"], layer["w_hh_b"],
                            layer["b_b"], reverse=True)
        inp = jnp.concatenate([fwd, bwd], axis=-1)
    out = jnp.transpose(inp, (1, 0, 2)).reshape(B * T, -1)
    h = jnp.maximum(out @ params["fc1_w_t"] + params["fc1_b"], 0.0)
    y = jax.nn.sigmoid(h @ params["fc2_w_t"] + params["fc2_b"])
    return y.reshape(B, T, -1)


# ----------------------------------------------------------------------------
# Deterministic parameter construction (PyTorch-style init, pre-transposed)
# ----------------------------------------------------------------------------
def init_params(key, input_dim, hidden_dim, output_dim, num_layers=3):
    params = {"lstm": []}
    k = 1.0 / np.sqrt(hidden_dim)
    for layer in range(num_layers):
        d_in = input_dim if layer == 0 else 2 * hidden_dim
        layer_p = {}
        for tag in ("f", "b"):
            key, k1, k2, k3, k4 = jax.random.split(key, 5)
            w_ih = jax.random.uniform(k1, (4 * hidden_dim, d_in),
                                      jnp.float32, -k, k)
            w_hh = jax.random.uniform(k2, (4 * hidden_dim, hidden_dim),
                                      jnp.float32, -k, k)
            b_ih = jax.random.uniform(k3, (4 * hidden_dim,), jnp.float32, -k, k)
            b_hh = jax.random.uniform(k4, (4 * hidden_dim,), jnp.float32, -k, k)
            layer_p[f"w_ih_{tag}"] = w_ih.T          # (d_in, 4H)
            layer_p[f"w_hh_{tag}"] = w_hh.T          # (H, 4H)
            layer_p[f"b_{tag}"] = b_ih + b_hh        # (4H,)
        params["lstm"].append(layer_p)

    key, k1, k2, k3, k4 = jax.random.split(key, 5)
    kf1 = 1.0 / np.sqrt(2 * hidden_dim)
    kf2 = 1.0 / np.sqrt(hidden_dim)
    params["fc1_w_t"] = jax.random.uniform(
        k1, (hidden_dim, 2 * hidden_dim), jnp.float32, -kf1, kf1).T  # (2H, H)
    params["fc1_b"] = jax.random.uniform(k2, (hidden_dim,), jnp.float32,
                                         -kf1, kf1)
    params["fc2_w_t"] = jax.random.uniform(
        k3, (output_dim, hidden_dim), jnp.float32, -kf2, kf2).T      # (H, out)
    params["fc2_b"] = jax.random.uniform(k4, (output_dim,), jnp.float32,
                                         -kf2, kf2)
    return params


# ----------------------------------------------------------------------------
if __name__ == "__main__":
    B, T = 2, 8
    INPUT_DIM, HIDDEN_DIM, OUTPUT_DIM = 32, 32, 3

    root = jax.random.PRNGKey(0)
    kx, kp = jax.random.split(root)
    x = jax.random.normal(kx, (B, T, INPUT_DIM), jnp.float32)
    params = init_params(kp, INPUT_DIM, HIDDEN_DIM, OUTPUT_DIM, num_layers=3)

    y = jax.block_until_ready(lstm_model_forward(x, params))
    y_ref = jax.block_until_ready(lstm_model_ref(x, params))

    assert y.shape == (B, T, OUTPUT_DIM), y.shape
    np.testing.assert_allclose(np.asarray(y), np.asarray(y_ref),
                               rtol=1e-3, atol=1e-3)
    print("KERNEL_OK")
</pallas_src>

<mosaic_0001>
module attributes {stable_mosaic.version = 11 : i64} {
  func.func @_fused_lstm_mlp_kernel(%arg0: memref<64x32xf32, #tpu.memory_space<vmem>>, %arg1: memref<32x256xf32, #tpu.memory_space<vmem>>, %arg2: memref<32x128xf32, #tpu.memory_space<vmem>>, %arg3: memref<32x128xf32, #tpu.memory_space<vmem>>, %arg4: memref<1x256xf32, #tpu.memory_space<vmem>>, %arg5: memref<64x256xf32, #tpu.memory_space<vmem>>, %arg6: memref<32x128xf32, #tpu.memory_space<vmem>>, %arg7: memref<32x128xf32, #tpu.memory_space<vmem>>, %arg8: memref<1x256xf32, #tpu.memory_space<vmem>>, %arg9: memref<64x256xf32, #tpu.memory_space<vmem>>, %arg10: memref<32x128xf32, #tpu.memory_space<vmem>>, %arg11: memref<32x128xf32, #tpu.memory_space<vmem>>, %arg12: memref<1x256xf32, #tpu.memory_space<vmem>>, %arg13: memref<64x32xf32, #tpu.memory_space<vmem>>, %arg14: memref<1x32xf32, #tpu.memory_space<vmem>>, %arg15: memref<32x3xf32, #tpu.memory_space<vmem>>, %arg16: memref<1x3xf32, #tpu.memory_space<vmem>>, %arg17: memref<64x3xf32, #tpu.memory_space<vmem>>, %arg18: memref<64x256xf32, #tpu.memory_space<vmem>>, %arg19: memref<64x32xf32, #tpu.memory_space<vmem>>, %arg20: memref<64x32xf32, #tpu.memory_space<vmem>>) attributes {dimension_semantics = [], scalar_prefetch = 0 : i64, scratch_operands = 3 : i64, tpu.core_type = #tpu.core_type<tc>} {
    %c0 = arith.constant 0 : index
    %c0_0 = arith.constant 0 : index
    %0 = vector.load %arg0[%c0, %c0_0] : memref<64x32xf32, #tpu.memory_space<vmem>>, vector<64x32xf32>
    %c0_1 = arith.constant 0 : index
    %c0_2 = arith.constant 0 : index
    %1 = vector.load %arg1[%c0_1, %c0_2] : memref<32x256xf32, #tpu.memory_space<vmem>>, vector<32x256xf32>
    %cst = arith.constant dense<0.000000e+00> : vector<64x256xf32>
    %2 = tpu.matmul %0, %1, %cst {dimension_numbers = #tpu.dot_dimension_numbers<[1], [0], [0], [1], [0, 0, 1, 1], [], []>} : vector<64x32xf32>, vector<32x256xf32>, vector<64x256xf32> -> vector<64x256xf32>
    %c0_3 = arith.constant 0 : index
    %c0_4 = arith.constant 0 : index
    %3 = vector.load %arg4[%c0_3, %c0_4] : memref<1x256xf32, #tpu.memory_space<vmem>>, vector<1x256xf32>
    %4 = vector.broadcast %3 : vector<1x256xf32> to vector<64x256xf32>
    %5 = arith.addf %2, %4 : vector<64x256xf32>
    %c0_5 = arith.constant 0 : index
    %c0_6 = arith.constant 0 : index
    %6 = vector.load %arg18[%c0_5, %c0_6] : memref<64x256xf32, #tpu.memory_space<vmem>>, vector<64x256xf32>
    tpu.vector_store %arg18[%c0_5, %c0_6], %5 {strides = array<i32>} : memref<64x256xf32, #tpu.memory_space<vmem>>, vector<64x256xf32>,
    %c0_7 = arith.constant 0 : index
    %c0_8 = arith.constant 0 : index
    %7 = vector.load %arg2[%c0_7, %c0_8] : memref<32x128xf32, #tpu.memory_space<vmem>>, vector<32x128xf32>
    %c0_9 = arith.constant 0 : index
    %c0_10 = arith.constant 0 : index
    %8 = vector.load %arg3[%c0_9, %c0_10] : memref<32x128xf32, #tpu.memory_space<vmem>>, vector<32x128xf32>
    %cst_11 = arith.constant 0.000000e+00 : f32
    %9 = vector.broadcast %cst_11 : f32 to vector<8x32xf32>
    %c0_12 = arith.constant 0 : index
    %c0_13 = arith.constant 0 : index
    %10 = vector.load %arg18[%c0_12, %c0_13] : memref<64x256xf32, #tpu.memory_space<vmem>>, vector<8x128xf32>
    %cst_14 = arith.constant dense<0.000000e+00> : vector<8x128xf32>
    %11 = tpu.matmul %9, %7, %cst_14 {dimension_numbers = #tpu.dot_dimension_numbers<[1], [0], [0], [1], [0, 0, 1, 1], [], []>} : vector<8x32xf32>, vector<32x128xf32>, vector<8x128xf32> -> vector<8x128xf32>
    %12 = arith.addf %10, %11 : vector<8x128xf32>
    %c56 = arith.constant 56 : index
    %c128 = arith.constant 128 : index
    %13 = vector.load %arg18[%c56, %c128] : memref<64x256xf32, #tpu.memory_space<vmem>>, vector<8x128xf32>
    %cst_15 = arith.constant dense<0.000000e+00> : vector<8x128xf32>
    %14 = tpu.matmul %9, %8, %cst_15 {dimension_numbers = #tpu.dot_dimension_numbers<[1], [0], [0], [1], [0, 0, 1, 1], [], []>} : vector<8x32xf32>, vector<32x128xf32>, vector<8x128xf32> -> vector<8x128xf32>
    %15 = arith.addf %13, %14 : vector<8x128xf32>
    %16 = arith.negf %12 : vector<8x128xf32>
    %17 = math.exp %16 : vector<8x128xf32>
    %cst_16 = arith.constant 1.000000e+00 : f32
    %18 = vector.broadcast %cst_16 : f32 to vector<8x128xf32>
    %19 = arith.addf %18, %17 : vector<8x128xf32>
    %20 = arith.divf %18, %19 : vector<8x128xf32>
    %21 = math.tanh %12 : vector<8x128xf32>
    %22 = vector.extract_strided_slice %20 {offsets = [0, 0], sizes = [8, 32], strides = [1, 1]} : vector<8x128xf32> to vector<8x32xf32>
    %23 = vector.extract_strided_slice %20 {offsets = [0, 32], sizes = [8, 32], strides = [1, 1]} : vector<8x128xf32> to vector<8x32xf32>
    %24 = vector.extract_strided_slice %21 {offsets = [0, 64], sizes = [8, 32], strides = [1, 1]} : vector<8x128xf32> to vector<8x32xf32>
    %25 = vector.extract_strided_slice %20 {offsets = [0, 96], sizes = [8, 32], strides = [1, 1]} : vector<8x128xf32> to vector<8x32xf32>
    %26 = arith.mulf %23, %9 : vector<8x32xf32>
    %27 = arith.mulf %22, %24 : vector<8x32xf32>
    %28 = arith.addf %26, %27 : vector<8x32xf32>
    %29 = math.tanh %28 : vector<8x32xf32>
    %30 = arith.mulf %25, %29 : vector<8x32xf32>
    %31 = arith.negf %15 : vector<8x128xf32>
    %32 = math.exp %31 : vector<8x128xf32>
    %cst_17 = arith.constant 1.000000e+00 : f32
    %33 = vector.broadcast %cst_17 : f32 to vector<8x128xf32>
    %34 = arith.addf %33, %32 : vector<8x128xf32>
    %35 = arith.divf %33, %34 : vector<8x128xf32>
    %36 = math.tanh %15 : vector<8x128xf32>
    %37 = vector.extract_strided_slice %35 {offsets = [0, 0], sizes = [8, 32], strides = [1, 1]} : vector<8x128xf32> to vector<8x32xf32>
    %38 = vector.extract_strided_slice %35 {offsets = [0, 32], sizes = [8, 32], strides = [1, 1]} : vector<8x128xf32> to vector<8x32xf32>
    %39 = vector.extract_strided_slice %36 {offsets = [0, 64], sizes = [8, 32], strides = [1, 1]} : vector<8x128xf32> to vector<8x32xf32>
    %40 = vector.extract_strided_slice %35 {offsets = [0, 96], sizes = [8, 32], strides = [1, 1]} : vector<8x128xf32> to vector<8x32xf32>
    %41 = arith.mulf %38, %9 : vector<8x32xf32>
    %42 = arith.mulf %37, %39 : vector<8x32xf32>
    %43 = arith.addf %41, %42 : vector<8x32xf32>
    %44 = math.tanh %43 : vector<8x32xf32>
    %45 = arith.mulf %40, %44 : vector<8x32xf32>
    %c0_18 = arith.constant 0 : index
    %c0_19 = arith.constant 0 : index
    %46 = vector.load %arg19[%c0_18, %c0_19] : memref<64x32xf32, #tpu.memory_space<vmem>>, vector<8x32xf32>
    tpu.vector_store %arg19[%c0_18, %c0_19], %30 {strides = array<i32>} : memref<64x32xf32, #tpu.memory_space<vmem>>, vector<8x32xf32>,
    %c56_20 = arith.constant 56 : index
    %c0_21 = arith.constant 0 : index
    %47 = vector.load %arg20[%c56_20, %c0_21] : memref<64x32xf32, #tpu.memory_space<vmem>>, vector<8x32xf32>
    tpu.vector_store %arg20[%c56_20, %c0_21], %45 {strides = array<i32>} : memref<64x32xf32, #tpu.memory_space<vmem>>, vector<8x32xf32>,
    %c8 = arith.constant 8 : index
    %c0_22 = arith.constant 0 : index
    %48 = vector.load %arg18[%c8, %c0_22] : memref<64x256xf32, #tpu.memory_space<vmem>>, vector<8x128xf32>
    %cst_23 = arith.constant dense<0.000000e+00> : vector<8x128xf32>
    %49 = tpu.matmul %30, %7, %cst_23 {dimension_numbers = #tpu.dot_dimension_numbers<[1], [0], [0], [1], [0, 0, 1, 1], [], []>} : vector<8x32xf32>, vector<32x128xf32>, vector<8x128xf32> -> vector<8x128xf32>
    %50 = arith.addf %48, %49 : vector<8x128xf32>
    %c48 = arith.constant 48 : index
    %c128_24 = arith.constant 128 : index
    %51 = vector.load %arg18[%c48, %c128_24] : memref<64x256xf32, #tpu.memory_space<vmem>>, vector<8x128xf32>
    %cst_25 = arith.constant dense<0.000000e+00> : vector<8x128xf32>
    %52 = tpu.matmul %45, %8, %cst_25 {dimension_numbers = #tpu.dot_dimension_numbers<[1], [0], [0], [1], [0, 0, 1, 1], [], []>} : vector<8x32xf32>, vector<32x128xf32>, vector<8x128xf32> -> vector<8x128xf32>
    %53 = arith.addf %51, %52 : vector<8x128xf32>
    %54 = arith.negf %50 : vector<8x128xf32>
    %55 = math.exp %54 : vector<8x128xf32>
    %cst_26 = arith.constant 1.000000e+00 : f32
    %56 = vector.broadcast %cst_26 : f32 to vector<8x128xf32>
    %57 = arith.addf %56, %55 : vector<8x128xf32>
    %58 = arith.divf %56, %57 : vector<8x128xf32>
    %59 = math.tanh %50 : vector<8x128xf32>
    %60 = vector.extract_strided_slice %58 {offsets = [0, 0], sizes = [8, 32], strides = [1, 1]} : vector<8x128xf32> to vector<8x32xf32>
    %61 = vector.extract_strided_slice %58 {offsets = [0, 32], sizes = [8, 32], strides = [1, 1]} : vector<8x128xf32> to vector<8x32xf32>
    %62 = vector.extract_strided_slice %59 {offsets = [0, 64], sizes = [8, 32], strides = [1, 1]} : vector<8x128xf32> to vector<8x32xf32>
    %63 = vector.extract_strided_slice %58 {offsets = [0, 96], sizes = [8, 32], strides = [1, 1]} : vector<8x128xf32> to vector<8x32xf32>
    %64 = arith.mulf %61, %28 : vector<8x32xf32>
    %65 = arith.mulf %60, %62 : vector<8x32xf32>
    %66 = arith.addf %64, %65 : vector<8x32xf32>
    %67 = math.tanh %66 : vector<8x32xf32>
    %68 = arith.mulf %63, %67 : vector<8x32xf32>
    %69 = arith.negf %53 : vector<8x128xf32>
    %70 = math.exp %69 : vector<8x128xf32>
    %cst_27 = arith.constant 1.000000e+00 : f32
    %71 = vector.broadcast %cst_27 : f32 to vector<8x128xf32>
    %72 = arith.addf %71, %70 : vector<8x128xf32>
    %73 = arith.divf %71, %72 : vector<8x128xf32>
    %74 = math.tanh %53 : vector<8x128xf32>
    %75 = vector.extract_strided_slice %73 {offsets = [0, 0], sizes = [8, 32], strides = [1, 1]} : vector<8x128xf32> to vector<8x32xf32>
    %76 = vector.extract_strided_slice %73 {offsets = [0, 32], sizes = [8, 32], strides = [1, 1]} : vector<8x128xf32> to vector<8x32xf32>
    %77 = vector.extract_strided_slice %74 {offsets = [0, 64], sizes = [8, 32], strides = [1, 1]} : vector<8x128xf32> to vector<8x32xf32>
    %78 = vector.extract_strided_slice %73 {offsets = [0, 96], sizes = [8, 32], strides = [1, 1]} : vector<8x128xf32> to vector<8x32xf32>
    %79 = arith.mulf %76, %43 : vector<8x32xf32>
    %80 = arith.mulf %75, %77 : vector<8x32xf32>
    %81 = arith.addf %79, %80 : vector<8x32xf32>
    %82 = math.tanh %81 : vector<8x32xf32>
    %83 = arith.mulf %78, %82 : vector<8x32xf32>
    %c8_28 = arith.constant 8 : index
    %c0_29 = arith.constant 0 : index
    %84 = vector.load %arg19[%c8_28, %c0_29] : memref<64x32xf32, #tpu.memory_space<vmem>>, vector<8x32xf32>
    tpu.vector_store %arg19[%c8_28, %c0_29], %68 {strides = array<i32>} : memref<64x32xf32, #tpu.memory_space<vmem>>, vector<8x32xf32>,
    %c48_30 = arith.constant 48 : index
    %c0_31 = arith.constant 0 : index
    %85 = vector.load %arg20[%c48_30, %c0_31] : memref<64x32xf32, #tpu.memory_space<vmem>>, vector<8x32xf32>
    tpu.vector_store %arg20[%c48_30, %c0_31], %83 {strides = array<i32>} : memref<64x32xf32, #tpu.memory_space<vmem>>, vector<8x32xf32>,
    %c16 = arith.constant 16 : index
    %c0_32 = arith.constant 0 : index
    %86 = vector.load %arg18[%c16, %c0_32] : memref<64x256xf32, #tpu.memory_space<vmem>>, vector<8x128xf32>
    %cst_33 = arith.constant dense<0.000000e+00> : vector<8x128xf32>
    %87 = tpu.matmul %68, %7, %cst_33 {dimension_numbers = #tpu.dot_dimension_numbers<[1], [0], [0], [1], [0, 0, 1, 1], [], []>} : vector<8x32xf32>, vector<32x128xf32>, vector<8x128xf32> -> vector<8x128xf32>
    %88 = arith.addf %86, %87 : vector<8x128xf32>
    %c40 = arith.constant 40 : index
    %c128_34 = arith.constant 128 : index
    %89 = vector.load %arg18[%c40, %c128_34] : memref<64x256xf32, #tpu.memory_space<vmem>>, vector<8x128xf32>
    %cst_35 = arith.constant dense<0.000000e+00> : vector<8x128xf32>
    %90 = tpu.matmul %83, %8, %cst_35 {dimension_numbers = #tpu.dot_dimension_numbers<[1], [0], [0], [1], [0, 0, 1, 1], [], []>} : vector<8x32xf32>, vector<32x128xf32>, vector<8x128xf32> -> vector<8x128xf32>
    %91 = arith.addf %89, %90 : vector<8x128xf32>
    %92 = arith.negf %88 : vector<8x128xf32>
    %93 = math.exp %92 : vector<8x128xf32>
    %cst_36 = arith.constant 1.000000e+00 : f32
    %94 = vector.broadcast %cst_36 : f32 to vector<8x128xf32>
    %95 = arith.addf %94, %93 : vector<8x128xf32>
    %96 = arith.divf %94, %95 : vector<8x128xf32>
    %97 = math.tanh %88 : vector<8x128xf32>
    %98 = vector.extract_strided_slice %96 {offsets = [0, 0], sizes = [8, 32], strides = [1, 1]} : vector<8x128xf32> to vector<8x32xf32>
    %99 = vector.extract_strided_slice %96 {offsets = [0, 32], sizes = [8, 32], strides = [1, 1]} : vector<8x128xf32> to vector<8x32xf32>
    %100 = vector.extract_strided_slice %97 {offsets = [0, 64], sizes = [8, 32], strides = [1, 1]} : vector<8x128xf32> to vector<8x32xf32>
    %101 = vector.extract_strided_slice %96 {offsets = [0, 96], sizes = [8, 32], strides = [1, 1]} : vector<8x128xf32> to vector<8x32xf32>
    %102 = arith.mulf %99, %66 : vector<8x32xf32>
    %103 = arith.mulf %98, %100 : vector<8x32xf32>
    %104 = arith.addf %102, %103 : vector<8x32xf32>
    %105 = math.tanh %104 : vector<8x32xf32>
    %106 = arith.mulf %101, %105 : vector<8x32xf32>
    %107 = arith.negf %91 : vector<8x128xf32>
    %108 = math.exp %107 : vector<8x128xf32>
    %cst_37 = arith.constant 1.000000e+00 : f32
    %109 = vector.broadcast %cst_37 : f32 to vector<8x128xf32>
    %110 = arith.addf %109, %108 : vector<8x128xf32>
    %111 = arith.divf %109, %110 : vector<8x128xf32>
    %112 = math.tanh %91 : vector<8x128xf32>
    %113 = vector.extract_strided_slice %111 {offsets = [0, 0], sizes = [8, 32], strides = [1, 1]} : vector<8x128xf32> to vector<8x32xf32>
    %114 = vector.extract_strided_slice %111 {offsets = [0, 32], sizes = [8, 32], strides = [1, 1]} : vector<8x128xf32> to vector<8x32xf32>
    %115 = vector.extract_strided_slice %112 {offsets = [0, 64], sizes = [8, 32], strides = [1, 1]} : vector<8x128xf32> to vector<8x32xf32>
    %116 = vector.extract_strided_slice %111 {offsets = [0, 96], sizes = [8, 32], strides = [1, 1]} : vector<8x128xf32> to vector<8x32xf32>
    %117 = arith.mulf %114, %81 : vector<8x32xf32>
    %118 = arith.mulf %113, %115 : vector<8x32xf32>
    %119 = arith.addf %117, %118 : vector<8x32xf32>
    %120 = math.tanh %119 : vector<8x32xf32>
    %121 = arith.mulf %116, %120 : vector<8x32xf32>
    %c16_38 = arith.constant 16 : index
    %c0_39 = arith.constant 0 : index
    %122 = vector.load %arg19[%c16_38, %c0_39] : memref<64x32xf32, #tpu.memory_space<vmem>>, vector<8x32xf32>
    tpu.vector_store %arg19[%c16_38, %c0_39], %106 {strides = array<i32>} : memref<64x32xf32, #tpu.memory_space<vmem>>, vector<8x32xf32>,
    %c40_40 = arith.constant 40 : index
    %c0_41 = arith.constant 0 : index
    %123 = vector.load %arg20[%c40_40, %c0_41] : memref<64x32xf32, #tpu.memory_space<vmem>>, vector<8x32xf32>
    tpu.vector_store %arg20[%c40_40, %c0_41], %121 {strides = array<i32>} : memref<64x32xf32, #tpu.memory_space<vmem>>, vector<8x32xf32>,
    %c24 = arith.constant 24 : index
    %c0_42 = arith.constant 0 : index
    %124 = vector.load %arg18[%c24, %c0_42] : memref<64x256xf32, #tpu.memory_space<vmem>>, vector<8x128xf32>
    %cst_43 = arith.constant dense<0.000000e+00> : vector<8x128xf32>
    %125 = tpu.matmul %106, %7, %cst_43 {dimension_numbers = #tpu.dot_dimension_numbers<[1], [0], [0], [1], [0, 0, 1, 1], [], []>} : vector<8x32xf32>, vector<32x128xf32>, vector<8x128xf32> -> vector<8x128xf32>
    %126 = arith.addf %124, %125 : vector<8x128xf32>
    %c32 = arith.constant 32 : index
    %c128_44 = arith.constant 128 : index
    %127 = vector.load %arg18[%c32, %c128_44] : memref<64x256xf32, #tpu.memory_space<vmem>>, vector<8x128xf32>
    %cst_45 = arith.constant dense<0.000000e+00> : vector<8x128xf32>
    %128 = tpu.matmul %121, %8, %cst_45 {dimension_numbers = #tpu.dot_dimension_numbers<[1], [0], [0], [1], [0, 0, 1, 1], [], []>} : vector<8x32xf32>, vector<32x128xf32>, vector<8x128xf32> -> vector<8x128xf32>
    %129 = arith.addf %127, %128 : vector<8x128xf32>
    %130 = arith.negf %126 : vector<8x128xf32>
    %131 = math.exp %130 : vector<8x128xf32>
    %cst_46 = arith.constant 1.000000e+00 : f32
    %132 = vector.broadcast %cst_46 : f32 to vector<8x128xf32>
    %133 = arith.addf %132, %131 : vector<8x128xf32>
    %134 = arith.divf %132, %133 : vector<8x128xf32>
    %135 = math.tanh %126 : vector<8x128xf32>
    %136 = vector.extract_strided_slice %134 {offsets = [0, 0], sizes = [8, 32], strides = [1, 1]} : vector<8x128xf32> to vector<8x32xf32>
    %137 = vector.extract_strided_slice %134 {offsets = [0, 32], sizes = [8, 32], strides = [1, 1]} : vector<8x128xf32> to vector<8x32xf32>
    %138 = vector.extract_strided_slice %135 {offsets = [0, 64], sizes = [8, 32], strides = [1, 1]} : vector<8x128xf32> to vector<8x32xf32>
    %139 = vector.extract_strided_slice %134 {offsets = [0, 96], sizes = [8, 32], strides = [1, 1]} : vector<8x128xf32> to vector<8x32xf32>
    %140 = arith.mulf %137, %104 : vector<8x32xf32>
    %141 = arith.mulf %136, %138 : vector<8x32xf32>
    %142 = arith.addf %140, %141 : vector<8x32xf32>
    %143 = math.tanh %142 : vector<8x32xf32>
    %144 = arith.mulf %139, %143 : vector<8x32xf32>
    %145 = arith.negf %129 : vector<8x128xf32>
    %146 = math.exp %145 : vector<8x128xf32>
    %cst_47 = arith.constant 1.000000e+00 : f32
    %147 = vector.broadcast %cst_47 : f32 to vector<8x128xf32>
    %148 = arith.addf %147, %146 : vector<8x128xf32>
    %149 = arith.divf %147, %148 : vector<8x128xf32>
    %150 = math.tanh %129 : vector<8x128xf32>
    %151 = vector.extract_strided_slice %149 {offsets = [0, 0], sizes = [8, 32], strides = [1, 1]} : vector<8x128xf32> to vector<8x32xf32>
    %152 = vector.extract_strided_slice %149 {offsets = [0, 32], sizes = [8, 32], strides = [1, 1]} : vector<8x128xf32> to vector<8x32xf32>
    %153 = vector.extract_strided_slice %150 {offsets = [0, 64], sizes = [8, 32], strides = [1, 1]} : vector<8x128xf32> to vector<8x32xf32>
    %154 = vector.extract_strided_slice %149 {offsets = [0, 96], sizes = [8, 32], strides = [1, 1]} : vector<8x128xf32> to vector<8x32xf32>
    %155 = arith.mulf %152, %119 : vector<8x32xf32>
    %156 = arith.mulf %151, %153 : vector<8x32xf32>
    %157 = arith.addf %155, %156 : vector<8x32xf32>
    %158 = math.tanh %157 : vector<8x32xf32>
    %159 = arith.mulf %154, %158 : vector<8x32xf32>
    %c24_48 = arith.constant 24 : index
    %c0_49 = arith.constant 0 : index
    %160 = vector.load %arg19[%c24_48, %c0_49] : memref<64x32xf32, #tpu.memory_space<vmem>>, vector<8x32xf32>
    tpu.vector_store %arg19[%c24_48, %c0_49], %144 {strides = array<i32>} : memref<64x32xf32, #tpu.memory_space<vmem>>, vector<8x32xf32>,
    %c32_50 = arith.constant 32 : index
    %c0_51 = arith.constant 0 : index
    %161 = vector.load %arg20[%c32_50, %c0_51] : memref<64x32xf32, #tpu.memory_space<vmem>>, vector<8x32xf32>
    tpu.vector_store %arg20[%c32_50, %c0_51], %159 {strides = array<i32>} : memref<64x32xf32, #tpu.memory_space<vmem>>, vector<8x32xf32>,
    %c32_52 = arith.constant 32 : index
    %c0_53 = arith.constant 0 : index
    %162 = vector.load %arg18[%c32_52, %c0_53] : memref<64x256xf32, #tpu.memory_space<vmem>>, vector<8x128xf32>
    %cst_54 = arith.constant dense<0.000000e+00> : vector<8x128xf32>
    %163 = tpu.matmul %144, %7, %cst_54 {dimension_numbers = #tpu.dot_dimension_numbers<[1], [0], [0], [1], [0, 0, 1, 1], [], []>} : vector<8x32xf32>, vector<32x128xf32>, vector<8x128xf32> -> vector<8x128xf32>
    %164 = arith.addf %162, %163 : vector<8x128xf32>
    %c24_55 = arith.constant 24 : index
    %c128_56 = arith.constant 128 : index
    %165 = vector.load %arg18[%c24_55, %c128_56] : memref<64x256xf32, #tpu.memory_space<vmem>>, vector<8x128xf32>
    %cst_57 = arith.constant dense<0.000000e+00> : vector<8x128xf32>
    %166 = tpu.matmul %159, %8, %cst_57 {dimension_numbers = #tpu.dot_dimension_numbers<[1], [0], [0], [1], [0, 0, 1, 1], [], []>} : vector<8x32xf32>, vector<32x128xf32>, vector<8x128xf32> -> vector<8x128xf32>
    %167 = arith.addf %165, %166 : vector<8x128xf32>
    %168 = arith.negf %164 : vector<8x128xf32>
    %169 = math.exp %168 : vector<8x128xf32>
    %cst_58 = arith.constant 1.000000e+00 : f32
    %170 = vector.broadcast %cst_58 : f32 to vector<8x128xf32>
    %171 = arith.addf %170, %169 : vector<8x128xf32>
    %172 = arith.divf %170, %171 : vector<8x128xf32>
    %173 = math.tanh %164 : vector<8x128xf32>
    %174 = vector.extract_strided_slice %172 {offsets = [0, 0], sizes = [8, 32], strides = [1, 1]} : vector<8x128xf32> to vector<8x32xf32>
    %175 = vector.extract_strided_slice %172 {offsets = [0, 32], sizes = [8, 32], strides = [1, 1]} : vector<8x128xf32> to vector<8x32xf32>
    %176 = vector.extract_strided_slice %173 {offsets = [0, 64], sizes = [8, 32], strides = [1, 1]} : vector<8x128xf32> to vector<8x32xf32>
    %177 = vector.extract_strided_slice %172 {offsets = [0, 96], sizes = [8, 32], strides = [1, 1]} : vector<8x128xf32> to vector<8x32xf32>
    %178 = arith.mulf %175, %142 : vector<8x32xf32>
    %179 = arith.mulf %174, %176 : vector<8x32xf32>
    %180 = arith.addf %178, %179 : vector<8x32xf32>
    %181 = math.tanh %180 : vector<8x32xf32>
    %182 = arith.mulf %177, %181 : vector<8x32xf32>
    %183 = arith.negf %167 : vector<8x128xf32>
    %184 = math.exp %183 : vector<8x128xf32>
    %cst_59 = arith.constant 1.000000e+00 : f32
    %185 = vector.broadcast %cst_59 : f32 to vector<8x128xf32>
    %186 = arith.addf %185, %184 : vector<8x128xf32>
    %187 = arith.divf %185, %186 : vector<8x128xf32>
    %188 = math.tanh %167 : vector<8x128xf32>
    %189 = vector.extract_strided_slice %187 {offsets = [0, 0], sizes = [8, 32], strides = [1, 1]} : vector<8x128xf32> to vector<8x32xf32>
    %190 = vector.extract_strided_slice %187 {offsets = [0, 32], sizes = [8, 32], strides = [1, 1]} : vector<8x128xf32> to vector<8x32xf32>
    %191 = vector.extract_strided_slice %188 {offsets = [0, 64], sizes = [8, 32], strides = [1, 1]} : vector<8x128xf32> to vector<8x32xf32>
    %192 = vector.extract_strided_slice %187 {offsets = [0, 96], sizes = [8, 32], strides = [1, 1]} : vector<8x128xf32> to vector<8x32xf32>
    %193 = arith.mulf %190, %157 : vector<8x32xf32>
    %194 = arith.mulf %189, %191 : vector<8x32xf32>
    %195 = arith.addf %193, %194 : vector<8x32xf32>
    %196 = math.tanh %195 : vector<8x32xf32>
    %197 = arith.mulf %192, %196 : vector<8x32xf32>
    %c32_60 = arith.constant 32 : index
    %c0_61 = arith.constant 0 : index
    %198 = vector.load %arg19[%c32_60, %c0_61] : memref<64x32xf32, #tpu.memory_space<vmem>>, vector<8x32xf32>
    tpu.vector_store %arg19[%c32_60, %c0_61], %182 {strides = array<i32>} : memref<64x32xf32, #tpu.memory_space<vmem>>, vector<8x32xf32>,
    %c24_62 = arith.constant 24 : index
    %c0_63 = arith.constant 0 : index
    %199 = vector.load %arg20[%c24_62, %c0_63] : memref<64x32xf32, #tpu.memory_space<vmem>>, vector<8x32xf32>
    tpu.vector_store %arg20[%c24_62, %c0_63], %197 {strides = array<i32>} : memref<64x32xf32, #tpu.memory_space<vmem>>, vector<8x32xf32>,
    %c40_64 = arith.constant 40 : index
    %c0_65 = arith.constant 0 : index
    %200 = vector.load %arg18[%c40_64, %c0_65] : memref<64x256xf32, #tpu.memory_space<vmem>>, vector<8x128xf32>
    %cst_66 = arith.constant dense<0.000000e+00> : vector<8x128xf32>
    %201 = tpu.matmul %182, %7, %cst_66 {dimension_numbers = #tpu.dot_dimension_numbers<[1], [0], [0], [1], [0, 0, 1, 1], [], []>} : vector<8x32xf32>, vector<32x128xf32>, vector<8x128xf32> -> vector<8x128xf32>
    %202 = arith.addf %200, %201 : vector<8x128xf32>
    %c16_67 = arith.constant 16 : index
    %c128_68 = arith.constant 128 : index
    %203 = vector.load %arg18[%c16_67, %c128_68] : memref<64x256xf32, #tpu.memory_space<vmem>>, vector<8x128xf32>
    %cst_69 = arith.constant dense<0.000000e+00> : vector<8x128xf32>
    %204 = tpu.matmul %197, %8, %cst_69 {dimension_numbers = #tpu.dot_dimension_numbers<[1], [0], [0], [1], [0, 0, 1, 1], [], []>} : vector<8x32xf32>, vector<32x128xf32>, vector<8x128xf32> -> vector<8x128xf32>
    %205 = arith.addf %203, %204 : vector<8x128xf32>
    %206 = arith.negf %202 : vector<8x128xf32>
    %207 = math.exp %206 : vector<8x128xf32>
    %cst_70 = arith.constant 1.000000e+00 : f32
    %208 = vector.broadcast %cst_70 : f32 to vector<8x128xf32>
    %209 = arith.addf %208, %207 : vector<8x128xf32>
    %210 = arith.divf %208, %209 : vector<8x128xf32>
    %211 = math.tanh %202 : vector<8x128xf32>
    %212 = vector.extract_strided_slice %210 {offsets = [0, 0], sizes = [8, 32], strides = [1, 1]} : vector<8x128xf32> to vector<8x32xf32>
    %213 = vector.extract_strided_slice %210 {offsets = [0, 32], sizes = [8, 32], strides = [1, 1]} : vector<8x128xf32> to vector<8x32xf32>
    %214 = vector.extract_strided_slice %211 {offsets = [0, 64], sizes = [8, 32], strides = [1, 1]} : vector<8x128xf32> to vector<8x32xf32>
    %215 = vector.extract_strided_slice %210 {offsets = [0, 96], sizes = [8, 32], strides = [1, 1]} : vector<8x128xf32> to vector<8x32xf32>
    %216 = arith.mulf %213, %180 : vector<8x32xf32>
    %217 = arith.mulf %212, %214 : vector<8x32xf32>
    %218 = arith.addf %216, %217 : vector<8x32xf32>
    %219 = math.tanh %218 : vector<8x32xf32>
    %220 = arith.mulf %215, %219 : vector<8x32xf32>
    %221 = arith.negf %205 : vector<8x128xf32>
    %222 = math.exp %221 : vector<8x128xf32>
    %cst_71 = arith.constant 1.000000e+00 : f32
    %223 = vector.broadcast %cst_71 : f32 to vector<8x128xf32>
    %224 = arith.addf %223, %222 : vector<8x128xf32>
    %225 = arith.divf %223, %224 : vector<8x128xf32>
    %226 = math.tanh %205 : vector<8x128xf32>
    %227 = vector.extract_strided_slice %225 {offsets = [0, 0], sizes = [8, 32], strides = [1, 1]} : vector<8x128xf32> to vector<8x32xf32>
    %228 = vector.extract_strided_slice %225 {offsets = [0, 32], sizes = [8, 32], strides = [1, 1]} : vector<8x128xf32> to vector<8x32xf32>
    %229 = vector.extract_strided_slice %226 {offsets = [0, 64], sizes = [8, 32], strides = [1, 1]} : vector<8x128xf32> to vector<8x32xf32>
    %230 = vector.extract_strided_slice %225 {offsets = [0, 96], sizes = [8, 32], strides = [1, 1]} : vector<8x128xf32> to vector<8x32xf32>
    %231 = arith.mulf %228, %195 : vector<8x32xf32>
    %232 = arith.mulf %227, %229 : vector<8x32xf32>
    %233 = arith.addf %231, %232 : vector<8x32xf32>
    %234 = math.tanh %233 : vector<8x32xf32>
    %235 = arith.mulf %230, %234 : vector<8x32xf32>
    %c40_72 = arith.constant 40 : index
    %c0_73 = arith.constant 0 : index
    %236 = vector.load %arg19[%c40_72, %c0_73] : memref<64x32xf32, #tpu.memory_space<vmem>>, vector<8x32xf32>
    tpu.vector_store %arg19[%c40_72, %c0_73], %220 {strides = array<i32>} : memref<64x32xf32, #tpu.memory_space<vmem>>, vector<8x32xf32>,
    %c16_74 = arith.constant 16 : index
    %c0_75 = arith.constant 0 : index
    %237 = vector.load %arg20[%c16_74, %c0_75] : memref<64x32xf32, #tpu.memory_space<vmem>>, vector<8x32xf32>
    tpu.vector_store %arg20[%c16_74, %c0_75], %235 {strides = array<i32>} : memref<64x32xf32, #tpu.memory_space<vmem>>, vector<8x32xf32>,
    %c48_76 = arith.constant 48 : index
    %c0_77 = arith.constant 0 : index
    %238 = vector.load %arg18[%c48_76, %c0_77] : memref<64x256xf32, #tpu.memory_space<vmem>>, vector<8x128xf32>
    %cst_78 = arith.constant dense<0.000000e+00> : vector<8x128xf32>
    %239 = tpu.matmul %220, %7, %cst_78 {dimension_numbers = #tpu.dot_dimension_numbers<[1], [0], [0], [1], [0, 0, 1, 1], [], []>} : vector<8x32xf32>, vector<32x128xf32>, vector<8x128xf32> -> vector<8x128xf32>
    %240 = arith.addf %238, %239 : vector<8x128xf32>
    %c8_79 = arith.constant 8 : index
    %c128_80 = arith.constant 128 : index
    %241 = vector.load %arg18[%c8_79, %c128_80] : memref<64x256xf32, #tpu.memory_space<vmem>>, vector<8x128xf32>
    %cst_81 = arith.constant dense<0.000000e+00> : vector<8x128xf32>
    %242 = tpu.matmul %235, %8, %cst_81 {dimension_numbers = #tpu.dot_dimension_numbers<[1], [0], [0], [1], [0, 0, 1, 1], [], []>} : vector<8x32xf32>, vector<32x128xf32>, vector<8x128xf32> -> vector<8x128xf32>
    %243 = arith.addf %241, %242 : vector<8x128xf32>
    %244 = arith.negf %240 : vector<8x128xf32>
    %245 = math.exp %244 : vector<8x128xf32>
    %cst_82 = arith.constant 1.000000e+00 : f32
    %246 = vector.broadcast %cst_82 : f32 to vector<8x128xf32>
    %247 = arith.addf %246, %245 : vector<8x128xf32>
    %248 = arith.divf %246, %247 : vector<8x128xf32>
    %249 = math.tanh %240 : vector<8x128xf32>
    %250 = vector.extract_strided_slice %248 {offsets = [0, 0], sizes = [8, 32], strides = [1, 1]} : vector<8x128xf32> to vector<8x32xf32>
    %251 = vector.extract_strided_slice %248 {offsets = [0, 32], sizes = [8, 32], strides = [1, 1]} : vector<8x128xf32> to vector<8x32xf32>
    %252 = vector.extract_strided_slice %249 {offsets = [0, 64], sizes = [8, 32], strides = [1, 1]} : vector<8x128xf32> to vector<8x32xf32>
    %253 = vector.extract_strided_slice %248 {offsets = [0, 96], sizes = [8, 32], strides = [1, 1]} : vector<8x128xf32> to vector<8x32xf32>
    %254 = arith.mulf %251, %218 : vector<8x32xf32>
    %255 = arith.mulf %250, %252 : vector<8x32xf32>
    %256 = arith.addf %254, %255 : vector<8x32xf32>
    %257 = math.tanh %256 : vector<8x32xf32>
    %258 = arith.mulf %253, %257 : vector<8x32xf32>
    %259 = arith.negf %243 : vector<8x128xf32>
    %260 = math.exp %259 : vector<8x128xf32>
    %cst_83 = arith.constant 1.000000e+00 : f32
    %261 = vector.broadcast %cst_83 : f32 to vector<8x128xf32>
    %262 = arith.addf %261, %260 : vector<8x128xf32>
    %263 = arith.divf %261, %262 : vector<8x128xf32>
    %264 = math.tanh %243 : vector<8x128xf32>
    %265 = vector.extract_strided_slice %263 {offsets = [0, 0], sizes = [8, 32], strides = [1, 1]} : vector<8x128xf32> to vector<8x32xf32>
    %266 = vector.extract_strided_slice %263 {offsets = [0, 32], sizes = [8, 32], strides = [1, 1]} : vector<8x128xf32> to vector<8x32xf32>
    %267 = vector.extract_strided_slice %264 {offsets = [0, 64], sizes = [8, 32], strides = [1, 1]} : vector<8x128xf32> to vector<8x32xf32>
    %268 = vector.extract_strided_slice %263 {offsets = [0, 96], sizes = [8, 32], strides = [1, 1]} : vector<8x128xf32> to vector<8x32xf32>
    %269 = arith.mulf %266, %233 : vector<8x32xf32>
    %270 = arith.mulf %265, %267 : vector<8x32xf32>
    %271 = arith.addf %269, %270 : vector<8x32xf32>
    %272 = math.tanh %271 : vector<8x32xf32>
    %273 = arith.mulf %268, %272 : vector<8x32xf32>
    %c48_84 = arith.constant 48 : index
    %c0_85 = arith.constant 0 : index
    %274 = vector.load %arg19[%c48_84, %c0_85] : memref<64x32xf32, #tpu.memory_space<vmem>>, vector<8x32xf32>
    tpu.vector_store %arg19[%c48_84, %c0_85], %258 {strides = array<i32>} : memref<64x32xf32, #tpu.memory_space<vmem>>, vector<8x32xf32>,
    %c8_86 = arith.constant 8 : index
    %c0_87 = arith.constant 0 : index
    %275 = vector.load %arg20[%c8_86, %c0_87] : memref<64x32xf32, #tpu.memory_space<vmem>>, vector<8x32xf32>
    tpu.vector_store %arg20[%c8_86, %c0_87], %273 {strides = array<i32>} : memref<64x32xf32, #tpu.memory_space<vmem>>, vector<8x32xf32>,
    %c56_88 = arith.constant 56 : index
    %c0_89 = arith.constant 0 : index
    %276 = vector.load %arg18[%c56_88, %c0_89] : memref<64x256xf32, #tpu.memory_space<vmem>>, vector<8x128xf32>
    %cst_90 = arith.constant dense<0.000000e+00> : vector<8x128xf32>
    %277 = tpu.matmul %258, %7, %cst_90 {dimension_numbers = #tpu.dot_dimension_numbers<[1], [0], [0], [1], [0, 0, 1, 1], [], []>} : vector<8x32xf32>, vector<32x128xf32>, vector<8x128xf32> -> vector<8x128xf32>
    %278 = arith.addf %276, %277 : vector<8x128xf32>
    %c0_91 = arith.constant 0 : index
    %c128_92 = arith.constant 128 : index
    %279 = vector.load %arg18[%c0_91, %c128_92] : memref<64x256xf32, #tpu.memory_space<vmem>>, vector<8x128xf32>
    %cst_93 = arith.constant dense<0.000000e+00> : vector<8x128xf32>
    %280 = tpu.matmul %273, %8, %cst_93 {dimension_numbers = #tpu.dot_dimension_numbers<[1], [0], [0], [1], [0, 0, 1, 1], [], []>} : vector<8x32xf32>, vector<32x128xf32>, vector<8x128xf32> -> vector<8x128xf32>
    %281 = arith.addf %279, %280 : vector<8x128xf32>
    %282 = arith.negf %278 : vector<8x128xf32>
    %283 = math.exp %282 : vector<8x128xf32>
    %cst_94 = arith.constant 1.000000e+00 : f32
    %284 = vector.broadcast %cst_94 : f32 to vector<8x128xf32>
    %285 = arith.addf %284, %283 : vector<8x128xf32>
    %286 = arith.divf %284, %285 : vector<8x128xf32>
    %287 = math.tanh %278 : vector<8x128xf32>
    %288 = vector.extract_strided_slice %286 {offsets = [0, 0], sizes = [8, 32], strides = [1, 1]} : vector<8x128xf32> to vector<8x32xf32>
    %289 = vector.extract_strided_slice %286 {offsets = [0, 32], sizes = [8, 32], strides = [1, 1]} : vector<8x128xf32> to vector<8x32xf32>
    %290 = vector.extract_strided_slice %287 {offsets = [0, 64], sizes = [8, 32], strides = [1, 1]} : vector<8x128xf32> to vector<8x32xf32>
    %291 = vector.extract_strided_slice %286 {offsets = [0, 96], sizes = [8, 32], strides = [1, 1]} : vector<8x128xf32> to vector<8x32xf32>
    %292 = arith.mulf %289, %256 : vector<8x32xf32>
    %293 = arith.mulf %288, %290 : vector<8x32xf32>
    %294 = arith.addf %292, %293 : vector<8x32xf32>
    %295 = math.tanh %294 : vector<8x32xf32>
    %296 = arith.mulf %291, %295 : vector<8x32xf32>
    %297 = arith.negf %281 : vector<8x128xf32>
    %298 = math.exp %297 : vector<8x128xf32>
    %cst_95 = arith.constant 1.000000e+00 : f32
    %299 = vector.broadcast %cst_95 : f32 to vector<8x128xf32>
    %300 = arith.addf %299, %298 : vector<8x128xf32>
    %301 = arith.divf %299, %300 : vector<8x128xf32>
    %302 = math.tanh %281 : vector<8x128xf32>
    %303 = vector.extract_strided_slice %301 {offsets = [0, 0], sizes = [8, 32], strides = [1, 1]} : vector<8x128xf32> to vector<8x32xf32>
    %304 = vector.extract_strided_slice %301 {offsets = [0, 32], sizes = [8, 32], strides = [1, 1]} : vector<8x128xf32> to vector<8x32xf32>
    %305 = vector.extract_strided_slice %302 {offsets = [0, 64], sizes = [8, 32], strides = [1, 1]} : vector<8x128xf32> to vector<8x32xf32>
    %306 = vector.extract_strided_slice %301 {offsets = [0, 96], sizes = [8, 32], strides = [1, 1]} : vector<8x128xf32> to vector<8x32xf32>
    %307 = arith.mulf %304, %271 : vector<8x32xf32>
    %308 = arith.mulf %303, %305 : vector<8x32xf32>
    %309 = arith.addf %307, %308 : vector<8x32xf32>
    %310 = math.tanh %309 : vector<8x32xf32>
    %311 = arith.mulf %306, %310 : vector<8x32xf32>
    %c56_96 = arith.constant 56 : index
    %c0_97 = arith.constant 0 : index
    %312 = vector.load %arg19[%c56_96, %c0_97] : memref<64x32xf32, #tpu.memory_space<vmem>>, vector<8x32xf32>
    tpu.vector_store %arg19[%c56_96, %c0_97], %296 {strides = array<i32>} : memref<64x32xf32, #tpu.memory_space<vmem>>, vector<8x32xf32>,
    %c0_98 = arith.constant 0 : index
    %c0_99 = arith.constant 0 : index
    %313 = vector.load %arg20[%c0_98, %c0_99] : memref<64x32xf32, #tpu.memory_space<vmem>>, vector<8x32xf32>
    tpu.vector_store %arg20[%c0_98, %c0_99], %311 {strides = array<i32>} : memref<64x32xf32, #tpu.memory_space<vmem>>, vector<8x32xf32>,
    %c0_100 = arith.constant 0 : index
    %c0_101 = arith.constant 0 : index
    %314 = vector.load %arg19[%c0_100, %c0_101] : memref<64x32xf32, #tpu.memory_space<vmem>>, vector<64x32xf32>
    %c0_102 = arith.constant 0 : index
    %c0_103 = arith.constant 0 : index
    %315 = vector.load %arg5[%c0_102, %c0_103] : memref<64x256xf32, #tpu.memory_space<vmem>>, vector<32x256xf32>
    %cst_104 = arith.constant dense<0.000000e+00> : vector<64x256xf32>
    %316 = tpu.matmul %314, %315, %cst_104 {dimension_numbers = #tpu.dot_dimension_numbers<[1], [0], [0], [1], [0, 0, 1, 1], [], []>} : vector<64x32xf32>, vector<32x256xf32>, vector<64x256xf32> -> vector<64x256xf32>
    %c0_105 = arith.constant 0 : index
    %c0_106 = arith.constant 0 : index
    %317 = vector.load %arg20[%c0_105, %c0_106] : memref<64x32xf32, #tpu.memory_space<vmem>>, vector<64x32xf32>
    %c32_107 = arith.constant 32 : index
    %c0_108 = arith.constant 0 : index
    %318 = vector.load %arg5[%c32_107, %c0_108] : memref<64x256xf32, #tpu.memory_space<vmem>>, vector<32x256xf32>
    %cst_109 = arith.constant dense<0.000000e+00> : vector<64x256xf32>
    %319 = tpu.matmul %317, %318, %cst_109 {dimension_numbers = #tpu.dot_dimension_numbers<[1], [0], [0], [1], [0, 0, 1, 1], [], []>} : vector<64x32xf32>, vector<32x256xf32>, vector<64x256xf32> -> vector<64x256xf32>
    %320 = arith.addf %316, %319 : vector<64x256xf32>
    %c0_110 = arith.constant 0 : index
    %c0_111 = arith.constant 0 : index
    %321 = vector.load %arg8[%c0_110, %c0_111] : memref<1x256xf32, #tpu.memory_space<vmem>>, vector<1x256xf32>
    %322 = vector.broadcast %321 : vector<1x256xf32> to vector<64x256xf32>
    %323 = arith.addf %320, %322 : vector<64x256xf32>
    %c0_112 = arith.constant 0 : index
    %c0_113 = arith.constant 0 : index
    %324 = vector.load %arg18[%c0_112, %c0_113] : memref<64x256xf32, #tpu.memory_space<vmem>>, vector<64x256xf32>
    tpu.vector_store %arg18[%c0_112, %c0_113], %323 {strides = array<i32>} : memref<64x256xf32, #tpu.memory_space<vmem>>, vector<64x256xf32>,
    %c0_114 = arith.constant 0 : index
    %c0_115 = arith.constant 0 : index
    %325 = vector.load %arg6[%c0_114, %c0_115] : memref<32x128xf32, #tpu.memory_space<vmem>>, vector<32x128xf32>
    %c0_116 = arith.constant 0 : index
    %c0_117 = arith.constant 0 : index
    %326 = vector.load %arg7[%c0_116, %c0_117] : memref<32x128xf32, #tpu.memory_space<vmem>>, vector<32x128xf32>
    %cst_118 = arith.constant 0.000000e+00 : f32
    %327 = vector.broadcast %cst_118 : f32 to vector<8x32xf32>
    %c0_119 = arith.constant 0 : index
    %c0_120 = arith.constant 0 : index
    %328 = vector.load %arg18[%c0_119, %c0_120] : memref<64x256xf32, #tpu.memory_space<vmem>>, vector<8x128xf32>
    %cst_121 = arith.constant dense<0.000000e+00> : vector<8x128xf32>
    %329 = tpu.matmul %327, %325, %cst_121 {dimension_numbers = #tpu.dot_dimension_numbers<[1], [0], [0], [1], [0, 0, 1, 1], [], []>} : vector<8x32xf32>, vector<32x128xf32>, vector<8x128xf32> -> vector<8x128xf32>
    %330 = arith.addf %328, %329 : vector<8x128xf32>
    %c56_122 = arith.constant 56 : index
    %c128_123 = arith.constant 128 : index
    %331 = vector.load %arg18[%c56_122, %c128_123] : memref<64x256xf32, #tpu.memory_space<vmem>>, vector<8x128xf32>
    %cst_124 = arith.constant dense<0.000000e+00> : vector<8x128xf32>
    %332 = tpu.matmul %327, %326, %cst_124 {dimension_numbers = #tpu.dot_dimension_numbers<[1], [0], [0], [1], [0, 0, 1, 1], [], []>} : vector<8x32xf32>, vector<32x128xf32>, vector<8x128xf32> -> vector<8x128xf32>
    %333 = arith.addf %331, %332 : vector<8x128xf32>
    %334 = arith.negf %330 : vector<8x128xf32>
    %335 = math.exp %334 : vector<8x128xf32>
    %cst_125 = arith.constant 1.000000e+00 : f32
    %336 = vector.broadcast %cst_125 : f32 to vector<8x128xf32>
    %337 = arith.addf %336, %335 : vector<8x128xf32>
    %338 = arith.divf %336, %337 : vector<8x128xf32>
    %339 = math.tanh %330 : vector<8x128xf32>
    %340 = vector.extract_strided_slice %338 {offsets = [0, 0], sizes = [8, 32], strides = [1, 1]} : vector<8x128xf32> to vector<8x32xf32>
    %341 = vector.extract_strided_slice %338 {offsets = [0, 32], sizes = [8, 32], strides = [1, 1]} : vector<8x128xf32> to vector<8x32xf32>
    %342 = vector.extract_strided_slice %339 {offsets = [0, 64], sizes = [8, 32], strides = [1, 1]} : vector<8x128xf32> to vector<8x32xf32>
    %343 = vector.extract_strided_slice %338 {offsets = [0, 96], sizes = [8, 32], strides = [1, 1]} : vector<8x128xf32> to vector<8x32xf32>
    %344 = arith.mulf %341, %327 : vector<8x32xf32>
    %345 = arith.mulf %340, %342 : vector<8x32xf32>
    %346 = arith.addf %344, %345 : vector<8x32xf32>
    %347 = math.tanh %346 : vector<8x32xf32>
    %348 = arith.mulf %343, %347 : vector<8x32xf32>
    %349 = arith.negf %333 : vector<8x128xf32>
    %350 = math.exp %349 : vector<8x128xf32>
    %cst_126 = arith.constant 1.000000e+00 : f32
    %351 = vector.broadcast %cst_126 : f32 to vector<8x128xf32>
    %352 = arith.addf %351, %350 : vector<8x128xf32>
    %353 = arith.divf %351, %352 : vector<8x128xf32>
    %354 = math.tanh %333 : vector<8x128xf32>
    %355 = vector.extract_strided_slice %353 {offsets = [0, 0], sizes = [8, 32], strides = [1, 1]} : vector<8x128xf32> to vector<8x32xf32>
    %356 = vector.extract_strided_slice %353 {offsets = [0, 32], sizes = [8, 32], strides = [1, 1]} : vector<8x128xf32> to vector<8x32xf32>
    %357 = vector.extract_strided_slice %354 {offsets = [0, 64], sizes = [8, 32], strides = [1, 1]} : vector<8x128xf32> to vector<8x32xf32>
    %358 = vector.extract_strided_slice %353 {offsets = [0, 96], sizes = [8, 32], strides = [1, 1]} : vector<8x128xf32> to vector<8x32xf32>
    %359 = arith.mulf %356, %327 : vector<8x32xf32>
    %360 = arith.mulf %355, %357 : vector<8x32xf32>
    %361 = arith.addf %359, %360 : vector<8x32xf32>
    %362 = math.tanh %361 : vector<8x32xf32>
    %363 = arith.mulf %358, %362 : vector<8x32xf32>
    %c0_127 = arith.constant 0 : index
    %c0_128 = arith.constant 0 : index
    %364 = vector.load %arg19[%c0_127, %c0_128] : memref<64x32xf32, #tpu.memory_space<vmem>>, vector<8x32xf32>
    tpu.vector_store %arg19[%c0_127, %c0_128], %348 {strides = array<i32>} : memref<64x32xf32, #tpu.memory_space<vmem>>, vector<8x32xf32>,
    %c56_129 = arith.constant 56 : index
    %c0_130 = arith.constant 0 : index
    %365 = vector.load %arg20[%c56_129, %c0_130] : memref<64x32xf32, #tpu.memory_space<vmem>>, vector<8x32xf32>
    tpu.vector_store %arg20[%c56_129, %c0_130], %363 {strides = array<i32>} : memref<64x32xf32, #tpu.memory_space<vmem>>, vector<8x32xf32>,
    %c8_131 = arith.constant 8 : index
    %c0_132 = arith.constant 0 : index
    %366 = vector.load %arg18[%c8_131, %c0_132] : memref<64x256xf32, #tpu.memory_space<vmem>>, vector<8x128xf32>
    %cst_133 = arith.constant dense<0.000000e+00> : vector<8x128xf32>
    %367 = tpu.matmul %348, %325, %cst_133 {dimension_numbers = #tpu.dot_dimension_numbers<[1], [0], [0], [1], [0, 0, 1, 1], [], []>} : vector<8x32xf32>, vector<32x128xf32>, vector<8x128xf32> -> vector<8x128xf32>
    %368 = arith.addf %366, %367 : vector<8x128xf32>
    %c48_134 = arith.constant 48 : index
    %c128_135 = arith.constant 128 : index
    %369 = vector.load %arg18[%c48_134, %c128_135] : memref<64x256xf32, #tpu.memory_space<vmem>>, vector<8x128xf32>
    %cst_136 = arith.constant dense<0.000000e+00> : vector<8x128xf32>
    %370 = tpu.matmul %363, %326, %cst_136 {dimension_numbers = #tpu.dot_dimension_numbers<[1], [0], [0], [1], [0, 0, 1, 1], [], []>} : vector<8x32xf32>, vector<32x128xf32>, vector<8x128xf32> -> vector<8x128xf32>
    %371 = arith.addf %369, %370 : vector<8x128xf32>
    %372 = arith.negf %368 : vector<8x128xf32>
    %373 = math.exp %372 : vector<8x128xf32>
    %cst_137 = arith.constant 1.000000e+00 : f32
    %374 = vector.broadcast %cst_137 : f32 to vector<8x128xf32>
    %375 = arith.addf %374, %373 : vector<8x128xf32>
    %376 = arith.divf %374, %375 : vector<8x128xf32>
    %377 = math.tanh %368 : vector<8x128xf32>
    %378 = vector.extract_strided_slice %376 {offsets = [0, 0], sizes = [8, 32], strides = [1, 1]} : vector<8x128xf32> to vector<8x32xf32>
    %379 = vector.extract_strided_slice %376 {offsets = [0, 32], sizes = [8, 32], strides = [1, 1]} : vector<8x128xf32> to vector<8x32xf32>
    %380 = vector.extract_strided_slice %377 {offsets = [0, 64], sizes = [8, 32], strides = [1, 1]} : vector<8x128xf32> to vector<8x32xf32>
    %381 = vector.extract_strided_slice %376 {offsets = [0, 96], sizes = [8, 32], strides = [1, 1]} : vector<8x128xf32> to vector<8x32xf32>
    %382 = arith.mulf %379, %346 : vector<8x32xf32>
    %383 = arith.mulf %378, %380 : vector<8x32xf32>
    %384 = arith.addf %382, %383 : vector<8x32xf32>
    %385 = math.tanh %384 : vector<8x32xf32>
    %386 = arith.mulf %381, %385 : vector<8x32xf32>
    %387 = arith.negf %371 : vector<8x128xf32>
    %388 = math.exp %387 : vector<8x128xf32>
    %cst_138 = arith.constant 1.000000e+00 : f32
    %389 = vector.broadcast %cst_138 : f32 to vector<8x128xf32>
    %390 = arith.addf %389, %388 : vector<8x128xf32>
    %391 = arith.divf %389, %390 : vector<8x128xf32>
    %392 = math.tanh %371 : vector<8x128xf32>
    %393 = vector.extract_strided_slice %391 {offsets = [0, 0], sizes = [8, 32], strides = [1, 1]} : vector<8x128xf32> to vector<8x32xf32>
    %394 = vector.extract_strided_slice %391 {offsets = [0, 32], sizes = [8, 32], strides = [1, 1]} : vector<8x128xf32> to vector<8x32xf32>
    %395 = vector.extract_strided_slice %392 {offsets = [0, 64], sizes = [8, 32], strides = [1, 1]} : vector<8x128xf32> to vector<8x32xf32>
    %396 = vector.extract_strided_slice %391 {offsets = [0, 96], sizes = [8, 32], strides = [1, 1]} : vector<8x128xf32> to vector<8x32xf32>
    %397 = arith.mulf %394, %361 : vector<8x32xf32>
    %398 = arith.mulf %393, %395 : vector<8x32xf32>
    %399 = arith.addf %397, %398 : vector<8x32xf32>
    %400 = math.tanh %399 : vector<8x32xf32>
    %401 = arith.mulf %396, %400 : vector<8x32xf32>
    %c8_139 = arith.constant 8 : index
    %c0_140 = arith.constant 0 : index
    %402 = vector.load %arg19[%c8_139, %c0_140] : memref<64x32xf32, #tpu.memory_space<vmem>>, vector<8x32xf32>
    tpu.vector_store %arg19[%c8_139, %c0_140], %386 {strides = array<i32>} : memref<64x32xf32, #tpu.memory_space<vmem>>, vector<8x32xf32>,
    %c48_141 = arith.constant 48 : index
    %c0_142 = arith.constant 0 : index
    %403 = vector.load %arg20[%c48_141, %c0_142] : memref<64x32xf32, #tpu.memory_space<vmem>>, vector<8x32xf32>
    tpu.vector_store %arg20[%c48_141, %c0_142], %401 {strides = array<i32>} : memref<64x32xf32, #tpu.memory_space<vmem>>, vector<8x32xf32>,
    %c16_143 = arith.constant 16 : index
    %c0_144 = arith.constant 0 : index
    %404 = vector.load %arg18[%c16_143, %c0_144] : memref<64x256xf32, #tpu.memory_space<vmem>>, vector<8x128xf32>
    %cst_145 = arith.constant dense<0.000000e+00> : vector<8x128xf32>
    %405 = tpu.matmul %386, %325, %cst_145 {dimension_numbers = #tpu.dot_dimension_numbers<[1], [0], [0], [1], [0, 0, 1, 1], [], []>} : vector<8x32xf32>, vector<32x128xf32>, vector<8x128xf32> -> vector<8x128xf32>
    %406 = arith.addf %404, %405 : vector<8x128xf32>
    %c40_146 = arith.constant 40 : index
    %c128_147 = arith.constant 128 : index
    %407 = vector.load %arg18[%c40_146, %c128_147] : memref<64x256xf32, #tpu.memory_space<vmem>>, vector<8x128xf32>
    %cst_148 = arith.constant dense<0.000000e+00> : vector<8x128xf32>
    %408 = tpu.matmul %401, %326, %cst_148 {dimension_numbers = #tpu.dot_dimension_numbers<[1], [0], [0], [1], [0, 0, 1, 1], [], []>} : vector<8x32xf32>, vector<32x128xf32>, vector<8x128xf32> -> vector<8x128xf32>
    %409 = arith.addf %407, %408 : vector<8x128xf32>
    %410 = arith.negf %406 : vector<8x128xf32>
    %411 = math.exp %410 : vector<8x128xf32>
    %cst_149 = arith.constant 1.000000e+00 : f32
    %412 = vector.broadcast %cst_149 : f32 to vector<8x128xf32>
    %413 = arith.addf %412, %411 : vector<8x128xf32>
    %414 = arith.divf %412, %413 : vector<8x128xf32>
    %415 = math.tanh %406 : vector<8x128xf32>
    %416 = vector.extract_strided_slice %414 {offsets = [0, 0], sizes = [8, 32], strides = [1, 1]} : vector<8x128xf32> to vector<8x32xf32>
    %417 = vector.extract_strided_slice %414 {offsets = [0, 32], sizes = [8, 32], strides = [1, 1]} : vector<8x128xf32> to vector<8x32xf32>
    %418 = vector.extract_strided_slice %415 {offsets = [0, 64], sizes = [8, 32], strides = [1, 1]} : vector<8x128xf32> to vector<8x32xf32>
    %419 = vector.extract_strided_slice %414 {offsets = [0, 96], sizes = [8, 32], strides = [1, 1]} : vector<8x128xf32> to vector<8x32xf32>
    %420 = arith.mulf %417, %384 : vector<8x32xf32>
    %421 = arith.mulf %416, %418 : vector<8x32xf32>
    %422 = arith.addf %420, %421 : vector<8x32xf32>
    %423 = math.tanh %422 : vector<8x32xf32>
    %424 = arith.mulf %419, %423 : vector<8x32xf32>
    %425 = arith.negf %409 : vector<8x128xf32>
    %426 = math.exp %425 : vector<8x128xf32>
    %cst_150 = arith.constant 1.000000e+00 : f32
    %427 = vector.broadcast %cst_150 : f32 to vector<8x128xf32>
    %428 = arith.addf %427, %426 : vector<8x128xf32>
    %429 = arith.divf %427, %428 : vector<8x128xf32>
    %430 = math.tanh %409 : vector<8x128xf32>
    %431 = vector.extract_strided_slice %429 {offsets = [0, 0], sizes = [8, 32], strides = [1, 1]} : vector<8x128xf32> to vector<8x32xf32>
    %432 = vector.extract_strided_slice %429 {offsets = [0, 32], sizes = [8, 32], strides = [1, 1]} : vector<8x128xf32> to vector<8x32xf32>
    %433 = vector.extract_strided_slice %430 {offsets = [0, 64], sizes = [8, 32], strides = [1, 1]} : vector<8x128xf32> to vector<8x32xf32>
    %434 = vector.extract_strided_slice %429 {offsets = [0, 96], sizes = [8, 32], strides = [1, 1]} : vector<8x128xf32> to vector<8x32xf32>
    %435 = arith.mulf %432, %399 : vector<8x32xf32>
    %436 = arith.mulf %431, %433 : vector<8x32xf32>
    %437 = arith.addf %435, %436 : vector<8x32xf32>
    %438 = math.tanh %437 : vector<8x32xf32>
    %439 = arith.mulf %434, %438 : vector<8x32xf32>
    %c16_151 = arith.constant 16 : index
    %c0_152 = arith.constant 0 : index
    %440 = vector.load %arg19[%c16_151, %c0_152] : memref<64x32xf32, #tpu.memory_space<vmem>>, vector<8x32xf32>
    tpu.vector_store %arg19[%c16_151, %c0_152], %424 {strides = array<i32>} : memref<64x32xf32, #tpu.memory_space<vmem>>, vector<8x32xf32>,
    %c40_153 = arith.constant 40 : index
    %c0_154 = arith.constant 0 : index
    %441 = vector.load %arg20[%c40_153, %c0_154] : memref<64x32xf32, #tpu.memory_space<vmem>>, vector<8x32xf32>
    tpu.vector_store %arg20[%c40_153, %c0_154], %439 {strides = array<i32>} : memref<64x32xf32, #tpu.memory_space<vmem>>, vector<8x32xf32>,
    %c24_155 = arith.constant 24 : index
    %c0_156 = arith.constant 0 : index
    %442 = vector.load %arg18[%c24_155, %c0_156] : memref<64x256xf32, #tpu.memory_space<vmem>>, vector<8x128xf32>
    %cst_157 = arith.constant dense<0.000000e+00> : vector<8x128xf32>
    %443 = tpu.matmul %424, %325, %cst_157 {dimension_numbers = #tpu.dot_dimension_numbers<[1], [0], [0], [1], [0, 0, 1, 1], [], []>} : vector<8x32xf32>, vector<32x128xf32>, vector<8x128xf32> -> vector<8x128xf32>
    %444 = arith.addf %442, %443 : vector<8x128xf32>
    %c32_158 = arith.constant 32 : index
    %c128_159 = arith.constant 128 : index
    %445 = vector.load %arg18[%c32_158, %c128_159] : memref<64x256xf32, #tpu.memory_space<vmem>>, vector<8x128xf32>
    %cst_160 = arith.constant dense<0.000000e+00> : vector<8x128xf32>
    %446 = tpu.matmul %439, %326, %cst_160 {dimension_numbers = #tpu.dot_dimension_numbers<[1], [0], [0], [1], [0, 0, 1, 1], [], []>} : vector<8x32xf32>, vector<32x128xf32>, vector<8x128xf32> -> vector<8x128xf32>
    %447 = arith.addf %445, %446 : vector<8x128xf32>
    %448 = arith.negf %444 : vector<8x128xf32>
    %449 = math.exp %448 : vector<8x128xf32>
    %cst_161 = arith.constant 1.000000e+00 : f32
    %450 = vector.broadcast %cst_161 : f32 to vector<8x128xf32>
    %451 = arith.addf %450, %449 : vector<8x128xf32>
    %452 = arith.divf %450, %451 : vector<8x128xf32>
    %453 = math.tanh %444 : vector<8x128xf32>
    %454 = vector.extract_strided_slice %452 {offsets = [0, 0], sizes = [8, 32], strides = [1, 1]} : vector<8x128xf32> to vector<8x32xf32>
    %455 = vector.extract_strided_slice %452 {offsets = [0, 32], sizes = [8, 32], strides = [1, 1]} : vector<8x128xf32> to vector<8x32xf32>
    %456 = vector.extract_strided_slice %453 {offsets = [0, 64], sizes = [8, 32], strides = [1, 1]} : vector<8x128xf32> to vector<8x32xf32>
    %457 = vector.extract_strided_slice %452 {offsets = [0, 96], sizes = [8, 32], strides = [1, 1]} : vector<8x128xf32> to vector<8x32xf32>
    %458 = arith.mulf %455, %422 : vector<8x32xf32>
    %459 = arith.mulf %454, %456 : vector<8x32xf32>
    %460 = arith.addf %458, %459 : vector<8x32xf32>
    %461 = math.tanh %460 : vector<8x32xf32>
    %462 = arith.mulf %457, %461 : vector<8x32xf32>
    %463 = arith.negf %447 : vector<8x128xf32>
    %464 = math.exp %463 : vector<8x128xf32>
    %cst_162 = arith.constant 1.000000e+00 : f32
    %465 = vector.broadcast %cst_162 : f32 to vector<8x128xf32>
    %466 = arith.addf %465, %464 : vector<8x128xf32>
    %467 = arith.divf %465, %466 : vector<8x128xf32>
    %468 = math.tanh %447 : vector<8x128xf32>
    %469 = vector.extract_strided_slice %467 {offsets = [0, 0], sizes = [8, 32], strides = [1, 1]} : vector<8x128xf32> to vector<8x32xf32>
    %470 = vector.extract_strided_slice %467 {offsets = [0, 32], sizes = [8, 32], strides = [1, 1]} : vector<8x128xf32> to vector<8x32xf32>
    %471 = vector.extract_strided_slice %468 {offsets = [0, 64], sizes = [8, 32], strides = [1, 1]} : vector<8x128xf32> to vector<8x32xf32>
    %472 = vector.extract_strided_slice %467 {offsets = [0, 96], sizes = [8, 32], strides = [1, 1]} : vector<8x128xf32> to vector<8x32xf32>
    %473 = arith.mulf %470, %437 : vector<8x32xf32>
    %474 = arith.mulf %469, %471 : vector<8x32xf32>
    %475 = arith.addf %473, %474 : vector<8x32xf32>
    %476 = math.tanh %475 : vector<8x32xf32>
    %477 = arith.mulf %472, %476 : vector<8x32xf32>
    %c24_163 = arith.constant 24 : index
    %c0_164 = arith.constant 0 : index
    %478 = vector.load %arg19[%c24_163, %c0_164] : memref<64x32xf32, #tpu.memory_space<vmem>>, vector<8x32xf32>
    tpu.vector_store %arg19[%c24_163, %c0_164], %462 {strides = array<i32>} : memref<64x32xf32, #tpu.memory_space<vmem>>, vector<8x32xf32>,
    %c32_165 = arith.constant 32 : index
    %c0_166 = arith.constant 0 : index
    %479 = vector.load %arg20[%c32_165, %c0_166] : memref<64x32xf32, #tpu.memory_space<vmem>>, vector<8x32xf32>
    tpu.vector_store %arg20[%c32_165, %c0_166], %477 {strides = array<i32>} : memref<64x32xf32, #tpu.memory_space<vmem>>, vector<8x32xf32>,
    %c32_167 = arith.constant 32 : index
    %c0_168 = arith.constant 0 : index
    %480 = vector.load %arg18[%c32_167, %c0_168] : memref<64x256xf32, #tpu.memory_space<vmem>>, vector<8x128xf32>
    %cst_169 = arith.constant dense<0.000000e+00> : vector<8x128xf32>
    %481 = tpu.matmul %462, %325, %cst_169 {dimension_numbers = #tpu.dot_dimension_numbers<[1], [0], [0], [1], [0, 0, 1, 1], [], []>} : vector<8x32xf32>, vector<32x128xf32>, vector<8x128xf32> -> vector<8x128xf32>
    %482 = arith.addf %480, %481 : vector<8x128xf32>
    %c24_170 = arith.constant 24 : index
    %c128_171 = arith.constant 128 : index
    %483 = vector.load %arg18[%c24_170, %c128_171] : memref<64x256xf32, #tpu.memory_space<vmem>>, vector<8x128xf32>
    %cst_172 = arith.constant dense<0.000000e+00> : vector<8x128xf32>
    %484 = tpu.matmul %477, %326, %cst_172 {dimension_numbers = #tpu.dot_dimension_numbers<[1], [0], [0], [1], [0, 0, 1, 1], [], []>} : vector<8x32xf32>, vector<32x128xf32>, vector<8x128xf32> -> vector<8x128xf32>
    %485 = arith.addf %483, %484 : vector<8x128xf32>
    %486 = arith.negf %482 : vector<8x128xf32>
    %487 = math.exp %486 : vector<8x128xf32>
    %cst_173 = arith.constant 1.000000e+00 : f32
    %488 = vector.broadcast %cst_173 : f32 to vector<8x128xf32>
    %489 = arith.addf %488, %487 : vector<8x128xf32>
    %490 = arith.divf %488, %489 : vector<8x128xf32>
    %491 = math.tanh %482 : vector<8x128xf32>
    %492 = vector.extract_strided_slice %490 {offsets = [0, 0], sizes = [8, 32], strides = [1, 1]} : vector<8x128xf32> to vector<8x32xf32>
    %493 = vector.extract_strided_slice %490 {offsets = [0, 32], sizes = [8, 32], strides = [1, 1]} : vector<8x128xf32> to vector<8x32xf32>
    %494 = vector.extract_strided_slice %491 {offsets = [0, 64], sizes = [8, 32], strides = [1, 1]} : vector<8x128xf32> to vector<8x32xf32>
    %495 = vector.extract_strided_slice %490 {offsets = [0, 96], sizes = [8, 32], strides = [1, 1]} : vector<8x128xf32> to vector<8x32xf32>
    %496 = arith.mulf %493, %460 : vector<8x32xf32>
    %497 = arith.mulf %492, %494 : vector<8x32xf32>
    %498 = arith.addf %496, %497 : vector<8x32xf32>
    %499 = math.tanh %498 : vector<8x32xf32>
    %500 = arith.mulf %495, %499 : vector<8x32xf32>
    %501 = arith.negf %485 : vector<8x128xf32>
    %502 = math.exp %501 : vector<8x128xf32>
    %cst_174 = arith.constant 1.000000e+00 : f32
    %503 = vector.broadcast %cst_174 : f32 to vector<8x128xf32>
    %504 = arith.addf %503, %502 : vector<8x128xf32>
    %505 = arith.divf %503, %504 : vector<8x128xf32>
    %506 = math.tanh %485 : vector<8x128xf32>
    %507 = vector.extract_strided_slice %505 {offsets = [0, 0], sizes = [8, 32], strides = [1, 1]} : vector<8x128xf32> to vector<8x32xf32>
    %508 = vector.extract_strided_slice %505 {offsets = [0, 32], sizes = [8, 32], strides = [1, 1]} : vector<8x128xf32> to vector<8x32xf32>
    %509 = vector.extract_strided_slice %506 {offsets = [0, 64], sizes = [8, 32], strides = [1, 1]} : vector<8x128xf32> to vector<8x32xf32>
    %510 = vector.extract_strided_slice %505 {offsets = [0, 96], sizes = [8, 32], strides = [1, 1]} : vector<8x128xf32> to vector<8x32xf32>
    %511 = arith.mulf %508, %475 : vector<8x32xf32>
    %512 = arith.mulf %507, %509 : vector<8x32xf32>
    %513 = arith.addf %511, %512 : vector<8x32xf32>
    %514 = math.tanh %513 : vector<8x32xf32>
    %515 = arith.mulf %510, %514 : vector<8x32xf32>
    %c32_175 = arith.constant 32 : index
    %c0_176 = arith.constant 0 : index
    %516 = vector.load %arg19[%c32_175, %c0_176] : memref<64x32xf32, #tpu.memory_space<vmem>>, vector<8x32xf32>
    tpu.vector_store %arg19[%c32_175, %c0_176], %500 {strides = array<i32>} : memref<64x32xf32, #tpu.memory_space<vmem>>, vector<8x32xf32>,
    %c24_177 = arith.constant 24 : index
    %c0_178 = arith.constant 0 : index
    %517 = vector.load %arg20[%c24_177, %c0_178] : memref<64x32xf32, #tpu.memory_space<vmem>>, vector<8x32xf32>
    tpu.vector_store %arg20[%c24_177, %c0_178], %515 {strides = array<i32>} : memref<64x32xf32, #tpu.memory_space<vmem>>, vector<8x32xf32>,
    %c40_179 = arith.constant 40 : index
    %c0_180 = arith.constant 0 : index
    %518 = vector.load %arg18[%c40_179, %c0_180] : memref<64x256xf32, #tpu.memory_space<vmem>>, vector<8x128xf32>
    %cst_181 = arith.constant dense<0.000000e+00> : vector<8x128xf32>
    %519 = tpu.matmul %500, %325, %cst_181 {dimension_numbers = #tpu.dot_dimension_numbers<[1], [0], [0], [1], [0, 0, 1, 1], [], []>} : vector<8x32xf32>, vector<32x128xf32>, vector<8x128xf32> -> vector<8x128xf32>
    %520 = arith.addf %518, %519 : vector<8x128xf32>
    %c16_182 = arith.constant 16 : index
    %c128_183 = arith.constant 128 : index
    %521 = vector.load %arg18[%c16_182, %c128_183] : memref<64x256xf32, #tpu.memory_space<vmem>>, vector<8x128xf32>
    %cst_184 = arith.constant dense<0.000000e+00> : vector<8x128xf32>
    %522 = tpu.matmul %515, %326, %cst_184 {dimension_numbers = #tpu.dot_dimension_numbers<[1], [0], [0], [1], [0, 0, 1, 1], [], []>} : vector<8x32xf32>, vector<32x128xf32>, vector<8x128xf32> -> vector<8x128xf32>
    %523 = arith.addf %521, %522 : vector<8x128xf32>
    %524 = arith.negf %520 : vector<8x128xf32>
    %525 = math.exp %524 : vector<8x128xf32>
    %cst_185 = arith.constant 1.000000e+00 : f32
    %526 = vector.broadcast %cst_185 : f32 to vector<8x128xf32>
    %527 = arith.addf %526, %525 : vector<8x128xf32>
    %528 = arith.divf %526, %527 : vector<8x128xf32>
    %529 = math.tanh %520 : vector<8x128xf32>
    %530 = vector.extract_strided_slice %528 {offsets = [0, 0], sizes = [8, 32], strides = [1, 1]} : vector<8x128xf32> to vector<8x32xf32>
    %531 = vector.extract_strided_slice %528 {offsets = [0, 32], sizes = [8, 32], strides = [1, 1]} : vector<8x128xf32> to vector<8x32xf32>
    %532 = vector.extract_strided_slice %529 {offsets = [0, 64], sizes = [8, 32], strides = [1, 1]} : vector<8x128xf32> to vector<8x32xf32>
    %533 = vector.extract_strided_slice %528 {offsets = [0, 96], sizes = [8, 32], strides = [1, 1]} : vector<8x128xf32> to vector<8x32xf32>
    %534 = arith.mulf %531, %498 : vector<8x32xf32>
    %535 = arith.mulf %530, %532 : vector<8x32xf32>
    %536 = arith.addf %534, %535 : vector<8x32xf32>
    %537 = math.tanh %536 : vector<8x32xf32>
    %538 = arith.mulf %533, %537 : vector<8x32xf32>
    %539 = arith.negf %523 : vector<8x128xf32>
    %540 = math.exp %539 : vector<8x128xf32>
    %cst_186 = arith.constant 1.000000e+00 : f32
    %541 = vector.broadcast %cst_186 : f32 to vector<8x128xf32>
    %542 = arith.addf %541, %540 : vector<8x128xf32>
    %543 = arith.divf %541, %542 : vector<8x128xf32>
    %544 = math.tanh %523 : vector<8x128xf32>
    %545 = vector.extract_strided_slice %543 {offsets = [0, 0], sizes = [8, 32], strides = [1, 1]} : vector<8x128xf32> to vector<8x32xf32>
    %546 = vector.extract_strided_slice %543 {offsets = [0, 32], sizes = [8, 32], strides = [1, 1]} : vector<8x128xf32> to vector<8x32xf32>
    %547 = vector.extract_strided_slice %544 {offsets = [0, 64], sizes = [8, 32], strides = [1, 1]} : vector<8x128xf32> to vector<8x32xf32>
    %548 = vector.extract_strided_slice %543 {offsets = [0, 96], sizes = [8, 32], strides = [1, 1]} : vector<8x128xf32> to vector<8x32xf32>
    %549 = arith.mulf %546, %513 : vector<8x32xf32>
    %550 = arith.mulf %545, %547 : vector<8x32xf32>
    %551 = arith.addf %549, %550 : vector<8x32xf32>
    %552 = math.tanh %551 : vector<8x32xf32>
    %553 = arith.mulf %548, %552 : vector<8x32xf32>
    %c40_187 = arith.constant 40 : index
    %c0_188 = arith.constant 0 : index
    %554 = vector.load %arg19[%c40_187, %c0_188] : memref<64x32xf32, #tpu.memory_space<vmem>>, vector<8x32xf32>
    tpu.vector_store %arg19[%c40_187, %c0_188], %538 {strides = array<i32>} : memref<64x32xf32, #tpu.memory_space<vmem>>, vector<8x32xf32>,
    %c16_189 = arith.constant 16 : index
    %c0_190 = arith.constant 0 : index
    %555 = vector.load %arg20[%c16_189, %c0_190] : memref<64x32xf32, #tpu.memory_space<vmem>>, vector<8x32xf32>
    tpu.vector_store %arg20[%c16_189, %c0_190], %553 {strides = array<i32>} : memref<64x32xf32, #tpu.memory_space<vmem>>, vector<8x32xf32>,
    %c48_191 = arith.constant 48 : index
    %c0_192 = arith.constant 0 : index
    %556 = vector.load %arg18[%c48_191, %c0_192] : memref<64x256xf32, #tpu.memory_space<vmem>>, vector<8x128xf32>
    %cst_193 = arith.constant dense<0.000000e+00> : vector<8x128xf32>
    %557 = tpu.matmul %538, %325, %cst_193 {dimension_numbers = #tpu.dot_dimension_numbers<[1], [0], [0], [1], [0, 0, 1, 1], [], []>} : vector<8x32xf32>, vector<32x128xf32>, vector<8x128xf32> -> vector<8x128xf32>
    %558 = arith.addf %556, %557 : vector<8x128xf32>
    %c8_194 = arith.constant 8 : index
    %c128_195 = arith.constant 128 : index
    %559 = vector.load %arg18[%c8_194, %c128_195] : memref<64x256xf32, #tpu.memory_space<vmem>>, vector<8x128xf32>
    %cst_196 = arith.constant dense<0.000000e+00> : vector<8x128xf32>
    %560 = tpu.matmul %553, %326, %cst_196 {dimension_numbers = #tpu.dot_dimension_numbers<[1], [0], [0], [1], [0, 0, 1, 1], [], []>} : vector<8x32xf32>, vector<32x128xf32>, vector<8x128xf32> -> vector<8x128xf32>
    %561 = arith.addf %559, %560 : vector<8x128xf32>
    %562 = arith.negf %558 : vector<8x128xf32>
    %563 = math.exp %562 : vector<8x128xf32>
    %cst_197 = arith.constant 1.000000e+00 : f32
    %564 = vector.broadcast %cst_197 : f32 to vector<8x128xf32>
    %565 = arith.addf %564, %563 : vector<8x128xf32>
    %566 = arith.divf %564, %565 : vector<8x128xf32>
    %567 = math.tanh %558 : vector<8x128xf32>
    %568 = vector.extract_strided_slice %566 {offsets = [0, 0], sizes = [8, 32], strides = [1, 1]} : vector<8x128xf32> to vector<8x32xf32>
    %569 = vector.extract_strided_slice %566 {offsets = [0, 32], sizes = [8, 32], strides = [1, 1]} : vector<8x128xf32> to vector<8x32xf32>
    %570 = vector.extract_strided_slice %567 {offsets = [0, 64], sizes = [8, 32], strides = [1, 1]} : vector<8x128xf32> to vector<8x32xf32>
    %571 = vector.extract_strided_slice %566 {offsets = [0, 96], sizes = [8, 32], strides = [1, 1]} : vector<8x128xf32> to vector<8x32xf32>
    %572 = arith.mulf %569, %536 : vector<8x32xf32>
    %573 = arith.mulf %568, %570 : vector<8x32xf32>
    %574 = arith.addf %572, %573 : vector<8x32xf32>
    %575 = math.tanh %574 : vector<8x32xf32>
    %576 = arith.mulf %571, %575 : vector<8x32xf32>
    %577 = arith.negf %561 : vector<8x128xf32>
    %578 = math.exp %577 : vector<8x128xf32>
    %cst_198 = arith.constant 1.000000e+00 : f32
    %579 = vector.broadcast %cst_198 : f32 to vector<8x128xf32>
    %580 = arith.addf %579, %578 : vector<8x128xf32>
    %581 = arith.divf %579, %580 : vector<8x128xf32>
    %582 = math.tanh %561 : vector<8x128xf32>
    %583 = vector.extract_strided_slice %581 {offsets = [0, 0], sizes = [8, 32], strides = [1, 1]} : vector<8x128xf32> to vector<8x32xf32>
    %584 = vector.extract_strided_slice %581 {offsets = [0, 32], sizes = [8, 32], strides = [1, 1]} : vector<8x128xf32> to vector<8x32xf32>
    %585 = vector.extract_strided_slice %582 {offsets = [0, 64], sizes = [8, 32], strides = [1, 1]} : vector<8x128xf32> to vector<8x32xf32>
    %586 = vector.extract_strided_slice %581 {offsets = [0, 96], sizes = [8, 32], strides = [1, 1]} : vector<8x128xf32> to vector<8x32xf32>
    %587 = arith.mulf %584, %551 : vector<8x32xf32>
    %588 = arith.mulf %583, %585 : vector<8x32xf32>
    %589 = arith.addf %587, %588 : vector<8x32xf32>
    %590 = math.tanh %589 : vector<8x32xf32>
    %591 = arith.mulf %586, %590 : vector<8x32xf32>
    %c48_199 = arith.constant 48 : index
    %c0_200 = arith.constant 0 : index
    %592 = vector.load %arg19[%c48_199, %c0_200] : memref<64x32xf32, #tpu.memory_space<vmem>>, vector<8x32xf32>
    tpu.vector_store %arg19[%c48_199, %c0_200], %576 {strides = array<i32>} : memref<64x32xf32, #tpu.memory_space<vmem>>, vector<8x32xf32>,
    %c8_201 = arith.constant 8 : index
    %c0_202 = arith.constant 0 : index
    %593 = vector.load %arg20[%c8_201, %c0_202] : memref<64x32xf32, #tpu.memory_space<vmem>>, vector<8x32xf32>
    tpu.vector_store %arg20[%c8_201, %c0_202], %591 {strides = array<i32>} : memref<64x32xf32, #tpu.memory_space<vmem>>, vector<8x32xf32>,
    %c56_203 = arith.constant 56 : index
    %c0_204 = arith.constant 0 : index
    %594 = vector.load %arg18[%c56_203, %c0_204] : memref<64x256xf32, #tpu.memory_space<vmem>>, vector<8x128xf32>
    %cst_205 = arith.constant dense<0.000000e+00> : vector<8x128xf32>
    %595 = tpu.matmul %576, %325, %cst_205 {dimension_numbers = #tpu.dot_dimension_numbers<[1], [0], [0], [1], [0, 0, 1, 1], [], []>} : vector<8x32xf32>, vector<32x128xf32>, vector<8x128xf32> -> vector<8x128xf32>
    %596 = arith.addf %594, %595 : vector<8x128xf32>
    %c0_206 = arith.constant 0 : index
    %c128_207 = arith.constant 128 : index
    %597 = vector.load %arg18[%c0_206, %c128_207] : memref<64x256xf32, #tpu.memory_space<vmem>>, vector<8x128xf32>
    %cst_208 = arith.constant dense<0.000000e+00> : vector<8x128xf32>
    %598 = tpu.matmul %591, %326, %cst_208 {dimension_numbers = #tpu.dot_dimension_numbers<[1], [0], [0], [1], [0, 0, 1, 1], [], []>} : vector<8x32xf32>, vector<32x128xf32>, vector<8x128xf32> -> vector<8x128xf32>
    %599 = arith.addf %597, %598 : vector<8x128xf32>
    %600 = arith.negf %596 : vector<8x128xf32>
    %601 = math.exp %600 : vector<8x128xf32>
    %cst_209 = arith.constant 1.000000e+00 : f32
    %602 = vector.broadcast %cst_209 : f32 to vector<8x128xf32>
    %603 = arith.addf %602, %601 : vector<8x128xf32>
    %604 = arith.divf %602, %603 : vector<8x128xf32>
    %605 = math.tanh %596 : vector<8x128xf32>
    %606 = vector.extract_strided_slice %604 {offsets = [0, 0], sizes = [8, 32], strides = [1, 1]} : vector<8x128xf32> to vector<8x32xf32>
    %607 = vector.extract_strided_slice %604 {offsets = [0, 32], sizes = [8, 32], strides = [1, 1]} : vector<8x128xf32> to vector<8x32xf32>
    %608 = vector.extract_strided_slice %605 {offsets = [0, 64], sizes = [8, 32], strides = [1, 1]} : vector<8x128xf32> to vector<8x32xf32>
    %609 = vector.extract_strided_slice %604 {offsets = [0, 96], sizes = [8, 32], strides = [1, 1]} : vector<8x128xf32> to vector<8x32xf32>
    %610 = arith.mulf %607, %574 : vector<8x32xf32>
    %611 = arith.mulf %606, %608 : vector<8x32xf32>
    %612 = arith.addf %610, %611 : vector<8x32xf32>
    %613 = math.tanh %612 : vector<8x32xf32>
    %614 = arith.mulf %609, %613 : vector<8x32xf32>
    %615 = arith.negf %599 : vector<8x128xf32>
    %616 = math.exp %615 : vector<8x128xf32>
    %cst_210 = arith.constant 1.000000e+00 : f32
    %617 = vector.broadcast %cst_210 : f32 to vector<8x128xf32>
    %618 = arith.addf %617, %616 : vector<8x128xf32>
    %619 = arith.divf %617, %618 : vector<8x128xf32>
    %620 = math.tanh %599 : vector<8x128xf32>
    %621 = vector.extract_strided_slice %619 {offsets = [0, 0], sizes = [8, 32], strides = [1, 1]} : vector<8x128xf32> to vector<8x32xf32>
    %622 = vector.extract_strided_slice %619 {offsets = [0, 32], sizes = [8, 32], strides = [1, 1]} : vector<8x128xf32> to vector<8x32xf32>
    %623 = vector.extract_strided_slice %620 {offsets = [0, 64], sizes = [8, 32], strides = [1, 1]} : vector<8x128xf32> to vector<8x32xf32>
    %624 = vector.extract_strided_slice %619 {offsets = [0, 96], sizes = [8, 32], strides = [1, 1]} : vector<8x128xf32> to vector<8x32xf32>
    %625 = arith.mulf %622, %589 : vector<8x32xf32>
    %626 = arith.mulf %621, %623 : vector<8x32xf32>
    %627 = arith.addf %625, %626 : vector<8x32xf32>
    %628 = math.tanh %627 : vector<8x32xf32>
    %629 = arith.mulf %624, %628 : vector<8x32xf32>
    %c56_211 = arith.constant 56 : index
    %c0_212 = arith.constant 0 : index
    %630 = vector.load %arg19[%c56_211, %c0_212] : memref<64x32xf32, #tpu.memory_space<vmem>>, vector<8x32xf32>
    tpu.vector_store %arg19[%c56_211, %c0_212], %614 {strides = array<i32>} : memref<64x32xf32, #tpu.memory_space<vmem>>, vector<8x32xf32>,
    %c0_213 = arith.constant 0 : index
    %c0_214 = arith.constant 0 : index
    %631 = vector.load %arg20[%c0_213, %c0_214] : memref<64x32xf32, #tpu.memory_space<vmem>>, vector<8x32xf32>
    tpu.vector_store %arg20[%c0_213, %c0_214], %629 {strides = array<i32>} : memref<64x32xf32, #tpu.memory_space<vmem>>, vector<8x32xf32>,
    %c0_215 = arith.constant 0 : index
    %c0_216 = arith.constant 0 : index
    %632 = vector.load %arg19[%c0_215, %c0_216] : memref<64x32xf32, #tpu.memory_space<vmem>>, vector<64x32xf32>
    %c0_217 = arith.constant 0 : index
    %c0_218 = arith.constant 0 : index
    %633 = vector.load %arg9[%c0_217, %c0_218] : memref<64x256xf32, #tpu.memory_space<vmem>>, vector<32x256xf32>
    %cst_219 = arith.constant dense<0.000000e+00> : vector<64x256xf32>
    %634 = tpu.matmul %632, %633, %cst_219 {dimension_numbers = #tpu.dot_dimension_numbers<[1], [0], [0], [1], [0, 0, 1, 1], [], []>} : vector<64x32xf32>, vector<32x256xf32>, vector<64x256xf32> -> vector<64x256xf32>
    %c0_220 = arith.constant 0 : index
    %c0_221 = arith.constant 0 : index
    %635 = vector.load %arg20[%c0_220, %c0_221] : memref<64x32xf32, #tpu.memory_space<vmem>>, vector<64x32xf32>
    %c32_222 = arith.constant 32 : index
    %c0_223 = arith.constant 0 : index
    %636 = vector.load %arg9[%c32_222, %c0_223] : memref<64x256xf32, #tpu.memory_space<vmem>>, vector<32x256xf32>
    %cst_224 = arith.constant dense<0.000000e+00> : vector<64x256xf32>
    %637 = tpu.matmul %635, %636, %cst_224 {dimension_numbers = #tpu.dot_dimension_numbers<[1], [0], [0], [1], [0, 0, 1, 1], [], []>} : vector<64x32xf32>, vector<32x256xf32>, vector<64x256xf32> -> vector<64x256xf32>
    %638 = arith.addf %634, %637 : vector<64x256xf32>
    %c0_225 = arith.constant 0 : index
    %c0_226 = arith.constant 0 : index
    %639 = vector.load %arg12[%c0_225, %c0_226] : memref<1x256xf32, #tpu.memory_space<vmem>>, vector<1x256xf32>
    %640 = vector.broadcast %639 : vector<1x256xf32> to vector<64x256xf32>
    %641 = arith.addf %638, %640 : vector<64x256xf32>
    %c0_227 = arith.constant 0 : index
    %c0_228 = arith.constant 0 : index
    %642 = vector.load %arg18[%c0_227, %c0_228] : memref<64x256xf32, #tpu.memory_space<vmem>>, vector<64x256xf32>
    tpu.vector_store %arg18[%c0_227, %c0_228], %641 {strides = array<i32>} : memref<64x256xf32, #tpu.memory_space<vmem>>, vector<64x256xf32>,
    %c0_229 = arith.constant 0 : index
    %c0_230 = arith.constant 0 : index
    %643 = vector.load %arg10[%c0_229, %c0_230] : memref<32x128xf32, #tpu.memory_space<vmem>>, vector<32x128xf32>
    %c0_231 = arith.constant 0 : index
    %c0_232 = arith.constant 0 : index
    %644 = vector.load %arg11[%c0_231, %c0_232] : memref<32x128xf32, #tpu.memory_space<vmem>>, vector<32x128xf32>
    %cst_233 = arith.constant 0.000000e+00 : f32
    %645 = vector.broadcast %cst_233 : f32 to vector<8x32xf32>
    %c0_234 = arith.constant 0 : index
    %c0_235 = arith.constant 0 : index
    %646 = vector.load %arg18[%c0_234, %c0_235] : memref<64x256xf32, #tpu.memory_space<vmem>>, vector<8x128xf32>
    %cst_236 = arith.constant dense<0.000000e+00> : vector<8x128xf32>
    %647 = tpu.matmul %645, %643, %cst_236 {dimension_numbers = #tpu.dot_dimension_numbers<[1], [0], [0], [1], [0, 0, 1, 1], [], []>} : vector<8x32xf32>, vector<32x128xf32>, vector<8x128xf32> -> vector<8x128xf32>
    %648 = arith.addf %646, %647 : vector<8x128xf32>
    %c56_237 = arith.constant 56 : index
    %c128_238 = arith.constant 128 : index
    %649 = vector.load %arg18[%c56_237, %c128_238] : memref<64x256xf32, #tpu.memory_space<vmem>>, vector<8x128xf32>
    %cst_239 = arith.constant dense<0.000000e+00> : vector<8x128xf32>
    %650 = tpu.matmul %645, %644, %cst_239 {dimension_numbers = #tpu.dot_dimension_numbers<[1], [0], [0], [1], [0, 0, 1, 1], [], []>} : vector<8x32xf32>, vector<32x128xf32>, vector<8x128xf32> -> vector<8x128xf32>
    %651 = arith.addf %649, %650 : vector<8x128xf32>
    %652 = arith.negf %648 : vector<8x128xf32>
    %653 = math.exp %652 : vector<8x128xf32>
    %cst_240 = arith.constant 1.000000e+00 : f32
    %654 = vector.broadcast %cst_240 : f32 to vector<8x128xf32>
    %655 = arith.addf %654, %653 : vector<8x128xf32>
    %656 = arith.divf %654, %655 : vector<8x128xf32>
    %657 = math.tanh %648 : vector<8x128xf32>
    %658 = vector.extract_strided_slice %656 {offsets = [0, 0], sizes = [8, 32], strides = [1, 1]} : vector<8x128xf32> to vector<8x32xf32>
    %659 = vector.extract_strided_slice %656 {offsets = [0, 32], sizes = [8, 32], strides = [1, 1]} : vector<8x128xf32> to vector<8x32xf32>
    %660 = vector.extract_strided_slice %657 {offsets = [0, 64], sizes = [8, 32], strides = [1, 1]} : vector<8x128xf32> to vector<8x32xf32>
    %661 = vector.extract_strided_slice %656 {offsets = [0, 96], sizes = [8, 32], strides = [1, 1]} : vector<8x128xf32> to vector<8x32xf32>
    %662 = arith.mulf %659, %645 : vector<8x32xf32>
    %663 = arith.mulf %658, %660 : vector<8x32xf32>
    %664 = arith.addf %662, %663 : vector<8x32xf32>
    %665 = math.tanh %664 : vector<8x32xf32>
    %666 = arith.mulf %661, %665 : vector<8x32xf32>
    %667 = arith.negf %651 : vector<8x128xf32>
    %668 = math.exp %667 : vector<8x128xf32>
    %cst_241 = arith.constant 1.000000e+00 : f32
    %669 = vector.broadcast %cst_241 : f32 to vector<8x128xf32>
    %670 = arith.addf %669, %668 : vector<8x128xf32>
    %671 = arith.divf %669, %670 : vector<8x128xf32>
    %672 = math.tanh %651 : vector<8x128xf32>
    %673 = vector.extract_strided_slice %671 {offsets = [0, 0], sizes = [8, 32], strides = [1, 1]} : vector<8x128xf32> to vector<8x32xf32>
    %674 = vector.extract_strided_slice %671 {offsets = [0, 32], sizes = [8, 32], strides = [1, 1]} : vector<8x128xf32> to vector<8x32xf32>
    %675 = vector.extract_strided_slice %672 {offsets = [0, 64], sizes = [8, 32], strides = [1, 1]} : vector<8x128xf32> to vector<8x32xf32>
    %676 = vector.extract_strided_slice %671 {offsets = [0, 96], sizes = [8, 32], strides = [1, 1]} : vector<8x128xf32> to vector<8x32xf32>
    %677 = arith.mulf %674, %645 : vector<8x32xf32>
    %678 = arith.mulf %673, %675 : vector<8x32xf32>
    %679 = arith.addf %677, %678 : vector<8x32xf32>
    %680 = math.tanh %679 : vector<8x32xf32>
    %681 = arith.mulf %676, %680 : vector<8x32xf32>
    %c0_242 = arith.constant 0 : index
    %c0_243 = arith.constant 0 : index
    %682 = vector.load %arg19[%c0_242, %c0_243] : memref<64x32xf32, #tpu.memory_space<vmem>>, vector<8x32xf32>
    tpu.vector_store %arg19[%c0_242, %c0_243], %666 {strides = array<i32>} : memref<64x32xf32, #tpu.memory_space<vmem>>, vector<8x32xf32>,
    %c56_244 = arith.constant 56 : index
    %c0_245 = arith.constant 0 : index
    %683 = vector.load %arg20[%c56_244, %c0_245] : memref<64x32xf32, #tpu.memory_space<vmem>>, vector<8x32xf32>
    tpu.vector_store %arg20[%c56_244, %c0_245], %681 {strides = array<i32>} : memref<64x32xf32, #tpu.memory_space<vmem>>, vector<8x32xf32>,
    %c8_246 = arith.constant 8 : index
    %c0_247 = arith.constant 0 : index
    %684 = vector.load %arg18[%c8_246, %c0_247] : memref<64x256xf32, #tpu.memory_space<vmem>>, vector<8x128xf32>
    %cst_248 = arith.constant dense<0.000000e+00> : vector<8x128xf32>
    %685 = tpu.matmul %666, %643, %cst_248 {dimension_numbers = #tpu.dot_dimension_numbers<[1], [0], [0], [1], [0, 0, 1, 1], [], []>} : vector<8x32xf32>, vector<32x128xf32>, vector<8x128xf32> -> vector<8x128xf32>
    %686 = arith.addf %684, %685 : vector<8x128xf32>
    %c48_249 = arith.constant 48 : index
    %c128_250 = arith.constant 128 : index
    %687 = vector.load %arg18[%c48_249, %c128_250] : memref<64x256xf32, #tpu.memory_space<vmem>>, vector<8x128xf32>
    %cst_251 = arith.constant dense<0.000000e+00> : vector<8x128xf32>
    %688 = tpu.matmul %681, %644, %cst_251 {dimension_numbers = #tpu.dot_dimension_numbers<[1], [0], [0], [1], [0, 0, 1, 1], [], []>} : vector<8x32xf32>, vector<32x128xf32>, vector<8x128xf32> -> vector<8x128xf32>
    %689 = arith.addf %687, %688 : vector<8x128xf32>
    %690 = arith.negf %686 : vector<8x128xf32>
    %691 = math.exp %690 : vector<8x128xf32>
    %cst_252 = arith.constant 1.000000e+00 : f32
    %692 = vector.broadcast %cst_252 : f32 to vector<8x128xf32>
    %693 = arith.addf %692, %691 : vector<8x128xf32>
    %694 = arith.divf %692, %693 : vector<8x128xf32>
    %695 = math.tanh %686 : vector<8x128xf32>
    %696 = vector.extract_strided_slice %694 {offsets = [0, 0], sizes = [8, 32], strides = [1, 1]} : vector<8x128xf32> to vector<8x32xf32>
    %697 = vector.extract_strided_slice %694 {offsets = [0, 32], sizes = [8, 32], strides = [1, 1]} : vector<8x128xf32> to vector<8x32xf32>
    %698 = vector.extract_strided_slice %695 {offsets = [0, 64], sizes = [8, 32], strides = [1, 1]} : vector<8x128xf32> to vector<8x32xf32>
    %699 = vector.extract_strided_slice %694 {offsets = [0, 96], sizes = [8, 32], strides = [1, 1]} : vector<8x128xf32> to vector<8x32xf32>
    %700 = arith.mulf %697, %664 : vector<8x32xf32>
    %701 = arith.mulf %696, %698 : vector<8x32xf32>
    %702 = arith.addf %700, %701 : vector<8x32xf32>
    %703 = math.tanh %702 : vector<8x32xf32>
    %704 = arith.mulf %699, %703 : vector<8x32xf32>
    %705 = arith.negf %689 : vector<8x128xf32>
    %706 = math.exp %705 : vector<8x128xf32>
    %cst_253 = arith.constant 1.000000e+00 : f32
    %707 = vector.broadcast %cst_253 : f32 to vector<8x128xf32>
    %708 = arith.addf %707, %706 : vector<8x128xf32>
    %709 = arith.divf %707, %708 : vector<8x128xf32>
    %710 = math.tanh %689 : vector<8x128xf32>
    %711 = vector.extract_strided_slice %709 {offsets = [0, 0], sizes = [8, 32], strides = [1, 1]} : vector<8x128xf32> to vector<8x32xf32>
    %712 = vector.extract_strided_slice %709 {offsets = [0, 32], sizes = [8, 32], strides = [1, 1]} : vector<8x128xf32> to vector<8x32xf32>
    %713 = vector.extract_strided_slice %710 {offsets = [0, 64], sizes = [8, 32], strides = [1, 1]} : vector<8x128xf32> to vector<8x32xf32>
    %714 = vector.extract_strided_slice %709 {offsets = [0, 96], sizes = [8, 32], strides = [1, 1]} : vector<8x128xf32> to vector<8x32xf32>
    %715 = arith.mulf %712, %679 : vector<8x32xf32>
    %716 = arith.mulf %711, %713 : vector<8x32xf32>
    %717 = arith.addf %715, %716 : vector<8x32xf32>
    %718 = math.tanh %717 : vector<8x32xf32>
    %719 = arith.mulf %714, %718 : vector<8x32xf32>
    %c8_254 = arith.constant 8 : index
    %c0_255 = arith.constant 0 : index
    %720 = vector.load %arg19[%c8_254, %c0_255] : memref<64x32xf32, #tpu.memory_space<vmem>>, vector<8x32xf32>
    tpu.vector_store %arg19[%c8_254, %c0_255], %704 {strides = array<i32>} : memref<64x32xf32, #tpu.memory_space<vmem>>, vector<8x32xf32>,
    %c48_256 = arith.constant 48 : index
    %c0_257 = arith.constant 0 : index
    %721 = vector.load %arg20[%c48_256, %c0_257] : memref<64x32xf32, #tpu.memory_space<vmem>>, vector<8x32xf32>
    tpu.vector_store %arg20[%c48_256, %c0_257], %719 {strides = array<i32>} : memref<64x32xf32, #tpu.memory_space<vmem>>, vector<8x32xf32>,
    %c16_258 = arith.constant 16 : index
    %c0_259 = arith.constant 0 : index
    %722 = vector.load %arg18[%c16_258, %c0_259] : memref<64x256xf32, #tpu.memory_space<vmem>>, vector<8x128xf32>
    %cst_260 = arith.constant dense<0.000000e+00> : vector<8x128xf32>
    %723 = tpu.matmul %704, %643, %cst_260 {dimension_numbers = #tpu.dot_dimension_numbers<[1], [0], [0], [1], [0, 0, 1, 1], [], []>} : vector<8x32xf32>, vector<32x128xf32>, vector<8x128xf32> -> vector<8x128xf32>
    %724 = arith.addf %722, %723 : vector<8x128xf32>
    %c40_261 = arith.constant 40 : index
    %c128_262 = arith.constant 128 : index
    %725 = vector.load %arg18[%c40_261, %c128_262] : memref<64x256xf32, #tpu.memory_space<vmem>>, vector<8x128xf32>
    %cst_263 = arith.constant dense<0.000000e+00> : vector<8x128xf32>
    %726 = tpu.matmul %719, %644, %cst_263 {dimension_numbers = #tpu.dot_dimension_numbers<[1], [0], [0], [1], [0, 0, 1, 1], [], []>} : vector<8x32xf32>, vector<32x128xf32>, vector<8x128xf32> -> vector<8x128xf32>
    %727 = arith.addf %725, %726 : vector<8x128xf32>
    %728 = arith.negf %724 : vector<8x128xf32>
    %729 = math.exp %728 : vector<8x128xf32>
    %cst_264 = arith.constant 1.000000e+00 : f32
    %730 = vector.broadcast %cst_264 : f32 to vector<8x128xf32>
    %731 = arith.addf %730, %729 : vector<8x128xf32>
    %732 = arith.divf %730, %731 : vector<8x128xf32>
    %733 = math.tanh %724 : vector<8x128xf32>
    %734 = vector.extract_strided_slice %732 {offsets = [0, 0], sizes = [8, 32], strides = [1, 1]} : vector<8x128xf32> to vector<8x32xf32>
    %735 = vector.extract_strided_slice %732 {offsets = [0, 32], sizes = [8, 32], strides = [1, 1]} : vector<8x128xf32> to vector<8x32xf32>
    %736 = vector.extract_strided_slice %733 {offsets = [0, 64], sizes = [8, 32], strides = [1, 1]} : vector<8x128xf32> to vector<8x32xf32>
    %737 = vector.extract_strided_slice %732 {offsets = [0, 96], sizes = [8, 32], strides = [1, 1]} : vector<8x128xf32> to vector<8x32xf32>
    %738 = arith.mulf %735, %702 : vector<8x32xf32>
    %739 = arith.mulf %734, %736 : vector<8x32xf32>
    %740 = arith.addf %738, %739 : vector<8x32xf32>
    %741 = math.tanh %740 : vector<8x32xf32>
    %742 = arith.mulf %737, %741 : vector<8x32xf32>
    %743 = arith.negf %727 : vector<8x128xf32>
    %744 = math.exp %743 : vector<8x128xf32>
    %cst_265 = arith.constant 1.000000e+00 : f32
    %745 = vector.broadcast %cst_265 : f32 to vector<8x128xf32>
    %746 = arith.addf %745, %744 : vector<8x128xf32>
    %747 = arith.divf %745, %746 : vector<8x128xf32>
    %748 = math.tanh %727 : vector<8x128xf32>
    %749 = vector.extract_strided_slice %747 {offsets = [0, 0], sizes = [8, 32], strides = [1, 1]} : vector<8x128xf32> to vector<8x32xf32>
    %750 = vector.extract_strided_slice %747 {offsets = [0, 32], sizes = [8, 32], strides = [1, 1]} : vector<8x128xf32> to vector<8x32xf32>
    %751 = vector.extract_strided_slice %748 {offsets = [0, 64], sizes = [8, 32], strides = [1, 1]} : vector<8x128xf32> to vector<8x32xf32>
    %752 = vector.extract_strided_slice %747 {offsets = [0, 96], sizes = [8, 32], strides = [1, 1]} : vector<8x128xf32> to vector<8x32xf32>
    %753 = arith.mulf %750, %717 : vector<8x32xf32>
    %754 = arith.mulf %749, %751 : vector<8x32xf32>
    %755 = arith.addf %753, %754 : vector<8x32xf32>
    %756 = math.tanh %755 : vector<8x32xf32>
    %757 = arith.mulf %752, %756 : vector<8x32xf32>
    %c16_266 = arith.constant 16 : index
    %c0_267 = arith.constant 0 : index
    %758 = vector.load %arg19[%c16_266, %c0_267] : memref<64x32xf32, #tpu.memory_space<vmem>>, vector<8x32xf32>
    tpu.vector_store %arg19[%c16_266, %c0_267], %742 {strides = array<i32>} : memref<64x32xf32, #tpu.memory_space<vmem>>, vector<8x32xf32>,
    %c40_268 = arith.constant 40 : index
    %c0_269 = arith.constant 0 : index
    %759 = vector.load %arg20[%c40_268, %c0_269] : memref<64x32xf32, #tpu.memory_space<vmem>>, vector<8x32xf32>
    tpu.vector_store %arg20[%c40_268, %c0_269], %757 {strides = array<i32>} : memref<64x32xf32, #tpu.memory_space<vmem>>, vector<8x32xf32>,
    %c24_270 = arith.constant 24 : index
    %c0_271 = arith.constant 0 : index
    %760 = vector.load %arg18[%c24_270, %c0_271] : memref<64x256xf32, #tpu.memory_space<vmem>>, vector<8x128xf32>
    %cst_272 = arith.constant dense<0.000000e+00> : vector<8x128xf32>
    %761 = tpu.matmul %742, %643, %cst_272 {dimension_numbers = #tpu.dot_dimension_numbers<[1], [0], [0], [1], [0, 0, 1, 1], [], []>} : vector<8x32xf32>, vector<32x128xf32>, vector<8x128xf32> -> vector<8x128xf32>
    %762 = arith.addf %760, %761 : vector<8x128xf32>
    %c32_273 = arith.constant 32 : index
    %c128_274 = arith.constant 128 : index
    %763 = vector.load %arg18[%c32_273, %c128_274] : memref<64x256xf32, #tpu.memory_space<vmem>>, vector<8x128xf32>
    %cst_275 = arith.constant dense<0.000000e+00> : vector<8x128xf32>
    %764 = tpu.matmul %757, %644, %cst_275 {dimension_numbers = #tpu.dot_dimension_numbers<[1], [0], [0], [1], [0, 0, 1, 1], [], []>} : vector<8x32xf32>, vector<32x128xf32>, vector<8x128xf32> -> vector<8x128xf32>
    %765 = arith.addf %763, %764 : vector<8x128xf32>
    %766 = arith.negf %762 : vector<8x128xf32>
    %767 = math.exp %766 : vector<8x128xf32>
    %cst_276 = arith.constant 1.000000e+00 : f32
    %768 = vector.broadcast %cst_276 : f32 to vector<8x128xf32>
    %769 = arith.addf %768, %767 : vector<8x128xf32>
    %770 = arith.divf %768, %769 : vector<8x128xf32>
    %771 = math.tanh %762 : vector<8x128xf32>
    %772 = vector.extract_strided_slice %770 {offsets = [0, 0], sizes = [8, 32], strides = [1, 1]} : vector<8x128xf32> to vector<8x32xf32>
    %773 = vector.extract_strided_slice %770 {offsets = [0, 32], sizes = [8, 32], strides = [1, 1]} : vector<8x128xf32> to vector<8x32xf32>
    %774 = vector.extract_strided_slice %771 {offsets = [0, 64], sizes = [8, 32], strides = [1, 1]} : vector<8x128xf32> to vector<8x32xf32>
    %775 = vector.extract_strided_slice %770 {offsets = [0, 96], sizes = [8, 32], strides = [1, 1]} : vector<8x128xf32> to vector<8x32xf32>
    %776 = arith.mulf %773, %740 : vector<8x32xf32>
    %777 = arith.mulf %772, %774 : vector<8x32xf32>
    %778 = arith.addf %776, %777 : vector<8x32xf32>
    %779 = math.tanh %778 : vector<8x32xf32>
    %780 = arith.mulf %775, %779 : vector<8x32xf32>
    %781 = arith.negf %765 : vector<8x128xf32>
    %782 = math.exp %781 : vector<8x128xf32>
    %cst_277 = arith.constant 1.000000e+00 : f32
    %783 = vector.broadcast %cst_277 : f32 to vector<8x128xf32>
    %784 = arith.addf %783, %782 : vector<8x128xf32>
    %785 = arith.divf %783, %784 : vector<8x128xf32>
    %786 = math.tanh %765 : vector<8x128xf32>
    %787 = vector.extract_strided_slice %785 {offsets = [0, 0], sizes = [8, 32], strides = [1, 1]} : vector<8x128xf32> to vector<8x32xf32>
    %788 = vector.extract_strided_slice %785 {offsets = [0, 32], sizes = [8, 32], strides = [1, 1]} : vector<8x128xf32> to vector<8x32xf32>
    %789 = vector.extract_strided_slice %786 {offsets = [0, 64], sizes = [8, 32], strides = [1, 1]} : vector<8x128xf32> to vector<8x32xf32>
    %790 = vector.extract_strided_slice %785 {offsets = [0, 96], sizes = [8, 32], strides = [1, 1]} : vector<8x128xf32> to vector<8x32xf32>
    %791 = arith.mulf %788, %755 : vector<8x32xf32>
    %792 = arith.mulf %787, %789 : vector<8x32xf32>
    %793 = arith.addf %791, %792 : vector<8x32xf32>
    %794 = math.tanh %793 : vector<8x32xf32>
    %795 = arith.mulf %790, %794 : vector<8x32xf32>
    %c24_278 = arith.constant 24 : index
    %c0_279 = arith.constant 0 : index
    %796 = vector.load %arg19[%c24_278, %c0_279] : memref<64x32xf32, #tpu.memory_space<vmem>>, vector<8x32xf32>
    tpu.vector_store %arg19[%c24_278, %c0_279], %780 {strides = array<i32>} : memref<64x32xf32, #tpu.memory_space<vmem>>, vector<8x32xf32>,
    %c32_280 = arith.constant 32 : index
    %c0_281 = arith.constant 0 : index
    %797 = vector.load %arg20[%c32_280, %c0_281] : memref<64x32xf32, #tpu.memory_space<vmem>>, vector<8x32xf32>
    tpu.vector_store %arg20[%c32_280, %c0_281], %795 {strides = array<i32>} : memref<64x32xf32, #tpu.memory_space<vmem>>, vector<8x32xf32>,
    %c32_282 = arith.constant 32 : index
    %c0_283 = arith.constant 0 : index
    %798 = vector.load %arg18[%c32_282, %c0_283] : memref<64x256xf32, #tpu.memory_space<vmem>>, vector<8x128xf32>
    %cst_284 = arith.constant dense<0.000000e+00> : vector<8x128xf32>
    %799 = tpu.matmul %780, %643, %cst_284 {dimension_numbers = #tpu.dot_dimension_numbers<[1], [0], [0], [1], [0, 0, 1, 1], [], []>} : vector<8x32xf32>, vector<32x128xf32>, vector<8x128xf32> -> vector<8x128xf32>
    %800 = arith.addf %798, %799 : vector<8x128xf32>
    %c24_285 = arith.constant 24 : index
    %c128_286 = arith.constant 128 : index
    %801 = vector.load %arg18[%c24_285, %c128_286] : memref<64x256xf32, #tpu.memory_space<vmem>>, vector<8x128xf32>
    %cst_287 = arith.constant dense<0.000000e+00> : vector<8x128xf32>
    %802 = tpu.matmul %795, %644, %cst_287 {dimension_numbers = #tpu.dot_dimension_numbers<[1], [0], [0], [1], [0, 0, 1, 1], [], []>} : vector<8x32xf32>, vector<32x128xf32>, vector<8x128xf32> -> vector<8x128xf32>
    %803 = arith.addf %801, %802 : vector<8x128xf32>
    %804 = arith.negf %800 : vector<8x128xf32>
    %805 = math.exp %804 : vector<8x128xf32>
    %cst_288 = arith.constant 1.000000e+00 : f32
    %806 = vector.broadcast %cst_288 : f32 to vector<8x128xf32>
    %807 = arith.addf %806, %805 : vector<8x128xf32>
    %808 = arith.divf %806, %807 : vector<8x128xf32>
    %809 = math.tanh %800 : vector<8x128xf32>
    %810 = vector.extract_strided_slice %808 {offsets = [0, 0], sizes = [8, 32], strides = [1, 1]} : vector<8x128xf32> to vector<8x32xf32>
    %811 = vector.extract_strided_slice %808 {offsets = [0, 32], sizes = [8, 32], strides = [1, 1]} : vector<8x128xf32> to vector<8x32xf32>
    %812 = vector.extract_strided_slice %809 {offsets = [0, 64], sizes = [8, 32], strides = [1, 1]} : vector<8x128xf32> to vector<8x32xf32>
    %813 = vector.extract_strided_slice %808 {offsets = [0, 96], sizes = [8, 32], strides = [1, 1]} : vector<8x128xf32> to vector<8x32xf32>
    %814 = arith.mulf %811, %778 : vector<8x32xf32>
    %815 = arith.mulf %810, %812 : vector<8x32xf32>
    %816 = arith.addf %814, %815 : vector<8x32xf32>
    %817 = math.tanh %816 : vector<8x32xf32>
    %818 = arith.mulf %813, %817 : vector<8x32xf32>
    %819 = arith.negf %803 : vector<8x128xf32>
    %820 = math.exp %819 : vector<8x128xf32>
    %cst_289 = arith.constant 1.000000e+00 : f32
    %821 = vector.broadcast %cst_289 : f32 to vector<8x128xf32>
    %822 = arith.addf %821, %820 : vector<8x128xf32>
    %823 = arith.divf %821, %822 : vector<8x128xf32>
    %824 = math.tanh %803 : vector<8x128xf32>
    %825 = vector.extract_strided_slice %823 {offsets = [0, 0], sizes = [8, 32], strides = [1, 1]} : vector<8x128xf32> to vector<8x32xf32>
    %826 = vector.extract_strided_slice %823 {offsets = [0, 32], sizes = [8, 32], strides = [1, 1]} : vector<8x128xf32> to vector<8x32xf32>
    %827 = vector.extract_strided_slice %824 {offsets = [0, 64], sizes = [8, 32], strides = [1, 1]} : vector<8x128xf32> to vector<8x32xf32>
    %828 = vector.extract_strided_slice %823 {offsets = [0, 96], sizes = [8, 32], strides = [1, 1]} : vector<8x128xf32> to vector<8x32xf32>
    %829 = arith.mulf %826, %793 : vector<8x32xf32>
    %830 = arith.mulf %825, %827 : vector<8x32xf32>
    %831 = arith.addf %829, %830 : vector<8x32xf32>
    %832 = math.tanh %831 : vector<8x32xf32>
    %833 = arith.mulf %828, %832 : vector<8x32xf32>
    %c32_290 = arith.constant 32 : index
    %c0_291 = arith.constant 0 : index
    %834 = vector.load %arg19[%c32_290, %c0_291] : memref<64x32xf32, #tpu.memory_space<vmem>>, vector<8x32xf32>
    tpu.vector_store %arg19[%c32_290, %c0_291], %818 {strides = array<i32>} : memref<64x32xf32, #tpu.memory_space<vmem>>, vector<8x32xf32>,
    %c24_292 = arith.constant 24 : index
    %c0_293 = arith.constant 0 : index
    %835 = vector.load %arg20[%c24_292, %c0_293] : memref<64x32xf32, #tpu.memory_space<vmem>>, vector<8x32xf32>
    tpu.vector_store %arg20[%c24_292, %c0_293], %833 {strides = array<i32>} : memref<64x32xf32, #tpu.memory_space<vmem>>, vector<8x32xf32>,
    %c40_294 = arith.constant 40 : index
    %c0_295 = arith.constant 0 : index
    %836 = vector.load %arg18[%c40_294, %c0_295] : memref<64x256xf32, #tpu.memory_space<vmem>>, vector<8x128xf32>
    %cst_296 = arith.constant dense<0.000000e+00> : vector<8x128xf32>
    %837 = tpu.matmul %818, %643, %cst_296 {dimension_numbers = #tpu.dot_dimension_numbers<[1], [0], [0], [1], [0, 0, 1, 1], [], []>} : vector<8x32xf32>, vector<32x128xf32>, vector<8x128xf32> -> vector<8x128xf32>
    %838 = arith.addf %836, %837 : vector<8x128xf32>
    %c16_297 = arith.constant 16 : index
    %c128_298 = arith.constant 128 : index
    %839 = vector.load %arg18[%c16_297, %c128_298] : memref<64x256xf32, #tpu.memory_space<vmem>>, vector<8x128xf32>
    %cst_299 = arith.constant dense<0.000000e+00> : vector<8x128xf32>
    %840 = tpu.matmul %833, %644, %cst_299 {dimension_numbers = #tpu.dot_dimension_numbers<[1], [0], [0], [1], [0, 0, 1, 1], [], []>} : vector<8x32xf32>, vector<32x128xf32>, vector<8x128xf32> -> vector<8x128xf32>
    %841 = arith.addf %839, %840 : vector<8x128xf32>
    %842 = arith.negf %838 : vector<8x128xf32>
    %843 = math.exp %842 : vector<8x128xf32>
    %cst_300 = arith.constant 1.000000e+00 : f32
    %844 = vector.broadcast %cst_300 : f32 to vector<8x128xf32>
    %845 = arith.addf %844, %843 : vector<8x128xf32>
    %846 = arith.divf %844, %845 : vector<8x128xf32>
    %847 = math.tanh %838 : vector<8x128xf32>
    %848 = vector.extract_strided_slice %846 {offsets = [0, 0], sizes = [8, 32], strides = [1, 1]} : vector<8x128xf32> to vector<8x32xf32>
    %849 = vector.extract_strided_slice %846 {offsets = [0, 32], sizes = [8, 32], strides = [1, 1]} : vector<8x128xf32> to vector<8x32xf32>
    %850 = vector.extract_strided_slice %847 {offsets = [0, 64], sizes = [8, 32], strides = [1, 1]} : vector<8x128xf32> to vector<8x32xf32>
    %851 = vector.extract_strided_slice %846 {offsets = [0, 96], sizes = [8, 32], strides = [1, 1]} : vector<8x128xf32> to vector<8x32xf32>
    %852 = arith.mulf %849, %816 : vector<8x32xf32>
    %853 = arith.mulf %848, %850 : vector<8x32xf32>
    %854 = arith.addf %852, %853 : vector<8x32xf32>
    %855 = math.tanh %854 : vector<8x32xf32>
    %856 = arith.mulf %851, %855 : vector<8x32xf32>
    %857 = arith.negf %841 : vector<8x128xf32>
    %858 = math.exp %857 : vector<8x128xf32>
    %cst_301 = arith.constant 1.000000e+00 : f32
    %859 = vector.broadcast %cst_301 : f32 to vector<8x128xf32>
    %860 = arith.addf %859, %858 : vector<8x128xf32>
    %861 = arith.divf %859, %860 : vector<8x128xf32>
    %862 = math.tanh %841 : vector<8x128xf32>
    %863 = vector.extract_strided_slice %861 {offsets = [0, 0], sizes = [8, 32], strides = [1, 1]} : vector<8x128xf32> to vector<8x32xf32>
    %864 = vector.extract_strided_slice %861 {offsets = [0, 32], sizes = [8, 32], strides = [1, 1]} : vector<8x128xf32> to vector<8x32xf32>
    %865 = vector.extract_strided_slice %862 {offsets = [0, 64], sizes = [8, 32], strides = [1, 1]} : vector<8x128xf32> to vector<8x32xf32>
    %866 = vector.extract_strided_slice %861 {offsets = [0, 96], sizes = [8, 32], strides = [1, 1]} : vector<8x128xf32> to vector<8x32xf32>
    %867 = arith.mulf %864, %831 : vector<8x32xf32>
    %868 = arith.mulf %863, %865 : vector<8x32xf32>
    %869 = arith.addf %867, %868 : vector<8x32xf32>
    %870 = math.tanh %869 : vector<8x32xf32>
    %871 = arith.mulf %866, %870 : vector<8x32xf32>
    %c40_302 = arith.constant 40 : index
    %c0_303 = arith.constant 0 : index
    %872 = vector.load %arg19[%c40_302, %c0_303] : memref<64x32xf32, #tpu.memory_space<vmem>>, vector<8x32xf32>
    tpu.vector_store %arg19[%c40_302, %c0_303], %856 {strides = array<i32>} : memref<64x32xf32, #tpu.memory_space<vmem>>, vector<8x32xf32>,
    %c16_304 = arith.constant 16 : index
    %c0_305 = arith.constant 0 : index
    %873 = vector.load %arg20[%c16_304, %c0_305] : memref<64x32xf32, #tpu.memory_space<vmem>>, vector<8x32xf32>
    tpu.vector_store %arg20[%c16_304, %c0_305], %871 {strides = array<i32>} : memref<64x32xf32, #tpu.memory_space<vmem>>, vector<8x32xf32>,
    %c48_306 = arith.constant 48 : index
    %c0_307 = arith.constant 0 : index
    %874 = vector.load %arg18[%c48_306, %c0_307] : memref<64x256xf32, #tpu.memory_space<vmem>>, vector<8x128xf32>
    %cst_308 = arith.constant dense<0.000000e+00> : vector<8x128xf32>
    %875 = tpu.matmul %856, %643, %cst_308 {dimension_numbers = #tpu.dot_dimension_numbers<[1], [0], [0], [1], [0, 0, 1, 1], [], []>} : vector<8x32xf32>, vector<32x128xf32>, vector<8x128xf32> -> vector<8x128xf32>
    %876 = arith.addf %874, %875 : vector<8x128xf32>
    %c8_309 = arith.constant 8 : index
    %c128_310 = arith.constant 128 : index
    %877 = vector.load %arg18[%c8_309, %c128_310] : memref<64x256xf32, #tpu.memory_space<vmem>>, vector<8x128xf32>
    %cst_311 = arith.constant dense<0.000000e+00> : vector<8x128xf32>
    %878 = tpu.matmul %871, %644, %cst_311 {dimension_numbers = #tpu.dot_dimension_numbers<[1], [0], [0], [1], [0, 0, 1, 1], [], []>} : vector<8x32xf32>, vector<32x128xf32>, vector<8x128xf32> -> vector<8x128xf32>
    %879 = arith.addf %877, %878 : vector<8x128xf32>
    %880 = arith.negf %876 : vector<8x128xf32>
    %881 = math.exp %880 : vector<8x128xf32>
    %cst_312 = arith.constant 1.000000e+00 : f32
    %882 = vector.broadcast %cst_312 : f32 to vector<8x128xf32>
    %883 = arith.addf %882, %881 : vector<8x128xf32>
    %884 = arith.divf %882, %883 : vector<8x128xf32>
    %885 = math.tanh %876 : vector<8x128xf32>
    %886 = vector.extract_strided_slice %884 {offsets = [0, 0], sizes = [8, 32], strides = [1, 1]} : vector<8x128xf32> to vector<8x32xf32>
    %887 = vector.extract_strided_slice %884 {offsets = [0, 32], sizes = [8, 32], strides = [1, 1]} : vector<8x128xf32> to vector<8x32xf32>
    %888 = vector.extract_strided_slice %885 {offsets = [0, 64], sizes = [8, 32], strides = [1, 1]} : vector<8x128xf32> to vector<8x32xf32>
    %889 = vector.extract_strided_slice %884 {offsets = [0, 96], sizes = [8, 32], strides = [1, 1]} : vector<8x128xf32> to vector<8x32xf32>
    %890 = arith.mulf %887, %854 : vector<8x32xf32>
    %891 = arith.mulf %886, %888 : vector<8x32xf32>
    %892 = arith.addf %890, %891 : vector<8x32xf32>
    %893 = math.tanh %892 : vector<8x32xf32>
    %894 = arith.mulf %889, %893 : vector<8x32xf32>
    %895 = arith.negf %879 : vector<8x128xf32>
    %896 = math.exp %895 : vector<8x128xf32>
    %cst_313 = arith.constant 1.000000e+00 : f32
    %897 = vector.broadcast %cst_313 : f32 to vector<8x128xf32>
    %898 = arith.addf %897, %896 : vector<8x128xf32>
    %899 = arith.divf %897, %898 : vector<8x128xf32>
    %900 = math.tanh %879 : vector<8x128xf32>
    %901 = vector.extract_strided_slice %899 {offsets = [0, 0], sizes = [8, 32], strides = [1, 1]} : vector<8x128xf32> to vector<8x32xf32>
    %902 = vector.extract_strided_slice %899 {offsets = [0, 32], sizes = [8, 32], strides = [1, 1]} : vector<8x128xf32> to vector<8x32xf32>
    %903 = vector.extract_strided_slice %900 {offsets = [0, 64], sizes = [8, 32], strides = [1, 1]} : vector<8x128xf32> to vector<8x32xf32>
    %904 = vector.extract_strided_slice %899 {offsets = [0, 96], sizes = [8, 32], strides = [1, 1]} : vector<8x128xf32> to vector<8x32xf32>
    %905 = arith.mulf %902, %869 : vector<8x32xf32>
    %906 = arith.mulf %901, %903 : vector<8x32xf32>
    %907 = arith.addf %905, %906 : vector<8x32xf32>
    %908 = math.tanh %907 : vector<8x32xf32>
    %909 = arith.mulf %904, %908 : vector<8x32xf32>
    %c48_314 = arith.constant 48 : index
    %c0_315 = arith.constant 0 : index
    %910 = vector.load %arg19[%c48_314, %c0_315] : memref<64x32xf32, #tpu.memory_space<vmem>>, vector<8x32xf32>
    tpu.vector_store %arg19[%c48_314, %c0_315], %894 {strides = array<i32>} : memref<64x32xf32, #tpu.memory_space<vmem>>, vector<8x32xf32>,
    %c8_316 = arith.constant 8 : index
    %c0_317 = arith.constant 0 : index
    %911 = vector.load %arg20[%c8_316, %c0_317] : memref<64x32xf32, #tpu.memory_space<vmem>>, vector<8x32xf32>
    tpu.vector_store %arg20[%c8_316, %c0_317], %909 {strides = array<i32>} : memref<64x32xf32, #tpu.memory_space<vmem>>, vector<8x32xf32>,
    %c56_318 = arith.constant 56 : index
    %c0_319 = arith.constant 0 : index
    %912 = vector.load %arg18[%c56_318, %c0_319] : memref<64x256xf32, #tpu.memory_space<vmem>>, vector<8x128xf32>
    %cst_320 = arith.constant dense<0.000000e+00> : vector<8x128xf32>
    %913 = tpu.matmul %894, %643, %cst_320 {dimension_numbers = #tpu.dot_dimension_numbers<[1], [0], [0], [1], [0, 0, 1, 1], [], []>} : vector<8x32xf32>, vector<32x128xf32>, vector<8x128xf32> -> vector<8x128xf32>
    %914 = arith.addf %912, %913 : vector<8x128xf32>
    %c0_321 = arith.constant 0 : index
    %c128_322 = arith.constant 128 : index
    %915 = vector.load %arg18[%c0_321, %c128_322] : memref<64x256xf32, #tpu.memory_space<vmem>>, vector<8x128xf32>
    %cst_323 = arith.constant dense<0.000000e+00> : vector<8x128xf32>
    %916 = tpu.matmul %909, %644, %cst_323 {dimension_numbers = #tpu.dot_dimension_numbers<[1], [0], [0], [1], [0, 0, 1, 1], [], []>} : vector<8x32xf32>, vector<32x128xf32>, vector<8x128xf32> -> vector<8x128xf32>
    %917 = arith.addf %915, %916 : vector<8x128xf32>
    %918 = arith.negf %914 : vector<8x128xf32>
    %919 = math.exp %918 : vector<8x128xf32>
    %cst_324 = arith.constant 1.000000e+00 : f32
    %920 = vector.broadcast %cst_324 : f32 to vector<8x128xf32>
    %921 = arith.addf %920, %919 : vector<8x128xf32>
    %922 = arith.divf %920, %921 : vector<8x128xf32>
    %923 = math.tanh %914 : vector<8x128xf32>
    %924 = vector.extract_strided_slice %922 {offsets = [0, 0], sizes = [8, 32], strides = [1, 1]} : vector<8x128xf32> to vector<8x32xf32>
    %925 = vector.extract_strided_slice %922 {offsets = [0, 32], sizes = [8, 32], strides = [1, 1]} : vector<8x128xf32> to vector<8x32xf32>
    %926 = vector.extract_strided_slice %923 {offsets = [0, 64], sizes = [8, 32], strides = [1, 1]} : vector<8x128xf32> to vector<8x32xf32>
    %927 = vector.extract_strided_slice %922 {offsets = [0, 96], sizes = [8, 32], strides = [1, 1]} : vector<8x128xf32> to vector<8x32xf32>
    %928 = arith.mulf %925, %892 : vector<8x32xf32>
    %929 = arith.mulf %924, %926 : vector<8x32xf32>
    %930 = arith.addf %928, %929 : vector<8x32xf32>
    %931 = math.tanh %930 : vector<8x32xf32>
    %932 = arith.mulf %927, %931 : vector<8x32xf32>
    %933 = arith.negf %917 : vector<8x128xf32>
    %934 = math.exp %933 : vector<8x128xf32>
    %cst_325 = arith.constant 1.000000e+00 : f32
    %935 = vector.broadcast %cst_325 : f32 to vector<8x128xf32>
    %936 = arith.addf %935, %934 : vector<8x128xf32>
    %937 = arith.divf %935, %936 : vector<8x128xf32>
    %938 = math.tanh %917 : vector<8x128xf32>
    %939 = vector.extract_strided_slice %937 {offsets = [0, 0], sizes = [8, 32], strides = [1, 1]} : vector<8x128xf32> to vector<8x32xf32>
    %940 = vector.extract_strided_slice %937 {offsets = [0, 32], sizes = [8, 32], strides = [1, 1]} : vector<8x128xf32> to vector<8x32xf32>
    %941 = vector.extract_strided_slice %938 {offsets = [0, 64], sizes = [8, 32], strides = [1, 1]} : vector<8x128xf32> to vector<8x32xf32>
    %942 = vector.extract_strided_slice %937 {offsets = [0, 96], sizes = [8, 32], strides = [1, 1]} : vector<8x128xf32> to vector<8x32xf32>
    %943 = arith.mulf %940, %907 : vector<8x32xf32>
    %944 = arith.mulf %939, %941 : vector<8x32xf32>
    %945 = arith.addf %943, %944 : vector<8x32xf32>
    %946 = math.tanh %945 : vector<8x32xf32>
    %947 = arith.mulf %942, %946 : vector<8x32xf32>
    %c56_326 = arith.constant 56 : index
    %c0_327 = arith.constant 0 : index
    %948 = vector.load %arg19[%c56_326, %c0_327] : memref<64x32xf32, #tpu.memory_space<vmem>>, vector<8x32xf32>
    tpu.vector_store %arg19[%c56_326, %c0_327], %932 {strides = array<i32>} : memref<64x32xf32, #tpu.memory_space<vmem>>, vector<8x32xf32>,
    %c0_328 = arith.constant 0 : index
    %c0_329 = arith.constant 0 : index
    %949 = vector.load %arg20[%c0_328, %c0_329] : memref<64x32xf32, #tpu.memory_space<vmem>>, vector<8x32xf32>
    tpu.vector_store %arg20[%c0_328, %c0_329], %947 {strides = array<i32>} : memref<64x32xf32, #tpu.memory_space<vmem>>, vector<8x32xf32>,
    %c0_330 = arith.constant 0 : index
    %c0_331 = arith.constant 0 : index
    %950 = vector.load %arg19[%c0_330, %c0_331] : memref<64x32xf32, #tpu.memory_space<vmem>>, vector<64x32xf32>
    %c0_332 = arith.constant 0 : index
    %c0_333 = arith.constant 0 : index
    %951 = vector.load %arg13[%c0_332, %c0_333] : memref<64x32xf32, #tpu.memory_space<vmem>>, vector<32x32xf32>
    %cst_334 = arith.constant dense<0.000000e+00> : vector<64x32xf32>
    %952 = tpu.matmul %950, %951, %cst_334 {dimension_numbers = #tpu.dot_dimension_numbers<[1], [0], [0], [1], [0, 0, 1, 1], [], []>} : vector<64x32xf32>, vector<32x32xf32>, vector<64x32xf32> -> vector<64x32xf32>
    %c0_335 = arith.constant 0 : index
    %c0_336 = arith.constant 0 : index
    %953 = vector.load %arg20[%c0_335, %c0_336] : memref<64x32xf32, #tpu.memory_space<vmem>>, vector<64x32xf32>
    %c32_337 = arith.constant 32 : index
    %c0_338 = arith.constant 0 : index
    %954 = vector.load %arg13[%c32_337, %c0_338] : memref<64x32xf32, #tpu.memory_space<vmem>>, vector<32x32xf32>
    %cst_339 = arith.constant dense<0.000000e+00> : vector<64x32xf32>
    %955 = tpu.matmul %953, %954, %cst_339 {dimension_numbers = #tpu.dot_dimension_numbers<[1], [0], [0], [1], [0, 0, 1, 1], [], []>} : vector<64x32xf32>, vector<32x32xf32>, vector<64x32xf32> -> vector<64x32xf32>
    %956 = arith.addf %952, %955 : vector<64x32xf32>
    %c0_340 = arith.constant 0 : index
    %c0_341 = arith.constant 0 : index
    %957 = vector.load %arg14[%c0_340, %c0_341] : memref<1x32xf32, #tpu.memory_space<vmem>>, vector<1x32xf32>
    %958 = vector.broadcast %957 : vector<1x32xf32> to vector<64x32xf32>
    %959 = arith.addf %956, %958 : vector<64x32xf32>
    %cst_342 = arith.constant 0.000000e+00 : f32
    %960 = vector.broadcast %cst_342 : f32 to vector<64x32xf32>
    %961 = arith.maximumf %959, %960 : vector<64x32xf32>
    %c0_343 = arith.constant 0 : index
    %c0_344 = arith.constant 0 : index
    %962 = vector.load %arg15[%c0_343, %c0_344] : memref<32x3xf32, #tpu.memory_space<vmem>>, vector<32x3xf32>
    %cst_345 = arith.constant dense<0.000000e+00> : vector<64x3xf32>
    %963 = tpu.matmul %961, %962, %cst_345 {dimension_numbers = #tpu.dot_dimension_numbers<[1], [0], [0], [1], [0, 0, 1, 1], [], []>} : vector<64x32xf32>, vector<32x3xf32>, vector<64x3xf32> -> vector<64x3xf32>
    %c0_346 = arith.constant 0 : index
    %c0_347 = arith.constant 0 : index
    %964 = vector.load %arg16[%c0_346, %c0_347] : memref<1x3xf32, #tpu.memory_space<vmem>>, vector<1x3xf32>
    %965 = vector.broadcast %964 : vector<1x3xf32> to vector<64x3xf32>
    %966 = arith.addf %963, %965 : vector<64x3xf32>
    %967 = arith.negf %966 : vector<64x3xf32>
    %968 = math.exp %967 : vector<64x3xf32>
    %cst_348 = arith.constant 1.000000e+00 : f32
    %969 = vector.broadcast %cst_348 : f32 to vector<64x3xf32>
    %970 = arith.addf %969, %968 : vector<64x3xf32>
    %971 = arith.divf %969, %970 : vector<64x3xf32>
    %c0_349 = arith.constant 0 : index
    %c0_350 = arith.constant 0 : index
    %972 = vector.load %arg17[%c0_349, %c0_350] : memref<64x3xf32, #tpu.memory_space<vmem>>, vector<64x3xf32>
    tpu.vector_store %arg17[%c0_349, %c0_350], %971 {strides = array<i32>} : memref<64x3xf32, #tpu.memory_space<vmem>>, vector<64x3xf32>,
    return
  }
}

</mosaic_0001>

<bundles_post_ra>
// kernel: tpu_custom_call.1
= control target key start
LH: loop header
LB: loop body
LE: loop exit
PB: predicated region body
PF: predicated region fallthrough
CT: control target
= control target key end

     0   :  { %s6608_s0 = inlined_call_operand.vmem [shape: f32[64,32], index: 0, kind: input, shape index: {}]   ;;  %s6609_s1 = inlined_call_operand.hbm [shape: f32[32,256], index: 1, kind: input, shape index: {}]   ;;  %s6610_s2 = inlined_call_operand.vmem [shape: f32[32,128], index: 2, kind: input, shape index: {}]   ;;  %s6611_s3 = inlined_call_operand.hbm [shape: f32[32,128], index: 3, kind: input, shape index: {}]   ;;  %s6612_s4 = inlined_call_operand.vmem [shape: f32[1,256], index: 4, kind: input, shape index: {}]   ;;  %s6613_s5 = inlined_call_operand.vmem [shape: f32[64,256], index: 5, kind: input, shape index: {}]   ;;  %s6614_s6 = inlined_call_operand.hbm [shape: f32[32,128], index: 6, kind: input, shape index: {}]   ;;  %s6615_s7 = inlined_call_operand.hbm [shape: f32[32,128], index: 7, kind: input, shape index: {}]   ;;  %s6616_s8 = inlined_call_operand.vmem [shape: f32[1,256], index: 8, kind: input, shape index: {}]   ;;  %s6617_s9 = inlined_call_operand.hbm [shape: f32[64,256], index: 9, kind: input, shape index: {}]   ;;  %s6618_s10 = inlined_call_operand.hbm [shape: f32[32,128], index: 10, kind: input, shape index: {}]   ;;  %s6619_s11 = inlined_call_operand.hbm [shape: f32[32,128], index: 11, kind: input, shape index: {}]   ;;  %s6620_s12 = inlined_call_operand.vmem [shape: f32[1,256], index: 12, kind: input, shape index: {}]   ;;  %s6621_s13 = inlined_call_operand.vmem [shape: f32[64,32], index: 13, kind: input, shape index: {}]   ;;  %s6622_s14 = inlined_call_operand.vmem [shape: f32[1,32], index: 14, kind: input, shape index: {}]   ;;  %s6623_s15 = inlined_call_operand.vmem [shape: f32[32,3], index: 15, kind: input, shape index: {}]   ;;  %s6624_s16 = inlined_call_operand.vmem [shape: f32[1,3], index: 16, kind: input, shape index: {}]   ;;  %s6625_s17 = inlined_call_operand.vmem [shape: f32[64,3], index: 17, kind: output, shape index: {}]  }
   0x1   :  { %6627 = sst [smem:[#allocation20_spill]] %s6608_s0 }
   0x2   :  { %6628 = sst [smem:[#allocation21_spill]] %s6609_s1 }
   0x3   :  { %22 = vsyncpa [#allocation6], 0 }
   0x4   :  { %23 = vsyncpa [#allocation8], 0 }
   0x5   :  { %24 = vsyncpa [#allocation11], 0  ;;  %s47_s26 = sshll.u32 %s6611_s3, 4  ;;  %s48_s26 = int_to_ptr.hbm [resolvable:$true] %s47_s26 }
   0x6   :  { %25 = vsyncpa [#allocation14], 0  ;;  %s5299_s27 = smov [#allocation7]   ;;  %s77_s30 = sshll.u32 %s6615_s7, 4  ;;  %s78_s30 = int_to_ptr.hbm [resolvable:$true] %s77_s30 }
   0x7   :  { %s49_s28 = sshll.u32 %s5299_s27, 4  ;;  %s5300_s18 = smov 128   ;;  %s50_s28 = int_to_ptr.vmem [resolvable:$true] %s49_s28 }
   0x8   :  { %s5301_s19 = smov 8   ;;  %s5302_s1 = smov [#allocation10]  }
   0x9   :  { %55 = dma.hbm_to_vmem [thread:$0]  %s48_s26, 512, %s50_s28, [#allocation8], %s5300_s18, %s5300_s18, %s5301_s19  }
   0xa   :  { %s79_s20 = sshll.u32 %s5302_s1, 4  ;;  %s105_s22 = sshll.u32 %s6618_s10, 4  ;;  %s80_s20 = int_to_ptr.vmem [resolvable:$true] %s79_s20  ;;  %s106_s22 = int_to_ptr.hbm [resolvable:$true] %s105_s22 }
   0xb   :  { %85 = dma.hbm_to_vmem [thread:$0]  %s78_s30, 512, %s80_s20, [#allocation11], %s5300_s18, %s5300_s18, %s5301_s19  }
   0xc   :  { %s6629_s24 = sld [smem:[#allocation21_spill]]  ;;  %s5303_s27 = smov [#allocation13]  }
   0xd   :  { %s107_s29 = sshll.u32 %s5303_s27, 4  ;;  %s5304_s26 = smov [#allocation5]   ;;  %s108_s29 = int_to_ptr.vmem [resolvable:$true] %s107_s29 }
   0xe   :  { %113 = dma.hbm_to_vmem [thread:$0]  %s106_s22, 512, %s108_s29, [#allocation14], %s5300_s18, %s5300_s18, %s5301_s19  }
   0xf   :  { %s34_s10 = sshll.u32 %s5304_s26, 4  ;;  %s5305_s28 = smov 256   ;;  %s35_s10 = int_to_ptr.vmem [resolvable:$true] %s34_s10 }
  0x10   :  { %s5306_s0 = smov 16   ;;  %s64_s20 = sshll.u32 %s6614_s6, 4  ;;  %s65_s20 = int_to_ptr.hbm [resolvable:$true] %s64_s20 }
  0x11   :  { %s5307_s21 = smov [#allocation9]   ;;  %s5308_s22 = smov [#allocation12]  }
  0x12   :  { %s32_s25 = sshll.u32 %s6629_s24, 4  ;;  %s66_s3 = sshll.u32 %s5307_s21, 4  ;;  %s33_s25 = int_to_ptr.hbm [resolvable:$true] %s32_s25  ;;  %s67_s3 = int_to_ptr.vmem [resolvable:$true] %s66_s3 }
  0x13   :  { %40 = dma.hbm_to_vmem [thread:$0]  %s33_s25, 1024, %s35_s10, [#allocation6], %s5305_s28, %s5305_s28, %s5306_s0  }
  0x14   :  { %s92_s24 = sshll.u32 %s6617_s9, 4  ;;  %s94_s27 = sshll.u32 %s5308_s22, 4  ;;  %s93_s24 = int_to_ptr.hbm [resolvable:$true] %s92_s24  ;;  %s95_s27 = int_to_ptr.vmem [resolvable:$true] %s94_s27 }
  0x15   :  { %72 = dma.hbm_to_vmem [thread:$0]  %s65_s20, 512, %s67_s3, [#allocation8], %s5300_s18, %s5300_s18, %s5301_s19  }
  0x16   :  { %s118_s26 = sshll.u32 %s6619_s11, 4  ;;  %s5309_s6 = smov [#allocation15]   ;;  %s119_s26 = int_to_ptr.hbm [resolvable:$true] %s118_s26 }
  0x17   :  { %100 = dma.hbm_to_vmem [thread:$0]  %s93_s24, 2048, %s95_s27, [#allocation11], %s5305_s28, %s5305_s28, %s5306_s0  }
  0x18   :  { %s120_s10 = sshll.u32 %s5309_s6, 4  ;;  %s121_s10 = int_to_ptr.vmem [resolvable:$true] %s120_s10 }
  0x19   :  { %126 = dma.hbm_to_vmem [thread:$0]  %s119_s26, 512, %s121_s10, [#allocation14], %s5300_s18, %s5300_s18, %s5301_s19  }
  0x1a   :  { %5291 = dma.done.wait [#allocation6], 1024  }
  0x1b   :  { %5292 = vsyncadd [#allocation6], 4294966272 }
  0x1c   :  { %5293 = dma.done.wait [#allocation8], 1024  }
  0x1d   :  { %5294 = vsyncadd [#allocation8], 4294966272 }
  0x1e   :  { %5295 = dma.done.wait [#allocation11], 2560  }
  0x1f   :  { %5296 = vsyncadd [#allocation11], 4294964736 }
  0x20   :  { %5297 = dma.done.wait [#allocation14], 1024  }
  0x21   :  { %5298 = vsyncadd [#allocation14], 4294966272  ;;  %v179_v0 = vld [vmem:[#allocation5 + $0x30] sm:$0xff]  ;;  %v5442_v1 = vld [vmem:[%s6610_s2 + $0x18] sm:$0xff]  ;;  %s6630_s3 = sld [smem:[#allocation20_spill]]  ;;  %vm187_vm0 = vcmask 261120  }
  0x22   :  { %v177_v2 = vld [vmem:[#allocation5 + $0x20] sm:$0xff]  ;;  %4675 = vmatpush.msra.mxu3 %v179_v0  ;;  %334 = vmatpush.msra.mxu2 %v5442_v1  ;;  %v5448_v3 = vld [vmem:[%s6610_s2 + $0x10] sm:$0xff]  ;;  %v5453_v5 = vld [vmem:[%s6610_s2 + $0x8] sm:$0xff]  ;;  %v5310_v12 = vmov 0.0   ;;  %s5311_s29 = smov 64  }
  0x23   :  { %224 = vmatpush.msra.mxu0 %v179_v0  ;;  %v175_v4 = vld [vmem:[#allocation5 + $0x10] sm:$0xff]  ;;  %v180_v6 = vld [vmem:[#allocation5 + $0x38] sm:$0xff]  ;;  %v173_v7 = vld [vmem:[#allocation5] sm:$0xff] }
  0x24   :  { %4676 = vmatpush.msra.mxu3 %v177_v2  ;;  %335 = vmatpush.msra.mxu2 %v5448_v3  ;;  %v5459_v8 = vld [vmem:[%s6610_s2] sm:$0xff]  ;;  %v178_v10 = vld [vmem:[#allocation5 + $0x28] sm:$0xff]  ;;  %v176_v13 = vld [vmem:[#allocation5 + $0x18] sm:$0xff] }
  0x25   :  { %225 = vmatpush.msra.mxu0 %v177_v2  ;;  %265 = vmatpush.msra.mxu1 %v180_v6  ;;  %v174_v14 = vld [vmem:[#allocation5 + $0x8] sm:$0xff]  ;;  %v5477_v16 = vld [vmem:[#allocation7 + $0x18] sm:$0xff]  ;;  %v5482_v17 = vld [vmem:[#allocation7 + $0x10] sm:$0xff] }
  0x26   :  { %4677 = vmatpush.msra.mxu3 %v175_v4  ;;  %336 = vmatpush.msra.mxu2 %v5453_v5  ;;  %v5487_v18 = vld [vmem:[#allocation7 + $0x8] sm:$0xff]  ;;  %v5491_v19 = vld [vmem:[#allocation7] sm:$0xff] }
  0x27   :  { %v171_v9 = vld [vmem:[%s6630_s3 + $0x30] sm:$0xff]  ;;  %226 = vmatpush.msra.mxu0 %v175_v4  ;;  %266 = vmatpush.msra.mxu1 %v178_v10  ;;  %v165_v11 = vld [vmem:[%s6630_s3] sm:$0xff]  ;;  %v172_v15 = vld [vmem:[%s6630_s3 + $0x38] sm:$0xff] }
  0x28   :  { %4678 = vmatpush.msra.mxu3 %v173_v7  ;;  %337 = vmatpush.msra.mxu2 %v5459_v8  ;;  %v181_v20 = vld [vmem:[%s6612_s4] sm:$0x3]  ;;  %s5312_s4 = smov 32  }
  0x29   :  { %4479 = vmatmul.msk.f32.vlgmr.msra.gmra.mxu3 %vm187_vm0, %v171_v9  ;;  %338 = vmatmul.f32.vlgmr.msra.gmra.mxu2 %v5310_v12  ;;  %v5511_v21 = vperm.slane %v181_v20, 0  ;;  %v5521_v31 = vperm.slane %v181_v20, 1 }
  0x2a   :  { %4679 = vmatpush.msrb.mxu3 %v180_v6  ;;  %227 = vmatpush.msra.mxu0 %v173_v7 }
  0x2b   :  { %4473 = vmatmul.msk.f32.vlgmr.msra.gmra.mxu0 %vm187_vm0, %v165_v11  ;;  %464 = vmatpush.msrb.mxu2 %v5442_v1 }
  0x2c   :  { %4680 = vmatpush.msrb.mxu3 %v178_v10  ;;  %267 = vmatpush.msra.mxu1 %v176_v13 }
  0x2d   :  { %465 = vmatpush.msrb.mxu2 %v5448_v3 }
  0x2e   :  { %4681 = vmatpush.msrb.mxu3 %v176_v13  ;;  %268 = vmatpush.msra.mxu1 %v174_v14 }
  0x2f   :  { %466 = vmatpush.msrb.mxu2 %v5453_v5  ;;  %4481 = vmatmul.msk.f32.vlgmr.msra.gmra.mxu1 %vm187_vm0, %v165_v11 }
  0x30   :  { %4682 = vmatpush.msrb.mxu3 %v174_v14 }
  0x31   :  { %4480 = vmatmul.msk.f32.gmra.mxu3 %vm187_vm0, %v172_v15  ;;  %467 = vmatpush.msrb.mxu2 %v5459_v8 }
  0x32   :  { %356 = vmatpush.msra.mxu3 %v5477_v16 }
  0x33   :  { %596 = vmatpush.msra.mxu2 %v5442_v1 }
  0x34   :  { %357 = vmatpush.msra.mxu3 %v5482_v17 }
  0x35   :  { %597 = vmatpush.msra.mxu2 %v5448_v3 }
  0x36   :  { %358 = vmatpush.msra.mxu3 %v5487_v18 }
  0x37   :  { %598 = vmatpush.msra.mxu2 %v5453_v5 }
  0x38   :  { %359 = vmatpush.msra.mxu3 %v5491_v19 }
  0x39   :  { %599 = vmatpush.msra.mxu2 %v5459_v8  ;;  %4487 = vmatmul.msk.f32.vlgmr.msrb.gmra.mxu3 %vm187_vm0, %v171_v9 }
  0x3a   :  { %488 = vmatpush.msrb.mxu3 %v5477_v16 }
  0x3c   :  { %489 = vmatpush.msrb.mxu3 %v5482_v17 }
  0x3e   :  { %490 = vmatpush.msrb.mxu3 %v5487_v18 }
  0x40   :  { %491 = vmatpush.msrb.mxu3 %v5491_v19 }
  0x41   :  { %4488 = vmatmul.msk.f32.gmra.mxu3 %vm187_vm0, %v172_v15 }
  0x49   :  { %360 = vmatmul.f32.vlgmr.msra.gmra.mxu3 %v5310_v12 }
  0x4a   :  { %620 = vmatpush.msra.mxu3 %v5477_v16 }
  0x4c   :  { %621 = vmatpush.msra.mxu3 %v5482_v17 }
  0x4e   :  { %622 = vmatpush.msra.mxu3 %v5487_v18 }
  0x50   :  { %623 = vmatpush.msra.mxu3 %v5491_v19 }
  0xa8   :  { %v229_v22 = vpop.f32.mrf.mxu0 }
  0xa9   :  { %v230_v23 = vadd.f32 %v229_v22, %v5511_v21 }
  0xac   :  { %v5514_v24 = vpop.f32.mrf.mxu3  ;;  %v339_v25 = vpop.f32.mrf.mxu2 }
  0xad   :  { %v342_v26 = vadd.f32 %v339_v25, %v230_v23  ;;  %v166_v25 = vld [vmem:[%s6630_s3 + $0x8] sm:$0xff] }
  0xae   :  { %4474 = vmatmul.msk.f32.gmra.mxu0 %vm187_vm0, %v166_v25  ;;  %4482 = vmatmul.msk.f32.gmra.mxu1 %vm187_vm0, %v166_v25 }
  0xaf   :  { %4703 = vtanh.f32 %v342_v26  ;;  %v4489_v36 = vmul.f32 -1.442695, %v342_v26 }
  0xb4   :  { %v5516_v27 = vpop.f32.mrf.mxu3 }
  0xb5   :  { %v4704_v28 = vpop.eup %4703 }
  0xb6   :  { %387 = vrot.lane.b32.xlu0 %v4704_v28, %s5311_s29 }
  0xbc   :  { %v5519_v29 = vpop.f32.mrf.mxu3 }
  0xc4   :  { %v291_v30 = vpop.f32.mrf.mxu3 }
  0xc5   :  { %v292_v32 = vadd.f32 %v291_v30, %v5521_v31 }
  0xcc   :  { %v361_v33 = vpop.f32.mrf.mxu3 }
  0xcd   :  { %v364_v34 = vadd.f32 %v361_v33, %v292_v32 }
  0xcf   :  { %4705 = vtanh.f32 %v364_v34  ;;  %v4490_v42 = vmul.f32 -1.442695, %v364_v34 }
  0xd0   :  { %4707 = vpow2.f32 %v4489_v36  ;;  %v289_v36 = vadd.f32 %v5519_v29, %v5521_v31 }
  0xd5   :  { %v4706_v35 = vpop.eup %4705 }
  0xd6   :  { %424 = vrot.lane.b32.xlu0 %v4706_v35, %s5311_s29  ;;  %v4708_v37 = vpop.eup %4707 }
  0xd7   :  { %v368_v38 = vadd.f32 1.0, %v4708_v37 }
  0xd9   :  { %4709 = vrcp.f32 %v368_v38  ;;  %vm374_vm1 = vweird.f32 %v368_v38  ;;  %v380_v44 = vand.u32 2147483648, %v368_v38  ;;  %v378_v46 = vand.u32 2147483647, %v368_v38 }
  0xda   :  { %4711 = vpow2.f32 %v4490_v42 }
  0xdb   :  { %v381_v47 = vor.u32 1.1754944e-38, %v380_v44  ;;  %vm379_vm4 = vcmp.eq.f32.partialorder %v378_v46, 8.507059e+37 }
  0xdf   :  { %v4710_v39 = vpop.eup %4709 }
  0xe0   :  { %v370_v40 = vmul.f32 %v4710_v39, %v368_v38  ;;  %vm375_vm2 = vweird.f32 %v4710_v39  ;;  %v4712_v48 = vpop.eup %4711 }
  0xe1   :  { %vm376_vm3 = vmor %vm374_vm1, %vm375_vm2  ;;  %v405_v50 = vadd.f32 1.0, %v4712_v48 }
  0xe2   :  { %v371_v41 = vsub.f32 1.0, %v370_v40 }
  0xe3   :  { %4713 = vrcp.f32 %v405_v50  ;;  %v417_v59 = vand.u32 2147483648, %v405_v50  ;;  %vm411_vm6 = vweird.f32 %v405_v50  ;;  %v415_v60 = vand.u32 2147483647, %v405_v50 }
  0xe4   :  { %v372_v43 = vmul.f32 %v4710_v39, %v371_v41 }
  0xe5   :  { %v418_v62 = vor.u32 1.1754944e-38, %v417_v59  ;;  %vm416_vm8 = vcmp.eq.f32.partialorder %v415_v60, 8.507059e+37 }
  0xe6   :  { %v373_v45 = vadd.f32 %v4710_v39, %v372_v43 }
  0xe8   :  { %v377_v49 = vsel %vm376_vm3, %v4710_v39, %v373_v45 }
  0xe9   :  { %v382_v52 = vsel %vm379_vm4, %v381_v47, %v377_v49  ;;  %v4714_v54 = vpop.eup %4713 }
  0xea   :  { %v407_v55 = vmul.f32 %v4714_v54, %v405_v50  ;;  %vm412_vm5 = vweird.f32 %v4714_v54  ;;  %v385_v4 = vmul.f32 0.0, %v382_v52 }
  0xeb   :  { %vm413_vm7 = vmor %vm411_vm6, %vm412_vm5 }
  0xec   :  { %v408_v56 = vsub.f32 1.0, %v407_v55 }
  0xee   :  { %v409_v57 = vmul.f32 %v4714_v54, %v408_v56 }
  0xf0   :  { %v410_v58 = vadd.f32 %v4714_v54, %v409_v57 }
  0xf2   :  { %v414_v61 = vsel %vm413_vm7, %v4714_v54, %v410_v58 }
  0xf3   :  { %v419_v63 = vsel %vm416_vm8, %v418_v62, %v414_v61 }
  0xf4   :  { %v422_v10 = vmul.f32 0.0, %v419_v63 }
 0x128   :  { %v388_v51 = vpop.permute.xlu0 %387 }
 0x129   :  { %v390_v53 = vmul.f32 %v388_v51, %v382_v52 }
 0x12b   :  { %392 = vrot.lane.b32.xlu1 %v390_v53, %s5312_s4  ;;  %v232_v30 = vpop.f32.mrf.mxu0 }
 0x12c   :  { %v233_v32 = vadd.f32 %v232_v30, %v5511_v21 }
 0x148   :  { %v425_v0 = vpop.permute.xlu0 %424 }
 0x149   :  { %v427_v2 = vmul.f32 %v425_v0, %v419_v63 }
 0x14b   :  { %429 = vrot.lane.b32.xlu1 %v427_v2, %s5312_s4 }
 0x19d   :  { %v393_v6 = vpop.permute.xlu1 %392 }
 0x19e   :  { %v5527_v7 = vadd.f32 %v393_v6, %v385_v4 }
 0x1a0   :  { %4715 = vtanh.f32 %v5527_v7 }
 0x1a6   :  { %v4716_v9 = vpop.eup %4715 }
 0x1a7   :  { %398 = vrot.lane.b32.xlu2 %v4716_v9, %s5311_s29 }
 0x1bd   :  { %v430_v11 = vpop.permute.xlu1 %429 }
 0x1be   :  { %v5531_v13 = vadd.f32 %v430_v11, %v422_v10 }
 0x1c0   :  { %4717 = vtanh.f32 %v5531_v13 }
 0x1c6   :  { %v4718_v14 = vpop.eup %4717 }
 0x1c7   :  { %435 = vrot.lane.b32.xlu2 %v4718_v14, %s5311_s29 }
 0x201   :  { %v399_v15 = vpop.permute.xlu2 %398 }
 0x202   :  { %v401_v20 = vmul.f32 %v399_v15, %v382_v52 }
 0x204   :  { %440 = vrot.lane.b32.xlu0 %v401_v20, %s5312_s4 }
 0x221   :  { %v436_v22 = vpop.permute.xlu2 %435 }
 0x222   :  { %v438_v23 = vmul.f32 %v436_v22, %v419_v63 }
 0x224   :  { %445 = vrot.lane.b32.xlu1 %v438_v23, %s5312_s4 }
 0x276   :  { %v441_v26 = vpop.permute.xlu0 %440 }
 0x277   :  { %443 = vst.msk [vmem:[#allocation3] sm:$0xff] %vm187_vm0, %v441_v26  ;;  %4491 = vmatmul.msk.f32.vlgmr.msrb.gmra.mxu2 %vm187_vm0, %v441_v26 }
 0x278   :  { %728 = vmatpush.msrb.mxu2 %v5442_v1 }
 0x27a   :  { %729 = vmatpush.msrb.mxu2 %v5448_v3 }
 0x27c   :  { %730 = vmatpush.msrb.mxu2 %v5453_v5 }
 0x27e   :  { %731 = vmatpush.msrb.mxu2 %v5459_v8 }
 0x296   :  { %v446_v28 = vpop.permute.xlu1 %445 }
 0x297   :  { %448 = vst.msk [vmem:[#allocation4 + $0x38] sm:$0xff] %vm187_vm0, %v446_v28  ;;  %4492 = vmatmul.msk.f32.vlgmr.msrb.gmra.mxu3 %vm187_vm0, %v446_v28 }
 0x298   :  { %752 = vmatpush.msrb.mxu3 %v5477_v16 }
 0x29a   :  { %753 = vmatpush.msrb.mxu3 %v5482_v17 }
 0x29c   :  { %754 = vmatpush.msrb.mxu3 %v5487_v18 }
 0x29e   :  { %755 = vmatpush.msrb.mxu3 %v5491_v19 }
 0x2fa   :  { %v469_v33 = vpop.f32.mrf.mxu2 }
 0x2fb   :  { %v472_v34 = vadd.f32 %v469_v33, %v233_v32  ;;  %v168_v32 = vld [vmem:[%s6630_s3 + $0x18] sm:$0xff]  ;;  %v169_v33 = vld [vmem:[%s6630_s3 + $0x20] sm:$0xff] }
 0x2fd   :  { %4719 = vtanh.f32 %v472_v34  ;;  %v4493_v40 = vmul.f32 -1.442695, %v472_v34 }
 0x303   :  { %v4720_v35 = vpop.eup %4719 }
 0x304   :  { %519 = vrot.lane.b32.xlu2 %v4720_v35, %s5311_s29  ;;  %v170_v35 = vld [vmem:[%s6630_s3 + $0x28] sm:$0xff] }
 0x31a   :  { %v493_v37 = vpop.f32.mrf.mxu3 }
 0x31b   :  { %v496_v38 = vadd.f32 %v493_v37, %v289_v36 }
 0x31d   :  { %4721 = vtanh.f32 %v496_v38  ;;  %v4494_v54 = vmul.f32 -1.442695, %v496_v38 }
 0x31e   :  { %4723 = vpow2.f32 %v4493_v40  ;;  %v5606_v40 = vpop.f32.mrf.mxu1 }
 0x323   :  { %v4722_v39 = vpop.eup %4721 }
 0x324   :  { %556 = vrot.lane.b32.xlu0 %v4722_v39, %s5311_s29  ;;  %v4724_v41 = vpop.eup %4723 }
 0x325   :  { %v500_v42 = vadd.f32 1.0, %v4724_v41 }
 0x327   :  { %4725 = vrcp.f32 %v500_v42  ;;  %v512_v48 = vand.u32 2147483648, %v500_v42  ;;  %vm506_vm10 = vweird.f32 %v500_v42  ;;  %v510_v29 = vand.u32 2147483647, %v500_v42 }
 0x328   :  { %4727 = vpow2.f32 %v4494_v54 }
 0x329   :  { %v513_v50 = vor.u32 1.1754944e-38, %v512_v48  ;;  %vm511_vm12 = vcmp.eq.f32.partialorder %v510_v29, 8.507059e+37 }
 0x32d   :  { %v4726_v43 = vpop.eup %4725 }
 0x32e   :  { %v502_v44 = vmul.f32 %v4726_v43, %v500_v42  ;;  %vm507_vm9 = vweird.f32 %v4726_v43  ;;  %v4728_v55 = vpop.eup %4727 }
 0x32f   :  { %vm508_vm11 = vmor %vm506_vm10, %vm507_vm9  ;;  %v537_v56 = vadd.f32 1.0, %v4728_v55 }
 0x330   :  { %v503_v45 = vsub.f32 1.0, %v502_v44 }
 0x331   :  { %4729 = vrcp.f32 %v537_v56  ;;  %v549_v62 = vand.u32 2147483648, %v537_v56  ;;  %vm543_vm14 = vweird.f32 %v537_v56  ;;  %v547_v63 = vand.u32 2147483647, %v537_v56 }
 0x332   :  { %v504_v46 = vmul.f32 %v4726_v43, %v503_v45 }
 0x333   :  { %v550_v2 = vor.u32 1.1754944e-38, %v549_v62  ;;  %vm548_vm1 = vcmp.eq.f32.partialorder %v547_v63, 8.507059e+37 }
 0x334   :  { %v505_v47 = vadd.f32 %v4726_v43, %v504_v46 }
 0x336   :  { %v509_v49 = vsel %vm508_vm11, %v4726_v43, %v505_v47  ;;  %v5609_v43 = vpop.f32.mrf.mxu1 }
 0x337   :  { %v514_v51 = vsel %vm511_vm12, %v513_v50, %v509_v49  ;;  %v4730_v57 = vpop.eup %4729 }
 0x338   :  { %v539_v58 = vmul.f32 %v4730_v57, %v537_v56  ;;  %vm544_vm13 = vweird.f32 %v4730_v57  ;;  %v517_v10 = vmul.f32 %v514_v51, %v5527_v7 }
 0x339   :  { %vm545_vm15 = vmor %vm543_vm14, %vm544_vm13 }
 0x33a   :  { %v540_v59 = vsub.f32 1.0, %v539_v58 }
 0x33c   :  { %v541_v60 = vmul.f32 %v4730_v57, %v540_v59 }
 0x33e   :  { %v542_v61 = vadd.f32 %v4730_v57, %v541_v60 }
 0x340   :  { %v546_v0 = vsel %vm545_vm15, %v4730_v57, %v542_v61 }
 0x341   :  { %v551_v6 = vsel %vm548_vm1, %v550_v2, %v546_v0 }
 0x342   :  { %v554_v20 = vmul.f32 %v551_v6, %v5531_v13  ;;  %v167_v13 = vld [vmem:[%s6630_s3 + $0x10] sm:$0xff] }
 0x343   :  { %4475 = vmatmul.msk.f32.gmra.mxu0 %vm187_vm0, %v167_v13  ;;  %4483 = vmatmul.msk.f32.gmra.mxu1 %vm187_vm0, %v167_v13 }
 0x34b   :  { %4484 = vmatmul.msk.f32.gmra.mxu1 %vm187_vm0, %v168_v32  ;;  %4476 = vmatmul.msk.f32.gmra.mxu0 %vm187_vm0, %v168_v32 }
 0x353   :  { %4485 = vmatmul.msk.f32.gmra.mxu1 %vm187_vm0, %v169_v33  ;;  %4477 = vmatmul.msk.f32.gmra.mxu0 %vm187_vm0, %v169_v33 }
 0x35b   :  { %4486 = vmatmul.msk.f32.gmra.mxu1 %vm187_vm0, %v170_v35  ;;  %4478 = vmatmul.msk.f32.gmra.mxu0 %vm187_vm0, %v170_v35 }
 0x35e   :  { %v520_v52 = vpop.permute.xlu2 %519 }
 0x35f   :  { %v522_v53 = vmul.f32 %v520_v52, %v514_v51 }
 0x361   :  { %524 = vrot.lane.b32.xlu1 %v522_v53, %s5312_s4 }
 0x396   :  { %v557_v4 = vpop.permute.xlu0 %556 }
 0x397   :  { %v559_v9 = vmul.f32 %v557_v4, %v551_v6 }
 0x399   :  { %561 = vrot.lane.b32.xlu2 %v559_v9, %s5312_s4 }
 0x3c0   :  { %v235_v37 = vpop.f32.mrf.mxu0  ;;  %v5611_v44 = vpop.f32.mrf.mxu1 }
 0x3c1   :  { %v236_v38 = vadd.f32 %v235_v37, %v5511_v21 }
 0x3c8   :  { %v5613_v45 = vpop.f32.mrf.mxu1 }
 0x3d0   :  { %v5615_v46 = vpop.f32.mrf.mxu1 }
 0x3d3   :  { %v525_v11 = vpop.permute.xlu1 %524 }
 0x3d4   :  { %v5562_v14 = vadd.f32 %v525_v11, %v517_v10 }
 0x3d6   :  { %4731 = vtanh.f32 %v5562_v14 }
 0x3d8   :  { %v285_v47 = vpop.f32.mrf.mxu1 }
 0x3d9   :  { %v286_v48 = vadd.f32 %v285_v47, %v5521_v31 }
 0x3dc   :  { %v4732_v15 = vpop.eup %4731 }
 0x3dd   :  { %530 = vrot.lane.b32.xlu0 %v4732_v15, %s5311_s29 }
 0x3f3   :  { %v562_v22 = vpop.permute.xlu2 %561 }
 0x3f4   :  { %v5567_v23 = vadd.f32 %v562_v22, %v554_v20 }
 0x3f6   :  { %4733 = vtanh.f32 %v5567_v23 }
 0x3fc   :  { %v4734_v25 = vpop.eup %4733 }
 0x3fd   :  { %567 = vrot.lane.b32.xlu1 %v4734_v25, %s5311_s29 }
 0x44f   :  { %v531_v26 = vpop.permute.xlu0 %530 }
 0x450   :  { %v533_v7 = vmul.f32 %v531_v26, %v514_v51 }
 0x452   :  { %572 = vrot.lane.b32.xlu2 %v533_v7, %s5312_s4 }
 0x46f   :  { %v568_v28 = vpop.permute.xlu1 %567 }
 0x470   :  { %v570_v30 = vmul.f32 %v568_v28, %v551_v6 }
 0x472   :  { %577 = vrot.lane.b32.xlu0 %v570_v30, %s5312_s4 }
 0x4ac   :  { %v573_v34 = vpop.permute.xlu2 %572 }
 0x4ad   :  { %575 = vst.msk [vmem:[#allocation3 + $0x8] sm:$0xff] %vm187_vm0, %v573_v34  ;;  %4495 = vmatmul.msk.f32.vlgmr.msra.gmra.mxu2 %vm187_vm0, %v573_v34 }
 0x4ae   :  { %860 = vmatpush.msra.mxu2 %v5442_v1 }
 0x4b0   :  { %861 = vmatpush.msra.mxu2 %v5448_v3 }
 0x4b2   :  { %862 = vmatpush.msra.mxu2 %v5453_v5 }
 0x4b4   :  { %863 = vmatpush.msra.mxu2 %v5459_v8 }
 0x4e4   :  { %v578_v36 = vpop.permute.xlu0 %577 }
 0x4e5   :  { %580 = vst.msk [vmem:[#allocation4 + $0x30] sm:$0xff] %vm187_vm0, %v578_v36  ;;  %4496 = vmatmul.msk.f32.vlgmr.msra.gmra.mxu3 %vm187_vm0, %v578_v36 }
 0x4e6   :  { %884 = vmatpush.msra.mxu3 %v5477_v16 }
 0x4e8   :  { %885 = vmatpush.msra.mxu3 %v5482_v17 }
 0x4ea   :  { %886 = vmatpush.msra.mxu3 %v5487_v18 }
 0x4ec   :  { %887 = vmatpush.msra.mxu3 %v5491_v19 }
 0x530   :  { %v601_v39 = vpop.f32.mrf.mxu2 }
 0x531   :  { %v604_v41 = vadd.f32 %v601_v39, %v236_v38 }
 0x533   :  { %4735 = vtanh.f32 %v604_v41  ;;  %v4497_v51 = vmul.f32 -1.442695, %v604_v41 }
 0x539   :  { %v4736_v42 = vpop.eup %4735 }
 0x53a   :  { %651 = vrot.lane.b32.xlu1 %v4736_v42, %s5311_s29 }
 0x568   :  { %v625_v29 = vpop.f32.mrf.mxu3 }
 0x569   :  { %v628_v49 = vadd.f32 %v625_v29, %v286_v48 }
 0x56b   :  { %4737 = vtanh.f32 %v628_v49  ;;  %v4498_v57 = vmul.f32 -1.442695, %v628_v49  ;;  %v238_v49 = vpop.f32.mrf.mxu0 }
 0x56c   :  { %4739 = vpow2.f32 %v4497_v51 }
 0x571   :  { %v4738_v50 = vpop.eup %4737 }
 0x572   :  { %688 = vrot.lane.b32.xlu2 %v4738_v50, %s5311_s29  ;;  %v4740_v52 = vpop.eup %4739  ;;  %v239_v50 = vadd.f32 %v238_v49, %v5511_v21 }
 0x573   :  { %v632_v53 = vadd.f32 1.0, %v4740_v52 }
 0x575   :  { %4741 = vrcp.f32 %v632_v53  ;;  %v644_v60 = vand.u32 2147483648, %v632_v53  ;;  %vm638_vm3 = vweird.f32 %v632_v53  ;;  %v642_v61 = vand.u32 2147483647, %v632_v53 }
 0x576   :  { %4743 = vpow2.f32 %v4498_v57 }
 0x577   :  { %v645_v0 = vor.u32 1.1754944e-38, %v644_v60  ;;  %vm643_vm5 = vcmp.eq.f32.partialorder %v642_v61, 8.507059e+37 }
 0x57b   :  { %v4742_v54 = vpop.eup %4741 }
 0x57c   :  { %v634_v55 = vmul.f32 %v4742_v54, %v632_v53  ;;  %vm639_vm2 = vweird.f32 %v4742_v54  ;;  %v4744_v62 = vpop.eup %4743 }
 0x57d   :  { %vm640_vm4 = vmor %vm638_vm3, %vm639_vm2  ;;  %v669_v2 = vadd.f32 1.0, %v4744_v62 }
 0x57e   :  { %v635_v56 = vsub.f32 1.0, %v634_v55 }
 0x57f   :  { %4745 = vrcp.f32 %v669_v2  ;;  %v681_v25 = vand.u32 2147483648, %v669_v2  ;;  %vm675_vm7 = vweird.f32 %v669_v2  ;;  %v679_v26 = vand.u32 2147483647, %v669_v2 }
 0x580   :  { %v636_v58 = vmul.f32 %v4742_v54, %v635_v56 }
 0x581   :  { %v682_v28 = vor.u32 1.1754944e-38, %v681_v25  ;;  %vm680_vm9 = vcmp.eq.f32.partialorder %v679_v26, 8.507059e+37 }
 0x582   :  { %v637_v59 = vadd.f32 %v4742_v54, %v636_v58 }
 0x584   :  { %v641_v63 = vsel %vm640_vm4, %v4742_v54, %v637_v59  ;;  %v283_v54 = vadd.f32 %v5615_v46, %v5521_v31 }
 0x585   :  { %v646_v6 = vsel %vm643_vm5, %v645_v0, %v641_v63  ;;  %v4746_v10 = vpop.eup %4745 }
 0x586   :  { %v671_v11 = vmul.f32 %v4746_v10, %v669_v2  ;;  %vm676_vm6 = vweird.f32 %v4746_v10  ;;  %v649_v33 = vmul.f32 %v646_v6, %v5562_v14 }
 0x587   :  { %vm677_vm8 = vmor %vm675_vm7, %vm676_vm6 }
 0x588   :  { %v672_v15 = vsub.f32 1.0, %v671_v11 }
 0x58a   :  { %v673_v20 = vmul.f32 %v4746_v10, %v672_v15 }
 0x58c   :  { %v674_v22 = vadd.f32 %v4746_v10, %v673_v20 }
 0x58e   :  { %v678_v7 = vsel %vm677_vm8, %v4746_v10, %v674_v22 }
 0x58f   :  { %v683_v30 = vsel %vm680_vm9, %v682_v28, %v678_v7 }
 0x590   :  { %v686_v37 = vmul.f32 %v683_v30, %v5567_v23 }
 0x5ac   :  { %v652_v4 = vpop.permute.xlu1 %651 }
 0x5ad   :  { %v654_v9 = vmul.f32 %v652_v4, %v646_v6 }
 0x5af   :  { %656 = vrot.lane.b32.xlu0 %v654_v9, %s5312_s4 }
 0x5cc   :  { %v689_v13 = vpop.permute.xlu2 %688 }
 0x5cd   :  { %v691_v32 = vmul.f32 %v689_v13, %v683_v30 }
 0x5cf   :  { %693 = vrot.lane.b32.xlu1 %v691_v32, %s5312_s4 }
 0x621   :  { %v657_v34 = vpop.permute.xlu0 %656 }
 0x622   :  { %v5622_v35 = vadd.f32 %v657_v34, %v649_v33 }
 0x624   :  { %4747 = vtanh.f32 %v5622_v35 }
 0x62a   :  { %v4748_v36 = vpop.eup %4747 }
 0x62b   :  { %662 = vrot.lane.b32.xlu2 %v4748_v36, %s5311_s29 }
 0x641   :  { %v694_v38 = vpop.permute.xlu1 %693 }
 0x642   :  { %v5627_v39 = vadd.f32 %v694_v38, %v686_v37 }
 0x644   :  { %4749 = vtanh.f32 %v5627_v39 }
 0x64a   :  { %v4750_v41 = vpop.eup %4749 }
 0x64b   :  { %699 = vrot.lane.b32.xlu0 %v4750_v41, %s5311_s29 }
 0x685   :  { %v663_v42 = vpop.permute.xlu2 %662 }
 0x686   :  { %v665_v14 = vmul.f32 %v663_v42, %v646_v6 }
 0x688   :  { %704 = vrot.lane.b32.xlu1 %v665_v14, %s5312_s4 }
 0x6bd   :  { %v700_v47 = vpop.permute.xlu0 %699 }
 0x6be   :  { %v702_v48 = vmul.f32 %v700_v47, %v683_v30 }
 0x6c0   :  { %709 = vrot.lane.b32.xlu2 %v702_v48, %s5312_s4 }
 0x6fa   :  { %v705_v29 = vpop.permute.xlu1 %704 }
 0x6fb   :  { %707 = vst.msk [vmem:[#allocation3 + $0x10] sm:$0xff] %vm187_vm0, %v705_v29  ;;  %4499 = vmatmul.msk.f32.vlgmr.msrb.gmra.mxu2 %vm187_vm0, %v705_v29 }
 0x6fc   :  { %992 = vmatpush.msrb.mxu2 %v5442_v1 }
 0x6fe   :  { %993 = vmatpush.msrb.mxu2 %v5448_v3 }
 0x700   :  { %994 = vmatpush.msrb.mxu2 %v5453_v5 }
 0x702   :  { %995 = vmatpush.msrb.mxu2 %v5459_v8 }
 0x71a   :  { %v710_v23 = vpop.permute.xlu2 %709 }
 0x71b   :  { %712 = vst.msk [vmem:[#allocation4 + $0x28] sm:$0xff] %vm187_vm0, %v710_v23  ;;  %4500 = vmatmul.msk.f32.vlgmr.msrb.gmra.mxu3 %vm187_vm0, %v710_v23 }
 0x71c   :  { %1016 = vmatpush.msrb.mxu3 %v5477_v16 }
 0x71e   :  { %1017 = vmatpush.msrb.mxu3 %v5482_v17 }
 0x720   :  { %1018 = vmatpush.msrb.mxu3 %v5487_v18 }
 0x722   :  { %1019 = vmatpush.msrb.mxu3 %v5491_v19 }
 0x77e   :  { %v733_v51 = vpop.f32.mrf.mxu2 }
 0x77f   :  { %v736_v52 = vadd.f32 %v733_v51, %v239_v50 }
 0x781   :  { %4751 = vtanh.f32 %v736_v52  ;;  %v4501_v58 = vmul.f32 -1.442695, %v736_v52 }
 0x787   :  { %v4752_v53 = vpop.eup %4751 }
 0x788   :  { %783 = vrot.lane.b32.xlu0 %v4752_v53, %s5311_s29 }
 0x79e   :  { %v757_v55 = vpop.f32.mrf.mxu3 }
 0x79f   :  { %v760_v56 = vadd.f32 %v757_v55, %v283_v54 }
 0x7a1   :  { %4753 = vtanh.f32 %v760_v56  ;;  %v4502_v0 = vmul.f32 -1.442695, %v760_v56  ;;  %v280_v56 = vadd.f32 %v5613_v45, %v5521_v31 }
 0x7a2   :  { %4755 = vpow2.f32 %v4501_v58 }
 0x7a7   :  { %v4754_v57 = vpop.eup %4753 }
 0x7a8   :  { %820 = vrot.lane.b32.xlu1 %v4754_v57, %s5311_s29  ;;  %v4756_v59 = vpop.eup %4755 }
 0x7a9   :  { %v764_v60 = vadd.f32 1.0, %v4756_v59 }
 0x7ab   :  { %4757 = vrcp.f32 %v764_v60  ;;  %v776_v46 = vand.u32 2147483648, %v764_v60  ;;  %vm770_vm11 = vweird.f32 %v764_v60  ;;  %v774_v6 = vand.u32 2147483647, %v764_v60 }
 0x7ac   :  { %4759 = vpow2.f32 %v4502_v0 }
 0x7ad   :  { %v777_v11 = vor.u32 1.1754944e-38, %v776_v46  ;;  %vm775_vm13 = vcmp.eq.f32.partialorder %v774_v6, 8.507059e+37 }
 0x7b1   :  { %v4758_v61 = vpop.eup %4757 }
 0x7b2   :  { %v766_v62 = vmul.f32 %v4758_v61, %v764_v60  ;;  %vm771_vm10 = vweird.f32 %v4758_v61  ;;  %v4760_v9 = vpop.eup %4759 }
 0x7b3   :  { %vm772_vm12 = vmor %vm770_vm11, %vm771_vm10  ;;  %v801_v15 = vadd.f32 1.0, %v4760_v9 }
 0x7b4   :  { %v767_v63 = vsub.f32 1.0, %v766_v62 }
 0x7b5   :  { %4761 = vrcp.f32 %v801_v15  ;;  %v813_v32 = vand.u32 2147483648, %v801_v15  ;;  %vm807_vm15 = vweird.f32 %v801_v15  ;;  %v811_v33 = vand.u32 2147483647, %v801_v15 }
 0x7b6   :  { %v768_v2 = vmul.f32 %v4758_v61, %v767_v63 }
 0x7b7   :  { %v814_v36 = vor.u32 1.1754944e-38, %v813_v32  ;;  %vm812_vm2 = vcmp.eq.f32.partialorder %v811_v33, 8.507059e+37 }
 0x7b8   :  { %v769_v4 = vadd.f32 %v4758_v61, %v768_v2 }
 0x7ba   :  { %v773_v10 = vsel %vm772_vm12, %v4758_v61, %v769_v4 }
 0x7bb   :  { %v778_v22 = vsel %vm775_vm13, %v777_v11, %v773_v10  ;;  %v4762_v26 = vpop.eup %4761 }
 0x7bc   :  { %v803_v7 = vmul.f32 %v4762_v26, %v801_v15  ;;  %vm808_vm14 = vweird.f32 %v4762_v26  ;;  %v781_v42 = vmul.f32 %v778_v22, %v5622_v35 }
 0x7bd   :  { %vm809_vm1 = vmor %vm807_vm15, %vm808_vm14 }
 0x7be   :  { %v804_v28 = vsub.f32 1.0, %v803_v7 }
 0x7c0   :  { %v805_v30 = vmul.f32 %v4762_v26, %v804_v28 }
 0x7c2   :  { %v806_v13 = vadd.f32 %v4762_v26, %v805_v30 }
 0x7c4   :  { %v810_v34 = vsel %vm809_vm1, %v4762_v26, %v806_v13 }
 0x7c5   :  { %v815_v38 = vsel %vm812_vm2, %v814_v36, %v810_v34 }
 0x7c6   :  { %v818_v29 = vmul.f32 %v815_v38, %v5627_v39 }
 0x7fa   :  { %v784_v20 = vpop.permute.xlu0 %783 }
 0x7fb   :  { %v786_v25 = vmul.f32 %v784_v20, %v778_v22 }
 0x7fd   :  { %788 = vrot.lane.b32.xlu2 %v786_v25, %s5312_s4 }
 0x81a   :  { %v821_v37 = vpop.permute.xlu1 %820 }
 0x81b   :  { %v823_v41 = vmul.f32 %v821_v37, %v815_v38 }
 0x81d   :  { %825 = vrot.lane.b32.xlu0 %v823_v41, %s5312_s4 }
 0x857   :  { %v789_v14 = vpop.permute.xlu2 %788 }
 0x858   :  { %v5653_v47 = vadd.f32 %v789_v14, %v781_v42 }
 0x85a   :  { %4763 = vtanh.f32 %v5653_v47 }
 0x860   :  { %v4764_v48 = vpop.eup %4763 }
 0x861   :  { %794 = vrot.lane.b32.xlu1 %v4764_v48, %s5311_s29 }
 0x88f   :  { %v826_v23 = vpop.permute.xlu0 %825 }
 0x890   :  { %v5658_v49 = vadd.f32 %v826_v23, %v818_v29 }
 0x892   :  { %4765 = vtanh.f32 %v5658_v49 }
 0x898   :  { %v4766_v50 = vpop.eup %4765 }
 0x899   :  { %831 = vrot.lane.b32.xlu2 %v4766_v50, %s5311_s29 }
 0x8d3   :  { %v795_v51 = vpop.permute.xlu1 %794 }
 0x8d4   :  { %v797_v35 = vmul.f32 %v795_v51, %v778_v22 }
 0x8d6   :  { %836 = vrot.lane.b32.xlu0 %v797_v35, %s5312_s4 }
 0x8f3   :  { %v832_v52 = vpop.permute.xlu2 %831 }
 0x8f4   :  { %v834_v53 = vmul.f32 %v832_v52, %v815_v38 }
 0x8f6   :  { %841 = vrot.lane.b32.xlu1 %v834_v53, %s5312_s4 }
 0x948   :  { %v837_v54 = vpop.permute.xlu0 %836 }
 0x949   :  { %839 = vst.msk [vmem:[#allocation3 + $0x18] sm:$0xff] %vm187_vm0, %v837_v54  ;;  %4503 = vmatmul.msk.f32.vlgmr.msra.gmra.mxu2 %vm187_vm0, %v837_v54 }
 0x94a   :  { %1124 = vmatpush.msra.mxu2 %v5442_v1  ;;  %v241_v1 = vpop.f32.mrf.mxu0 }
 0x94c   :  { %1125 = vmatpush.msra.mxu2 %v5448_v3  ;;  %v242_v3 = vadd.f32 %v241_v1, %v5511_v21 }
 0x94e   :  { %1126 = vmatpush.msra.mxu2 %v5453_v5 }
 0x950   :  { %1127 = vmatpush.msra.mxu2 %v5459_v8 }
 0x968   :  { %v842_v39 = vpop.permute.xlu1 %841 }
 0x969   :  { %844 = vst.msk [vmem:[#allocation4 + $0x20] sm:$0xff] %vm187_vm0, %v842_v39  ;;  %4504 = vmatmul.msk.f32.vlgmr.msra.gmra.mxu3 %vm187_vm0, %v842_v39 }
 0x96a   :  { %1148 = vmatpush.msra.mxu3 %v5477_v16 }
 0x96c   :  { %1149 = vmatpush.msra.mxu3 %v5482_v17 }
 0x96e   :  { %1150 = vmatpush.msra.mxu3 %v5487_v18 }
 0x970   :  { %1151 = vmatpush.msra.mxu3 %v5491_v19 }
 0x9cc   :  { %v865_v55 = vpop.f32.mrf.mxu2 }
 0x9cd   :  { %v868_v5 = vadd.f32 %v865_v55, %v242_v3  ;;  %v5120_v3 = vld [vmem:[%s6610_s2 + $0x10] sm:$0xff]  ;;  %v5121_v55 = vld [vmem:[%s6610_s2 + $0x8] sm:$0xff] }
 0x9cf   :  { %4767 = vtanh.f32 %v868_v5  ;;  %v4505_v60 = vmul.f32 -1.442695, %v868_v5  ;;  %v5122_v5 = vld [vmem:[%s6610_s2] sm:$0xff] }
 0x9d5   :  { %v4768_v8 = vpop.eup %4767 }
 0x9d6   :  { %915 = vrot.lane.b32.xlu2 %v4768_v8, %s5311_s29 }
 0x9ec   :  { %v889_v57 = vpop.f32.mrf.mxu3 }
 0x9ed   :  { %v892_v58 = vadd.f32 %v889_v57, %v280_v56  ;;  %v244_v56 = vpop.f32.mrf.mxu0 }
 0x9ee   :  { %v245_v57 = vadd.f32 %v244_v56, %v5511_v21  ;;  %v274_v56 = vadd.f32 %v5609_v43, %v5521_v31 }
 0x9ef   :  { %4769 = vtanh.f32 %v892_v58  ;;  %v4506_v22 = vmul.f32 -1.442695, %v892_v58 }
 0x9f0   :  { %4771 = vpow2.f32 %v4505_v60 }
 0x9f5   :  { %v4770_v59 = vpop.eup %4769 }
 0x9f6   :  { %952 = vrot.lane.b32.xlu0 %v4770_v59, %s5311_s29  ;;  %v4772_v61 = vpop.eup %4771 }
 0x9f7   :  { %v896_v62 = vadd.f32 1.0, %v4772_v61  ;;  %v277_v61 = vadd.f32 %v5611_v44, %v5521_v31 }
 0x9f9   :  { %4773 = vrcp.f32 %v896_v62  ;;  %v908_v6 = vand.u32 2147483648, %v896_v62  ;;  %vm902_vm4 = vweird.f32 %v896_v62  ;;  %v906_v45 = vand.u32 2147483647, %v896_v62 }
 0x9fa   :  { %4775 = vpow2.f32 %v4506_v22 }
 0x9fb   :  { %v909_v10 = vor.u32 1.1754944e-38, %v908_v6  ;;  %vm907_vm6 = vcmp.eq.f32.partialorder %v906_v45, 8.507059e+37 }
 0x9ff   :  { %v4774_v63 = vpop.eup %4773 }
 0xa00   :  { %v898_v0 = vmul.f32 %v4774_v63, %v896_v62  ;;  %vm903_vm3 = vweird.f32 %v4774_v63  ;;  %v4776_v25 = vpop.eup %4775 }
 0xa01   :  { %vm904_vm5 = vmor %vm902_vm4, %vm903_vm3  ;;  %v933_v26 = vadd.f32 1.0, %v4776_v25 }
 0xa02   :  { %v899_v2 = vsub.f32 1.0, %v898_v0 }
 0xa03   :  { %4777 = vrcp.f32 %v933_v26  ;;  %v945_v33 = vand.u32 2147483648, %v933_v26  ;;  %vm939_vm8 = vweird.f32 %v933_v26  ;;  %v943_v34 = vand.u32 2147483647, %v933_v26 }
 0xa04   :  { %v900_v4 = vmul.f32 %v4774_v63, %v899_v2 }
 0xa05   :  { %v946_v37 = vor.u32 1.1754944e-38, %v945_v33  ;;  %vm944_vm10 = vcmp.eq.f32.partialorder %v943_v34, 8.507059e+37 }
 0xa06   :  { %v901_v46 = vadd.f32 %v4774_v63, %v900_v4 }
 0xa08   :  { %v905_v9 = vsel %vm904_vm5, %v4774_v63, %v901_v46 }
 0xa09   :  { %v910_v11 = vsel %vm907_vm6, %v909_v10, %v905_v9  ;;  %v4778_v7 = vpop.eup %4777 }
 0xa0a   :  { %v935_v28 = vmul.f32 %v4778_v7, %v933_v26  ;;  %vm940_vm7 = vweird.f32 %v4778_v7  ;;  %v913_v14 = vmul.f32 %v910_v11, %v5653_v47 }
 0xa0b   :  { %vm941_vm9 = vmor %vm939_vm8, %vm940_vm7 }
 0xa0c   :  { %v936_v30 = vsub.f32 1.0, %v935_v28 }
 0xa0e   :  { %v937_v13 = vmul.f32 %v4778_v7, %v936_v30 }
 0xa10   :  { %v938_v32 = vadd.f32 %v4778_v7, %v937_v13 }
 0xa12   :  { %v942_v36 = vsel %vm941_vm9, %v4778_v7, %v938_v32 }
 0xa13   :  { %v947_v41 = vsel %vm944_vm10, %v946_v37, %v942_v36 }
 0xa14   :  { %v950_v50 = vmul.f32 %v947_v41, %v5658_v49  ;;  %v5119_v49 = vld [vmem:[%s6610_s2 + $0x18] sm:$0xff] }
 0xa30   :  { %v916_v15 = vpop.permute.xlu2 %915 }
 0xa31   :  { %v918_v20 = vmul.f32 %v916_v15, %v910_v11 }
 0xa33   :  { %920 = vrot.lane.b32.xlu1 %v918_v20, %s5312_s4 }
 0xa68   :  { %v953_v38 = vpop.permute.xlu0 %952 }
 0xa69   :  { %v955_v42 = vmul.f32 %v953_v38, %v947_v41 }
 0xa6b   :  { %957 = vrot.lane.b32.xlu2 %v955_v42, %s5312_s4 }
 0xaa5   :  { %v921_v48 = vpop.permute.xlu1 %920 }
 0xaa6   :  { %v5684_v29 = vadd.f32 %v921_v48, %v913_v14 }
 0xaa8   :  { %4779 = vtanh.f32 %v5684_v29 }
 0xaae   :  { %v4780_v23 = vpop.eup %4779 }
 0xaaf   :  { %926 = vrot.lane.b32.xlu0 %v4780_v23, %s5311_s29 }
 0xac5   :  { %v958_v51 = vpop.permute.xlu2 %957 }
 0xac6   :  { %v5689_v35 = vadd.f32 %v958_v51, %v950_v50 }
 0xac8   :  { %4781 = vtanh.f32 %v5689_v35 }
 0xace   :  { %v4782_v52 = vpop.eup %4781 }
 0xacf   :  { %963 = vrot.lane.b32.xlu1 %v4782_v52, %s5311_s29 }
 0xb21   :  { %v927_v53 = vpop.permute.xlu0 %926 }
 0xb22   :  { %v929_v47 = vmul.f32 %v927_v53, %v910_v11 }
 0xb24   :  { %968 = vrot.lane.b32.xlu2 %v929_v47, %s5312_s4 }
 0xb41   :  { %v964_v54 = vpop.permute.xlu1 %963 }
 0xb42   :  { %v966_v39 = vmul.f32 %v964_v54, %v947_v41 }
 0xb44   :  { %973 = vrot.lane.b32.xlu0 %v966_v39, %s5312_s4 }
 0xb7e   :  { %v969_v1 = vpop.permute.xlu2 %968 }
 0xb7f   :  { %971 = vst.msk [vmem:[#allocation3 + $0x20] sm:$0xff] %vm187_vm0, %v969_v1  ;;  %4507 = vmatmul.msk.f32.vlgmr.msrb.gmra.mxu2 %vm187_vm0, %v969_v1 }
 0xb80   :  { %1256 = vmatpush.msrb.mxu2 %v5119_v49 }
 0xb82   :  { %1257 = vmatpush.msrb.mxu2 %v5120_v3  ;;  %v248_v3 = vadd.f32 %v5514_v24, %v5511_v21 }
 0xb84   :  { %1258 = vmatpush.msrb.mxu2 %v5121_v55 }
 0xb86   :  { %1259 = vmatpush.msrb.mxu2 %v5122_v5 }
 0xbb6   :  { %v974_v8 = vpop.permute.xlu0 %973 }
 0xbb7   :  { %976 = vst.msk [vmem:[#allocation4 + $0x18] sm:$0xff] %vm187_vm0, %v974_v8  ;;  %4508 = vmatmul.msk.f32.vlgmr.msrb.gmra.mxu3 %vm187_vm0, %v974_v8 }
 0xbb8   :  { %1280 = vmatpush.msrb.mxu3 %v5477_v16 }
 0xbba   :  { %1281 = vmatpush.msrb.mxu3 %v5482_v17 }
 0xbbc   :  { %1282 = vmatpush.msrb.mxu3 %v5487_v18 }
 0xbbe   :  { %1283 = vmatpush.msrb.mxu3 %v5491_v19 }
 0xc02   :  { %v997_v58 = vpop.f32.mrf.mxu2 }
 0xc03   :  { %v1000_v59 = vadd.f32 %v997_v58, %v245_v57 }
 0xc05   :  { %4783 = vtanh.f32 %v1000_v59  ;;  %v4509_v18 = vmul.f32 -1.442695, %v1000_v59 }
 0xc0b   :  { %v4784_v60 = vpop.eup %4783 }
 0xc0c   :  { %1047 = vrot.lane.b32.xlu1 %v4784_v60, %s5311_s29 }
 0xc3a   :  { %v1021_v62 = vpop.f32.mrf.mxu3 }
 0xc3b   :  { %v1024_v16 = vadd.f32 %v1021_v62, %v277_v61 }
 0xc3d   :  { %4785 = vtanh.f32 %v1024_v16  ;;  %v4510_v46 = vmul.f32 -1.442695, %v1024_v16 }
 0xc3e   :  { %4787 = vpow2.f32 %v4509_v18 }
 0xc43   :  { %v4786_v17 = vpop.eup %4785 }
 0xc44   :  { %1084 = vrot.lane.b32.xlu2 %v4786_v17, %s5311_s29  ;;  %v4788_v19 = vpop.eup %4787 }
 0xc45   :  { %v1028_v63 = vadd.f32 1.0, %v4788_v19 }
 0xc47   :  { %4789 = vrcp.f32 %v1028_v63  ;;  %v1040_v44 = vand.u32 2147483648, %v1028_v63  ;;  %vm1034_vm12 = vweird.f32 %v1028_v63  ;;  %v1038_v9 = vand.u32 2147483647, %v1028_v63 }
 0xc48   :  { %4791 = vpow2.f32 %v4510_v46 }
 0xc49   :  { %v1041_v15 = vor.u32 1.1754944e-38, %v1040_v44  ;;  %vm1039_vm14 = vcmp.eq.f32.partialorder %v1038_v9, 8.507059e+37 }
 0xc4d   :  { %v4790_v0 = vpop.eup %4789 }
 0xc4e   :  { %v1030_v2 = vmul.f32 %v4790_v0, %v1028_v63  ;;  %vm1035_vm11 = vweird.f32 %v4790_v0  ;;  %v4792_v10 = vpop.eup %4791 }
 0xc4f   :  { %vm1036_vm13 = vmor %vm1034_vm12, %vm1035_vm11  ;;  %v1065_v20 = vadd.f32 1.0, %v4792_v10 }
 0xc50   :  { %v1031_v4 = vsub.f32 1.0, %v1030_v2 }
 0xc51   :  { %4793 = vrcp.f32 %v1065_v20  ;;  %v1077_v33 = vand.u32 2147483648, %v1065_v20  ;;  %vm1071_vm1 = vweird.f32 %v1065_v20  ;;  %v1075_v34 = vand.u32 2147483647, %v1065_v20 }
 0xc52   :  { %v1032_v6 = vmul.f32 %v4790_v0, %v1031_v4 }
 0xc53   :  { %v1078_v37 = vor.u32 1.1754944e-38, %v1077_v33  ;;  %vm1076_vm3 = vcmp.eq.f32.partialorder %v1075_v34, 8.507059e+37 }
 0xc54   :  { %v1033_v45 = vadd.f32 %v4790_v0, %v1032_v6 }
 0xc56   :  { %v1037_v11 = vsel %vm1036_vm13, %v4790_v0, %v1033_v45 }
 0xc57   :  { %v1042_v25 = vsel %vm1039_vm14, %v1041_v15, %v1037_v11  ;;  %v4794_v7 = vpop.eup %4793 }
 0xc58   :  { %v1067_v28 = vmul.f32 %v4794_v7, %v1065_v20  ;;  %vm1072_vm15 = vweird.f32 %v4794_v7  ;;  %v1045_v14 = vmul.f32 %v1042_v25, %v5684_v29 }
 0xc59   :  { %vm1073_vm2 = vmor %vm1071_vm1, %vm1072_vm15 }
 0xc5a   :  { %v1068_v30 = vsub.f32 1.0, %v1067_v28 }
 0xc5c   :  { %v1069_v13 = vmul.f32 %v4794_v7, %v1068_v30 }
 0xc5e   :  { %v1070_v32 = vadd.f32 %v4794_v7, %v1069_v13 }
 0xc60   :  { %v1074_v36 = vsel %vm1073_vm2, %v4794_v7, %v1070_v32 }
 0xc61   :  { %v1079_v38 = vsel %vm1076_vm3, %v1078_v37, %v1074_v36 }
 0xc62   :  { %v1082_v51 = vmul.f32 %v1079_v38, %v5689_v35 }
 0xc7e   :  { %v1048_v22 = vpop.permute.xlu1 %1047 }
 0xc7f   :  { %v1050_v26 = vmul.f32 %v1048_v22, %v1042_v25 }
 0xc81   :  { %1052 = vrot.lane.b32.xlu0 %v1050_v26, %s5312_s4 }
 0xc9e   :  { %v1085_v41 = vpop.permute.xlu2 %1084 }
 0xc9f   :  { %v1087_v42 = vmul.f32 %v1085_v41, %v1079_v38 }
 0xca1   :  { %1089 = vrot.lane.b32.xlu1 %v1087_v42, %s5312_s4 }
 0xcf3   :  { %v1053_v48 = vpop.permute.xlu0 %1052 }
 0xcf4   :  { %v5723_v23 = vadd.f32 %v1053_v48, %v1045_v14 }
 0xcf6   :  { %4795 = vtanh.f32 %v5723_v23 }
 0xcfc   :  { %v4796_v50 = vpop.eup %4795 }
 0xcfd   :  { %1058 = vrot.lane.b32.xlu2 %v4796_v50, %s5311_s29 }
 0xd13   :  { %v1090_v52 = vpop.permute.xlu1 %1089 }
 0xd14   :  { %v5728_v53 = vadd.f32 %v1090_v52, %v1082_v51  ;;  %v1387_v52 = vld [vmem:[%s6613_s5 + $0x30] sm:$0xff] }
 0xd16   :  { %4797 = vtanh.f32 %v5728_v53 }
 0xd1c   :  { %v4798_v47 = vpop.eup %4797 }
 0xd1d   :  { %1095 = vrot.lane.b32.xlu0 %v4798_v47, %s5311_s29  ;;  %v1383_v47 = vld [vmem:[%s6613_s5 + $0x10] sm:$0xff] }
 0xd57   :  { %v1059_v54 = vpop.permute.xlu2 %1058 }
 0xd58   :  { %v1061_v29 = vmul.f32 %v1059_v54, %v1042_v25  ;;  %v1381_v54 = vld [vmem:[%s6613_s5] sm:$0xff] }
 0xd5a   :  { %1100 = vrot.lane.b32.xlu1 %v1061_v29, %s5312_s4 }
 0xd8f   :  { %v1096_v39 = vpop.permute.xlu0 %1095 }
 0xd90   :  { %v1098_v1 = vmul.f32 %v1096_v39, %v1079_v38  ;;  %v5772_v39 = vld [vmem:[#allocation3] sm:$0xff] }
 0xd92   :  { %1105 = vrot.lane.b32.xlu2 %v1098_v1, %s5312_s4  ;;  %v5776_v1 = vld [vmem:[#allocation3 + $0x8] sm:$0xff] }
 0xdcc   :  { %v1101_v49 = vpop.permute.xlu1 %1100 }
 0xdcd   :  { %1103 = vst.msk [vmem:[#allocation3 + $0x28] sm:$0xff] %vm187_vm0, %v1101_v49  ;;  %4511 = vmatmul.msk.f32.vlgmr.msra.gmra.mxu2 %vm187_vm0, %v1101_v49  ;;  %v5780_v49 = vld [vmem:[#allocation3 + $0x10] sm:$0xff] }
 0xdce   :  { %1547 = vmatpush.msra.mxu2 %v1387_v52 }
 0xdec   :  { %v1106_v35 = vpop.permute.xlu2 %1105 }
 0xded   :  { %1108 = vst.msk [vmem:[#allocation4 + $0x10] sm:$0xff] %vm187_vm0, %v1106_v35  ;;  %4512 = vmatmul.msk.f32.vlgmr.msra.gmra.mxu3 %vm187_vm0, %v1106_v35 }
 0xdee   :  { %4683 = vmatpush.msra.mxu3 %v1387_v52 }
 0xe50   :  { %v1129_v55 = vpop.f32.mrf.mxu2 }
 0xe51   :  { %v1132_v5 = vadd.f32 %v1129_v55, %v248_v3  ;;  %v5784_v3 = vld [vmem:[#allocation3 + $0x18] sm:$0xff]  ;;  %v5790_v55 = vld [vmem:[#allocation3 + $0x20] sm:$0xff] }
 0xe53   :  { %4799 = vtanh.f32 %v1132_v5  ;;  %v4513_v60 = vmul.f32 -1.442695, %v1132_v5 }
 0xe59   :  { %v4800_v8 = vpop.eup %4799 }
 0xe5a   :  { %1179 = vrot.lane.b32.xlu0 %v4800_v8, %s5311_s29  ;;  %v5798_v8 = vld [vmem:[#allocation3 + $0x28] sm:$0xff] }
 0xe70   :  { %v1153_v57 = vpop.f32.mrf.mxu3 }
 0xe71   :  { %v1156_v58 = vadd.f32 %v1153_v57, %v274_v56  ;;  %v251_v56 = vadd.f32 %v5516_v27, %v5511_v21 }
 0xe73   :  { %4801 = vtanh.f32 %v1156_v58  ;;  %v4514_v18 = vmul.f32 -1.442695, %v1156_v58 }
 0xe74   :  { %4803 = vpow2.f32 %v4513_v60  ;;  %v271_v60 = vadd.f32 %v5606_v40, %v5521_v31 }
 0xe79   :  { %v4802_v59 = vpop.eup %4801 }
 0xe7a   :  { %1216 = vrot.lane.b32.xlu1 %v4802_v59, %s5311_s29  ;;  %v4804_v61 = vpop.eup %4803 }
 0xe7b   :  { %v1160_v62 = vadd.f32 1.0, %v4804_v61 }
 0xe7d   :  { %4805 = vrcp.f32 %v1160_v62  ;;  %v1172_v43 = vand.u32 2147483648, %v1160_v62  ;;  %vm1166_vm5 = vweird.f32 %v1160_v62  ;;  %v1170_v0 = vand.u32 2147483647, %v1160_v62 }
 0xe7e   :  { %4807 = vpow2.f32 %v4514_v18 }
 0xe7f   :  { %v1173_v46 = vor.u32 1.1754944e-38, %v1172_v43  ;;  %vm1171_vm7 = vcmp.eq.f32.partialorder %v1170_v0, 8.507059e+37 }
 0xe83   :  { %v4806_v24 = vpop.eup %4805 }
 0xe84   :  { %v1162_v16 = vmul.f32 %v4806_v24, %v1160_v62  ;;  %vm1167_vm4 = vweird.f32 %v4806_v24  ;;  %v4808_v2 = vpop.eup %4807 }
 0xe85   :  { %vm1168_vm6 = vmor %vm1166_vm5, %vm1167_vm4  ;;  %v1197_v6 = vadd.f32 1.0, %v4808_v2 }
 0xe86   :  { %v1163_v17 = vsub.f32 1.0, %v1162_v16 }
 0xe87   :  { %4809 = vrcp.f32 %v1197_v6  ;;  %v1209_v25 = vand.u32 2147483648, %v1197_v6  ;;  %vm1203_vm9 = vweird.f32 %v1197_v6  ;;  %v1207_v26 = vand.u32 2147483647, %v1197_v6 }
 0xe88   :  { %v1164_v19 = vmul.f32 %v4806_v24, %v1163_v17 }
 0xe89   :  { %v1210_v28 = vor.u32 1.1754944e-38, %v1209_v25  ;;  %vm1208_vm11 = vcmp.eq.f32.partialorder %v1207_v26, 8.507059e+37 }
 0xe8a   :  { %v1165_v63 = vadd.f32 %v4806_v24, %v1164_v19 }
 0xe8c   :  { %v1169_v4 = vsel %vm1168_vm6, %v4806_v24, %v1165_v63 }
 0xe8d   :  { %v1174_v44 = vsel %vm1171_vm7, %v1173_v46, %v1169_v4  ;;  %v4810_v10 = vpop.eup %4809 }
 0xe8e   :  { %v1199_v11 = vmul.f32 %v4810_v10, %v1197_v6  ;;  %vm1204_vm8 = vweird.f32 %v4810_v10  ;;  %v1177_v33 = vmul.f32 %v1174_v44, %v5723_v23 }
 0xe8f   :  { %vm1205_vm10 = vmor %vm1203_vm9, %vm1204_vm8 }
 0xe90   :  { %v1200_v15 = vsub.f32 1.0, %v1199_v11 }
 0xe92   :  { %v1201_v20 = vmul.f32 %v4810_v10, %v1200_v15 }
 0xe94   :  { %v1202_v22 = vadd.f32 %v4810_v10, %v1201_v20 }
 0xe96   :  { %v1206_v7 = vsel %vm1205_vm10, %v4810_v10, %v1202_v22 }
 0xe97   :  { %v1211_v13 = vsel %vm1208_vm11, %v1210_v28, %v1206_v7 }
 0xe98   :  { %v1214_v38 = vmul.f32 %v1211_v13, %v5728_v53  ;;  %v1385_v53 = vld [vmem:[%s6613_s5 + $0x20] sm:$0xff] }
 0xe99   :  { %1548 = vmatpush.msra.mxu2 %v1385_v53  ;;  %4684 = vmatpush.msra.mxu3 %v1385_v53  ;;  %v1388_v53 = vld [vmem:[%s6613_s5 + $0x38] sm:$0xff] }
 0xe9b   :  { %1549 = vmatpush.msra.mxu2 %v1383_v47  ;;  %4685 = vmatpush.msra.mxu3 %v1383_v47  ;;  %v1404_v47 = vld [vmem:[%s6613_s5 + $0x78] sm:$0xff] }
 0xe9c   :  { %1482 = vmatpush.msrb.mxu1 %v1404_v47 }
 0xe9d   :  { %1550 = vmatpush.msra.mxu2 %v1381_v54  ;;  %4686 = vmatpush.msra.mxu3 %v1381_v54  ;;  %v1384_v54 = vld [vmem:[%s6613_s5 + $0x18] sm:$0xff] }
 0xecc   :  { %v1180_v45 = vpop.permute.xlu0 %1179 }
 0xecd   :  { %v1182_v9 = vmul.f32 %v1180_v45, %v1174_v44 }
 0xecf   :  { %1184 = vrot.lane.b32.xlu2 %v1182_v9, %s5312_s4 }
 0xeec   :  { %v1217_v30 = vpop.permute.xlu1 %1216 }
 0xeed   :  { %v1219_v32 = vmul.f32 %v1217_v30, %v1211_v13 }
 0xeef   :  { %1221 = vrot.lane.b32.xlu0 %v1219_v32, %s5312_s4 }
 0xf29   :  { %v1185_v34 = vpop.permute.xlu2 %1184 }
 0xf2a   :  { %v5747_v36 = vadd.f32 %v1185_v34, %v1177_v33 }
 0xf2c   :  { %4811 = vtanh.f32 %v5747_v36 }
 0xf32   :  { %v4812_v37 = vpop.eup %4811 }
 0xf33   :  { %1190 = vrot.lane.b32.xlu1 %v4812_v37, %s5311_s29 }
 0xf61   :  { %v1222_v41 = vpop.permute.xlu0 %1221 }
 0xf62   :  { %v5752_v42 = vadd.f32 %v1222_v41, %v1214_v38 }
 0xf64   :  { %4813 = vtanh.f32 %v5752_v42 }
 0xf6a   :  { %v4814_v14 = vpop.eup %4813 }
 0xf6b   :  { %1227 = vrot.lane.b32.xlu2 %v4814_v14, %s5311_s29 }
 0xfa5   :  { %v1191_v48 = vpop.permute.xlu1 %1190 }
 0xfa6   :  { %v1193_v23 = vmul.f32 %v1191_v48, %v1174_v44 }
 0xfa8   :  { %1232 = vrot.lane.b32.xlu0 %v1193_v23, %s5312_s4 }
 0xfc5   :  { %v1228_v50 = vpop.permute.xlu2 %1227 }
 0xfc6   :  { %v1230_v51 = vmul.f32 %v1228_v50, %v1211_v13 }
 0xfc8   :  { %1237 = vrot.lane.b32.xlu1 %v1230_v51, %s5312_s4 }
0x101a   :  { %v1233_v29 = vpop.permute.xlu0 %1232 }
0x101b   :  { %1235 = vst.msk [vmem:[#allocation3 + $0x30] sm:$0xff] %vm187_vm0, %v1233_v29  ;;  %4515 = vmatmul.msk.f32.vlgmr.msrb.gmra.mxu2 %vm187_vm0, %v1233_v29  ;;  %v1382_v29 = vld [vmem:[%s6613_s5 + $0x8] sm:$0xff] }
0x1022   :  { %v5792_v5 = vld [vmem:[#allocation3 + $0x30] sm:$0xff] }
0x1023   :  { %4535 = vmatmul.msk.f32.vlgmr.msra.gmra.mxu2 %vm187_vm0, %v5772_v39 }
0x102b   :  { %4536 = vmatmul.msk.f32.gmra.mxu2 %vm187_vm0, %v5776_v1 }
0x1033   :  { %4537 = vmatmul.msk.f32.gmra.mxu2 %vm187_vm0, %v5780_v49 }
0x103a   :  { %v1238_v35 = vpop.permute.xlu1 %1237 }
0x103b   :  { %1240 = vst.msk [vmem:[#allocation4 + $0x8] sm:$0xff] %vm187_vm0, %v1238_v35  ;;  %4516 = vmatmul.msk.f32.vlgmr.msrb.gmra.mxu3 %vm187_vm0, %v1238_v35  ;;  %4538 = vmatmul.msk.f32.gmra.mxu2 %vm187_vm0, %v5784_v3  ;;  %v1402_v35 = vld [vmem:[%s6613_s5 + $0x68] sm:$0xff] }
0x103c   :  { %1588 = vmatpush.msrb.mxu3 %v1388_v53  ;;  %1483 = vmatpush.msrb.mxu1 %v1402_v35 }
0x1043   :  { %4539 = vmatmul.msk.f32.gmra.mxu2 %vm187_vm0, %v5790_v55  ;;  %4541 = vmatmul.msk.f32.vlgmr.msra.gmra.mxu3 %vm187_vm0, %v5792_v5 }
0x104b   :  { %4540 = vmatmul.msk.f32.gmra.mxu2 %vm187_vm0, %v5798_v8 }
0x109e   :  { %v1261_v57 = vpop.f32.mrf.mxu2 }
0x109f   :  { %v1264_v58 = vadd.f32 %v1261_v57, %v251_v56  ;;  %v1400_v57 = vld [vmem:[%s6613_s5 + $0x58] sm:$0xff] }
0x10a0   :  { %1484 = vmatpush.msrb.mxu1 %v1400_v57 }
0x10a1   :  { %4815 = vtanh.f32 %v1264_v58  ;;  %v4517_v16 = vmul.f32 -1.442695, %v1264_v58 }
0x10a7   :  { %v4816_v59 = vpop.eup %4815 }
0x10a8   :  { %1311 = vrot.lane.b32.xlu2 %v4816_v59, %s5311_s29  ;;  %v1398_v59 = vld [vmem:[%s6613_s5 + $0x48] sm:$0xff] }
0x10a9   :  { %1485 = vmatpush.msrb.mxu1 %v1398_v59  ;;  %v1552_v59 = vpop.f32.mrf.mxu2 }
0x10be   :  { %v1285_v61 = vpop.f32.mrf.mxu3 }
0x10bf   :  { %v1288_v62 = vadd.f32 %v1285_v61, %v271_v60  ;;  %v1403_v60 = vld [vmem:[%s6613_s5 + $0x70] sm:$0xff]  ;;  %v1401_v61 = vld [vmem:[%s6613_s5 + $0x60] sm:$0xff] }
0x10c0   :  { %1441 = vmatpush.msrb.mxu0 %v1403_v60 }
0x10c1   :  { %4817 = vtanh.f32 %v1288_v62  ;;  %v4518_v45 = vmul.f32 -1.442695, %v1288_v62  ;;  %v1397_v62 = vld [vmem:[%s6613_s5 + $0x40] sm:$0xff] }
0x10c2   :  { %4819 = vpow2.f32 %v4517_v16  ;;  %1442 = vmatpush.msrb.mxu0 %v1401_v61 }
0x10c7   :  { %v4818_v24 = vpop.eup %4817 }
0x10c8   :  { %1348 = vrot.lane.b32.xlu0 %v4818_v24, %s5311_s29  ;;  %v4820_v17 = vpop.eup %4819  ;;  %v5868_v24 = vld [vmem:[#allocation10 + $0x10] sm:$0xff] }
0x10c9   :  { %v1292_v18 = vadd.f32 1.0, %v4820_v17  ;;  %v5888_v17 = vld [vmem:[#allocation10] sm:$0xff] }
0x10cb   :  { %4821 = vrcp.f32 %v1292_v18  ;;  %v1304_v0 = vand.u32 2147483648, %v1292_v18  ;;  %vm1298_vm13 = vweird.f32 %v1292_v18  ;;  %v1302_v31 = vand.u32 2147483647, %v1292_v18 }
0x10cc   :  { %4823 = vpow2.f32 %v4518_v45 }
0x10cd   :  { %v1305_v2 = vor.u32 1.1754944e-38, %v1304_v0  ;;  %vm1303_vm15 = vcmp.eq.f32.partialorder %v1302_v31, 8.507059e+37  ;;  %v1395_v0 = vld [vmem:[#allocation4 + $0x30] sm:$0xff]  ;;  %v1396_v31 = vld [vmem:[#allocation4 + $0x38] sm:$0xff] }
0x10d1   :  { %v4822_v21 = vpop.eup %4821 }
0x10d2   :  { %v1294_v27 = vmul.f32 %v4822_v21, %v1292_v18  ;;  %vm1299_vm12 = vweird.f32 %v4822_v21  ;;  %v4824_v44 = vpop.eup %4823  ;;  %v5900_v18 = vld [vmem:[#allocation9 + $0x18] sm:$0xff] }
0x10d3   :  { %vm1300_vm14 = vmor %vm1298_vm13, %vm1299_vm12  ;;  %v1329_v9 = vadd.f32 1.0, %v4824_v44  ;;  %1806 = vmatpush.msrb.mxu2 %v5900_v18 }
0x10d4   :  { %v1295_v19 = vsub.f32 1.0, %v1294_v27  ;;  %v5906_v27 = vld [vmem:[#allocation9 + $0x8] sm:$0xff] }
0x10d5   :  { %4825 = vrcp.f32 %v1329_v9  ;;  %v1341_v25 = vand.u32 2147483648, %v1329_v9  ;;  %vm1335_vm2 = vweird.f32 %v1329_v9  ;;  %v1339_v26 = vand.u32 2147483647, %v1329_v9 }
0x10d6   :  { %v1296_v63 = vmul.f32 %v4822_v21, %v1295_v19  ;;  %v5912_v19 = vld [vmem:[#allocation9] sm:$0xff] }
0x10d7   :  { %v1342_v28 = vor.u32 1.1754944e-38, %v1341_v25  ;;  %vm1340_vm4 = vcmp.eq.f32.partialorder %v1339_v26, 8.507059e+37 }
0x10d8   :  { %v1297_v43 = vadd.f32 %v4822_v21, %v1296_v63  ;;  %v1393_v63 = vld [vmem:[#allocation4 + $0x20] sm:$0xff] }
0x10da   :  { %v1301_v40 = vsel %vm1300_vm14, %v4822_v21, %v1297_v43  ;;  %v5902_v21 = vld [vmem:[#allocation9 + $0x10] sm:$0xff]  ;;  %v1394_v43 = vld [vmem:[#allocation4 + $0x28] sm:$0xff] }
0x10db   :  { %v1306_v4 = vsel %vm1303_vm15, %v1305_v2, %v1301_v40  ;;  %v4826_v10 = vpop.eup %4825  ;;  %1807 = vmatpush.msrb.mxu2 %v5902_v21  ;;  %v5944_v40 = vpop.f32.mrf.mxu3 }
0x10dc   :  { %v1331_v11 = vmul.f32 %v4826_v10, %v1329_v9  ;;  %vm1336_vm1 = vweird.f32 %v4826_v10  ;;  %v1309_v33 = vmul.f32 %v1306_v4, %v5747_v36 }
0x10dd   :  { %vm1337_vm3 = vmor %vm1335_vm2, %vm1336_vm1  ;;  %1808 = vmatpush.msrb.mxu2 %v5906_v27 }
0x10de   :  { %v1332_v15 = vsub.f32 1.0, %v1331_v11 }
0x10df   :  { %1809 = vmatpush.msrb.mxu2 %v5912_v19 }
0x10e0   :  { %v1333_v20 = vmul.f32 %v4826_v10, %v1332_v15 }
0x10e1   :  { %2070 = vmatpush.msra.mxu2 %v5900_v18 }
0x10e2   :  { %v1334_v22 = vadd.f32 %v4826_v10, %v1333_v20 }
0x10e3   :  { %2071 = vmatpush.msra.mxu2 %v5902_v21 }
0x10e4   :  { %v1338_v7 = vsel %vm1337_vm3, %v4826_v10, %v1334_v22 }
0x10e5   :  { %v1343_v13 = vsel %vm1340_vm4, %v1342_v28, %v1338_v7  ;;  %2072 = vmatpush.msra.mxu2 %v5906_v27 }
0x10e6   :  { %v1346_v41 = vmul.f32 %v1343_v13, %v5752_v42  ;;  %v1386_v42 = vld [vmem:[%s6613_s5 + $0x28] sm:$0xff] }
0x10e7   :  { %1589 = vmatpush.msrb.mxu3 %v1386_v42  ;;  %2073 = vmatpush.msra.mxu2 %v5912_v19 }
0x10e9   :  { %1590 = vmatpush.msrb.mxu3 %v1384_v54 }
0x10eb   :  { %1591 = vmatpush.msrb.mxu3 %v1382_v29 }
0x1102   :  { %v1312_v46 = vpop.permute.xlu2 %1311 }
0x1103   :  { %v1314_v6 = vmul.f32 %v1312_v46, %v1306_v4  ;;  %v1617_v46 = vld [vmem:[%s6616_s8] sm:$0x3] }
0x1104   :  { %v1620_v45 = vperm.slane %v1617_v46, 1 }
0x1105   :  { %1316 = vrot.lane.b32.xlu1 %v1314_v6, %s5312_s4 }
0x113a   :  { %v1349_v30 = vpop.permute.xlu0 %1348 }
0x113b   :  { %v1351_v32 = vmul.f32 %v1349_v30, %v1343_v13 }
0x113d   :  { %1353 = vrot.lane.b32.xlu2 %v1351_v32, %s5312_s4 }
0x1177   :  { %v1317_v34 = vpop.permute.xlu1 %1316 }
0x1178   :  { %v1319_v37 = vadd.f32 %v1317_v34, %v1309_v33 }
0x117a   :  { %4827 = vtanh.f32 %v1319_v37 }
0x1180   :  { %v4828_v38 = vpop.eup %4827 }
0x1181   :  { %1322 = vrot.lane.b32.xlu0 %v4828_v38, %s5311_s29 }
0x1197   :  { %v1354_v14 = vpop.permute.xlu2 %1353 }
0x1198   :  { %v1356_v48 = vadd.f32 %v1354_v14, %v1346_v41 }
0x119a   :  { %4829 = vtanh.f32 %v1356_v48 }
0x11a0   :  { %v4830_v23 = vpop.eup %4829 }
0x11a1   :  { %1359 = vrot.lane.b32.xlu1 %v4830_v23, %s5311_s29 }
0x11f3   :  { %v1323_v50 = vpop.permute.xlu0 %1322 }
0x11f4   :  { %v1325_v51 = vmul.f32 %v1323_v50, %v1306_v4 }
0x11f6   :  { %1364 = vrot.lane.b32.xlu2 %v1325_v51, %s5312_s4 }
0x1213   :  { %v1360_v52 = vpop.permute.xlu1 %1359 }
0x1214   :  { %v1362_v36 = vmul.f32 %v1360_v52, %v1343_v13 }
0x1216   :  { %1369 = vrot.lane.b32.xlu0 %v1362_v36, %s5312_s4 }
0x1250   :  { %v1365_v56 = vpop.permute.xlu2 %1364 }
0x1251   :  { %1367 = vst.msk [vmem:[#allocation3 + $0x38] sm:$0xff] %vm187_vm0, %v1365_v56 }
0x1258   :  { %v1380_v58 = vld [vmem:[#allocation3 + $0x38] sm:$0xff] }
0x1259   :  { %4542 = vmatmul.msk.f32.gmra.mxu3 %vm187_vm0, %v1380_v58 }
0x1261   :  { %4543 = vmatmul.msk.f32.vlgmr.msrb.gmra.mxu3 %vm187_vm0, %v5772_v39  ;;  %v1399_v39 = vld [vmem:[%s6613_s5 + $0x50] sm:$0xff] }
0x1262   :  { %1443 = vmatpush.msrb.mxu0 %v1399_v39 }
0x1264   :  { %1444 = vmatpush.msrb.mxu0 %v1397_v62  ;;  %v5979_v62 = vperm.slane %v1617_v46, 0 }
0x1266   :  { %1676 = vmatpush.msra.mxu0 %v5900_v18 }
0x1268   :  { %1677 = vmatpush.msra.mxu0 %v5902_v21 }
0x1269   :  { %4544 = vmatmul.msk.f32.gmra.mxu3 %vm187_vm0, %v5776_v1  ;;  %v5860_v1 = vld [vmem:[#allocation10 + $0x18] sm:$0xff] }
0x126a   :  { %1698 = vmatpush.msra.mxu1 %v5860_v1  ;;  %1830 = vmatpush.msra.mxu3 %v5860_v1 }
0x126b   :  { %1678 = vmatpush.msra.mxu0 %v5906_v27 }
0x126c   :  { %1699 = vmatpush.msra.mxu1 %v5868_v24  ;;  %1831 = vmatpush.msra.mxu3 %v5868_v24 }
0x126d   :  { %1679 = vmatpush.msra.mxu0 %v5912_v19 }
0x1271   :  { %4545 = vmatmul.msk.f32.gmra.mxu3 %vm187_vm0, %v5780_v49 }
0x1279   :  { %4546 = vmatmul.msk.f32.gmra.mxu3 %vm187_vm0, %v5784_v3  ;;  %v5877_v3 = vld [vmem:[#allocation10 + $0x8] sm:$0xff] }
0x127a   :  { %1700 = vmatpush.msra.mxu1 %v5877_v3  ;;  %1832 = vmatpush.msra.mxu3 %v5877_v3 }
0x127c   :  { %1701 = vmatpush.msra.mxu1 %v5888_v17  ;;  %1833 = vmatpush.msra.mxu3 %v5888_v17 }
0x127e   :  { %2094 = vmatpush.msrb.mxu3 %v5860_v1 }
0x1280   :  { %2095 = vmatpush.msrb.mxu3 %v5868_v24 }
0x1281   :  { %4547 = vmatmul.msk.f32.gmra.mxu3 %vm187_vm0, %v5790_v55  ;;  %v1390_v55 = vld [vmem:[#allocation4 + $0x8] sm:$0xff] }
0x1282   :  { %2096 = vmatpush.msrb.mxu3 %v5877_v3 }
0x1284   :  { %2097 = vmatpush.msrb.mxu3 %v5888_v17 }
0x1288   :  { %v1370_v16 = vpop.permute.xlu0 %1369 }
0x1289   :  { %1372 = vst.msk [vmem:[#allocation4] sm:$0xff] %vm187_vm0, %v1370_v16  ;;  %4548 = vmatmul.msk.f32.gmra.mxu3 %vm187_vm0, %v5798_v8  ;;  %v1391_v8 = vld [vmem:[#allocation4 + $0x10] sm:$0xff] }
0x1290   :  { %v1389_v49 = vld [vmem:[#allocation4] sm:$0xff] }
0x1291   :  { %4519 = vmatmul.msk.f32.vlgmr.msrb.gmra.mxu0 %vm187_vm0, %v1389_v49  ;;  %4527 = vmatmul.msk.f32.vlgmr.msrb.gmra.mxu1 %vm187_vm0, %v1389_v49 }
0x1292   :  { %4549 = vmatmul.msk.f32.gmra.mxu3 %vm187_vm0, %v5792_v5  ;;  %1962 = vmatpush.msrb.mxu1 %v5860_v1  ;;  %v1392_v5 = vld [vmem:[#allocation4 + $0x18] sm:$0xff] }
0x1293   :  { %1938 = vmatpush.msrb.mxu0 %v5900_v18 }
0x1294   :  { %1963 = vmatpush.msrb.mxu1 %v5868_v24 }
0x1295   :  { %1939 = vmatpush.msrb.mxu0 %v5902_v21 }
0x1296   :  { %1964 = vmatpush.msrb.mxu1 %v5877_v3 }
0x1297   :  { %1940 = vmatpush.msrb.mxu0 %v5906_v27 }
0x1298   :  { %1965 = vmatpush.msrb.mxu1 %v5888_v17 }
0x1299   :  { %4520 = vmatmul.msk.f32.gmra.mxu0 %vm187_vm0, %v1390_v55  ;;  %4528 = vmatmul.msk.f32.gmra.mxu1 %vm187_vm0, %v1390_v55 }
0x129a   :  { %4550 = vmatmul.msk.f32.gmra.mxu3 %vm187_vm0, %v1380_v58  ;;  %1941 = vmatpush.msrb.mxu0 %v5912_v19 }
0x12a1   :  { %4521 = vmatmul.msk.f32.gmra.mxu0 %vm187_vm0, %v1391_v8  ;;  %4529 = vmatmul.msk.f32.gmra.mxu1 %vm187_vm0, %v1391_v8 }
0x12a9   :  { %4522 = vmatmul.msk.f32.gmra.mxu0 %vm187_vm0, %v1392_v5  ;;  %4530 = vmatmul.msk.f32.gmra.mxu1 %vm187_vm0, %v1392_v5 }
0x12b1   :  { %4523 = vmatmul.msk.f32.gmra.mxu0 %vm187_vm0, %v1393_v63  ;;  %4531 = vmatmul.msk.f32.gmra.mxu1 %vm187_vm0, %v1393_v63 }
0x12b9   :  { %4524 = vmatmul.msk.f32.gmra.mxu0 %vm187_vm0, %v1394_v43  ;;  %4532 = vmatmul.msk.f32.gmra.mxu1 %vm187_vm0, %v1394_v43 }
0x12c1   :  { %4525 = vmatmul.msk.f32.gmra.mxu0 %vm187_vm0, %v1395_v0  ;;  %4533 = vmatmul.msk.f32.gmra.mxu1 %vm187_vm0, %v1395_v0 }
0x12c9   :  { %4526 = vmatmul.msk.f32.gmra.mxu0 %vm187_vm0, %v1396_v31  ;;  %4534 = vmatmul.msk.f32.gmra.mxu1 %vm187_vm0, %v1396_v31 }
0x12d1   :  { %1680 = vmatmul.f32.vlgmr.msra.gmra.mxu0 %v5310_v12  ;;  %1702 = vmatmul.f32.vlgmr.msra.gmra.mxu1 %v5310_v12 }
0x12d2   :  { %2226 = vmatpush.msra.mxu1 %v5860_v1  ;;  %2202 = vmatpush.msra.mxu0 %v5900_v18 }
0x12d4   :  { %2227 = vmatpush.msra.mxu1 %v5868_v24  ;;  %2203 = vmatpush.msra.mxu0 %v5902_v21 }
0x12d6   :  { %2228 = vmatpush.msra.mxu1 %v5877_v3  ;;  %2204 = vmatpush.msra.mxu0 %v5906_v27 }
0x12d8   :  { %2229 = vmatpush.msra.mxu1 %v5888_v17  ;;  %2205 = vmatpush.msra.mxu0 %v5912_v19 }
0x12dc   :  { %v5946_v2 = vpop.f32.mrf.mxu3 }
0x12e4   :  { %v1593_v4 = vpop.f32.mrf.mxu3 }
0x12ec   :  { %v1596_v6 = vpop.f32.mrf.mxu3 }
0x12f4   :  { %v1599_v15 = vpop.f32.mrf.mxu3 }
0x12fc   :  { %v1602_v30 = vpop.f32.mrf.mxu3 }
0x1304   :  { %v1605_v38 = vpop.f32.mrf.mxu3 }
0x130c   :  { %v1608_v51 = vpop.f32.mrf.mxu3 }
0x130e   :  { %v1446_v44 = vpop.f32.mrf.mxu0  ;;  %v1487_v9 = vpop.f32.mrf.mxu1 }
0x130f   :  { %v1594_v10 = vadd.f32 %v1593_v4, %v1487_v9  ;;  %v1553_v61 = vadd.f32 %v1552_v59, %v1446_v44 }
0x1311   :  { %v5951_v11 = vadd.f32 %v1620_v45, %v1594_v10  ;;  %v1623_v16 = vadd.f32 %v5979_v62, %v1553_v61 }
0x1315   :  { %v1611_v47 = vpop.f32.mrf.mxu3 }
0x1316   :  { %v5953_v20 = vpop.f32.mrf.mxu0  ;;  %v1490_v22 = vpop.f32.mrf.mxu1 }
0x1317   :  { %v1597_v25 = vadd.f32 %v1596_v6, %v1490_v22 }
0x1319   :  { %v5955_v26 = vadd.f32 %v1620_v45, %v1597_v25 }
0x131d   :  { %v1614_v60 = vpop.f32.mrf.mxu3 }
0x131e   :  { %v5957_v7 = vpop.f32.mrf.mxu0  ;;  %v1493_v28 = vpop.f32.mrf.mxu1 }
0x131f   :  { %v1600_v13 = vadd.f32 %v1599_v15, %v1493_v28 }
0x1321   :  { %v5959_v32 = vadd.f32 %v1620_v45, %v1600_v13 }
0x1326   :  { %v5961_v33 = vpop.f32.mrf.mxu0  ;;  %v1496_v34 = vpop.f32.mrf.mxu1 }
0x1327   :  { %v1603_v37 = vadd.f32 %v1602_v30, %v1496_v34 }
0x1329   :  { %v5963_v41 = vadd.f32 %v1620_v45, %v1603_v37 }
0x132e   :  { %v5965_v14 = vpop.f32.mrf.mxu0  ;;  %v1499_v48 = vpop.f32.mrf.mxu1 }
0x132f   :  { %v1606_v23 = vadd.f32 %v1605_v38, %v1499_v48 }
0x1331   :  { %v5967_v50 = vadd.f32 %v1620_v45, %v1606_v23 }
0x1336   :  { %v5969_v52 = vpop.f32.mrf.mxu0  ;;  %v1502_v36 = vpop.f32.mrf.mxu1 }
0x1337   :  { %v1609_v53 = vadd.f32 %v1608_v51, %v1502_v36 }
0x1339   :  { %v5971_v42 = vadd.f32 %v1620_v45, %v1609_v53 }
0x133e   :  { %v5973_v54 = vpop.f32.mrf.mxu0  ;;  %v1505_v29 = vpop.f32.mrf.mxu1 }
0x133f   :  { %v1612_v35 = vadd.f32 %v1611_v47, %v1505_v29 }
0x1341   :  { %v5975_v56 = vadd.f32 %v1620_v45, %v1612_v35 }
0x1346   :  { %v5977_v57 = vpop.f32.mrf.mxu0  ;;  %v1508_v58 = vpop.f32.mrf.mxu1 }
0x1347   :  { %v1615_v39 = vadd.f32 %v1614_v60, %v1508_v58 }
0x1349   :  { %v1638_v49 = vadd.f32 %v1620_v45, %v1615_v39 }
0x134e   :  { %v1681_v55 = vpop.f32.mrf.mxu0  ;;  %v1703_v8 = vpop.f32.mrf.mxu1 }
0x134f   :  { %v1684_v5 = vadd.f32 %v1681_v55, %v1623_v16  ;;  %v1706_v63 = vadd.f32 %v1703_v8, %v1638_v49 }
0x1351   :  { %4831 = vtanh.f32 %v1684_v5  ;;  %v4552_v31 = vmul.f32 -1.442695, %v1706_v63  ;;  %v4551_v4 = vmul.f32 -1.442695, %v1684_v5 }
0x1352   :  { %4833 = vtanh.f32 %v1706_v63 }
0x1353   :  { %4835 = vpow2.f32 %v4552_v31 }
0x1354   :  { %4837 = vpow2.f32 %v4551_v4 }
0x1357   :  { %v4832_v43 = vpop.eup %4831 }
0x1358   :  { %v4834_v0 = vpop.eup %4833  ;;  %1729 = vrot.lane.b32.xlu0 %v4832_v43, %s5311_s29 }
0x1359   :  { %1766 = vrot.lane.b32.xlu1 %v4834_v0, %s5311_s29  ;;  %v4836_v46 = vpop.eup %4835 }
0x135a   :  { %v1747_v6 = vadd.f32 1.0, %v4836_v46  ;;  %v4838_v45 = vpop.eup %4837 }
0x135b   :  { %v1710_v44 = vadd.f32 1.0, %v4838_v45 }
0x135c   :  { %4839 = vrcp.f32 %v1747_v6  ;;  %v1759_v34 = vand.u32 2147483648, %v1747_v6  ;;  %vm1753_vm6 = vweird.f32 %v1747_v6  ;;  %v1757_v37 = vand.u32 2147483647, %v1747_v6 }
0x135d   :  { %4841 = vrcp.f32 %v1710_v44  ;;  %v1722_v29 = vand.u32 2147483648, %v1710_v44  ;;  %vm1716_vm10 = vweird.f32 %v1710_v44  ;;  %v1720_v35 = vand.u32 2147483647, %v1710_v44 }
0x135e   :  { %v1760_v23 = vor.u32 1.1754944e-38, %v1759_v34  ;;  %vm1758_vm8 = vcmp.eq.f32.partialorder %v1757_v37, 8.507059e+37 }
0x135f   :  { %v1723_v60 = vor.u32 1.1754944e-38, %v1722_v29  ;;  %vm1721_vm12 = vcmp.eq.f32.partialorder %v1720_v35, 8.507059e+37 }
0x1362   :  { %v4840_v9 = vpop.eup %4839 }
0x1363   :  { %v1749_v10 = vmul.f32 %v4840_v9, %v1747_v6  ;;  %v4842_v22 = vpop.eup %4841  ;;  %vm1754_vm5 = vweird.f32 %v4840_v9 }
0x1364   :  { %v1712_v25 = vmul.f32 %v4842_v22, %v1710_v44  ;;  %vm1755_vm7 = vmor %vm1753_vm6, %vm1754_vm5  ;;  %vm1717_vm9 = vweird.f32 %v4842_v22 }
0x1365   :  { %v1750_v15 = vsub.f32 1.0, %v1749_v10  ;;  %vm1718_vm11 = vmor %vm1716_vm10, %vm1717_vm9 }
0x1366   :  { %v1713_v30 = vsub.f32 1.0, %v1712_v25 }
0x1367   :  { %v1751_v28 = vmul.f32 %v4840_v9, %v1750_v15 }
0x1368   :  { %v1714_v38 = vmul.f32 %v4842_v22, %v1713_v30 }
0x1369   :  { %v1752_v13 = vadd.f32 %v4840_v9, %v1751_v28 }
0x136a   :  { %v1715_v53 = vadd.f32 %v4842_v22, %v1714_v38 }
0x136b   :  { %v1756_v48 = vsel %vm1755_vm7, %v4840_v9, %v1752_v13  ;;  %v1555_v9 = vpop.f32.mrf.mxu2 }
0x136c   :  { %v1761_v36 = vsel %vm1758_vm8, %v1760_v23, %v1756_v48  ;;  %v1719_v58 = vsel %vm1718_vm11, %v4842_v22, %v1715_v53  ;;  %v1556_v28 = vadd.f32 %v1555_v9, %v5953_v20 }
0x136d   :  { %v1724_v61 = vsel %vm1721_vm12, %v1723_v60, %v1719_v58  ;;  %v1764_v16 = vmul.f32 0.0, %v1761_v36 }
0x136e   :  { %v1727_v8 = vmul.f32 0.0, %v1724_v61  ;;  %v1625_v30 = vadd.f32 %v5979_v62, %v1556_v28 }
0x1373   :  { %v6008_v10 = vpop.f32.mrf.mxu2 }
0x137b   :  { %v6010_v15 = vpop.f32.mrf.mxu2 }
0x1383   :  { %v6012_v22 = vpop.f32.mrf.mxu2 }
0x138b   :  { %v6014_v25 = vpop.f32.mrf.mxu2 }
0x13ca   :  { %v1730_v59 = vpop.permute.xlu0 %1729 }
0x13cb   :  { %v1767_v51 = vpop.permute.xlu1 %1766  ;;  %v1732_v39 = vmul.f32 %v1730_v59, %v1724_v61 }
0x13cc   :  { %v1769_v47 = vmul.f32 %v1767_v51, %v1761_v36 }
0x13ce   :  { %1771 = vrot.lane.b32.xlu2 %v1769_v47, %s5312_s4 }
0x13d6   :  { %1734 = vrot.lane.b32.xlu2 %v1732_v39, %s5312_s4 }
0x1428   :  { %v1772_v49 = vpop.permute.xlu2 %1771 }
0x1429   :  { %v5986_v55 = vadd.f32 %v1772_v49, %v1764_v16 }
0x142b   :  { %4843 = vtanh.f32 %v5986_v55 }
0x1430   :  { %v1735_v5 = vpop.permute.xlu2 %1734 }
0x1431   :  { %v4844_v63 = vpop.eup %4843  ;;  %v5989_v43 = vadd.f32 %v1735_v5, %v1727_v8 }
0x1432   :  { %1777 = vrot.lane.b32.xlu1 %v4844_v63, %s5311_s29 }
0x1433   :  { %4845 = vtanh.f32 %v5989_v43 }
0x1439   :  { %v4846_v0 = vpop.eup %4845 }
0x143a   :  { %1740 = vrot.lane.b32.xlu1 %v4846_v0, %s5311_s29 }
0x14a4   :  { %v1778_v31 = vpop.permute.xlu1 %1777 }
0x14a5   :  { %v1780_v4 = vmul.f32 %v1778_v31, %v1761_v36 }
0x14a7   :  { %1787 = vrot.lane.b32.xlu0 %v1780_v4, %s5312_s4 }
0x14ac   :  { %v1741_v46 = vpop.permute.xlu1 %1740 }
0x14ad   :  { %v1743_v6 = vmul.f32 %v1741_v46, %v1724_v61 }
0x14af   :  { %1782 = vrot.lane.b32.xlu2 %v1743_v6, %s5312_s4 }
0x1509   :  { %v1783_v45 = vpop.permute.xlu2 %1782 }
0x150a   :  { %1785 = vst.msk [vmem:[#allocation3] sm:$0xff] %vm187_vm0, %v1783_v45  ;;  %4553 = vmatmul.msk.f32.vlgmr.msrb.gmra.mxu2 %vm187_vm0, %v1783_v45 }
0x150b   :  { %2334 = vmatpush.msrb.mxu2 %v5900_v18 }
0x150d   :  { %2335 = vmatpush.msrb.mxu2 %v5902_v21 }
0x150f   :  { %2336 = vmatpush.msrb.mxu2 %v5906_v27 }
0x1511   :  { %2337 = vmatpush.msrb.mxu2 %v5912_v19 }
0x1519   :  { %v1788_v44 = vpop.permute.xlu0 %1787 }
0x151a   :  { %1790 = vst.msk [vmem:[#allocation4 + $0x38] sm:$0xff] %vm187_vm0, %v1788_v44  ;;  %4554 = vmatmul.msk.f32.vlgmr.msra.gmra.mxu3 %vm187_vm0, %v1788_v44 }
0x151b   :  { %2358 = vmatpush.msra.mxu3 %v5860_v1 }
0x151d   :  { %2359 = vmatpush.msra.mxu3 %v5868_v24 }
0x151f   :  { %2360 = vmatpush.msra.mxu3 %v5877_v3 }
0x1521   :  { %2361 = vmatpush.msra.mxu3 %v5888_v17 }
0x158d   :  { %v1811_v13 = vpop.f32.mrf.mxu2 }
0x158e   :  { %v1814_v34 = vadd.f32 %v1811_v13, %v1625_v30 }
0x1590   :  { %4847 = vtanh.f32 %v1814_v34  ;;  %v4555_v36 = vmul.f32 -1.442695, %v1814_v34 }
0x1596   :  { %v4848_v37 = vpop.eup %4847 }
0x1597   :  { %1861 = vrot.lane.b32.xlu2 %v4848_v37, %s5311_s29 }
0x159d   :  { %v1835_v38 = vpop.f32.mrf.mxu3 }
0x159e   :  { %v1838_v48 = vadd.f32 %v1835_v38, %v5975_v56 }
0x15a0   :  { %4849 = vtanh.f32 %v1838_v48  ;;  %v4556_v51 = vmul.f32 -1.442695, %v1838_v48 }
0x15a2   :  { %4851 = vpow2.f32 %v4556_v51 }
0x15a3   :  { %4853 = vpow2.f32 %v4555_v36 }
0x15a6   :  { %v4850_v23 = vpop.eup %4849 }
0x15a7   :  { %1898 = vrot.lane.b32.xlu0 %v4850_v23, %s5311_s29 }
0x15a8   :  { %v4852_v53 = vpop.eup %4851 }
0x15a9   :  { %v1879_v20 = vadd.f32 1.0, %v4852_v53  ;;  %v4854_v47 = vpop.eup %4853 }
0x15aa   :  { %v1842_v29 = vadd.f32 1.0, %v4854_v47 }
0x15ab   :  { %4855 = vrcp.f32 %v1879_v20  ;;  %v1891_v49 = vand.u32 2147483648, %v1879_v20  ;;  %vm1885_vm14 = vweird.f32 %v1879_v20  ;;  %v1889_v8 = vand.u32 2147483647, %v1879_v20 }
0x15ac   :  { %4857 = vrcp.f32 %v1842_v29  ;;  %v1854_v45 = vand.u32 2147483648, %v1842_v29  ;;  %vm1848_vm3 = vweird.f32 %v1842_v29  ;;  %v1852_v44 = vand.u32 2147483647, %v1842_v29 }
0x15ad   :  { %v1892_v0 = vor.u32 1.1754944e-38, %v1891_v49  ;;  %vm1890_vm1 = vcmp.eq.f32.partialorder %v1889_v8, 8.507059e+37 }
0x15ae   :  { %v1855_v30 = vor.u32 1.1754944e-38, %v1854_v45  ;;  %vm1853_vm5 = vcmp.eq.f32.partialorder %v1852_v44, 8.507059e+37 }
0x15b1   :  { %v4856_v35 = vpop.eup %4855 }
0x15b2   :  { %v1881_v58 = vmul.f32 %v4856_v35, %v1879_v20  ;;  %v4858_v60 = vpop.eup %4857  ;;  %vm1886_vm13 = vweird.f32 %v4856_v35 }
0x15b3   :  { %v1844_v61 = vmul.f32 %v4858_v60, %v1842_v29  ;;  %vm1887_vm15 = vmor %vm1885_vm14, %vm1886_vm13  ;;  %vm1849_vm2 = vweird.f32 %v4858_v60 }
0x15b4   :  { %v1882_v59 = vsub.f32 1.0, %v1881_v58  ;;  %vm1850_vm4 = vmor %vm1848_vm3, %vm1849_vm2 }
0x15b5   :  { %v1845_v39 = vsub.f32 1.0, %v1844_v61 }
0x15b6   :  { %v1883_v56 = vmul.f32 %v4856_v35, %v1882_v59 }
0x15b7   :  { %v1846_v5 = vmul.f32 %v4858_v60, %v1845_v39 }
0x15b8   :  { %v1884_v16 = vadd.f32 %v4856_v35, %v1883_v56  ;;  %v1559_v56 = vadd.f32 %v6008_v10, %v5957_v7 }
0x15b9   :  { %v1847_v46 = vadd.f32 %v4858_v60, %v1846_v5 }
0x15ba   :  { %v1888_v63 = vsel %vm1887_vm15, %v4856_v35, %v1884_v16  ;;  %v1627_v39 = vadd.f32 %v5979_v62, %v1559_v56 }
0x15bb   :  { %v1893_v4 = vsel %vm1890_vm1, %v1892_v0, %v1888_v63  ;;  %v1851_v9 = vsel %vm1850_vm4, %v4858_v60, %v1847_v46 }
0x15bc   :  { %v1856_v13 = vsel %vm1853_vm5, %v1855_v30, %v1851_v9  ;;  %v1896_v37 = vmul.f32 %v1893_v4, %v5986_v55 }
0x15bd   :  { %v1859_v23 = vmul.f32 %v1856_v13, %v5989_v43 }
0x15f1   :  { %v1862_v28 = vpop.permute.xlu2 %1861 }
0x15f2   :  { %v1864_v34 = vmul.f32 %v1862_v28, %v1856_v13 }
0x1619   :  { %v1899_v31 = vpop.permute.xlu0 %1898 }
0x161a   :  { %v1901_v6 = vmul.f32 %v1899_v31, %v1893_v4 }
0x161c   :  { %1903 = vrot.lane.b32.xlu1 %v1901_v6, %s5312_s4 }
0x1624   :  { %1866 = vrot.lane.b32.xlu1 %v1864_v34, %s5312_s4 }
0x168e   :  { %v1904_v38 = vpop.permute.xlu1 %1903 }
0x168f   :  { %v6024_v48 = vadd.f32 %v1904_v38, %v1896_v37 }
0x1691   :  { %4859 = vtanh.f32 %v6024_v48 }
0x1696   :  { %v1867_v51 = vpop.permute.xlu1 %1866 }
0x1697   :  { %v4860_v36 = vpop.eup %4859  ;;  %v6028_v53 = vadd.f32 %v1867_v51, %v1859_v23 }
0x1698   :  { %1909 = vrot.lane.b32.xlu0 %v4860_v36, %s5311_s29 }
0x1699   :  { %4861 = vtanh.f32 %v6028_v53 }
0x169f   :  { %v4862_v20 = vpop.eup %4861 }
0x16a0   :  { %1872 = vrot.lane.b32.xlu0 %v4862_v20, %s5311_s29 }
0x170a   :  { %v1910_v47 = vpop.permute.xlu0 %1909 }
0x170b   :  { %v1912_v55 = vmul.f32 %v1910_v47, %v1893_v4 }
0x170d   :  { %1919 = vrot.lane.b32.xlu2 %v1912_v55, %s5312_s4 }
0x1712   :  { %v1873_v29 = vpop.permute.xlu0 %1872 }
0x1713   :  { %v1875_v35 = vmul.f32 %v1873_v29, %v1856_v13 }
0x1715   :  { %1914 = vrot.lane.b32.xlu1 %v1875_v35, %s5312_s4 }
0x1767   :  { %v1920_v43 = vpop.permute.xlu2 %1919 }
0x1768   :  { %1922 = vst.msk [vmem:[#allocation4 + $0x30] sm:$0xff] %vm187_vm0, %v1920_v43  ;;  %4558 = vmatmul.msk.f32.vlgmr.msrb.gmra.mxu1 %vm187_vm0, %v1920_v43 }
0x1769   :  { %2490 = vmatpush.msrb.mxu1 %v5860_v1 }
0x176b   :  { %2491 = vmatpush.msrb.mxu1 %v5868_v24 }
0x176d   :  { %2492 = vmatpush.msrb.mxu1 %v5877_v3 }
0x176f   :  { %2493 = vmatpush.msrb.mxu1 %v5888_v17 }
0x1787   :  { %v1915_v58 = vpop.permute.xlu1 %1914 }
0x1788   :  { %1917 = vst.msk [vmem:[#allocation3 + $0x8] sm:$0xff] %vm187_vm0, %v1915_v58  ;;  %4557 = vmatmul.msk.f32.vlgmr.msrb.gmra.mxu0 %vm187_vm0, %v1915_v58 }
0x1789   :  { %2466 = vmatpush.msrb.mxu0 %v5900_v18 }
0x178b   :  { %2467 = vmatpush.msrb.mxu0 %v5902_v21 }
0x178d   :  { %2468 = vmatpush.msrb.mxu0 %v5906_v27 }
0x178f   :  { %2469 = vmatpush.msrb.mxu0 %v5912_v19 }
0x17e5   :  { %v1967_v59 = vpop.f32.mrf.mxu1 }
0x17e6   :  { %v1970_v60 = vadd.f32 %v1967_v59, %v5971_v42 }
0x17e8   :  { %4863 = vtanh.f32 %v1970_v60  ;;  %v4560_v5 = vmul.f32 -1.442695, %v1970_v60 }
0x17ee   :  { %v4864_v61 = vpop.eup %4863 }
0x17ef   :  { %2030 = vrot.lane.b32.xlu2 %v4864_v61, %s5311_s29 }
0x1805   :  { %v1943_v16 = vpop.f32.mrf.mxu0 }
0x1806   :  { %v1946_v49 = vadd.f32 %v1943_v16, %v1627_v39 }
0x1808   :  { %4865 = vtanh.f32 %v1946_v49  ;;  %v4559_v13 = vmul.f32 -1.442695, %v1946_v49 }
0x1809   :  { %4867 = vpow2.f32 %v4560_v5 }
0x180e   :  { %v4866_v8 = vpop.eup %4865 }
0x180f   :  { %1993 = vrot.lane.b32.xlu1 %v4866_v8, %s5311_s29  ;;  %v4868_v63 = vpop.eup %4867 }
0x1810   :  { %v2011_v0 = vadd.f32 1.0, %v4868_v63 }
0x1812   :  { %4869 = vrcp.f32 %v2011_v0  ;;  %v2023_v7 = vand.u32 2147483648, %v2011_v0  ;;  %vm2017_vm7 = vweird.f32 %v2011_v0  ;;  %v2021_v10 = vand.u32 2147483647, %v2011_v0 }
0x1813   :  { %4871 = vpow2.f32 %v4559_v13 }
0x1814   :  { %v2024_v44 = vor.u32 1.1754944e-38, %v2023_v7  ;;  %vm2022_vm9 = vcmp.eq.f32.partialorder %v2021_v10, 8.507059e+37 }
0x1818   :  { %v4870_v42 = vpop.eup %4869 }
0x1819   :  { %v2013_v31 = vmul.f32 %v4870_v42, %v2011_v0  ;;  %vm2018_vm6 = vweird.f32 %v4870_v42  ;;  %v4872_v34 = vpop.eup %4871 }
0x181a   :  { %vm2019_vm8 = vmor %vm2017_vm7, %vm2018_vm6  ;;  %v1974_v37 = vadd.f32 1.0, %v4872_v34 }
0x181b   :  { %v2014_v4 = vsub.f32 1.0, %v2013_v31 }
0x181c   :  { %4873 = vrcp.f32 %v1974_v37  ;;  %v1986_v47 = vand.u32 2147483648, %v1974_v37  ;;  %vm1980_vm11 = vweird.f32 %v1974_v37  ;;  %v1984_v55 = vand.u32 2147483647, %v1974_v37 }
0x181d   :  { %v2015_v46 = vmul.f32 %v4870_v42, %v2014_v4 }
0x181e   :  { %v1987_v35 = vor.u32 1.1754944e-38, %v1986_v47  ;;  %vm1985_vm13 = vcmp.eq.f32.partialorder %v1984_v55, 8.507059e+37 }
0x181f   :  { %v2016_v6 = vadd.f32 %v4870_v42, %v2015_v46 }
0x1821   :  { %v2020_v45 = vsel %vm2019_vm8, %v4870_v42, %v2016_v6 }
0x1822   :  { %v2025_v28 = vsel %vm2022_vm9, %v2024_v44, %v2020_v45  ;;  %v4874_v38 = vpop.eup %4873 }
0x1823   :  { %v1976_v23 = vmul.f32 %v4874_v38, %v1974_v37  ;;  %vm1981_vm10 = vweird.f32 %v4874_v38  ;;  %v2028_v60 = vmul.f32 %v2025_v28, %v6024_v48 }
0x1824   :  { %vm1982_vm12 = vmor %vm1980_vm11, %vm1981_vm10 }
0x1825   :  { %v1977_v51 = vsub.f32 1.0, %v1976_v23 }
0x1827   :  { %v1978_v36 = vmul.f32 %v4874_v38, %v1977_v51 }
0x1829   :  { %v1979_v20 = vadd.f32 %v4874_v38, %v1978_v36 }
0x182b   :  { %v1983_v29 = vsel %vm1982_vm12, %v4874_v38, %v1979_v20 }
0x182c   :  { %v1988_v58 = vsel %vm1985_vm13, %v1987_v35, %v1983_v29 }
0x182d   :  { %v1991_v16 = vmul.f32 %v1988_v58, %v6028_v53 }
0x1849   :  { %v2031_v9 = vpop.permute.xlu2 %2030 }
0x184a   :  { %v2033_v30 = vmul.f32 %v2031_v9, %v2025_v28 }
0x184c   :  { %2035 = vrot.lane.b32.xlu0 %v2033_v30, %s5312_s4 }
0x1881   :  { %v1994_v43 = vpop.permute.xlu1 %1993 }
0x1882   :  { %v1996_v59 = vmul.f32 %v1994_v43, %v1988_v58 }
0x1884   :  { %1998 = vrot.lane.b32.xlu0 %v1996_v59, %s5312_s4 }
0x18be   :  { %v2036_v61 = vpop.permute.xlu0 %2035 }
0x18bf   :  { %v6056_v56 = vadd.f32 %v2036_v61, %v2028_v60 }
0x18c1   :  { %4875 = vtanh.f32 %v6056_v56 }
0x18c7   :  { %v4876_v39 = vpop.eup %4875 }
0x18c8   :  { %2041 = vrot.lane.b32.xlu2 %v4876_v39, %s5311_s29 }
0x18f6   :  { %v1999_v49 = vpop.permute.xlu0 %1998 }
0x18f7   :  { %v6061_v8 = vadd.f32 %v1999_v49, %v1991_v16 }
0x18f9   :  { %4877 = vtanh.f32 %v6061_v8 }
0x18ff   :  { %v4878_v5 = vpop.eup %4877 }
0x1900   :  { %2004 = vrot.lane.b32.xlu2 %v4878_v5, %s5311_s29 }
0x1922   :  { %v2042_v63 = vpop.permute.xlu2 %2041 }
0x1923   :  { %v2044_v48 = vmul.f32 %v2042_v63, %v2025_v28 }
0x1925   :  { %2051 = vrot.lane.b32.xlu1 %v2044_v48, %s5312_s4 }
0x195a   :  { %v2005_v0 = vpop.permute.xlu2 %2004 }
0x195b   :  { %v2007_v42 = vmul.f32 %v2005_v0, %v1988_v58 }
0x195d   :  { %2046 = vrot.lane.b32.xlu0 %v2007_v42, %s5312_s4 }
0x1997   :  { %v2052_v31 = vpop.permute.xlu1 %2051 }
0x1998   :  { %2054 = vst.msk [vmem:[#allocation4 + $0x28] sm:$0xff] %vm187_vm0, %v2052_v31  ;;  %4562 = vmatmul.msk.f32.vlgmr.msrb.gmra.mxu3 %vm187_vm0, %v2052_v31 }
0x1999   :  { %2622 = vmatpush.msrb.mxu3 %v5860_v1 }
0x199b   :  { %2623 = vmatpush.msrb.mxu3 %v5868_v24 }
0x199d   :  { %2624 = vmatpush.msrb.mxu3 %v5877_v3 }
0x199f   :  { %2625 = vmatpush.msrb.mxu3 %v5888_v17  ;;  %v1562_v17 = vadd.f32 %v6010_v15, %v5961_v33 }
0x19a1   :  { %v1629_v4 = vadd.f32 %v5979_v62, %v1562_v17 }
0x19cf   :  { %v2047_v53 = vpop.permute.xlu0 %2046 }
0x19d0   :  { %2049 = vst.msk [vmem:[#allocation3 + $0x10] sm:$0xff] %vm187_vm0, %v2047_v53  ;;  %4561 = vmatmul.msk.f32.vlgmr.msra.gmra.mxu2 %vm187_vm0, %v2047_v53 }
0x19d1   :  { %2598 = vmatpush.msra.mxu2 %v5900_v18 }
0x19d3   :  { %2599 = vmatpush.msra.mxu2 %v5902_v21 }
0x19d5   :  { %2600 = vmatpush.msra.mxu2 %v5906_v27 }
0x19d7   :  { %2601 = vmatpush.msra.mxu2 %v5912_v19 }
0x1a1b   :  { %v2099_v1 = vpop.f32.mrf.mxu3 }
0x1a1c   :  { %v2102_v24 = vadd.f32 %v2099_v1, %v5967_v50 }
0x1a1e   :  { %4879 = vtanh.f32 %v2102_v24  ;;  %v4564_v27 = vmul.f32 -1.442695, %v2102_v24 }
0x1a24   :  { %v4880_v3 = vpop.eup %4879 }
0x1a25   :  { %2162 = vrot.lane.b32.xlu1 %v4880_v3, %s5311_s29 }
0x1a53   :  { %v2075_v46 = vpop.f32.mrf.mxu2 }
0x1a54   :  { %v2078_v18 = vadd.f32 %v2075_v46, %v1629_v4  ;;  %v1565_v46 = vadd.f32 %v6012_v22, %v5965_v14 }
0x1a56   :  { %4881 = vtanh.f32 %v2078_v18  ;;  %v4563_v37 = vmul.f32 -1.442695, %v2078_v18  ;;  %v1631_v18 = vadd.f32 %v5979_v62, %v1565_v46 }
0x1a57   :  { %4883 = vpow2.f32 %v4564_v27 }
0x1a5c   :  { %v4882_v21 = vpop.eup %4881 }
0x1a5d   :  { %2125 = vrot.lane.b32.xlu0 %v4882_v21, %s5311_s29  ;;  %v4884_v19 = vpop.eup %4883 }
0x1a5e   :  { %v2143_v6 = vadd.f32 1.0, %v4884_v19 }
0x1a60   :  { %4885 = vrcp.f32 %v2143_v6  ;;  %v2155_v33 = vand.u32 2147483648, %v2143_v6  ;;  %vm2149_vm15 = vweird.f32 %v2143_v6  ;;  %v2153_v15 = vand.u32 2147483647, %v2143_v6 }
0x1a61   :  { %4887 = vpow2.f32 %v4563_v37 }
0x1a62   :  { %v2156_v28 = vor.u32 1.1754944e-38, %v2155_v33  ;;  %vm2154_vm2 = vcmp.eq.f32.partialorder %v2153_v15, 8.507059e+37 }
0x1a66   :  { %v4886_v50 = vpop.eup %4885 }
0x1a67   :  { %v2145_v7 = vmul.f32 %v4886_v50, %v2143_v6  ;;  %vm2150_vm14 = vweird.f32 %v4886_v50  ;;  %v4888_v38 = vpop.eup %4887 }
0x1a68   :  { %vm2151_vm1 = vmor %vm2149_vm15, %vm2150_vm14  ;;  %v2106_v23 = vadd.f32 1.0, %v4888_v38 }
0x1a69   :  { %v2146_v10 = vsub.f32 1.0, %v2145_v7 }
0x1a6a   :  { %4889 = vrcp.f32 %v2106_v23  ;;  %v2118_v29 = vand.u32 2147483648, %v2106_v23  ;;  %vm2112_vm4 = vweird.f32 %v2106_v23  ;;  %v2116_v35 = vand.u32 2147483647, %v2106_v23 }
0x1a6b   :  { %v2147_v45 = vmul.f32 %v4886_v50, %v2146_v10 }
0x1a6c   :  { %v2119_v58 = vor.u32 1.1754944e-38, %v2118_v29  ;;  %vm2117_vm6 = vcmp.eq.f32.partialorder %v2116_v35, 8.507059e+37 }
0x1a6d   :  { %v2148_v44 = vadd.f32 %v4886_v50, %v2147_v45 }
0x1a6f   :  { %v2152_v9 = vsel %vm2151_vm1, %v4886_v50, %v2148_v44 }
0x1a70   :  { %v2157_v13 = vsel %vm2154_vm2, %v2156_v28, %v2152_v9  ;;  %v4890_v51 = vpop.eup %4889 }
0x1a71   :  { %v2108_v36 = vmul.f32 %v4890_v51, %v2106_v23  ;;  %vm2113_vm3 = vweird.f32 %v4890_v51  ;;  %v2160_v39 = vmul.f32 %v2157_v13, %v6056_v56 }
0x1a72   :  { %vm2114_vm5 = vmor %vm2112_vm4, %vm2113_vm3 }
0x1a73   :  { %v2109_v20 = vsub.f32 1.0, %v2108_v36 }
0x1a75   :  { %v2110_v47 = vmul.f32 %v4890_v51, %v2109_v20 }
0x1a77   :  { %v2111_v55 = vadd.f32 %v4890_v51, %v2110_v47 }
0x1a79   :  { %v2115_v43 = vsel %vm2114_vm5, %v4890_v51, %v2111_v55 }
0x1a7a   :  { %v2120_v60 = vsel %vm2117_vm6, %v2119_v58, %v2115_v43 }
0x1a7b   :  { %v2123_v63 = vmul.f32 %v2120_v60, %v6061_v8 }
0x1a97   :  { %v2163_v30 = vpop.permute.xlu1 %2162 }
0x1a98   :  { %v2165_v34 = vmul.f32 %v2163_v30, %v2157_v13 }
0x1a9a   :  { %2167 = vrot.lane.b32.xlu2 %v2165_v34, %s5312_s4 }
0x1acf   :  { %v2126_v59 = vpop.permute.xlu0 %2125 }
0x1ad0   :  { %v2128_v61 = vmul.f32 %v2126_v59, %v2120_v60 }
0x1ad2   :  { %2130 = vrot.lane.b32.xlu2 %v2128_v61, %s5312_s4 }
0x1af4   :  { %v2168_v16 = vpop.permute.xlu2 %2167 }
0x1af5   :  { %v6088_v49 = vadd.f32 %v2168_v16, %v2160_v39 }
0x1af7   :  { %4891 = vtanh.f32 %v6088_v49 }
0x1afd   :  { %v4892_v5 = vpop.eup %4891 }
0x1afe   :  { %2173 = vrot.lane.b32.xlu1 %v4892_v5, %s5311_s29 }
0x1b2c   :  { %v2131_v48 = vpop.permute.xlu2 %2130 }
0x1b2d   :  { %v6093_v0 = vadd.f32 %v2131_v48, %v2123_v63 }
0x1b2f   :  { %4893 = vtanh.f32 %v6093_v0 }
0x1b35   :  { %v4894_v42 = vpop.eup %4893 }
0x1b36   :  { %2136 = vrot.lane.b32.xlu1 %v4894_v42, %s5311_s29 }
0x1b70   :  { %v2174_v31 = vpop.permute.xlu1 %2173 }
0x1b71   :  { %v2176_v56 = vmul.f32 %v2174_v31, %v2157_v13 }
0x1b73   :  { %2183 = vrot.lane.b32.xlu0 %v2176_v56, %s5312_s4 }
0x1ba8   :  { %v2137_v53 = vpop.permute.xlu1 %2136 }
0x1ba9   :  { %v2139_v1 = vmul.f32 %v2137_v53, %v2120_v60 }
0x1bab   :  { %2178 = vrot.lane.b32.xlu2 %v2139_v1, %s5312_s4 }
0x1be5   :  { %v2184_v24 = vpop.permute.xlu0 %2183 }
0x1be6   :  { %2186 = vst.msk [vmem:[#allocation4 + $0x20] sm:$0xff] %vm187_vm0, %v2184_v24  ;;  %4566 = vmatmul.msk.f32.vlgmr.msra.gmra.mxu1 %vm187_vm0, %v2184_v24 }
0x1c05   :  { %v2179_v8 = vpop.permute.xlu2 %2178 }
0x1c06   :  { %2181 = vst.msk [vmem:[#allocation3 + $0x18] sm:$0xff] %vm187_vm0, %v2179_v8  ;;  %4565 = vmatmul.msk.f32.vlgmr.msra.gmra.mxu0 %vm187_vm0, %v2179_v8 }
0x1c63   :  { %v2231_v3 = vpop.f32.mrf.mxu1 }
0x1c64   :  { %v2234_v17 = vadd.f32 %v2231_v3, %v5963_v41 }
0x1c66   :  { %4895 = vtanh.f32 %v2234_v17  ;;  %v4568_v6 = vmul.f32 -1.442695, %v2234_v17 }
0x1c6c   :  { %v4896_v4 = vpop.eup %4895 }
0x1c6d   :  { %2294 = vrot.lane.b32.xlu0 %v4896_v4, %s5311_s29  ;;  %v1568_v4 = vadd.f32 %v6014_v25, %v5969_v52 }
0x1c6f   :  { %v1633_v46 = vadd.f32 %v5979_v62, %v1568_v4 }
0x1c83   :  { %v2207_v21 = vpop.f32.mrf.mxu0 }
0x1c84   :  { %v2210_v27 = vadd.f32 %v2207_v21, %v1631_v18 }
0x1c86   :  { %4897 = vtanh.f32 %v2210_v27  ;;  %v4567_v50 = vmul.f32 -1.442695, %v2210_v27 }
0x1c87   :  { %4899 = vpow2.f32 %v4568_v6 }
0x1c88   :  { %4901 = vpow2.f32 %v4567_v50 }
0x1c8c   :  { %v4898_v19 = vpop.eup %4897 }
0x1c8d   :  { %2257 = vrot.lane.b32.xlu2 %v4898_v19, %s5311_s29  ;;  %v4900_v7 = vpop.eup %4899 }
0x1c8e   :  { %v2275_v41 = vadd.f32 1.0, %v4900_v7  ;;  %v4902_v10 = vpop.eup %4901 }
0x1c8f   :  { %v2238_v45 = vadd.f32 1.0, %v4902_v10 }
0x1c90   :  { %4903 = vrcp.f32 %v2275_v41  ;;  %v2287_v13 = vand.u32 2147483648, %v2275_v41  ;;  %vm2281_vm8 = vweird.f32 %v2275_v41  ;;  %v2285_v34 = vand.u32 2147483647, %v2275_v41 }
0x1c91   :  { %4905 = vrcp.f32 %v2238_v45  ;;  %v2250_v55 = vand.u32 2147483648, %v2238_v45  ;;  %vm2244_vm12 = vweird.f32 %v2238_v45  ;;  %v2248_v29 = vand.u32 2147483647, %v2238_v45 }
0x1c92   :  { %v2288_v23 = vor.u32 1.1754944e-38, %v2287_v13  ;;  %vm2286_vm10 = vcmp.eq.f32.partialorder %v2285_v34, 8.507059e+37 }
0x1c93   :  { %v2251_v43 = vor.u32 1.1754944e-38, %v2250_v55  ;;  %vm2249_vm14 = vcmp.eq.f32.partialorder %v2248_v29, 8.507059e+37 }
0x1c96   :  { %v4904_v44 = vpop.eup %4903 }
0x1c97   :  { %v2277_v14 = vmul.f32 %v4904_v44, %v2275_v41  ;;  %v4906_v33 = vpop.eup %4905  ;;  %vm2282_vm7 = vweird.f32 %v4904_v44 }
0x1c98   :  { %v2240_v9 = vmul.f32 %v4906_v33, %v2238_v45  ;;  %vm2283_vm9 = vmor %vm2281_vm8, %vm2282_vm7  ;;  %vm2245_vm11 = vweird.f32 %v4906_v33 }
0x1c99   :  { %v2278_v22 = vsub.f32 1.0, %v2277_v14  ;;  %vm2246_vm13 = vmor %vm2244_vm12, %vm2245_vm11 }
0x1c9a   :  { %v2241_v30 = vsub.f32 1.0, %v2240_v9 }
0x1c9b   :  { %v2279_v15 = vmul.f32 %v4904_v44, %v2278_v22 }
0x1c9c   :  { %v2242_v38 = vmul.f32 %v4906_v33, %v2241_v30 }
0x1c9d   :  { %v2280_v28 = vadd.f32 %v4904_v44, %v2279_v15 }
0x1c9e   :  { %v2243_v47 = vadd.f32 %v4906_v33, %v2242_v38 }
0x1c9f   :  { %v2284_v37 = vsel %vm2283_vm9, %v4904_v44, %v2280_v28 }
0x1ca0   :  { %v2289_v36 = vsel %vm2286_vm10, %v2288_v23, %v2284_v37  ;;  %v2247_v35 = vsel %vm2246_vm13, %v4906_v33, %v2243_v47 }
0x1ca1   :  { %v2252_v59 = vsel %vm2249_vm14, %v2251_v43, %v2247_v35  ;;  %v2292_v61 = vmul.f32 %v2289_v36, %v6088_v49 }
0x1ca2   :  { %v2255_v5 = vmul.f32 %v2252_v59, %v6093_v0 }
0x1cdf   :  { %v2295_v51 = vpop.permute.xlu0 %2294 }
0x1ce0   :  { %v2297_v20 = vmul.f32 %v2295_v51, %v2289_v36 }
0x1ce2   :  { %2299 = vrot.lane.b32.xlu1 %v2297_v20, %s5312_s4 }
0x1ce7   :  { %v2258_v58 = vpop.permute.xlu2 %2257 }
0x1ce8   :  { %v2260_v60 = vmul.f32 %v2258_v58, %v2252_v59 }
0x1cea   :  { %2262 = vrot.lane.b32.xlu1 %v2260_v60, %s5312_s4 }
0x1d54   :  { %v2300_v39 = vpop.permute.xlu1 %2299 }
0x1d55   :  { %v6112_v16 = vadd.f32 %v2300_v39, %v2292_v61 }
0x1d57   :  { %4907 = vtanh.f32 %v6112_v16 }
0x1d5c   :  { %v2263_v63 = vpop.permute.xlu1 %2262 }
0x1d5d   :  { %v4908_v48 = vpop.eup %4907  ;;  %v6116_v42 = vadd.f32 %v2263_v63, %v2255_v5 }
0x1d5e   :  { %2305 = vrot.lane.b32.xlu0 %v4908_v48, %s5311_s29 }
0x1d5f   :  { %4909 = vtanh.f32 %v6116_v42 }
0x1d65   :  { %v4910_v31 = vpop.eup %4909 }
0x1d66   :  { %2268 = vrot.lane.b32.xlu0 %v4910_v31, %s5311_s29 }
0x1dd0   :  { %v2306_v56 = vpop.permute.xlu0 %2305 }
0x1dd1   :  { %v2308_v49 = vmul.f32 %v2306_v56, %v2289_v36 }
0x1dd3   :  { %2315 = vrot.lane.b32.xlu2 %v2308_v49, %s5312_s4 }
0x1dd8   :  { %v2269_v53 = vpop.permute.xlu0 %2268 }
0x1dd9   :  { %v2271_v1 = vmul.f32 %v2269_v53, %v2252_v59 }
0x1ddb   :  { %2310 = vrot.lane.b32.xlu1 %v2271_v1, %s5312_s4 }
0x1e2d   :  { %v2316_v0 = vpop.permute.xlu2 %2315 }
0x1e2e   :  { %2318 = vst.msk [vmem:[#allocation4 + $0x18] sm:$0xff] %vm187_vm0, %v2316_v0  ;;  %4570 = vmatmul.msk.f32.vlgmr.msra.gmra.mxu3 %vm187_vm0, %v2316_v0 }
0x1e4d   :  { %v2311_v24 = vpop.permute.xlu1 %2310 }
0x1e4e   :  { %2313 = vst.msk [vmem:[#allocation3 + $0x20] sm:$0xff] %vm187_vm0, %v2311_v24  ;;  %4569 = vmatmul.msk.f32.vlgmr.msrb.gmra.mxu2 %vm187_vm0, %v2311_v24  ;;  %v1571_v24 = vadd.f32 %v5944_v40, %v5973_v54 }
0x1eb1   :  { %v2363_v8 = vpop.f32.mrf.mxu3 }
0x1eb2   :  { %v2366_v3 = vadd.f32 %v2363_v8, %v5959_v32  ;;  %v1635_v8 = vadd.f32 %v5979_v62, %v1571_v24 }
0x1eb4   :  { %4911 = vtanh.f32 %v2366_v3  ;;  %v4572_v19 = vmul.f32 -1.442695, %v2366_v3 }
0x1eba   :  { %v4912_v17 = vpop.eup %4911 }
0x1ebb   :  { %2426 = vrot.lane.b32.xlu2 %v4912_v17, %s5311_s29 }
0x1ed1   :  { %v2339_v18 = vpop.f32.mrf.mxu2 }
0x1ed2   :  { %v2342_v21 = vadd.f32 %v2339_v18, %v1633_v46 }
0x1ed4   :  { %4913 = vtanh.f32 %v2342_v21  ;;  %v4571_v9 = vmul.f32 -1.442695, %v2342_v21 }
0x1ed5   :  { %4915 = vpow2.f32 %v4572_v19 }
0x1eda   :  { %v4914_v27 = vpop.eup %4913 }
0x1edb   :  { %2389 = vrot.lane.b32.xlu1 %v4914_v27, %s5311_s29  ;;  %v4916_v6 = vpop.eup %4915 }
0x1edc   :  { %v2407_v50 = vadd.f32 1.0, %v4916_v6 }
0x1ede   :  { %4917 = vrcp.f32 %v2407_v50  ;;  %v2419_v52 = vand.u32 2147483648, %v2407_v50  ;;  %vm2413_vm1 = vweird.f32 %v2407_v50  ;;  %v2417_v25 = vand.u32 2147483647, %v2407_v50 }
0x1edf   :  { %4919 = vpow2.f32 %v4571_v9 }
0x1ee0   :  { %v2420_v14 = vor.u32 1.1754944e-38, %v2419_v52  ;;  %vm2418_vm3 = vcmp.eq.f32.partialorder %v2417_v25, 8.507059e+37 }
0x1ee4   :  { %v4918_v32 = vpop.eup %4917 }
0x1ee5   :  { %v2409_v7 = vmul.f32 %v4918_v32, %v2407_v50  ;;  %vm2414_vm15 = vweird.f32 %v4918_v32  ;;  %v4920_v28 = vpop.eup %4919 }
0x1ee6   :  { %vm2415_vm2 = vmor %vm2413_vm1, %vm2414_vm15  ;;  %v2370_v30 = vadd.f32 1.0, %v4920_v28 }
0x1ee7   :  { %v2410_v41 = vsub.f32 1.0, %v2409_v7 }
0x1ee8   :  { %4921 = vrcp.f32 %v2370_v30  ;;  %v2382_v51 = vand.u32 2147483648, %v2370_v30  ;;  %vm2376_vm5 = vweird.f32 %v2370_v30  ;;  %v2380_v36 = vand.u32 2147483647, %v2370_v30 }
0x1ee9   :  { %v2411_v10 = vmul.f32 %v4918_v32, %v2410_v41 }
0x1eea   :  { %v2383_v47 = vor.u32 1.1754944e-38, %v2382_v51  ;;  %vm2381_vm7 = vcmp.eq.f32.partialorder %v2380_v36, 8.507059e+37 }
0x1eeb   :  { %v2412_v45 = vadd.f32 %v4918_v32, %v2411_v10 }
0x1eed   :  { %v2416_v44 = vsel %vm2415_vm2, %v4918_v32, %v2412_v45 }
0x1eee   :  { %v2421_v33 = vsel %vm2418_vm3, %v2420_v14, %v2416_v44  ;;  %v4922_v13 = vpop.eup %4921 }
0x1eef   :  { %v2372_v34 = vmul.f32 %v4922_v13, %v2370_v30  ;;  %vm2377_vm4 = vweird.f32 %v4922_v13  ;;  %v2424_v43 = vmul.f32 %v2421_v33, %v6112_v16 }
0x1ef0   :  { %vm2378_vm6 = vmor %vm2376_vm5, %vm2377_vm4 }
0x1ef1   :  { %v2373_v37 = vsub.f32 1.0, %v2372_v34 }
0x1ef3   :  { %v2374_v38 = vmul.f32 %v4922_v13, %v2373_v37 }
0x1ef5   :  { %v2375_v23 = vadd.f32 %v4922_v13, %v2374_v38 }
0x1ef7   :  { %v2379_v20 = vsel %vm2378_vm6, %v4922_v13, %v2375_v23 }
0x1ef8   :  { %v2384_v29 = vsel %vm2381_vm7, %v2383_v47, %v2379_v20 }
0x1ef9   :  { %v2387_v61 = vmul.f32 %v2384_v29, %v6116_v42 }
0x1f15   :  { %v2427_v22 = vpop.permute.xlu2 %2426 }
0x1f16   :  { %v2429_v15 = vmul.f32 %v2427_v22, %v2421_v33 }
0x1f18   :  { %2431 = vrot.lane.b32.xlu0 %v2429_v15, %s5312_s4 }
0x1f4d   :  { %v2390_v55 = vpop.permute.xlu1 %2389 }
0x1f4e   :  { %v2392_v35 = vmul.f32 %v2390_v55, %v2384_v29 }
0x1f50   :  { %2394 = vrot.lane.b32.xlu0 %v2392_v35, %s5312_s4 }
0x1f8a   :  { %v2432_v58 = vpop.permute.xlu0 %2431 }
0x1f8b   :  { %v6136_v59 = vadd.f32 %v2432_v58, %v2424_v43 }
0x1f8d   :  { %4923 = vtanh.f32 %v6136_v59 }
0x1f93   :  { %v4924_v60 = vpop.eup %4923 }
0x1f94   :  { %2437 = vrot.lane.b32.xlu2 %v4924_v60, %s5311_s29 }
0x1fc2   :  { %v2395_v39 = vpop.permute.xlu0 %2394 }
0x1fc3   :  { %v6141_v5 = vadd.f32 %v2395_v39, %v2387_v61  ;;  %v2730_v39 = vld [vmem:[#allocation12 + $0x38] sm:$0xff] }
0x1fc4   :  { %2930 = vmatpush.msra.mxu3 %v2730_v39 }
0x1fc5   :  { %4925 = vtanh.f32 %v6141_v5 }
0x1fcb   :  { %v4926_v63 = vpop.eup %4925 }
0x1fcc   :  { %2400 = vrot.lane.b32.xlu2 %v4926_v63, %s5311_s29  ;;  %v2728_v63 = vld [vmem:[#allocation12 + $0x28] sm:$0xff] }
0x1fcd   :  { %2931 = vmatpush.msra.mxu3 %v2728_v63 }
0x1fee   :  { %v2438_v48 = vpop.permute.xlu2 %2437 }
0x1fef   :  { %v2440_v16 = vmul.f32 %v2438_v48, %v2421_v33  ;;  %v2724_v48 = vld [vmem:[#allocation12 + $0x8] sm:$0xff] }
0x1ff1   :  { %2447 = vrot.lane.b32.xlu1 %v2440_v16, %s5312_s4 }
0x2026   :  { %v2401_v31 = vpop.permute.xlu2 %2400 }
0x2027   :  { %v2403_v56 = vmul.f32 %v2401_v31, %v2384_v29  ;;  %v2729_v31 = vld [vmem:[#allocation12 + $0x30] sm:$0xff] }
0x2028   :  { %2889 = vmatpush.msrb.mxu2 %v2729_v31  ;;  %v2746_v31 = vld [vmem:[#allocation12 + $0x78] sm:$0xff] }
0x2029   :  { %2442 = vrot.lane.b32.xlu0 %v2403_v56, %s5312_s4  ;;  %v2727_v56 = vld [vmem:[#allocation12 + $0x20] sm:$0xff]  ;;  %2824 = vmatpush.msra.mxu1 %v2746_v31 }
0x202a   :  { %2890 = vmatpush.msrb.mxu2 %v2727_v56  ;;  %v2745_v56 = vld [vmem:[#allocation12 + $0x70] sm:$0xff] }
0x202b   :  { %2783 = vmatpush.msra.mxu0 %v2745_v56 }
0x2063   :  { %v2448_v49 = vpop.permute.xlu1 %2447 }
0x2064   :  { %2450 = vst.msk [vmem:[#allocation4 + $0x10] sm:$0xff] %vm187_vm0, %v2448_v49  ;;  %4574 = vmatmul.msk.f32.vlgmr.msrb.gmra.mxu1 %vm187_vm0, %v2448_v49  ;;  %v2725_v49 = vld [vmem:[#allocation12 + $0x10] sm:$0xff] }
0x2065   :  { %2891 = vmatpush.msrb.mxu2 %v2725_v49  ;;  %v2743_v49 = vld [vmem:[#allocation12 + $0x60] sm:$0xff] }
0x2066   :  { %2784 = vmatpush.msra.mxu0 %v2743_v49 }
0x209b   :  { %v2443_v42 = vpop.permute.xlu0 %2442 }
0x209c   :  { %2445 = vst.msk [vmem:[#allocation3 + $0x28] sm:$0xff] %vm187_vm0, %v2443_v42  ;;  %4573 = vmatmul.msk.f32.vlgmr.msrb.gmra.mxu0 %vm187_vm0, %v2443_v42  ;;  %v2723_v42 = vld [vmem:[#allocation12] sm:$0xff] }
0x209d   :  { %2892 = vmatpush.msrb.mxu2 %v2723_v42  ;;  %v2742_v42 = vld [vmem:[#allocation12 + $0x58] sm:$0xff] }
0x20e1   :  { %v2495_v53 = vpop.f32.mrf.mxu1 }
0x20e2   :  { %v2498_v1 = vadd.f32 %v2495_v53, %v5955_v26  ;;  %v2715_v53 = vld [vmem:[#allocation3] sm:$0xff] }
0x20e4   :  { %4927 = vtanh.f32 %v2498_v1  ;;  %v4576_v46 = vmul.f32 -1.442695, %v2498_v1  ;;  %v2716_v1 = vld [vmem:[#allocation3 + $0x8] sm:$0xff] }
0x20ea   :  { %v4928_v0 = vpop.eup %4927 }
0x20eb   :  { %2558 = vrot.lane.b32.xlu1 %v4928_v0, %s5311_s29  ;;  %v2717_v0 = vld [vmem:[#allocation3 + $0x10] sm:$0xff] }
0x2119   :  { %v2471_v3 = vpop.f32.mrf.mxu0 }
0x211a   :  { %v2474_v17 = vadd.f32 %v2471_v3, %v1635_v8  ;;  %v2718_v8 = vld [vmem:[#allocation3 + $0x18] sm:$0xff]  ;;  %v2719_v3 = vld [vmem:[#allocation3 + $0x20] sm:$0xff] }
0x211c   :  { %4929 = vtanh.f32 %v2474_v17  ;;  %v4575_v52 = vmul.f32 -1.442695, %v2474_v17  ;;  %v2720_v17 = vld [vmem:[#allocation3 + $0x28] sm:$0xff] }
0x211d   :  { %4931 = vpow2.f32 %v4576_v46 }
0x2122   :  { %v4930_v4 = vpop.eup %4929 }
0x2123   :  { %2521 = vrot.lane.b32.xlu0 %v4930_v4, %s5311_s29  ;;  %v4932_v18 = vpop.eup %4931 }
0x2124   :  { %v2539_v21 = vadd.f32 1.0, %v4932_v18 }
0x2126   :  { %4933 = vrcp.f32 %v2539_v21  ;;  %v2551_v40 = vand.u32 2147483648, %v2539_v21  ;;  %vm2545_vm9 = vweird.f32 %v2539_v21  ;;  %v2549_v54 = vand.u32 2147483647, %v2539_v21 }
0x2127   :  { %4935 = vpow2.f32 %v4575_v52 }
0x2128   :  { %v2552_v7 = vor.u32 1.1754944e-38, %v2551_v40  ;;  %vm2550_vm11 = vcmp.eq.f32.partialorder %v2549_v54, 8.507059e+37 }
0x212c   :  { %v4934_v26 = vpop.eup %4933 }
0x212d   :  { %v2541_v27 = vmul.f32 %v4934_v26, %v2539_v21  ;;  %vm2546_vm8 = vweird.f32 %v4934_v26  ;;  %v4936_v25 = vpop.eup %4935 }
0x212e   :  { %vm2547_vm10 = vmor %vm2545_vm9, %vm2546_vm8  ;;  %v2502_v44 = vadd.f32 1.0, %v4936_v25 }
0x212f   :  { %v2542_v19 = vsub.f32 1.0, %v2541_v27 }
0x2130   :  { %4937 = vrcp.f32 %v2502_v44  ;;  %v2514_v28 = vand.u32 2147483648, %v2502_v44  ;;  %vm2508_vm13 = vweird.f32 %v2502_v44  ;;  %v2512_v30 = vand.u32 2147483647, %v2502_v44 }
0x2131   :  { %v2543_v6 = vmul.f32 %v4934_v26, %v2542_v19 }
0x2132   :  { %v2515_v34 = vor.u32 1.1754944e-38, %v2514_v28  ;;  %vm2513_vm15 = vcmp.eq.f32.partialorder %v2512_v30, 8.507059e+37 }
0x2133   :  { %v2544_v50 = vadd.f32 %v4934_v26, %v2543_v6 }
0x2135   :  { %v2548_v32 = vsel %vm2547_vm10, %v4934_v26, %v2544_v50  ;;  %v1574_v26 = vadd.f32 %v5946_v2, %v5977_v57 }
0x2136   :  { %v2553_v10 = vsel %vm2550_vm11, %v2552_v7, %v2548_v32  ;;  %v4938_v14 = vpop.eup %4937 }
0x2137   :  { %v2504_v22 = vmul.f32 %v4938_v14, %v2502_v44  ;;  %vm2509_vm12 = vweird.f32 %v4938_v14  ;;  %v2556_v51 = vmul.f32 %v2553_v10, %v6136_v59  ;;  %v1637_v27 = vadd.f32 %v5979_v62, %v1574_v26 }
0x2138   :  { %vm2510_vm14 = vmor %vm2508_vm13, %vm2509_vm12 }
0x2139   :  { %v2505_v33 = vsub.f32 1.0, %v2504_v22 }
0x213b   :  { %v2506_v15 = vmul.f32 %v4938_v14, %v2505_v33 }
0x213d   :  { %v2507_v9 = vadd.f32 %v4938_v14, %v2506_v15 }
0x213f   :  { %v2511_v13 = vsel %vm2510_vm14, %v4938_v14, %v2507_v9 }
0x2140   :  { %v2516_v38 = vsel %vm2513_vm15, %v2515_v34, %v2511_v13 }
0x2141   :  { %v2519_v55 = vmul.f32 %v2516_v38, %v6141_v5  ;;  %v2726_v5 = vld [vmem:[#allocation12 + $0x18] sm:$0xff] }
0x2142   :  { %2932 = vmatpush.msra.mxu3 %v2726_v5 }
0x2144   :  { %2933 = vmatpush.msra.mxu3 %v2724_v48 }
0x215d   :  { %v2559_v41 = vpop.permute.xlu1 %2558 }
0x215e   :  { %v2561_v45 = vmul.f32 %v2559_v41, %v2553_v10 }
0x2160   :  { %2563 = vrot.lane.b32.xlu2 %v2561_v45, %s5312_s4 }
0x2195   :  { %v2522_v37 = vpop.permute.xlu0 %2521 }
0x2196   :  { %v2524_v23 = vmul.f32 %v2522_v37, %v2516_v38 }
0x2198   :  { %2526 = vrot.lane.b32.xlu2 %v2524_v23, %s5312_s4 }
0x21ba   :  { %v2564_v36 = vpop.permute.xlu2 %2563 }
0x21bb   :  { %v6160_v20 = vadd.f32 %v2564_v36, %v2556_v51 }
0x21bd   :  { %4939 = vtanh.f32 %v6160_v20 }
0x21c3   :  { %v4940_v47 = vpop.eup %4939 }
0x21c4   :  { %2569 = vrot.lane.b32.xlu1 %v4940_v47, %s5311_s29 }
0x21f2   :  { %v2527_v29 = vpop.permute.xlu2 %2526 }
0x21f3   :  { %v6165_v35 = vadd.f32 %v2527_v29, %v2519_v55 }
0x21f5   :  { %4941 = vtanh.f32 %v6165_v35 }
0x21fb   :  { %v4942_v43 = vpop.eup %4941 }
0x21fc   :  { %2532 = vrot.lane.b32.xlu1 %v4942_v43, %s5311_s29 }
0x2236   :  { %v2570_v58 = vpop.permute.xlu1 %2569 }
0x2237   :  { %v2572_v59 = vmul.f32 %v2570_v58, %v2553_v10 }
0x2239   :  { %2579 = vrot.lane.b32.xlu0 %v2572_v59, %s5312_s4 }
0x226e   :  { %v2533_v60 = vpop.permute.xlu1 %2532 }
0x226f   :  { %v2535_v61 = vmul.f32 %v2533_v60, %v2516_v38 }
0x2271   :  { %2574 = vrot.lane.b32.xlu2 %v2535_v61, %s5312_s4 }
0x22ab   :  { %v2580_v16 = vpop.permute.xlu0 %2579 }
0x22ac   :  { %2582 = vst.msk [vmem:[#allocation4 + $0x8] sm:$0xff] %vm187_vm0, %v2580_v16  ;;  %4578 = vmatmul.msk.f32.vlgmr.msrb.gmra.mxu3 %vm187_vm0, %v2580_v16 }
0x22b4   :  { %4605 = vmatmul.msk.f32.vlgmr.msra.gmra.mxu3 %vm187_vm0, %v2715_v53 }
0x22bc   :  { %4606 = vmatmul.msk.f32.gmra.mxu3 %vm187_vm0, %v2716_v1 }
0x22c4   :  { %4607 = vmatmul.msk.f32.gmra.mxu3 %vm187_vm0, %v2717_v0 }
0x22cb   :  { %v2575_v24 = vpop.permute.xlu2 %2574 }
0x22cc   :  { %2577 = vst.msk [vmem:[#allocation3 + $0x30] sm:$0xff] %vm187_vm0, %v2575_v24  ;;  %4577 = vmatmul.msk.f32.vlgmr.msra.gmra.mxu2 %vm187_vm0, %v2575_v24  ;;  %4608 = vmatmul.msk.f32.gmra.mxu3 %vm187_vm0, %v2718_v8  ;;  %v6203_v24 = vld [vmem:[#allocation15 + $0x18] sm:$0xff] }
0x22cd   :  { %3172 = vmatpush.msrb.mxu3 %v6203_v24 }
0x22d3   :  { %v2721_v4 = vld [vmem:[#allocation3 + $0x30] sm:$0xff] }
0x22d4   :  { %4597 = vmatmul.msk.f32.vlgmr.msrb.gmra.mxu2 %vm187_vm0, %v2715_v53  ;;  %4609 = vmatmul.msk.f32.gmra.mxu3 %vm187_vm0, %v2719_v3  ;;  %v2741_v53 = vld [vmem:[#allocation12 + $0x50] sm:$0xff] }
0x22d5   :  { %2785 = vmatpush.msra.mxu0 %v2741_v53 }
0x22dc   :  { %4598 = vmatmul.msk.f32.gmra.mxu2 %vm187_vm0, %v2716_v1  ;;  %4610 = vmatmul.msk.f32.gmra.mxu3 %vm187_vm0, %v2720_v17  ;;  %v2740_v1 = vld [vmem:[#allocation12 + $0x48] sm:$0xff] }
0x22e4   :  { %4599 = vmatmul.msk.f32.gmra.mxu2 %vm187_vm0, %v2717_v0  ;;  %4611 = vmatmul.msk.f32.gmra.mxu3 %vm187_vm0, %v2721_v4  ;;  %v2739_v0 = vld [vmem:[#allocation12 + $0x40] sm:$0xff] }
0x22e5   :  { %2786 = vmatpush.msra.mxu0 %v2739_v0 }
0x22ec   :  { %4600 = vmatmul.msk.f32.gmra.mxu2 %vm187_vm0, %v2718_v8  ;;  %v6207_v8 = vld [vmem:[#allocation15 + $0x10] sm:$0xff] }
0x22ed   :  { %3173 = vmatpush.msrb.mxu3 %v6207_v8 }
0x22f4   :  { %4601 = vmatmul.msk.f32.gmra.mxu2 %vm187_vm0, %v2719_v3 }
0x22fc   :  { %4602 = vmatmul.msk.f32.gmra.mxu2 %vm187_vm0, %v2720_v17 }
0x2304   :  { %4603 = vmatmul.msk.f32.gmra.mxu2 %vm187_vm0, %v2721_v4  ;;  %v6214_v4 = vld [vmem:[#allocation15 + $0x8] sm:$0xff] }
0x2305   :  { %3174 = vmatpush.msrb.mxu3 %v6214_v4 }
0x232f   :  { %v2627_v46 = vpop.f32.mrf.mxu3 }
0x2330   :  { %v2630_v18 = vadd.f32 %v2627_v46, %v5951_v11  ;;  %v2732_v46 = vld [vmem:[#allocation4 + $0x8] sm:$0xff] }
0x2332   :  { %4943 = vtanh.f32 %v2630_v18  ;;  %v4580_v40 = vmul.f32 -1.442695, %v2630_v18  ;;  %v2733_v18 = vld [vmem:[#allocation4 + $0x10] sm:$0xff] }
0x2338   :  { %v4944_v21 = vpop.eup %4943 }
0x2339   :  { %2690 = vrot.lane.b32.xlu0 %v4944_v21, %s5311_s29  ;;  %v6222_v21 = vld [vmem:[#allocation15] sm:$0xff] }
0x233a   :  { %3175 = vmatpush.msrb.mxu3 %v6222_v21 }
0x233c   :  { %3436 = vmatpush.msra.mxu3 %v6203_v24 }
0x233e   :  { %3437 = vmatpush.msra.mxu3 %v6207_v8 }
0x2340   :  { %3438 = vmatpush.msra.mxu3 %v6214_v4 }
0x2342   :  { %3439 = vmatpush.msra.mxu3 %v6222_v21 }
0x234f   :  { %v2603_v19 = vpop.f32.mrf.mxu2 }
0x2350   :  { %v2606_v6 = vadd.f32 %v2603_v19, %v1637_v27  ;;  %v2734_v27 = vld [vmem:[#allocation4 + $0x18] sm:$0xff] }
0x2351   :  { %v6235_v19 = vld [vmem:[#allocation13 + $0x18] sm:$0xff] }
0x2352   :  { %4945 = vtanh.f32 %v2606_v6  ;;  %v4579_v54 = vmul.f32 -1.442695, %v2606_v6  ;;  %v6237_v6 = vld [vmem:[#allocation13 + $0x10] sm:$0xff]  ;;  %3018 = vmatpush.msrb.mxu0 %v6235_v19  ;;  %3148 = vmatpush.msra.mxu2 %v6235_v19 }
0x2353   :  { %4947 = vpow2.f32 %v4580_v40  ;;  %v6247_v40 = vld [vmem:[#allocation13] sm:$0xff] }
0x2354   :  { %4949 = vpow2.f32 %v4579_v54  ;;  %3019 = vmatpush.msrb.mxu0 %v6237_v6  ;;  %3149 = vmatpush.msra.mxu2 %v6237_v6  ;;  %v2735_v54 = vld [vmem:[#allocation4 + $0x20] sm:$0xff] }
0x2358   :  { %v4946_v50 = vpop.eup %4945 }
0x2359   :  { %2653 = vrot.lane.b32.xlu2 %v4946_v50, %s5311_s29  ;;  %v4948_v32 = vpop.eup %4947  ;;  %v6241_v50 = vld [vmem:[#allocation13 + $0x8] sm:$0xff] }
0x235a   :  { %v2671_v11 = vadd.f32 1.0, %v4948_v32  ;;  %v4950_v7 = vpop.eup %4949  ;;  %3020 = vmatpush.msrb.mxu0 %v6241_v50  ;;  %3150 = vmatpush.msra.mxu2 %v6241_v50 }
0x235b   :  { %v2634_v41 = vadd.f32 1.0, %v4950_v7  ;;  %v2737_v7 = vld [vmem:[#allocation4 + $0x30] sm:$0xff] }
0x235c   :  { %4951 = vrcp.f32 %v2671_v11  ;;  %v2683_v14 = vand.u32 2147483648, %v2671_v11  ;;  %vm2677_vm2 = vweird.f32 %v2671_v11  ;;  %v2681_v22 = vand.u32 2147483647, %v2671_v11  ;;  %3021 = vmatpush.msrb.mxu0 %v6247_v40  ;;  %3151 = vmatpush.msra.mxu2 %v6247_v40 }
0x235d   :  { %4953 = vrcp.f32 %v2634_v41  ;;  %v2646_v37 = vand.u32 2147483648, %v2634_v41  ;;  %vm2640_vm6 = vweird.f32 %v2634_v41  ;;  %v2644_v38 = vand.u32 2147483647, %v2634_v41 }
0x235e   :  { %v2684_v9 = vor.u32 1.1754944e-38, %v2683_v14  ;;  %vm2682_vm4 = vcmp.eq.f32.partialorder %v2681_v22, 8.507059e+37  ;;  %3412 = vmatpush.msrb.mxu2 %v6235_v19 }
0x235f   :  { %v2647_v51 = vor.u32 1.1754944e-38, %v2646_v37  ;;  %vm2645_vm8 = vcmp.eq.f32.partialorder %v2644_v38, 8.507059e+37 }
0x2360   :  { %3413 = vmatpush.msrb.mxu2 %v6237_v6 }
0x2362   :  { %v4952_v10 = vpop.eup %4951  ;;  %3414 = vmatpush.msrb.mxu2 %v6241_v50 }
0x2363   :  { %v2673_v2 = vmul.f32 %v4952_v10, %v2671_v11  ;;  %v4954_v62 = vpop.eup %4953  ;;  %vm2678_vm1 = vweird.f32 %v4952_v10  ;;  %v2736_v11 = vld [vmem:[#allocation4 + $0x28] sm:$0xff] }
0x2364   :  { %v2636_v52 = vmul.f32 %v4954_v62, %v2634_v41  ;;  %vm2679_vm3 = vmor %vm2677_vm2, %vm2678_vm1  ;;  %vm2641_vm5 = vweird.f32 %v4954_v62  ;;  %3415 = vmatpush.msrb.mxu2 %v6247_v40  ;;  %v2738_v41 = vld [vmem:[#allocation4 + $0x38] sm:$0xff] }
0x2365   :  { %v2674_v57 = vsub.f32 1.0, %v2673_v2  ;;  %vm2642_vm7 = vmor %vm2640_vm6, %vm2641_vm5  ;;  %v2894_v2 = vpop.f32.mrf.mxu2 }
0x2366   :  { %v2637_v44 = vsub.f32 1.0, %v2636_v52 }
0x2367   :  { %v2675_v45 = vmul.f32 %v4952_v10, %v2674_v57 }
0x2368   :  { %v2638_v15 = vmul.f32 %v4954_v62, %v2637_v44 }
0x2369   :  { %v2676_v25 = vadd.f32 %v4952_v10, %v2675_v45 }
0x236a   :  { %v2639_v34 = vadd.f32 %v4954_v62, %v2638_v15 }
0x236b   :  { %v2680_v33 = vsel %vm2679_vm3, %v4952_v10, %v2676_v25  ;;  %v2935_v10 = vpop.f32.mrf.mxu3 }
0x236c   :  { %v2685_v30 = vsel %vm2682_vm4, %v2684_v9, %v2680_v33  ;;  %v2643_v23 = vsel %vm2642_vm7, %v4954_v62, %v2639_v34 }
0x236d   :  { %v2648_v47 = vsel %vm2645_vm8, %v2647_v51, %v2643_v23  ;;  %v2688_v29 = vmul.f32 %v2685_v30, %v6160_v20  ;;  %v2897_v62 = vpop.f32.mrf.mxu2 }
0x236e   :  { %v2651_v59 = vmul.f32 %v2648_v47, %v6165_v35  ;;  %v2744_v35 = vld [vmem:[#allocation12 + $0x68] sm:$0xff] }
0x236f   :  { %2825 = vmatpush.msra.mxu1 %v2744_v35 }
0x2371   :  { %2826 = vmatpush.msra.mxu1 %v2742_v42 }
0x2373   :  { %2827 = vmatpush.msra.mxu1 %v2740_v1  ;;  %v2938_v57 = vpop.f32.mrf.mxu3 }
0x2375   :  { %3040 = vmatpush.msrb.mxu1 %v6203_v24  ;;  %v2900_v33 = vpop.f32.mrf.mxu2 }
0x2377   :  { %3041 = vmatpush.msrb.mxu1 %v6207_v8 }
0x2379   :  { %3042 = vmatpush.msrb.mxu1 %v6214_v4 }
0x237b   :  { %3043 = vmatpush.msrb.mxu1 %v6222_v21  ;;  %v2941_v22 = vpop.f32.mrf.mxu3 }
0x2383   :  { %v2944_v51 = vpop.f32.mrf.mxu3 }
0x23ab   :  { %v2691_v28 = vpop.permute.xlu0 %2690 }
0x23ac   :  { %v2693_v13 = vmul.f32 %v2691_v28, %v2685_v30 }
0x23ae   :  { %2695 = vrot.lane.b32.xlu1 %v2693_v13, %s5312_s4 }
0x23b3   :  { %v2654_v36 = vpop.permute.xlu2 %2653 }
0x23b4   :  { %v2656_v55 = vmul.f32 %v2654_v36, %v2648_v47  ;;  %v2903_v36 = vpop.f32.mrf.mxu2 }
0x23b6   :  { %2658 = vrot.lane.b32.xlu1 %v2656_v55, %s5312_s4 }
0x2420   :  { %v2696_v43 = vpop.permute.xlu1 %2695 }
0x2421   :  { %v2698_v58 = vadd.f32 %v2696_v43, %v2688_v29 }
0x2423   :  { %4955 = vtanh.f32 %v2698_v58 }
0x2428   :  { %v2659_v60 = vpop.permute.xlu1 %2658 }
0x2429   :  { %v4956_v61 = vpop.eup %4955  ;;  %v2661_v39 = vadd.f32 %v2659_v60, %v2651_v59 }
0x242a   :  { %2701 = vrot.lane.b32.xlu0 %v4956_v61, %s5311_s29 }
0x242b   :  { %4957 = vtanh.f32 %v2661_v39  ;;  %v2947_v39 = vpop.f32.mrf.mxu3 }
0x2431   :  { %v4958_v63 = vpop.eup %4957 }
0x2432   :  { %2664 = vrot.lane.b32.xlu0 %v4958_v63, %s5311_s29  ;;  %v2906_v63 = vpop.f32.mrf.mxu2 }
0x2433   :  { %v2950_v42 = vpop.f32.mrf.mxu3 }
0x243a   :  { %v2909_v53 = vpop.f32.mrf.mxu2 }
0x249c   :  { %v2702_v5 = vpop.permute.xlu0 %2701 }
0x249d   :  { %v2704_v48 = vmul.f32 %v2702_v5, %v2685_v30 }
0x249f   :  { %2711 = vrot.lane.b32.xlu2 %v2704_v48, %s5312_s4 }
0x24a4   :  { %v2665_v16 = vpop.permute.xlu0 %2664 }
0x24a5   :  { %v2667_v20 = vmul.f32 %v2665_v16, %v2648_v47 }
0x24a7   :  { %2706 = vrot.lane.b32.xlu1 %v2667_v20, %s5312_s4 }
0x24f9   :  { %v2712_v3 = vpop.permute.xlu2 %2711 }
0x24fa   :  { %2714 = vst.msk [vmem:[#allocation4] sm:$0xff] %vm187_vm0, %v2712_v3 }
0x2501   :  { %v2731_v17 = vld [vmem:[#allocation4] sm:$0xff] }
0x2502   :  { %4581 = vmatmul.msk.f32.vlgmr.msra.gmra.mxu0 %vm187_vm0, %v2731_v17  ;;  %4589 = vmatmul.msk.f32.vlgmr.msra.gmra.mxu1 %vm187_vm0, %v2731_v17 }
0x2503   :  { %3304 = vmatpush.msra.mxu1 %v6203_v24  ;;  %3280 = vmatpush.msra.mxu0 %v6235_v19 }
0x2505   :  { %3305 = vmatpush.msra.mxu1 %v6207_v8  ;;  %3281 = vmatpush.msra.mxu0 %v6237_v6 }
0x2507   :  { %3306 = vmatpush.msra.mxu1 %v6214_v4  ;;  %3282 = vmatpush.msra.mxu0 %v6241_v50 }
0x2509   :  { %3307 = vmatpush.msra.mxu1 %v6222_v21  ;;  %3283 = vmatpush.msra.mxu0 %v6247_v40 }
0x250a   :  { %4582 = vmatmul.msk.f32.gmra.mxu0 %vm187_vm0, %v2732_v46  ;;  %4590 = vmatmul.msk.f32.gmra.mxu1 %vm187_vm0, %v2732_v46 }
0x2512   :  { %4583 = vmatmul.msk.f32.gmra.mxu0 %vm187_vm0, %v2733_v18  ;;  %4591 = vmatmul.msk.f32.gmra.mxu1 %vm187_vm0, %v2733_v18 }
0x2519   :  { %v2707_v26 = vpop.permute.xlu1 %2706 }
0x251a   :  { %2709 = vst.msk [vmem:[#allocation3 + $0x38] sm:$0xff] %vm187_vm0, %v2707_v26  ;;  %4584 = vmatmul.msk.f32.gmra.mxu0 %vm187_vm0, %v2734_v27  ;;  %4592 = vmatmul.msk.f32.gmra.mxu1 %vm187_vm0, %v2734_v27  ;;  %v2953_v26 = vpop.f32.mrf.mxu3  ;;  %v2912_v27 = vpop.f32.mrf.mxu2 }
0x2521   :  { %v2722_v32 = vld [vmem:[#allocation3 + $0x38] sm:$0xff] }
0x2522   :  { %4585 = vmatmul.msk.f32.gmra.mxu0 %vm187_vm0, %v2735_v54  ;;  %4593 = vmatmul.msk.f32.gmra.mxu1 %vm187_vm0, %v2735_v54 }
0x2523   :  { %4604 = vmatmul.msk.f32.gmra.mxu2 %vm187_vm0, %v2722_v32  ;;  %4612 = vmatmul.msk.f32.gmra.mxu3 %vm187_vm0, %v2722_v32 }
0x252a   :  { %4586 = vmatmul.msk.f32.gmra.mxu0 %vm187_vm0, %v2736_v11  ;;  %4594 = vmatmul.msk.f32.gmra.mxu1 %vm187_vm0, %v2736_v11 }
0x2532   :  { %4587 = vmatmul.msk.f32.gmra.mxu0 %vm187_vm0, %v2737_v7  ;;  %4595 = vmatmul.msk.f32.gmra.mxu1 %vm187_vm0, %v2737_v7 }
0x253a   :  { %4588 = vmatmul.msk.f32.gmra.mxu0 %vm187_vm0, %v2738_v41  ;;  %4596 = vmatmul.msk.f32.gmra.mxu1 %vm187_vm0, %v2738_v41 }
0x2542   :  { %3022 = vmatmul.f32.vlgmr.msrb.gmra.mxu0 %v5310_v12  ;;  %3044 = vmatmul.f32.vlgmr.msrb.gmra.mxu1 %v5310_v12  ;;  %v2959_v12 = vld [vmem:[%s6620_s12] sm:$0x3] }
0x2543   :  { %3568 = vmatpush.msrb.mxu1 %v6203_v24  ;;  %3544 = vmatpush.msrb.mxu0 %v6235_v19  ;;  %v2962_v45 = vperm.slane %v2959_v12, 1  ;;  %v2961_v13 = vperm.slane %v2959_v12, 0 }
0x2545   :  { %3569 = vmatpush.msrb.mxu1 %v6207_v8  ;;  %3545 = vmatpush.msrb.mxu0 %v6237_v6 }
0x2547   :  { %3570 = vmatpush.msrb.mxu1 %v6214_v4  ;;  %3546 = vmatpush.msrb.mxu0 %v6241_v50 }
0x2549   :  { %3571 = vmatpush.msrb.mxu1 %v6222_v21  ;;  %3547 = vmatpush.msrb.mxu0 %v6247_v40 }
0x257f   :  { %v2788_v52 = vpop.f32.mrf.mxu0  ;;  %v2829_v25 = vpop.f32.mrf.mxu1 }
0x2580   :  { %v2936_v44 = vadd.f32 %v2935_v10, %v2829_v25 }
0x2582   :  { %v6284_v14 = vadd.f32 %v2962_v45, %v2936_v44 }
0x2587   :  { %v2791_v15 = vpop.f32.mrf.mxu0  ;;  %v2832_v9 = vpop.f32.mrf.mxu1 }
0x2588   :  { %v2898_v28 = vadd.f32 %v2897_v62, %v2791_v15  ;;  %v2939_v30 = vadd.f32 %v2938_v57, %v2832_v9 }
0x258a   :  { %v6286_v34 = vadd.f32 %v2961_v13, %v2898_v28  ;;  %v6288_v37 = vadd.f32 %v2962_v45, %v2939_v30 }
0x258f   :  { %v2794_v38 = vpop.f32.mrf.mxu0  ;;  %v2835_v23 = vpop.f32.mrf.mxu1 }
0x2590   :  { %v2901_v47 = vadd.f32 %v2900_v33, %v2794_v38  ;;  %v2942_v55 = vadd.f32 %v2941_v22, %v2835_v23  ;;  %v2895_v22 = vadd.f32 %v2894_v2, %v2788_v52 }
0x2592   :  { %v6290_v29 = vadd.f32 %v2961_v13, %v2901_v47  ;;  %v6292_v43 = vadd.f32 %v2962_v45, %v2942_v55  ;;  %v2965_v9 = vadd.f32 %v2961_v13, %v2895_v22 }
0x2597   :  { %v2797_v58 = vpop.f32.mrf.mxu0  ;;  %v2838_v59 = vpop.f32.mrf.mxu1 }
0x2598   :  { %v2904_v60 = vadd.f32 %v2903_v36, %v2797_v58  ;;  %v2945_v61 = vadd.f32 %v2944_v51, %v2838_v59 }
0x259a   :  { %v6294_v5 = vadd.f32 %v2961_v13, %v2904_v60  ;;  %v6296_v48 = vadd.f32 %v2962_v45, %v2945_v61 }
0x259f   :  { %v2800_v16 = vpop.f32.mrf.mxu0  ;;  %v2841_v20 = vpop.f32.mrf.mxu1 }
0x25a0   :  { %v2907_v31 = vadd.f32 %v2906_v63, %v2800_v16  ;;  %v2948_v56 = vadd.f32 %v2947_v39, %v2841_v20 }
0x25a2   :  { %v6298_v35 = vadd.f32 %v2962_v45, %v2948_v56  ;;  %v6300_v49 = vadd.f32 %v2961_v13, %v2907_v31 }
0x25a6   :  { %v2915_v12 = vpop.f32.mrf.mxu2  ;;  %v2956_v44 = vpop.f32.mrf.mxu3 }
0x25a7   :  { %v2803_v1 = vpop.f32.mrf.mxu0  ;;  %v2844_v0 = vpop.f32.mrf.mxu1 }
0x25a8   :  { %v2910_v3 = vadd.f32 %v2909_v53, %v2803_v1  ;;  %v2951_v17 = vadd.f32 %v2950_v42, %v2844_v0 }
0x25aa   :  { %v6302_v46 = vadd.f32 %v2962_v45, %v2951_v17  ;;  %v6304_v18 = vadd.f32 %v2961_v13, %v2910_v3 }
0x25af   :  { %v2806_v54 = vpop.f32.mrf.mxu0  ;;  %v2847_v32 = vpop.f32.mrf.mxu1 }
0x25b0   :  { %v2913_v11 = vadd.f32 %v2912_v27, %v2806_v54  ;;  %v2954_v7 = vadd.f32 %v2953_v26, %v2847_v32 }
0x25b2   :  { %v6306_v41 = vadd.f32 %v2962_v45, %v2954_v7  ;;  %v6308_v10 = vadd.f32 %v2961_v13, %v2913_v11 }
0x25b7   :  { %v2809_v57 = vpop.f32.mrf.mxu0  ;;  %v2850_v62 = vpop.f32.mrf.mxu1 }
0x25b8   :  { %v2916_v25 = vadd.f32 %v2915_v12, %v2809_v57  ;;  %v2957_v33 = vadd.f32 %v2956_v44, %v2850_v62 }
0x25ba   :  { %v6310_v15 = vadd.f32 %v2961_v13, %v2916_v25  ;;  %v2980_v28 = vadd.f32 %v2962_v45, %v2957_v33 }
0x25bf   :  { %v3023_v30 = vpop.f32.mrf.mxu0  ;;  %v3045_v38 = vpop.f32.mrf.mxu1 }
0x25c0   :  { %v3026_v23 = vadd.f32 %v3023_v30, %v2965_v9  ;;  %v3048_v51 = vadd.f32 %v3045_v38, %v2980_v28 }
0x25c2   :  { %4959 = vtanh.f32 %v3026_v23  ;;  %v4614_v55 = vmul.f32 -1.442695, %v3048_v51  ;;  %v4613_v13 = vmul.f32 -1.442695, %v3026_v23 }
0x25c3   :  { %4961 = vtanh.f32 %v3048_v51 }
0x25c4   :  { %4963 = vpow2.f32 %v4614_v55 }
0x25c8   :  { %v4960_v36 = vpop.eup %4959 }
0x25c9   :  { %v4962_v47 = vpop.eup %4961  ;;  %3071 = vrot.lane.b32.xlu1 %v4960_v36, %s5311_s29 }
0x25ca   :  { %3108 = vrot.lane.b32.xlu2 %v4962_v47, %s5311_s29  ;;  %v4964_v2 = vpop.eup %4963 }
0x25cb   :  { %v3089_v52 = vadd.f32 1.0, %v4964_v2 }
0x25cd   :  { %4965 = vrcp.f32 %v3089_v52  ;;  %v3101_v16 = vand.u32 2147483648, %v3089_v52  ;;  %vm3095_vm10 = vweird.f32 %v3089_v52  ;;  %v3099_v20 = vand.u32 2147483647, %v3089_v52 }
0x25ce   :  { %4967 = vpow2.f32 %v4613_v13 }
0x25cf   :  { %v3102_v56 = vor.u32 1.1754944e-38, %v3101_v16  ;;  %vm3100_vm12 = vcmp.eq.f32.partialorder %v3099_v20, 8.507059e+37 }
0x25d3   :  { %v4966_v58 = vpop.eup %4965 }
0x25d4   :  { %v3091_v45 = vmul.f32 %v4966_v58, %v3089_v52  ;;  %v4968_v60 = vpop.eup %4967  ;;  %vm3096_vm9 = vweird.f32 %v4966_v58 }
0x25d5   :  { %v3052_v39 = vadd.f32 1.0, %v4968_v60  ;;  %vm3097_vm11 = vmor %vm3095_vm10, %vm3096_vm9 }
0x25d6   :  { %v3092_v59 = vsub.f32 1.0, %v3091_v45 }
0x25d7   :  { %4969 = vrcp.f32 %v3052_v39  ;;  %v3064_v54 = vand.u32 2147483648, %v3052_v39  ;;  %vm3058_vm14 = vweird.f32 %v3052_v39  ;;  %v3062_v32 = vand.u32 2147483647, %v3052_v39 }
0x25d8   :  { %v3093_v61 = vmul.f32 %v4966_v58, %v3092_v59 }
0x25d9   :  { %v3065_v7 = vor.u32 1.1754944e-38, %v3064_v54  ;;  %vm3063_vm1 = vcmp.eq.f32.partialorder %v3062_v32, 8.507059e+37 }
0x25da   :  { %v3094_v63 = vadd.f32 %v4966_v58, %v3093_v61 }
0x25dc   :  { %v3098_v31 = vsel %vm3097_vm11, %v4966_v58, %v3094_v63 }
0x25dd   :  { %v3103_v53 = vsel %vm3100_vm12, %v3102_v56, %v3098_v31  ;;  %v4970_v1 = vpop.eup %4969 }
0x25de   :  { %v3054_v3 = vmul.f32 %v4970_v1, %v3052_v39  ;;  %vm3059_vm13 = vweird.f32 %v4970_v1  ;;  %v3106_v25 = vmul.f32 0.0, %v3103_v53 }
0x25df   :  { %vm3060_vm15 = vmor %vm3058_vm14, %vm3059_vm13 }
0x25e0   :  { %v3055_v17 = vsub.f32 1.0, %v3054_v3 }
0x25e2   :  { %v3056_v26 = vmul.f32 %v4970_v1, %v3055_v17 }
0x25e4   :  { %v3057_v27 = vadd.f32 %v4970_v1, %v3056_v26 }
0x25e6   :  { %v3061_v11 = vsel %vm3060_vm15, %v4970_v1, %v3057_v27 }
0x25e7   :  { %v3066_v12 = vsel %vm3063_vm1, %v3065_v7, %v3061_v11 }
0x25e8   :  { %v3069_v9 = vmul.f32 0.0, %v3066_v12 }
0x2624   :  { %v3109_v42 = vpop.permute.xlu2 %3108 }
0x2625   :  { %v3111_v0 = vmul.f32 %v3109_v42, %v3103_v53 }
0x2627   :  { %3113 = vrot.lane.b32.xlu0 %v3111_v0, %s5312_s4 }
0x263b   :  { %v3072_v57 = vpop.permute.xlu1 %3071 }
0x263c   :  { %v3074_v62 = vmul.f32 %v3072_v57, %v3066_v12 }
0x263e   :  { %3076 = vrot.lane.b32.xlu0 %v3074_v62, %s5312_s4 }
0x2699   :  { %v3114_v44 = vpop.permute.xlu0 %3113 }
0x269a   :  { %v6316_v22 = vadd.f32 %v3114_v44, %v3106_v25 }
0x269c   :  { %4971 = vtanh.f32 %v6316_v22 }
0x26a2   :  { %v4972_v33 = vpop.eup %4971 }
0x26a3   :  { %3119 = vrot.lane.b32.xlu2 %v4972_v33, %s5311_s29 }
0x26b0   :  { %v3077_v28 = vpop.permute.xlu0 %3076 }
0x26b1   :  { %v6320_v30 = vadd.f32 %v3077_v28, %v3069_v9 }
0x26b3   :  { %4973 = vtanh.f32 %v6320_v30 }
0x26b9   :  { %v4974_v38 = vpop.eup %4973 }
0x26ba   :  { %3082 = vrot.lane.b32.xlu2 %v4974_v38, %s5311_s29 }
0x26fd   :  { %v3120_v23 = vpop.permute.xlu2 %3119 }
0x26fe   :  { %v3122_v51 = vmul.f32 %v3120_v23, %v3103_v53 }
0x2700   :  { %3129 = vrot.lane.b32.xlu1 %v3122_v51, %s5312_s4 }
0x2714   :  { %v3083_v36 = vpop.permute.xlu2 %3082 }
0x2715   :  { %v3085_v47 = vmul.f32 %v3083_v36, %v3066_v12 }
0x2717   :  { %3124 = vrot.lane.b32.xlu0 %v3085_v47, %s5312_s4 }
0x2772   :  { %v3130_v55 = vpop.permute.xlu1 %3129 }
0x2773   :  { %3132 = vst.msk [vmem:[#allocation4 + $0x38] sm:$0xff] %vm187_vm0, %v3130_v55  ;;  %4616 = vmatmul.msk.f32.vlgmr.msrb.gmra.mxu3 %vm187_vm0, %v3130_v55 }
0x2774   :  { %3700 = vmatpush.msrb.mxu3 %v6203_v24 }
0x2776   :  { %3701 = vmatpush.msrb.mxu3 %v6207_v8 }
0x2778   :  { %3702 = vmatpush.msrb.mxu3 %v6214_v4 }
0x277a   :  { %3703 = vmatpush.msrb.mxu3 %v6222_v21 }
0x2789   :  { %v3125_v2 = vpop.permute.xlu0 %3124 }
0x278a   :  { %3127 = vst.msk [vmem:[#allocation3] sm:$0xff] %vm187_vm0, %v3125_v2  ;;  %4615 = vmatmul.msk.f32.vlgmr.msra.gmra.mxu2 %vm187_vm0, %v3125_v2 }
0x278b   :  { %3676 = vmatpush.msra.mxu2 %v6235_v19 }
0x278d   :  { %3677 = vmatpush.msra.mxu2 %v6237_v6 }
0x278f   :  { %3678 = vmatpush.msra.mxu2 %v6241_v50 }
0x2791   :  { %3679 = vmatpush.msra.mxu2 %v6247_v40 }
0x27f6   :  { %v3177_v52 = vpop.f32.mrf.mxu3 }
0x27f7   :  { %v3180_v58 = vadd.f32 %v3177_v52, %v6306_v41 }
0x27f9   :  { %4975 = vtanh.f32 %v3180_v58  ;;  %v4618_v61 = vmul.f32 -1.442695, %v3180_v58 }
0x27ff   :  { %v4976_v13 = vpop.eup %4975 }
0x2800   :  { %3240 = vrot.lane.b32.xlu1 %v4976_v13, %s5311_s29 }
0x280d   :  { %v3153_v45 = vpop.f32.mrf.mxu2 }
0x280e   :  { %v3156_v59 = vadd.f32 %v3153_v45, %v6286_v34 }
0x2810   :  { %4977 = vtanh.f32 %v3156_v59  ;;  %v4617_v20 = vmul.f32 -1.442695, %v3156_v59 }
0x2811   :  { %4979 = vpow2.f32 %v4618_v61 }
0x2816   :  { %v4978_v60 = vpop.eup %4977 }
0x2817   :  { %3203 = vrot.lane.b32.xlu0 %v4978_v60, %s5311_s29  ;;  %v4980_v39 = vpop.eup %4979 }
0x2818   :  { %v3221_v63 = vadd.f32 1.0, %v4980_v39 }
0x281a   :  { %4981 = vrcp.f32 %v3221_v63  ;;  %v3233_v34 = vand.u32 2147483648, %v3221_v63  ;;  %vm3227_vm3 = vweird.f32 %v3221_v63  ;;  %v3231_v0 = vand.u32 2147483647, %v3221_v63 }
0x281b   :  { %4983 = vpow2.f32 %v4617_v20 }
0x281c   :  { %v3234_v17 = vor.u32 1.1754944e-38, %v3233_v34  ;;  %vm3232_vm5 = vcmp.eq.f32.partialorder %v3231_v0, 8.507059e+37 }
0x2820   :  { %v4982_v16 = vpop.eup %4981 }
0x2821   :  { %v3223_v31 = vmul.f32 %v4982_v16, %v3221_v63  ;;  %v4984_v56 = vpop.eup %4983  ;;  %vm3228_vm2 = vweird.f32 %v4982_v16 }
0x2822   :  { %v3184_v53 = vadd.f32 1.0, %v4984_v56  ;;  %vm3229_vm4 = vmor %vm3227_vm3, %vm3228_vm2 }
0x2823   :  { %v3224_v41 = vsub.f32 1.0, %v3223_v31 }
0x2824   :  { %4985 = vrcp.f32 %v3184_v53  ;;  %v3196_v62 = vand.u32 2147483648, %v3184_v53  ;;  %vm3190_vm7 = vweird.f32 %v3184_v53  ;;  %v3194_v25 = vand.u32 2147483647, %v3184_v53 }
0x2825   :  { %v3225_v42 = vmul.f32 %v4982_v16, %v3224_v41 }
0x2826   :  { %v3197_v33 = vor.u32 1.1754944e-38, %v3196_v62  ;;  %vm3195_vm9 = vcmp.eq.f32.partialorder %v3194_v25, 8.507059e+37 }
0x2827   :  { %v3226_v1 = vadd.f32 %v4982_v16, %v3225_v42 }
0x2829   :  { %v3230_v3 = vsel %vm3229_vm4, %v4982_v16, %v3226_v1 }
0x282a   :  { %v3235_v27 = vsel %vm3232_vm5, %v3234_v17, %v3230_v3  ;;  %v4986_v54 = vpop.eup %4985 }
0x282b   :  { %v3186_v11 = vmul.f32 %v4986_v54, %v3184_v53  ;;  %vm3191_vm6 = vweird.f32 %v4986_v54  ;;  %v3238_v23 = vmul.f32 %v3235_v27, %v6316_v22 }
0x282c   :  { %vm3192_vm8 = vmor %vm3190_vm7, %vm3191_vm6 }
0x282d   :  { %v3187_v7 = vsub.f32 1.0, %v3186_v11 }
0x282f   :  { %v3188_v12 = vmul.f32 %v4986_v54, %v3187_v7 }
0x2831   :  { %v3189_v57 = vadd.f32 %v4986_v54, %v3188_v12 }
0x2833   :  { %v3193_v44 = vsel %vm3192_vm8, %v4986_v54, %v3189_v57 }
0x2834   :  { %v3198_v28 = vsel %vm3195_vm9, %v3197_v33, %v3193_v44 }
0x2835   :  { %v3201_v55 = vmul.f32 %v3198_v28, %v6320_v30 }
0x2872   :  { %v3241_v26 = vpop.permute.xlu1 %3240 }
0x2873   :  { %v3243_v32 = vmul.f32 %v3241_v26, %v3235_v27 }
0x2875   :  { %3245 = vrot.lane.b32.xlu2 %v3243_v32, %s5312_s4 }
0x2889   :  { %v3204_v9 = vpop.permute.xlu0 %3203 }
0x288a   :  { %v3206_v38 = vmul.f32 %v3204_v9, %v3198_v28 }
0x288c   :  { %3208 = vrot.lane.b32.xlu2 %v3206_v38, %s5312_s4 }
0x28cf   :  { %v3246_v51 = vpop.permute.xlu2 %3245 }
0x28d0   :  { %v6345_v36 = vadd.f32 %v3246_v51, %v3238_v23 }
0x28d2   :  { %4987 = vtanh.f32 %v6345_v36 }
0x28d8   :  { %v4988_v47 = vpop.eup %4987 }
0x28d9   :  { %3251 = vrot.lane.b32.xlu1 %v4988_v47, %s5311_s29 }
0x28e6   :  { %v3209_v2 = vpop.permute.xlu2 %3208 }
0x28e7   :  { %v6350_v52 = vadd.f32 %v3209_v2, %v3201_v55 }
0x28e9   :  { %4989 = vtanh.f32 %v6350_v52 }
0x28ef   :  { %v4990_v58 = vpop.eup %4989 }
0x28f0   :  { %3214 = vrot.lane.b32.xlu1 %v4990_v58, %s5311_s29 }
0x294b   :  { %v3252_v13 = vpop.permute.xlu1 %3251 }
0x294c   :  { %v3254_v22 = vmul.f32 %v3252_v13, %v3235_v27 }
0x294e   :  { %3261 = vrot.lane.b32.xlu0 %v3254_v22, %s5312_s4 }
0x2962   :  { %v3215_v45 = vpop.permute.xlu1 %3214 }
0x2963   :  { %v3217_v59 = vmul.f32 %v3215_v45, %v3198_v28 }
0x2965   :  { %3256 = vrot.lane.b32.xlu2 %v3217_v59, %s5312_s4 }
0x29bf   :  { %v3257_v60 = vpop.permute.xlu2 %3256 }
0x29c0   :  { %v3262_v61 = vpop.permute.xlu0 %3261  ;;  %3259 = vst.msk [vmem:[#allocation3 + $0x8] sm:$0xff] %vm187_vm0, %v3257_v60  ;;  %4619 = vmatmul.msk.f32.vlgmr.msra.gmra.mxu0 %vm187_vm0, %v3257_v60 }
0x29c1   :  { %3264 = vst.msk [vmem:[#allocation4 + $0x30] sm:$0xff] %vm187_vm0, %v3262_v61  ;;  %4620 = vmatmul.msk.f32.vlgmr.msra.gmra.mxu1 %vm187_vm0, %v3262_v61  ;;  %3808 = vmatpush.msra.mxu0 %v6235_v19 }
0x29c2   :  { %3832 = vmatpush.msra.mxu1 %v6203_v24 }
0x29c3   :  { %3809 = vmatpush.msra.mxu0 %v6237_v6 }
0x29c4   :  { %3833 = vmatpush.msra.mxu1 %v6207_v8 }
0x29c5   :  { %3810 = vmatpush.msra.mxu0 %v6241_v50 }
0x29c6   :  { %3834 = vmatpush.msra.mxu1 %v6214_v4 }
0x29c7   :  { %3811 = vmatpush.msra.mxu0 %v6247_v40 }
0x29c8   :  { %3835 = vmatpush.msra.mxu1 %v6222_v21 }
0x2a3d   :  { %v3285_v30 = vpop.f32.mrf.mxu0 }
0x2a3e   :  { %v3288_v39 = vadd.f32 %v3285_v30, %v6290_v29  ;;  %v3309_v63 = vpop.f32.mrf.mxu1 }
0x2a3f   :  { %v3312_v16 = vadd.f32 %v3309_v63, %v6302_v46 }
0x2a40   :  { %4991 = vtanh.f32 %v3288_v39  ;;  %v4621_v56 = vmul.f32 -1.442695, %v3288_v39 }
0x2a41   :  { %4993 = vtanh.f32 %v3312_v16  ;;  %v4622_v41 = vmul.f32 -1.442695, %v3312_v16 }
0x2a43   :  { %4995 = vpow2.f32 %v4622_v41 }
0x2a44   :  { %4997 = vpow2.f32 %v4621_v56 }
0x2a46   :  { %v4992_v20 = vpop.eup %4991 }
0x2a47   :  { %v4994_v31 = vpop.eup %4993  ;;  %3335 = vrot.lane.b32.xlu2 %v4992_v20, %s5311_s29 }
0x2a48   :  { %3372 = vrot.lane.b32.xlu0 %v4994_v31, %s5311_s29 }
0x2a49   :  { %v4996_v42 = vpop.eup %4995 }
0x2a4a   :  { %v3353_v53 = vadd.f32 1.0, %v4996_v42  ;;  %v4998_v1 = vpop.eup %4997 }
0x2a4b   :  { %v3316_v29 = vadd.f32 1.0, %v4998_v1 }
0x2a4c   :  { %4999 = vrcp.f32 %v3353_v53  ;;  %v3365_v32 = vand.u32 2147483648, %v3353_v53  ;;  %vm3359_vm11 = vweird.f32 %v3353_v53  ;;  %v3363_v11 = vand.u32 2147483647, %v3353_v53 }
0x2a4d   :  { %5001 = vrcp.f32 %v3316_v29  ;;  %v3328_v9 = vand.u32 2147483648, %v3316_v29  ;;  %vm3322_vm15 = vweird.f32 %v3316_v29  ;;  %v3326_v28 = vand.u32 2147483647, %v3316_v29 }
0x2a4e   :  { %v3366_v57 = vor.u32 1.1754944e-38, %v3365_v32  ;;  %vm3364_vm13 = vcmp.eq.f32.partialorder %v3363_v11, 8.507059e+37 }
0x2a4f   :  { %v3329_v51 = vor.u32 1.1754944e-38, %v3328_v9  ;;  %vm3327_vm2 = vcmp.eq.f32.partialorder %v3326_v28, 8.507059e+37 }
0x2a52   :  { %v5000_v34 = vpop.eup %4999 }
0x2a53   :  { %v3355_v46 = vmul.f32 %v5000_v34, %v3353_v53  ;;  %v5002_v3 = vpop.eup %5001  ;;  %vm3360_vm10 = vweird.f32 %v5000_v34 }
0x2a54   :  { %v3318_v17 = vmul.f32 %v5002_v3, %v3316_v29  ;;  %vm3361_vm12 = vmor %vm3359_vm11, %vm3360_vm10  ;;  %vm3323_vm14 = vweird.f32 %v5002_v3 }
0x2a55   :  { %v3356_v0 = vsub.f32 1.0, %v3355_v46  ;;  %vm3324_vm1 = vmor %vm3322_vm15, %vm3323_vm14 }
0x2a56   :  { %v3319_v27 = vsub.f32 1.0, %v3318_v17 }
0x2a57   :  { %v3357_v26 = vmul.f32 %v5000_v34, %v3356_v0 }
0x2a58   :  { %v3320_v7 = vmul.f32 %v5002_v3, %v3319_v27 }
0x2a59   :  { %v3358_v54 = vadd.f32 %v5000_v34, %v3357_v26 }
0x2a5a   :  { %v3321_v44 = vadd.f32 %v5002_v3, %v3320_v7 }
0x2a5b   :  { %v3362_v12 = vsel %vm3361_vm12, %v5000_v34, %v3358_v54 }
0x2a5c   :  { %v3367_v25 = vsel %vm3364_vm13, %v3366_v57, %v3362_v12  ;;  %v3325_v38 = vsel %vm3324_vm1, %v5002_v3, %v3321_v44 }
0x2a5d   :  { %v3330_v47 = vsel %vm3327_vm2, %v3329_v51, %v3325_v38  ;;  %v3370_v2 = vmul.f32 %v3367_v25, %v6345_v36 }
0x2a5e   :  { %v3333_v22 = vmul.f32 %v3330_v47, %v6350_v52 }
0x2aa1   :  { %v3336_v23 = vpop.permute.xlu2 %3335 }
0x2aa2   :  { %v3338_v55 = vmul.f32 %v3336_v23, %v3330_v47 }
0x2aba   :  { %v3373_v62 = vpop.permute.xlu0 %3372 }
0x2abb   :  { %v3375_v33 = vmul.f32 %v3373_v62, %v3367_v25 }
0x2abd   :  { %3377 = vrot.lane.b32.xlu1 %v3375_v33, %s5312_s4 }
0x2ac5   :  { %3340 = vrot.lane.b32.xlu1 %v3338_v55, %s5312_s4 }
0x2b2f   :  { %v3378_v58 = vpop.permute.xlu1 %3377 }
0x2b30   :  { %v6375_v13 = vadd.f32 %v3378_v58, %v3370_v2 }
0x2b32   :  { %5003 = vtanh.f32 %v6375_v13 }
0x2b37   :  { %v3341_v45 = vpop.permute.xlu1 %3340 }
0x2b38   :  { %v5004_v59 = vpop.eup %5003  ;;  %v6379_v60 = vadd.f32 %v3341_v45, %v3333_v22 }
0x2b39   :  { %3383 = vrot.lane.b32.xlu0 %v5004_v59, %s5311_s29 }
0x2b3a   :  { %5005 = vtanh.f32 %v6379_v60 }
0x2b40   :  { %v5006_v61 = vpop.eup %5005 }
0x2b41   :  { %3346 = vrot.lane.b32.xlu0 %v5006_v61, %s5311_s29 }
0x2bab   :  { %v3384_v30 = vpop.permute.xlu0 %3383 }
0x2bac   :  { %v3386_v36 = vmul.f32 %v3384_v30, %v3367_v25 }
0x2bae   :  { %3393 = vrot.lane.b32.xlu2 %v3386_v36, %s5312_s4 }
0x2bb3   :  { %v3347_v39 = vpop.permute.xlu0 %3346 }
0x2bb4   :  { %v3349_v63 = vmul.f32 %v3347_v39, %v3330_v47 }
0x2bb6   :  { %3388 = vrot.lane.b32.xlu1 %v3349_v63, %s5312_s4 }
0x2c08   :  { %v3394_v52 = vpop.permute.xlu2 %3393 }
0x2c09   :  { %3396 = vst.msk [vmem:[#allocation4 + $0x28] sm:$0xff] %vm187_vm0, %v3394_v52  ;;  %4624 = vmatmul.msk.f32.vlgmr.msra.gmra.mxu3 %vm187_vm0, %v3394_v52 }
0x2c0a   :  { %3964 = vmatpush.msra.mxu3 %v6203_v24 }
0x2c0c   :  { %3965 = vmatpush.msra.mxu3 %v6207_v8 }
0x2c0e   :  { %3966 = vmatpush.msra.mxu3 %v6214_v4 }
0x2c10   :  { %3967 = vmatpush.msra.mxu3 %v6222_v21 }
0x2c28   :  { %v3389_v16 = vpop.permute.xlu1 %3388 }
0x2c29   :  { %3391 = vst.msk [vmem:[#allocation3 + $0x10] sm:$0xff] %vm187_vm0, %v3389_v16  ;;  %4623 = vmatmul.msk.f32.vlgmr.msrb.gmra.mxu2 %vm187_vm0, %v3389_v16 }
0x2c2a   :  { %3940 = vmatpush.msrb.mxu2 %v6235_v19 }
0x2c2c   :  { %3941 = vmatpush.msrb.mxu2 %v6237_v6 }
0x2c2e   :  { %3942 = vmatpush.msrb.mxu2 %v6241_v50 }
0x2c30   :  { %3943 = vmatpush.msrb.mxu2 %v6247_v40 }
0x2c8c   :  { %v3441_v24 = vpop.f32.mrf.mxu3 }
0x2c8d   :  { %v3444_v8 = vadd.f32 %v3441_v24, %v6298_v35 }
0x2c8f   :  { %5007 = vtanh.f32 %v3444_v8  ;;  %v4626_v19 = vmul.f32 -1.442695, %v3444_v8 }
0x2c95   :  { %v5008_v4 = vpop.eup %5007 }
0x2c96   :  { %3504 = vrot.lane.b32.xlu2 %v5008_v4, %s5311_s29 }
0x2cac   :  { %v3417_v21 = vpop.f32.mrf.mxu2 }
0x2cad   :  { %v3420_v20 = vadd.f32 %v3417_v21, %v6294_v5 }
0x2caf   :  { %5009 = vtanh.f32 %v3420_v20  ;;  %v4625_v3 = vmul.f32 -1.442695, %v3420_v20 }
0x2cb0   :  { %5011 = vpow2.f32 %v4626_v19 }
0x2cb5   :  { %v5010_v31 = vpop.eup %5009 }
0x2cb6   :  { %3467 = vrot.lane.b32.xlu1 %v5010_v31, %s5311_s29  ;;  %v5012_v6 = vpop.eup %5011 }
0x2cb7   :  { %v3485_v50 = vadd.f32 1.0, %v5012_v6 }
0x2cb9   :  { %5013 = vrcp.f32 %v3485_v50  ;;  %v3497_v53 = vand.u32 2147483648, %v3485_v50  ;;  %vm3491_vm4 = vweird.f32 %v3485_v50  ;;  %v3495_v1 = vand.u32 2147483647, %v3485_v50 }
0x2cba   :  { %5015 = vpow2.f32 %v4625_v3 }
0x2cbb   :  { %v3498_v29 = vor.u32 1.1754944e-38, %v3497_v53  ;;  %vm3496_vm6 = vcmp.eq.f32.partialorder %v3495_v1, 8.507059e+37 }
0x2cbf   :  { %v5014_v40 = vpop.eup %5013 }
0x2cc0   :  { %v3487_v41 = vmul.f32 %v5014_v40, %v3485_v50  ;;  %vm3492_vm3 = vweird.f32 %v5014_v40  ;;  %v5016_v17 = vpop.eup %5015 }
0x2cc1   :  { %vm3493_vm5 = vmor %vm3491_vm4, %vm3492_vm3  ;;  %v3448_v26 = vadd.f32 1.0, %v5016_v17 }
0x2cc2   :  { %v3488_v56 = vsub.f32 1.0, %v3487_v41 }
0x2cc3   :  { %5017 = vrcp.f32 %v3448_v26  ;;  %v3460_v12 = vand.u32 2147483648, %v3448_v26  ;;  %vm3454_vm8 = vweird.f32 %v3448_v26  ;;  %v3458_v57 = vand.u32 2147483647, %v3448_v26 }
0x2cc4   :  { %v3489_v35 = vmul.f32 %v5014_v40, %v3488_v56 }
0x2cc5   :  { %v3461_v25 = vor.u32 1.1754944e-38, %v3460_v12  ;;  %vm3459_vm10 = vcmp.eq.f32.partialorder %v3458_v57, 8.507059e+37 }
0x2cc6   :  { %v3490_v42 = vadd.f32 %v5014_v40, %v3489_v35 }
0x2cc8   :  { %v3494_v5 = vsel %vm3493_vm5, %v5014_v40, %v3490_v42 }
0x2cc9   :  { %v3499_v46 = vsel %vm3496_vm6, %v3498_v29, %v3494_v5  ;;  %v5018_v27 = vpop.eup %5017 }
0x2cca   :  { %v3450_v54 = vmul.f32 %v5018_v27, %v3448_v26  ;;  %vm3455_vm7 = vweird.f32 %v5018_v27  ;;  %v3502_v28 = vmul.f32 %v3499_v46, %v6375_v13 }
0x2ccb   :  { %vm3456_vm9 = vmor %vm3454_vm8, %vm3455_vm7 }
0x2ccc   :  { %v3451_v32 = vsub.f32 1.0, %v3450_v54 }
0x2cce   :  { %v3452_v11 = vmul.f32 %v5018_v27, %v3451_v32 }
0x2cd0   :  { %v3453_v7 = vadd.f32 %v5018_v27, %v3452_v11 }
0x2cd2   :  { %v3457_v62 = vsel %vm3456_vm9, %v5018_v27, %v3453_v7 }
0x2cd3   :  { %v3462_v33 = vsel %vm3459_vm10, %v3461_v25, %v3457_v62 }
0x2cd4   :  { %v3465_v47 = vmul.f32 %v3462_v33, %v6379_v60 }
0x2cf0   :  { %v3505_v34 = vpop.permute.xlu2 %3504 }
0x2cf1   :  { %v3507_v0 = vmul.f32 %v3505_v34, %v3499_v46 }
0x2cf3   :  { %3509 = vrot.lane.b32.xlu0 %v3507_v0, %s5312_s4 }
0x2d28   :  { %v3468_v44 = vpop.permute.xlu1 %3467 }
0x2d29   :  { %v3470_v9 = vmul.f32 %v3468_v44, %v3462_v33 }
0x2d2b   :  { %3472 = vrot.lane.b32.xlu0 %v3470_v9, %s5312_s4 }
0x2d65   :  { %v3510_v38 = vpop.permute.xlu0 %3509 }
0x2d66   :  { %v6405_v23 = vadd.f32 %v3510_v38, %v3502_v28 }
0x2d68   :  { %5019 = vtanh.f32 %v6405_v23 }
0x2d6e   :  { %v5020_v51 = vpop.eup %5019 }
0x2d6f   :  { %3515 = vrot.lane.b32.xlu2 %v5020_v51, %s5311_s29 }
0x2d9d   :  { %v3473_v55 = vpop.permute.xlu0 %3472 }
0x2d9e   :  { %v6410_v2 = vadd.f32 %v3473_v55, %v3465_v47 }
0x2da0   :  { %5021 = vtanh.f32 %v6410_v2 }
0x2da6   :  { %v5022_v58 = vpop.eup %5021 }
0x2da7   :  { %3478 = vrot.lane.b32.xlu2 %v5022_v58, %s5311_s29 }
0x2dc9   :  { %v3516_v22 = vpop.permute.xlu2 %3515 }
0x2dca   :  { %v3518_v13 = vmul.f32 %v3516_v22, %v3499_v46 }
0x2dcc   :  { %3525 = vrot.lane.b32.xlu1 %v3518_v13, %s5312_s4 }
0x2e01   :  { %v3479_v45 = vpop.permute.xlu2 %3478 }
0x2e02   :  { %v3481_v59 = vmul.f32 %v3479_v45, %v3462_v33 }
0x2e04   :  { %3520 = vrot.lane.b32.xlu0 %v3481_v59, %s5312_s4 }
0x2e3e   :  { %v3526_v61 = vpop.permute.xlu1 %3525 }
0x2e3f   :  { %3528 = vst.msk [vmem:[#allocation4 + $0x20] sm:$0xff] %vm187_vm0, %v3526_v61  ;;  %4628 = vmatmul.msk.f32.vlgmr.msrb.gmra.mxu1 %vm187_vm0, %v3526_v61 }
0x2e76   :  { %v3521_v60 = vpop.permute.xlu0 %3520 }
0x2e77   :  { %3523 = vst.msk [vmem:[#allocation3 + $0x18] sm:$0xff] %vm187_vm0, %v3521_v60  ;;  %4627 = vmatmul.msk.f32.vlgmr.msrb.gmra.mxu0 %vm187_vm0, %v3521_v60 }
0x2ebc   :  { %v3573_v30 = vpop.f32.mrf.mxu1 }
0x2ebd   :  { %v3576_v36 = vadd.f32 %v3573_v30, %v6296_v48 }
0x2ebf   :  { %5023 = vtanh.f32 %v3576_v36  ;;  %v4630_v24 = vmul.f32 -1.442695, %v3576_v36 }
0x2ec5   :  { %v5024_v39 = vpop.eup %5023 }
0x2ec6   :  { %3636 = vrot.lane.b32.xlu1 %v5024_v39, %s5311_s29 }
0x2ef4   :  { %v3549_v63 = vpop.f32.mrf.mxu0 }
0x2ef5   :  { %v3552_v52 = vadd.f32 %v3549_v63, %v6300_v49 }
0x2ef7   :  { %5025 = vtanh.f32 %v3552_v52  ;;  %v4629_v42 = vmul.f32 -1.442695, %v3552_v52 }
0x2ef8   :  { %5027 = vpow2.f32 %v4630_v24 }
0x2efd   :  { %v5026_v16 = vpop.eup %5025 }
0x2efe   :  { %3599 = vrot.lane.b32.xlu0 %v5026_v16, %s5311_s29  ;;  %v5028_v8 = vpop.eup %5027 }
0x2eff   :  { %v3617_v4 = vadd.f32 1.0, %v5028_v8 }
0x2f01   :  { %5029 = vrcp.f32 %v3617_v4  ;;  %v3629_v6 = vand.u32 2147483648, %v3617_v4  ;;  %vm3623_vm12 = vweird.f32 %v3617_v4  ;;  %v3627_v50 = vand.u32 2147483647, %v3617_v4 }
0x2f02   :  { %5031 = vpow2.f32 %v4629_v42 }
0x2f03   :  { %v3630_v40 = vor.u32 1.1754944e-38, %v3629_v6  ;;  %vm3628_vm14 = vcmp.eq.f32.partialorder %v3627_v50, 8.507059e+37 }
0x2f07   :  { %v5030_v21 = vpop.eup %5029 }
0x2f08   :  { %v3619_v20 = vmul.f32 %v5030_v21, %v3617_v4  ;;  %vm3624_vm11 = vweird.f32 %v5030_v21  ;;  %v5032_v53 = vpop.eup %5031 }
0x2f09   :  { %vm3625_vm13 = vmor %vm3623_vm12, %vm3624_vm11  ;;  %v3580_v1 = vadd.f32 1.0, %v5032_v53 }
0x2f0a   :  { %v3620_v31 = vsub.f32 1.0, %v3619_v20 }
0x2f0b   :  { %5033 = vrcp.f32 %v3580_v1  ;;  %v3592_v3 = vand.u32 2147483648, %v3580_v1  ;;  %vm3586_vm1 = vweird.f32 %v3580_v1  ;;  %v3590_v17 = vand.u32 2147483647, %v3580_v1 }
0x2f0c   :  { %v3621_v48 = vmul.f32 %v5030_v21, %v3620_v31 }
0x2f0d   :  { %v3593_v27 = vor.u32 1.1754944e-38, %v3592_v3  ;;  %vm3591_vm3 = vcmp.eq.f32.partialorder %v3590_v17, 8.507059e+37 }
0x2f0e   :  { %v3622_v19 = vadd.f32 %v5030_v21, %v3621_v48 }
0x2f10   :  { %v3626_v49 = vsel %vm3625_vm13, %v5030_v21, %v3622_v19 }
0x2f11   :  { %v3631_v56 = vsel %vm3628_vm14, %v3630_v40, %v3626_v49  ;;  %v5034_v5 = vpop.eup %5033 }
0x2f12   :  { %v3582_v29 = vmul.f32 %v5034_v5, %v3580_v1  ;;  %vm3587_vm15 = vweird.f32 %v5034_v5  ;;  %v3634_v7 = vmul.f32 %v3631_v56, %v6405_v23 }
0x2f13   :  { %vm3588_vm2 = vmor %vm3586_vm1, %vm3587_vm15 }
0x2f14   :  { %v3583_v34 = vsub.f32 1.0, %v3582_v29 }
0x2f16   :  { %v3584_v46 = vmul.f32 %v5034_v5, %v3583_v34 }
0x2f18   :  { %v3585_v0 = vadd.f32 %v5034_v5, %v3584_v46 }
0x2f1a   :  { %v3589_v26 = vsel %vm3588_vm2, %v5034_v5, %v3585_v0 }
0x2f1b   :  { %v3594_v32 = vsel %vm3591_vm3, %v3593_v27, %v3589_v26 }
0x2f1c   :  { %v3597_v25 = vmul.f32 %v3594_v32, %v6410_v2 }
0x2f38   :  { %v3637_v41 = vpop.permute.xlu1 %3636 }
0x2f39   :  { %v3639_v35 = vmul.f32 %v3637_v41, %v3631_v56 }
0x2f3b   :  { %3641 = vrot.lane.b32.xlu2 %v3639_v35, %s5312_s4 }
0x2f70   :  { %v3600_v54 = vpop.permute.xlu0 %3599 }
0x2f71   :  { %v3602_v11 = vmul.f32 %v3600_v54, %v3594_v32 }
0x2f73   :  { %3604 = vrot.lane.b32.xlu2 %v3602_v11, %s5312_s4 }
0x2f95   :  { %v3642_v12 = vpop.permute.xlu2 %3641 }
0x2f96   :  { %v6427_v57 = vadd.f32 %v3642_v12, %v3634_v7 }
0x2f98   :  { %5035 = vtanh.f32 %v6427_v57 }
0x2f9e   :  { %v5036_v62 = vpop.eup %5035 }
0x2f9f   :  { %3647 = vrot.lane.b32.xlu1 %v5036_v62, %s5311_s29  ;;  %v4067_v62 = vld [vmem:[%s6621_s13 + $0x10] sm:$0xff] }
0x2fcd   :  { %v3605_v44 = vpop.permute.xlu2 %3604 }
0x2fce   :  { %v6432_v33 = vadd.f32 %v3605_v44, %v3597_v25  ;;  %v4066_v25 = vld [vmem:[%s6621_s13 + $0x8] sm:$0xff]  ;;  %v4065_v44 = vld [vmem:[%s6621_s13] sm:$0xff] }
0x2fd0   :  { %5037 = vtanh.f32 %v6432_v33 }
0x2fd6   :  { %v5038_v9 = vpop.eup %5037 }
0x2fd7   :  { %3610 = vrot.lane.b32.xlu1 %v5038_v9, %s5311_s29  ;;  %v4057_v9 = vld [vmem:[#allocation3] sm:$0xff] }
0x3011   :  { %v3648_v28 = vpop.permute.xlu1 %3647 }
0x3012   :  { %v3650_v38 = vmul.f32 %v3648_v28, %v3631_v56  ;;  %v4058_v28 = vld [vmem:[#allocation3 + $0x8] sm:$0xff] }
0x3014   :  { %3657 = vrot.lane.b32.xlu0 %v3650_v38, %s5312_s4  ;;  %v4059_v38 = vld [vmem:[#allocation3 + $0x10] sm:$0xff] }
0x3049   :  { %v3611_v23 = vpop.permute.xlu1 %3610 }
0x304a   :  { %v3613_v51 = vmul.f32 %v3611_v23, %v3594_v32 }
0x304c   :  { %3652 = vrot.lane.b32.xlu2 %v3613_v51, %s5312_s4  ;;  %v4060_v51 = vld [vmem:[#allocation3 + $0x18] sm:$0xff] }
0x3086   :  { %v3658_v47 = vpop.permute.xlu0 %3657 }
0x3087   :  { %3660 = vst.msk [vmem:[#allocation4 + $0x18] sm:$0xff] %vm187_vm0, %v3658_v47  ;;  %4632 = vmatmul.msk.f32.vlgmr.msrb.gmra.mxu3 %vm187_vm0, %v3658_v47 }
0x30a6   :  { %v3653_v55 = vpop.permute.xlu2 %3652 }
0x30a7   :  { %3655 = vst.msk [vmem:[#allocation3 + $0x20] sm:$0xff] %vm187_vm0, %v3653_v55  ;;  %4631 = vmatmul.msk.f32.vlgmr.msra.gmra.mxu2 %vm187_vm0, %v3653_v55 }
0x30ae   :  { %v4061_v47 = vld [vmem:[#allocation3 + $0x20] sm:$0xff] }
0x310a   :  { %v3705_v2 = vpop.f32.mrf.mxu3 }
0x310b   :  { %v3708_v58 = vadd.f32 %v3705_v2, %v6292_v43 }
0x310d   :  { %5039 = vtanh.f32 %v3708_v58  ;;  %v4634_v61 = vmul.f32 -1.442695, %v3708_v58 }
0x3113   :  { %v5040_v22 = vpop.eup %5039 }
0x3114   :  { %3768 = vrot.lane.b32.xlu0 %v5040_v22, %s5311_s29 }
0x312a   :  { %v3681_v13 = vpop.f32.mrf.mxu2 }
0x312b   :  { %v3684_v45 = vadd.f32 %v3681_v13, %v6304_v18 }
0x312d   :  { %5041 = vtanh.f32 %v3684_v45  ;;  %v4633_v60 = vmul.f32 -1.442695, %v3684_v45 }
0x312e   :  { %5043 = vpow2.f32 %v4634_v61 }
0x312f   :  { %5045 = vpow2.f32 %v4633_v60 }
0x3133   :  { %v5042_v59 = vpop.eup %5041 }
0x3134   :  { %3731 = vrot.lane.b32.xlu2 %v5042_v59, %s5311_s29  ;;  %v5044_v30 = vpop.eup %5043 }
0x3135   :  { %v3749_v36 = vadd.f32 1.0, %v5044_v30  ;;  %v5046_v39 = vpop.eup %5045 }
0x3136   :  { %v3712_v43 = vadd.f32 1.0, %v5046_v39 }
0x3137   :  { %5047 = vrcp.f32 %v3749_v36  ;;  %v3761_v20 = vand.u32 2147483648, %v3749_v36  ;;  %vm3755_vm5 = vweird.f32 %v3749_v36  ;;  %v3759_v31 = vand.u32 2147483647, %v3749_v36 }
0x3138   :  { %5049 = vrcp.f32 %v3712_v43  ;;  %v3724_v56 = vand.u32 2147483648, %v3712_v43  ;;  %vm3718_vm9 = vweird.f32 %v3712_v43  ;;  %v3722_v35 = vand.u32 2147483647, %v3712_v43 }
0x3139   :  { %v3762_v6 = vor.u32 1.1754944e-38, %v3761_v20  ;;  %vm3760_vm7 = vcmp.eq.f32.partialorder %v3759_v31, 8.507059e+37 }
0x313a   :  { %v3725_v53 = vor.u32 1.1754944e-38, %v3724_v56  ;;  %vm3723_vm11 = vcmp.eq.f32.partialorder %v3722_v35, 8.507059e+37 }
0x313d   :  { %v5048_v63 = vpop.eup %5047 }
0x313e   :  { %v3751_v52 = vmul.f32 %v5048_v63, %v3749_v36  ;;  %v5050_v24 = vpop.eup %5049  ;;  %vm3756_vm4 = vweird.f32 %v5048_v63 }
0x313f   :  { %v3714_v18 = vmul.f32 %v5050_v24, %v3712_v43  ;;  %vm3757_vm6 = vmor %vm3755_vm5, %vm3756_vm4  ;;  %vm3719_vm8 = vweird.f32 %v5050_v24 }
0x3140   :  { %v3752_v16 = vsub.f32 1.0, %v3751_v52  ;;  %vm3720_vm10 = vmor %vm3718_vm9, %vm3719_vm8 }
0x3141   :  { %v3715_v21 = vsub.f32 1.0, %v3714_v18 }
0x3142   :  { %v3753_v8 = vmul.f32 %v5048_v63, %v3752_v16 }
0x3143   :  { %v3716_v19 = vmul.f32 %v5050_v24, %v3715_v21 }
0x3144   :  { %v3754_v4 = vadd.f32 %v5048_v63, %v3753_v8 }
0x3145   :  { %v3717_v41 = vadd.f32 %v5050_v24, %v3716_v19 }
0x3146   :  { %v3758_v48 = vsel %vm3757_vm6, %v5048_v63, %v3754_v4 }
0x3147   :  { %v3763_v49 = vsel %vm3760_vm7, %v3762_v6, %v3758_v48  ;;  %v3721_v42 = vsel %vm3720_vm10, %v5050_v24, %v3717_v41 }
0x3148   :  { %v3726_v5 = vsel %vm3723_vm11, %v3725_v53, %v3721_v42  ;;  %v3766_v34 = vmul.f32 %v3763_v49, %v6427_v57  ;;  %v4068_v57 = vld [vmem:[%s6621_s13 + $0x18] sm:$0xff] }
0x3149   :  { %v3729_v3 = vmul.f32 %v3726_v5, %v6432_v33  ;;  %4182 = vmatpush.msrb.mxu1 %v4068_v57 }
0x314b   :  { %4183 = vmatpush.msrb.mxu1 %v4067_v62 }
0x314d   :  { %4184 = vmatpush.msrb.mxu1 %v4066_v25 }
0x314f   :  { %4185 = vmatpush.msrb.mxu1 %v4065_v44 }
0x3186   :  { %v3769_v50 = vpop.permute.xlu0 %3768 }
0x3187   :  { %v3771_v40 = vmul.f32 %v3769_v50, %v3763_v49 }
0x3189   :  { %3773 = vrot.lane.b32.xlu1 %v3771_v40, %s5312_s4 }
0x318e   :  { %v3732_v1 = vpop.permute.xlu2 %3731 }
0x318f   :  { %v3734_v29 = vmul.f32 %v3732_v1, %v3726_v5 }
0x3191   :  { %3736 = vrot.lane.b32.xlu1 %v3734_v29, %s5312_s4 }
0x31fb   :  { %v3774_v46 = vpop.permute.xlu1 %3773 }
0x31fc   :  { %v6449_v0 = vadd.f32 %v3774_v46, %v3766_v34 }
0x31fe   :  { %5051 = vtanh.f32 %v6449_v0 }
0x3203   :  { %v3737_v17 = vpop.permute.xlu1 %3736 }
0x3204   :  { %v5052_v26 = vpop.eup %5051  ;;  %v6453_v27 = vadd.f32 %v3737_v17, %v3729_v3 }
0x3205   :  { %3779 = vrot.lane.b32.xlu0 %v5052_v26, %s5311_s29 }
0x3206   :  { %5053 = vtanh.f32 %v6453_v27 }
0x320c   :  { %v5054_v54 = vpop.eup %5053 }
0x320d   :  { %3742 = vrot.lane.b32.xlu0 %v5054_v54, %s5311_s29 }
0x3277   :  { %v3780_v32 = vpop.permute.xlu0 %3779 }
0x3278   :  { %v3782_v11 = vmul.f32 %v3780_v32, %v3763_v49 }
0x327a   :  { %3789 = vrot.lane.b32.xlu2 %v3782_v11, %s5312_s4 }
0x327f   :  { %v3743_v7 = vpop.permute.xlu0 %3742 }
0x3280   :  { %v3745_v12 = vmul.f32 %v3743_v7, %v3726_v5 }
0x3282   :  { %3784 = vrot.lane.b32.xlu1 %v3745_v12, %s5312_s4 }
0x32d4   :  { %v3790_v33 = vpop.permute.xlu2 %3789 }
0x32d5   :  { %3792 = vst.msk [vmem:[#allocation4 + $0x10] sm:$0xff] %vm187_vm0, %v3790_v33  ;;  %4636 = vmatmul.msk.f32.vlgmr.msra.gmra.mxu1 %vm187_vm0, %v3790_v33 }
0x32dd   :  { %4651 = vmatmul.msk.f32.vlgmr.msrb.gmra.mxu1 %vm187_vm0, %v4057_v9 }
0x32e5   :  { %4652 = vmatmul.msk.f32.gmra.mxu1 %vm187_vm0, %v4058_v28 }
0x32ed   :  { %4653 = vmatmul.msk.f32.gmra.mxu1 %vm187_vm0, %v4059_v38 }
0x32f4   :  { %v3785_v23 = vpop.permute.xlu1 %3784 }
0x32f5   :  { %3787 = vst.msk [vmem:[#allocation3 + $0x28] sm:$0xff] %vm187_vm0, %v3785_v23  ;;  %4635 = vmatmul.msk.f32.vlgmr.msra.gmra.mxu0 %vm187_vm0, %v3785_v23  ;;  %4654 = vmatmul.msk.f32.gmra.mxu1 %vm187_vm0, %v4060_v51 }
0x32fc   :  { %v4062_v55 = vld [vmem:[#allocation3 + $0x28] sm:$0xff] }
0x32fd   :  { %4655 = vmatmul.msk.f32.gmra.mxu1 %vm187_vm0, %v4061_v47 }
0x3305   :  { %4656 = vmatmul.msk.f32.gmra.mxu1 %vm187_vm0, %v4062_v55 }
0x3352   :  { %v3837_v2 = vpop.f32.mrf.mxu1 }
0x3353   :  { %v3840_v58 = vadd.f32 %v3837_v2, %v6288_v37 }
0x3355   :  { %5055 = vtanh.f32 %v3840_v58  ;;  %v4638_v61 = vmul.f32 -1.442695, %v3840_v58 }
0x335b   :  { %v5056_v22 = vpop.eup %5055 }
0x335c   :  { %3900 = vrot.lane.b32.xlu2 %v5056_v22, %s5311_s29 }
0x3372   :  { %v3813_v13 = vpop.f32.mrf.mxu0 }
0x3373   :  { %v3816_v45 = vadd.f32 %v3813_v13, %v6308_v10 }
0x3375   :  { %5057 = vtanh.f32 %v3816_v45  ;;  %v4637_v21 = vmul.f32 -1.442695, %v3816_v45 }
0x3376   :  { %5059 = vpow2.f32 %v4638_v61 }
0x337b   :  { %v5058_v59 = vpop.eup %5057 }
0x337c   :  { %3863 = vrot.lane.b32.xlu1 %v5058_v59, %s5311_s29  ;;  %v5060_v60 = vpop.eup %5059 }
0x337d   :  { %v3881_v30 = vadd.f32 1.0, %v5060_v60 }
0x337f   :  { %5061 = vrcp.f32 %v3881_v30  ;;  %v3893_v52 = vand.u32 2147483648, %v3881_v30  ;;  %vm3887_vm13 = vweird.f32 %v3881_v30  ;;  %v3891_v16 = vand.u32 2147483647, %v3881_v30 }
0x3380   :  { %5063 = vpow2.f32 %v4637_v21 }
0x3381   :  { %v3894_v24 = vor.u32 1.1754944e-38, %v3893_v52  ;;  %vm3892_vm15 = vcmp.eq.f32.partialorder %v3891_v16, 8.507059e+37 }
0x3385   :  { %v5062_v36 = vpop.eup %5061 }
0x3386   :  { %v3883_v39 = vmul.f32 %v5062_v36, %v3881_v30  ;;  %vm3888_vm12 = vweird.f32 %v5062_v36  ;;  %v5064_v20 = vpop.eup %5063 }
0x3387   :  { %vm3889_vm14 = vmor %vm3887_vm13, %vm3888_vm12  ;;  %v3844_v31 = vadd.f32 1.0, %v5064_v20 }
0x3388   :  { %v3884_v43 = vsub.f32 1.0, %v3883_v39 }
0x3389   :  { %5065 = vrcp.f32 %v3844_v31  ;;  %v3856_v40 = vand.u32 2147483648, %v3844_v31  ;;  %vm3850_vm2 = vweird.f32 %v3844_v31  ;;  %v3854_v41 = vand.u32 2147483647, %v3844_v31 }
0x338a   :  { %v3885_v37 = vmul.f32 %v5062_v36, %v3884_v43 }
0x338b   :  { %v3857_v35 = vor.u32 1.1754944e-38, %v3856_v40  ;;  %vm3855_vm4 = vcmp.eq.f32.partialorder %v3854_v41, 8.507059e+37 }
0x338c   :  { %v3886_v63 = vadd.f32 %v5062_v36, %v3885_v37 }
0x338e   :  { %v3890_v10 = vsel %vm3889_vm14, %v5062_v36, %v3886_v63 }
0x338f   :  { %v3895_v18 = vsel %vm3892_vm15, %v3894_v24, %v3890_v10  ;;  %v5066_v48 = vpop.eup %5065  ;;  %vm4456_vm15 = vcmask 23552  }
0x3390   :  { %v3846_v19 = vmul.f32 %v5066_v48, %v3844_v31  ;;  %vm3851_vm1 = vweird.f32 %v5066_v48  ;;  %v3898_v5 = vmul.f32 %v3895_v18, %v6449_v0 }
0x3391   :  { %vm3852_vm3 = vmor %vm3850_vm2, %vm3851_vm1 }
0x3392   :  { %v3847_v6 = vsub.f32 1.0, %v3846_v19 }
0x3394   :  { %v3848_v50 = vmul.f32 %v5066_v48, %v3847_v6 }
0x3396   :  { %v3849_v49 = vadd.f32 %v5066_v48, %v3848_v50 }
0x3398   :  { %v3853_v56 = vsel %vm3852_vm3, %v5066_v48, %v3849_v49 }
0x3399   :  { %v3858_v53 = vsel %vm3855_vm4, %v3857_v35, %v3853_v56 }
0x339a   :  { %v3861_v3 = vmul.f32 %v3858_v53, %v6453_v27 }
0x33b6   :  { %v3901_v8 = vpop.permute.xlu2 %3900 }
0x33b7   :  { %v3903_v4 = vmul.f32 %v3901_v8, %v3895_v18 }
0x33b9   :  { %3905 = vrot.lane.b32.xlu0 %v3903_v4, %s5312_s4 }
0x33ee   :  { %v3864_v42 = vpop.permute.xlu1 %3863 }
0x33ef   :  { %v3866_v1 = vmul.f32 %v3864_v42, %v3858_v53 }
0x33f1   :  { %3868 = vrot.lane.b32.xlu0 %v3866_v1, %s5312_s4  ;;  %v4080_v1 = vld [vmem:[%s6621_s13 + $0x38] sm:$0xff] }
0x33f2   :  { %4117 = vmatpush.msrb.mxu0 %v4080_v1 }
0x342b   :  { %v3906_v29 = vpop.permute.xlu0 %3905 }
0x342c   :  { %v6489_v34 = vadd.f32 %v3906_v29, %v3898_v5  ;;  %v4079_v5 = vld [vmem:[%s6621_s13 + $0x30] sm:$0xff]  ;;  %v4078_v29 = vld [vmem:[%s6621_s13 + $0x28] sm:$0xff] }
0x342d   :  { %4118 = vmatpush.msrb.mxu0 %v4079_v5 }
0x342e   :  { %5067 = vtanh.f32 %v6489_v34 }
0x342f   :  { %4119 = vmatpush.msrb.mxu0 %v4078_v29 }
0x3434   :  { %v5068_v46 = vpop.eup %5067 }
0x3435   :  { %3911 = vrot.lane.b32.xlu2 %v5068_v46, %s5311_s29 }
0x3463   :  { %v3869_v17 = vpop.permute.xlu0 %3868 }
0x3464   :  { %v6494_v26 = vadd.f32 %v3869_v17, %v3861_v3 }
0x3466   :  { %5069 = vtanh.f32 %v6494_v26 }
0x346c   :  { %v5070_v54 = vpop.eup %5069 }
0x346d   :  { %3874 = vrot.lane.b32.xlu2 %v5070_v54, %s5311_s29 }
0x348f   :  { %v3912_v32 = vpop.permute.xlu2 %3911 }
0x3490   :  { %v3914_v0 = vmul.f32 %v3912_v32, %v3895_v18  ;;  %v4072_v32 = vld [vmem:[#allocation4 + $0x18] sm:$0xff] }
0x3492   :  { %3921 = vrot.lane.b32.xlu1 %v3914_v0, %s5312_s4  ;;  %v4234_v0 = vld [vmem:[%s6623_s15 + $0x18] sm:$0xff] }
0x3493   :  { %4275 = vmatpush.msra.mxu2 %v4234_v0 }
0x34c7   :  { %v3875_v11 = vpop.permute.xlu2 %3874 }
0x34c8   :  { %v3877_v7 = vmul.f32 %v3875_v11, %v3858_v53  ;;  %v4073_v11 = vld [vmem:[#allocation4 + $0x20] sm:$0xff] }
0x34ca   :  { %3916 = vrot.lane.b32.xlu0 %v3877_v7, %s5312_s4 }
0x3504   :  { %v3922_v12 = vpop.permute.xlu1 %3921 }
0x3505   :  { %3924 = vst.msk [vmem:[#allocation4 + $0x8] sm:$0xff] %vm187_vm0, %v3922_v12  ;;  %4640 = vmatmul.msk.f32.vlgmr.msra.gmra.mxu3 %vm187_vm0, %v3922_v12  ;;  %v4074_v12 = vld [vmem:[#allocation4 + $0x28] sm:$0xff] }
0x350c   :  { %v4070_v17 = vld [vmem:[#allocation4 + $0x8] sm:$0xff] }
0x353c   :  { %v3917_v27 = vpop.permute.xlu0 %3916 }
0x353d   :  { %3919 = vst.msk [vmem:[#allocation3 + $0x30] sm:$0xff] %vm187_vm0, %v3917_v27  ;;  %4639 = vmatmul.msk.f32.vlgmr.msrb.gmra.mxu2 %vm187_vm0, %v3917_v27  ;;  %v4075_v27 = vld [vmem:[#allocation4 + $0x30] sm:$0xff] }
0x3544   :  { %v4063_v57 = vld [vmem:[#allocation3 + $0x30] sm:$0xff] }
0x3545   :  { %4657 = vmatmul.msk.f32.gmra.mxu1 %vm187_vm0, %v4063_v57  ;;  %v4076_v57 = vld [vmem:[#allocation4 + $0x38] sm:$0xff] }
0x3588   :  { %v3969_v62 = vpop.f32.mrf.mxu3 }
0x3589   :  { %v3972_v25 = vadd.f32 %v3969_v62, %v6284_v14  ;;  %v4233_v62 = vld [vmem:[%s6623_s15 + $0x10] sm:$0xff] }
0x358a   :  { %4276 = vmatpush.msra.mxu2 %v4233_v62 }
0x358b   :  { %5071 = vtanh.f32 %v3972_v25  ;;  %v4642_v38 = vmul.f32 -1.442695, %v3972_v25  ;;  %v4232_v25 = vld [vmem:[%s6623_s15 + $0x8] sm:$0xff] }
0x358c   :  { %4277 = vmatpush.msra.mxu2 %v4232_v25 }
0x3591   :  { %v5072_v44 = vpop.eup %5071 }
0x3592   :  { %4032 = vrot.lane.b32.xlu1 %v5072_v44, %s5311_s29  ;;  %v4231_v44 = vld [vmem:[%s6623_s15] sm:$0xff] }
0x3593   :  { %4278 = vmatpush.msra.mxu2 %v4231_v44 }
0x35c0   :  { %v3945_v33 = vpop.f32.mrf.mxu2 }
0x35c1   :  { %v3948_v9 = vadd.f32 %v3945_v33, %v6310_v15  ;;  %v4187_v33 = vpop.f32.mrf.mxu1 }
0x35c3   :  { %5073 = vtanh.f32 %v3948_v9  ;;  %v4641_v30 = vmul.f32 -1.442695, %v3948_v9  ;;  %v4701_v9 = vld [vmem:[%s6622_s14] ss:$0 sm:$0xff] }
0x35c4   :  { %5075 = vpow2.f32 %v4642_v38 }
0x35c9   :  { %v5074_v28 = vpop.eup %5073 }
0x35ca   :  { %3995 = vrot.lane.b32.xlu0 %v5074_v28, %s5311_s29  ;;  %v5076_v23 = vpop.eup %5075  ;;  %v4190_v28 = vpop.f32.mrf.mxu1 }
0x35cb   :  { %v4013_v51 = vadd.f32 1.0, %v5076_v23 }
0x35cd   :  { %5077 = vrcp.f32 %v4013_v51  ;;  %v4025_v22 = vand.u32 2147483648, %v4013_v51  ;;  %vm4019_vm6 = vweird.f32 %v4013_v51  ;;  %v4023_v13 = vand.u32 2147483647, %v4013_v51 }
0x35ce   :  { %5079 = vpow2.f32 %v4641_v30 }
0x35cf   :  { %v4026_v45 = vor.u32 1.1754944e-38, %v4025_v22  ;;  %vm4024_vm8 = vcmp.eq.f32.partialorder %v4023_v13, 8.507059e+37 }
0x35d3   :  { %v5078_v47 = vpop.eup %5077 }
0x35d4   :  { %v4015_v55 = vmul.f32 %v5078_v47, %v4013_v51  ;;  %vm4020_vm5 = vweird.f32 %v5078_v47  ;;  %v5080_v36 = vpop.eup %5079 }
0x35d5   :  { %vm4021_vm7 = vmor %vm4019_vm6, %vm4020_vm5  ;;  %v3976_v39 = vadd.f32 1.0, %v5080_v36 }
0x35d6   :  { %v4016_v2 = vsub.f32 1.0, %v4015_v55 }
0x35d7   :  { %5081 = vrcp.f32 %v3976_v39  ;;  %v3988_v10 = vand.u32 2147483648, %v3976_v39  ;;  %vm3982_vm10 = vweird.f32 %v3976_v39  ;;  %v3986_v24 = vand.u32 2147483647, %v3976_v39 }
0x35d8   :  { %v4017_v14 = vmul.f32 %v5078_v47, %v4016_v2 }
0x35d9   :  { %v3989_v18 = vor.u32 1.1754944e-38, %v3988_v10  ;;  %vm3987_vm12 = vcmp.eq.f32.partialorder %v3986_v24, 8.507059e+37 }
0x35da   :  { %v4018_v58 = vadd.f32 %v5078_v47, %v4017_v14  ;;  %v4193_v14 = vpop.f32.mrf.mxu1 }
0x35dc   :  { %v4022_v15 = vsel %vm4021_vm7, %v5078_v47, %v4018_v58 }
0x35dd   :  { %v4027_v61 = vsel %vm4024_vm8, %v4026_v45, %v4022_v15  ;;  %v5082_v43 = vpop.eup %5081 }
0x35de   :  { %v3978_v37 = vmul.f32 %v5082_v43, %v3976_v39  ;;  %vm3983_vm9 = vweird.f32 %v5082_v43  ;;  %v4030_v31 = vmul.f32 %v4027_v61, %v6489_v34  ;;  %v4077_v34 = vld [vmem:[%s6621_s13 + $0x20] sm:$0xff] }
0x35df   :  { %vm3984_vm11 = vmor %vm3982_vm10, %vm3983_vm9  ;;  %4120 = vmatpush.msrb.mxu0 %v4077_v34 }
0x35e0   :  { %v3979_v63 = vsub.f32 1.0, %v3978_v37 }
0x35e2   :  { %v3980_v52 = vmul.f32 %v5082_v43, %v3979_v63 }
0x35e4   :  { %v3981_v16 = vadd.f32 %v5082_v43, %v3980_v52 }
0x35e6   :  { %v3985_v8 = vsel %vm3984_vm11, %v5082_v43, %v3981_v16 }
0x35e7   :  { %v3990_v21 = vsel %vm3987_vm12, %v3989_v18, %v3985_v8 }
0x35e8   :  { %v3993_v50 = vmul.f32 %v3990_v21, %v6494_v26  ;;  %v4071_v26 = vld [vmem:[#allocation4 + $0x10] sm:$0xff] }
0x3604   :  { %v4033_v59 = vpop.permute.xlu1 %4032 }
0x3605   :  { %v4035_v60 = vmul.f32 %v4033_v59, %v4027_v61  ;;  %v4196_v59 = vpop.f32.mrf.mxu1 }
0x3607   :  { %4037 = vrot.lane.b32.xlu2 %v4035_v60, %s5312_s4 }
0x360d   :  { %v4199_v43 = vpop.f32.mrf.mxu1 }
0x3615   :  { %v4202_v10 = vpop.f32.mrf.mxu1 }
0x363c   :  { %v3996_v4 = vpop.permute.xlu0 %3995 }
0x363d   :  { %v3998_v20 = vmul.f32 %v3996_v4, %v3990_v21 }
0x363f   :  { %4000 = vrot.lane.b32.xlu2 %v3998_v20, %s5312_s4 }
0x3661   :  { %v4038_v48 = vpop.permute.xlu2 %4037 }
0x3662   :  { %v4040_v19 = vadd.f32 %v4038_v48, %v4030_v31 }
0x3664   :  { %5083 = vtanh.f32 %v4040_v19 }
0x366a   :  { %v5084_v6 = vpop.eup %5083 }
0x366b   :  { %4043 = vrot.lane.b32.xlu1 %v5084_v6, %s5311_s29 }
0x3699   :  { %v4001_v49 = vpop.permute.xlu2 %4000 }
0x369a   :  { %v4003_v40 = vadd.f32 %v4001_v49, %v3993_v50 }
0x369c   :  { %5085 = vtanh.f32 %v4003_v40 }
0x36a2   :  { %v5086_v41 = vpop.eup %5085 }
0x36a3   :  { %4006 = vrot.lane.b32.xlu1 %v5086_v41, %s5311_s29 }
0x36dd   :  { %v4044_v56 = vpop.permute.xlu1 %4043 }
0x36de   :  { %v4046_v35 = vmul.f32 %v4044_v56, %v4027_v61  ;;  %v6566_v56 = vld [vmem:[%s6624_s16] ss:$0 sm:$0xff] }
0x36e0   :  { %4053 = vrot.lane.b32.xlu0 %v4046_v35, %s5312_s4 }
0x3715   :  { %v4007_v42 = vpop.permute.xlu1 %4006 }
0x3716   :  { %v4009_v53 = vmul.f32 %v4007_v42, %v3990_v21  ;;  %v4205_v21 = vpop.f32.mrf.mxu1 }
0x3718   :  { %4048 = vrot.lane.b32.xlu2 %v4009_v53, %s5312_s4 }
0x3752   :  { %v4054_v46 = vpop.permute.xlu0 %4053 }
0x3753   :  { %4056 = vst.msk [vmem:[#allocation4] sm:$0xff] %vm187_vm0, %v4054_v46 }
0x375a   :  { %v4069_v3 = vld [vmem:[#allocation4] sm:$0xff] }
0x375b   :  { %4643 = vmatmul.msk.f32.vlgmr.msrb.gmra.mxu0 %vm187_vm0, %v4069_v3 }
0x3763   :  { %4644 = vmatmul.msk.f32.gmra.mxu0 %vm187_vm0, %v4070_v17 }
0x376b   :  { %4645 = vmatmul.msk.f32.gmra.mxu0 %vm187_vm0, %v4071_v26 }
0x3772   :  { %v4049_v54 = vpop.permute.xlu2 %4048 }
0x3773   :  { %4051 = vst.msk [vmem:[#allocation3 + $0x38] sm:$0xff] %vm187_vm0, %v4049_v54  ;;  %4646 = vmatmul.msk.f32.gmra.mxu0 %vm187_vm0, %v4072_v32 }
0x377a   :  { %v4064_v7 = vld [vmem:[#allocation3 + $0x38] sm:$0xff] }
0x377b   :  { %4647 = vmatmul.msk.f32.gmra.mxu0 %vm187_vm0, %v4073_v11  ;;  %4658 = vmatmul.msk.f32.gmra.mxu1 %vm187_vm0, %v4064_v7 }
0x3783   :  { %4648 = vmatmul.msk.f32.gmra.mxu0 %vm187_vm0, %v4074_v12 }
0x378b   :  { %4649 = vmatmul.msk.f32.gmra.mxu0 %vm187_vm0, %v4075_v27 }
0x3793   :  { %4650 = vmatmul.msk.f32.gmra.mxu0 %vm187_vm0, %v4076_v57 }
0x37d8   :  { %v4122_v38 = vpop.f32.mrf.mxu0 }
0x37d9   :  { %v4188_v23 = vadd.f32 %v4187_v33, %v4122_v38 }
0x37db   :  { %v4215_v51 = vadd.f32 %v4701_v9, %v4188_v23 }
0x37dd   :  { %v4223_v47 = vmax.f32 %v4215_v51, 0.0 }
0x37df   :  { %4659 = vmatmul.msk.f32.vlgmr.msra.gmra.mxu2 %vm187_vm0, %v4223_v47 }
0x37e0   :  { %v4125_v55 = vpop.f32.mrf.mxu0 }
0x37e1   :  { %v4191_v2 = vadd.f32 %v4190_v28, %v4125_v55 }
0x37e3   :  { %v4216_v58 = vadd.f32 %v4701_v9, %v4191_v2 }
0x37e5   :  { %v4224_v22 = vmax.f32 %v4216_v58, 0.0 }
0x37e7   :  { %4660 = vmatmul.msk.f32.gmra.mxu2 %vm187_vm0, %v4224_v22 }
0x37e8   :  { %v4128_v13 = vpop.f32.mrf.mxu0 }
0x37e9   :  { %v4194_v15 = vadd.f32 %v4193_v14, %v4128_v13 }
0x37eb   :  { %v4217_v45 = vadd.f32 %v4701_v9, %v4194_v15 }
0x37ed   :  { %v4225_v61 = vmax.f32 %v4217_v45, 0.0 }
0x37ef   :  { %4661 = vmatmul.msk.f32.gmra.mxu2 %vm187_vm0, %v4225_v61 }
0x37f0   :  { %v4131_v60 = vpop.f32.mrf.mxu0 }
0x37f1   :  { %v4197_v30 = vadd.f32 %v4196_v59, %v4131_v60 }
0x37f3   :  { %v4218_v36 = vadd.f32 %v4701_v9, %v4197_v30 }
0x37f5   :  { %v4226_v39 = vmax.f32 %v4218_v36, 0.0 }
0x37f7   :  { %4662 = vmatmul.msk.f32.gmra.mxu2 %vm187_vm0, %v4226_v39 }
0x37f8   :  { %v4134_v37 = vpop.f32.mrf.mxu0  ;;  %v4208_v6 = vpop.f32.mrf.mxu1 }
0x37f9   :  { %v4200_v63 = vadd.f32 %v4199_v43, %v4134_v37 }
0x37fb   :  { %v4219_v52 = vadd.f32 %v4701_v9, %v4200_v63 }
0x37fd   :  { %v4227_v16 = vmax.f32 %v4219_v52, 0.0 }
0x37ff   :  { %4663 = vmatmul.msk.f32.gmra.mxu2 %vm187_vm0, %v4227_v16 }
0x3800   :  { %v4137_v24 = vpop.f32.mrf.mxu0 }
0x3801   :  { %v4203_v8 = vadd.f32 %v4202_v10, %v4137_v24 }
0x3803   :  { %v4220_v18 = vadd.f32 %v4701_v9, %v4203_v8 }
0x3805   :  { %v4228_v4 = vmax.f32 %v4220_v18, 0.0 }
0x3807   :  { %4664 = vmatmul.msk.f32.gmra.mxu2 %vm187_vm0, %v4228_v4 }
0x3808   :  { %v4140_v20 = vpop.f32.mrf.mxu0 }
0x3809   :  { %v4206_v31 = vadd.f32 %v4205_v21, %v4140_v20 }
0x380b   :  { %v4221_v48 = vadd.f32 %v4701_v9, %v4206_v31 }
0x380d   :  { %v4229_v19 = vmax.f32 %v4221_v48, 0.0 }
0x380f   :  { %4665 = vmatmul.msk.f32.gmra.mxu2 %vm187_vm0, %v4229_v19 }
0x3810   :  { %v4143_v50 = vpop.f32.mrf.mxu0 }
0x3811   :  { %v4209_v49 = vadd.f32 %v4208_v6, %v4143_v50 }
0x3813   :  { %v4222_v40 = vadd.f32 %v4701_v9, %v4209_v49 }
0x3815   :  { %v4230_v41 = vmax.f32 %v4222_v40, 0.0 }
0x3817   :  { %4666 = vmatmul.msk.f32.gmra.mxu2 %vm187_vm0, %v4230_v41 }
0x3862   :  { %v4280_v35 = vpop.f32.mrf.mxu2 }
0x3863   :  { %v4281_v42 = vadd.f32 %v6566_v56, %v4280_v35 }
0x3865   :  { %v4667_v53 = vmul.f32 -1.442695, %v4281_v42 }
0x3867   :  { %5087 = vpow2.f32 %v4667_v53 }
0x386a   :  { %v4283_v1 = vpop.f32.mrf.mxu2 }
0x386b   :  { %v4284_v5 = vadd.f32 %v6566_v56, %v4283_v1 }
0x386d   :  { %v5088_v29 = vpop.eup %5087  ;;  %v4668_v34 = vmul.f32 -1.442695, %v4284_v5 }
0x386e   :  { %v4328_v46 = vadd.f32 1.0, %v5088_v29 }
0x386f   :  { %5089 = vpow2.f32 %v4668_v34 }
0x3870   :  { %5091 = vrcp.f32 %v4328_v46  ;;  %v4347_v12 = vand.u32 2147483648, %v4328_v46  ;;  %v4345_v62 = vand.u32 2147483647, %v4328_v46  ;;  %vm4341_vm13 = vweird.f32 %v4328_v46 }
0x3872   :  { %v4286_v3 = vpop.f32.mrf.mxu2  ;;  %v4348_v38 = vor.u32 1.1754944e-38, %v4347_v12  ;;  %vm4346_vm1 = vcmp.eq.f32.partialorder %v4345_v62, 8.507059e+37 }
0x3873   :  { %v4287_v17 = vadd.f32 %v6566_v56, %v4286_v3 }
0x3875   :  { %v5090_v26 = vpop.eup %5089  ;;  %v4669_v54 = vmul.f32 -1.442695, %v4287_v17 }
0x3876   :  { %v5092_v32 = vpop.eup %5091  ;;  %v4329_v0 = vadd.f32 1.0, %v5090_v26 }
0x3877   :  { %v4337_v11 = vmul.f32 %v5092_v32, %v4328_v46  ;;  %5093 = vpow2.f32 %v4669_v54  ;;  %vm4342_vm0 = vweird.f32 %v5092_v32 }
0x3878   :  { %5095 = vrcp.f32 %v4329_v0  ;;  %vm4343_vm14 = vmor %vm4341_vm13, %vm4342_vm0  ;;  %v4362_v14 = vand.u32 2147483648, %v4329_v0  ;;  %v4360_v13 = vand.u32 2147483647, %v4329_v0  ;;  %vm4356_vm3 = vweird.f32 %v4329_v0 }
0x3879   :  { %v4338_v7 = vsub.f32 1.0, %v4337_v11 }
0x387a   :  { %v4289_v27 = vpop.f32.mrf.mxu2  ;;  %v4363_v30 = vor.u32 1.1754944e-38, %v4362_v14  ;;  %vm4361_vm5 = vcmp.eq.f32.partialorder %v4360_v13, 8.507059e+37 }
0x387b   :  { %v4339_v57 = vmul.f32 %v5092_v32, %v4338_v7  ;;  %v4290_v25 = vadd.f32 %v6566_v56, %v4289_v27 }
0x387d   :  { %v5094_v44 = vpop.eup %5093  ;;  %v4340_v33 = vadd.f32 %v5092_v32, %v4339_v57  ;;  %v4670_v9 = vmul.f32 -1.442695, %v4290_v25 }
0x387e   :  { %v5096_v28 = vpop.eup %5095  ;;  %v4330_v23 = vadd.f32 1.0, %v5094_v44 }
0x387f   :  { %v4344_v51 = vsel %vm4343_vm14, %v5092_v32, %v4340_v33  ;;  %v4352_v47 = vmul.f32 %v5096_v28, %v4329_v0  ;;  %5097 = vpow2.f32 %v4670_v9  ;;  %vm4357_vm2 = vweird.f32 %v5096_v28 }
0x3880   :  { %v4349_v55 = vsel %vm4346_vm1, %v4348_v38, %v4344_v51  ;;  %5099 = vrcp.f32 %v4330_v23  ;;  %vm4358_vm4 = vmor %vm4356_vm3, %vm4357_vm2  ;;  %v4377_v52 = vand.u32 2147483648, %v4330_v23  ;;  %v4375_v24 = vand.u32 2147483647, %v4330_v23 }
0x3881   :  { %4457 = vst.msk [vmem:[%s6625_s17] sm:$0xff] %vm4456_vm15, %v4349_v55  ;;  %v4353_v2 = vsub.f32 1.0, %v4352_v47  ;;  %vm4371_vm7 = vweird.f32 %v4330_v23 }
0x3882   :  { %v4292_v58 = vpop.f32.mrf.mxu2  ;;  %v4378_v31 = vor.u32 1.1754944e-38, %v4377_v52  ;;  %vm4376_vm9 = vcmp.eq.f32.partialorder %v4375_v24, 8.507059e+37 }
0x3883   :  { %v4354_v22 = vmul.f32 %v5096_v28, %v4353_v2  ;;  %v4293_v15 = vadd.f32 %v6566_v56, %v4292_v58 }
0x3885   :  { %v5098_v45 = vpop.eup %5097  ;;  %v4355_v59 = vadd.f32 %v5096_v28, %v4354_v22  ;;  %v4671_v61 = vmul.f32 -1.442695, %v4293_v15 }
0x3886   :  { %v5100_v60 = vpop.eup %5099  ;;  %v4331_v36 = vadd.f32 1.0, %v5098_v45 }
0x3887   :  { %v4359_v39 = vsel %vm4358_vm4, %v5096_v28, %v4355_v59  ;;  %v4367_v43 = vmul.f32 %v5100_v60, %v4330_v23  ;;  %5101 = vpow2.f32 %v4671_v61  ;;  %vm4372_vm6 = vweird.f32 %v5100_v60 }
0x3888   :  { %v4364_v37 = vsel %vm4361_vm5, %v4363_v30, %v4359_v39  ;;  %5103 = vrcp.f32 %v4331_v36  ;;  %vm4373_vm8 = vmor %vm4371_vm7, %vm4372_vm6  ;;  %v4392_v40 = vand.u32 2147483648, %v4331_v36  ;;  %v4390_v42 = vand.u32 2147483647, %v4331_v36 }
0x3889   :  { %4458 = vst.msk [vmem:[%s6625_s17 + $0x8] sm:$0xff] %vm4456_vm15, %v4364_v37  ;;  %v4368_v63 = vsub.f32 1.0, %v4367_v43  ;;  %vm4386_vm11 = vweird.f32 %v4331_v36 }
0x388a   :  { %v4295_v16 = vpop.f32.mrf.mxu2  ;;  %v4393_v46 = vor.u32 1.1754944e-38, %v4392_v40  ;;  %vm4391_vm0 = vcmp.eq.f32.partialorder %v4390_v42, 8.507059e+37 }
0x388b   :  { %v4369_v10 = vmul.f32 %v5100_v60, %v4368_v63  ;;  %v4296_v8 = vadd.f32 %v6566_v56, %v4295_v16 }
0x388d   :  { %v5102_v18 = vpop.eup %5101  ;;  %v4370_v4 = vadd.f32 %v5100_v60, %v4369_v10  ;;  %v4672_v21 = vmul.f32 -1.442695, %v4296_v8 }
0x388e   :  { %v5104_v20 = vpop.eup %5103  ;;  %v4332_v48 = vadd.f32 1.0, %v5102_v18 }
0x388f   :  { %v4374_v19 = vsel %vm4373_vm8, %v5100_v60, %v4370_v4  ;;  %v4382_v6 = vmul.f32 %v5104_v20, %v4331_v36  ;;  %5105 = vpow2.f32 %v4672_v21  ;;  %vm4387_vm10 = vweird.f32 %v5104_v20 }
0x3890   :  { %v4379_v50 = vsel %vm4376_vm9, %v4378_v31, %v4374_v19  ;;  %5107 = vrcp.f32 %v4332_v48  ;;  %vm4388_vm12 = vmor %vm4386_vm11, %vm4387_vm10  ;;  %v4407_v0 = vand.u32 2147483648, %v4332_v48  ;;  %v4405_v12 = vand.u32 2147483647, %v4332_v48 }
0x3891   :  { %4459 = vst.msk [vmem:[%s6625_s17 + $0x10] sm:$0xff] %vm4456_vm15, %v4379_v50  ;;  %v4383_v49 = vsub.f32 1.0, %v4382_v6  ;;  %vm4401_vm14 = vweird.f32 %v4332_v48 }
0x3892   :  { %v4298_v41 = vpop.f32.mrf.mxu2  ;;  %v4408_v33 = vor.u32 1.1754944e-38, %v4407_v0  ;;  %vm4406_vm2 = vcmp.eq.f32.partialorder %v4405_v12, 8.507059e+37 }
0x3893   :  { %v4384_v35 = vmul.f32 %v5104_v20, %v4383_v49  ;;  %v4299_v53 = vadd.f32 %v6566_v56, %v4298_v41 }
0x3895   :  { %v5106_v1 = vpop.eup %5105  ;;  %v4385_v5 = vadd.f32 %v5104_v20, %v4384_v35  ;;  %v4673_v29 = vmul.f32 -1.442695, %v4299_v53 }
0x3896   :  { %v5108_v34 = vpop.eup %5107  ;;  %v4333_v3 = vadd.f32 1.0, %v5106_v1 }
0x3897   :  { %v4389_v17 = vsel %vm4388_vm12, %v5104_v20, %v4385_v5  ;;  %v4397_v26 = vmul.f32 %v5108_v34, %v4332_v48  ;;  %5109 = vpow2.f32 %v4673_v29  ;;  %vm4402_vm13 = vweird.f32 %v5108_v34 }
0x3898   :  { %v4394_v54 = vsel %vm4391_vm0, %v4393_v46, %v4389_v17  ;;  %5111 = vrcp.f32 %v4333_v3  ;;  %vm4403_vm1 = vmor %vm4401_vm14, %vm4402_vm13  ;;  %v4422_v51 = vand.u32 2147483648, %v4333_v3  ;;  %v4420_v55 = vand.u32 2147483647, %v4333_v3 }
0x3899   :  { %4460 = vst.msk [vmem:[%s6625_s17 + $0x18] sm:$0xff] %vm4456_vm15, %v4394_v54  ;;  %v4398_v32 = vsub.f32 1.0, %v4397_v26  ;;  %vm4416_vm4 = vweird.f32 %v4333_v3 }
0x389a   :  { %v4301_v11 = vpop.f32.mrf.mxu2  ;;  %v4423_v22 = vor.u32 1.1754944e-38, %v4422_v51  ;;  %vm4421_vm6 = vcmp.eq.f32.partialorder %v4420_v55, 8.507059e+37 }
0x389b   :  { %v4399_v7 = vmul.f32 %v5108_v34, %v4398_v32  ;;  %v4302_v27 = vadd.f32 %v6566_v56, %v4301_v11 }
0x389d   :  { %v5110_v57 = vpop.eup %5109  ;;  %v4400_v62 = vadd.f32 %v5108_v34, %v4399_v7  ;;  %v4674_v25 = vmul.f32 -1.442695, %v4302_v27 }
0x389e   :  { %v5112_v44 = vpop.eup %5111  ;;  %v4334_v9 = vadd.f32 1.0, %v5110_v57 }
0x389f   :  { %v4404_v28 = vsel %vm4403_vm1, %v5108_v34, %v4400_v62  ;;  %v4412_v38 = vmul.f32 %v5112_v44, %v4333_v3  ;;  %5113 = vpow2.f32 %v4674_v25  ;;  %vm4417_vm3 = vweird.f32 %v5112_v44 }
0x38a0   :  { %v4409_v23 = vsel %vm4406_vm2, %v4408_v33, %v4404_v28  ;;  %5115 = vrcp.f32 %v4334_v9  ;;  %vm4418_vm5 = vmor %vm4416_vm4, %vm4417_vm3  ;;  %v4437_v60 = vand.u32 2147483648, %v4334_v9  ;;  %v4435_v36 = vand.u32 2147483647, %v4334_v9 }
0x38a1   :  { %4461 = vst.msk [vmem:[%s6625_s17 + $0x20] sm:$0xff] %vm4456_vm15, %v4409_v23  ;;  %v4413_v56 = vsub.f32 1.0, %v4412_v38  ;;  %vm4431_vm8 = vweird.f32 %v4334_v9 }
0x38a2   :  { %v4438_v37 = vor.u32 1.1754944e-38, %v4437_v60  ;;  %vm4436_vm10 = vcmp.eq.f32.partialorder %v4435_v36, 8.507059e+37 }
0x38a3   :  { %v4414_v47 = vmul.f32 %v5112_v44, %v4413_v56 }
0x38a5   :  { %v5114_v2 = vpop.eup %5113  ;;  %v4415_v14 = vadd.f32 %v5112_v44, %v4414_v47 }
0x38a6   :  { %v5116_v58 = vpop.eup %5115  ;;  %v4335_v13 = vadd.f32 1.0, %v5114_v2 }
0x38a7   :  { %v4419_v15 = vsel %vm4418_vm5, %v5112_v44, %v4415_v14  ;;  %v4427_v45 = vmul.f32 %v5116_v58, %v4334_v9  ;;  %vm4432_vm7 = vweird.f32 %v5116_v58 }
0x38a8   :  { %v4424_v59 = vsel %vm4421_vm6, %v4423_v22, %v4419_v15  ;;  %5117 = vrcp.f32 %v4335_v13  ;;  %vm4433_vm9 = vmor %vm4431_vm8, %vm4432_vm7  ;;  %v4452_v24 = vand.u32 2147483648, %v4335_v13  ;;  %v4450_v18 = vand.u32 2147483647, %v4335_v13 }
0x38a9   :  { %4462 = vst.msk [vmem:[%s6625_s17 + $0x28] sm:$0xff] %vm4456_vm15, %v4424_v59  ;;  %v4428_v61 = vsub.f32 1.0, %v4427_v45  ;;  %vm4446_vm12 = vweird.f32 %v4335_v13 }
0x38aa   :  { %v4453_v21 = vor.u32 1.1754944e-38, %v4452_v24  ;;  %vm4451_vm13 = vcmp.eq.f32.partialorder %v4450_v18, 8.507059e+37 }
0x38ab   :  { %v4429_v30 = vmul.f32 %v5116_v58, %v4428_v61 }
0x38ad   :  { %v4430_v39 = vadd.f32 %v5116_v58, %v4429_v30 }
0x38ae   :  { %v5118_v43 = vpop.eup %5117 }
0x38af   :  { %v4434_v63 = vsel %vm4433_vm9, %v5116_v58, %v4430_v39  ;;  %v4442_v52 = vmul.f32 %v5118_v43, %v4335_v13  ;;  %vm4447_vm11 = vweird.f32 %v5118_v43 }
0x38b0   :  { %v4439_v16 = vsel %vm4436_vm10, %v4438_v37, %v4434_v63  ;;  %vm4448_vm0 = vmor %vm4446_vm12, %vm4447_vm11 }
0x38b1   :  { %4463 = vst.msk [vmem:[%s6625_s17 + $0x30] sm:$0xff] %vm4456_vm15, %v4439_v16  ;;  %v4443_v10 = vsub.f32 1.0, %v4442_v52 }
0x38b3   :  { %v4444_v8 = vmul.f32 %v5118_v43, %v4443_v10 }
0x38b5   :  { %v4445_v4 = vadd.f32 %v5118_v43, %v4444_v8 }
0x38b7   :  { %v4449_v20 = vsel %vm4448_vm0, %v5118_v43, %v4445_v4 }
0x38b8   :  { %v4454_v31 = vsel %vm4451_vm13, %v4453_v21, %v4449_v20 }
0x38b9   :  { %4464 = vst.msk [vmem:[%s6625_s17 + $0x38] sm:$0xff] %vm4456_vm15, %v4454_v31 }
0x38ba   :  { %4469 = vsyncpa [#allocation6], 1 }
0x38bb   :  { %4470 = vsyncpa [#allocation8], 1 }
0x38bc   :  { %4471 = vsyncpa [#allocation11], 1 }
0x38bd   :  { %4472 = vsyncpa [#allocation14], 1 }

</bundles_post_ra>
